<compile_context>
chip_gen: v7x
topology: tpu7x:2x2x1
jax: 0.10.0
libtpu: 0.0.40
codegen_flags: <defaults>
</compile_context>

<pallas_src>
import functools

import jax
import jax.numpy as jnp
from jax.experimental import pallas as pl
from jax.experimental.pallas import tpu as pltpu

# ----- problem sizes (FEA_DIM = raw feature width fed to the SAE encoder; synthetic here)
FEA_DIM = 384
H1 = FEA_DIM // 2          # 192
H2 = FEA_DIM // 3          # 128
SAE_DIM = 116
HID_DIM = 512
CLS_DIM = 150
BN_EPS = 1e-5

MAX_BATCH_TILE = 512       # per-tile VMEM stays < ~10 MiB on every generation


def _round_up(n, m):
    return ((n + m - 1) // m) * m


def cls_kernel(x_ref,
               w1, b1, w2, b2, w3, b3, w4, b4, w5, b5, w6, b6, w7, b7,
               out_ref, *, elem_bf16):
    """Fused 7-layer MLP. elem_bf16=True -> ELU/elementwise in bf16 (v6e/v7x)."""

    def elu(v):
        # nn.ELU(alpha=1.0): x if x > 0 else exp(x) - 1
        return jnp.where(v > 0, v, jnp.exp(jnp.minimum(v, 0)) - 1)

    def lin(h, w_ref, b_ref):
        # bf16 operands on the MXU, f32 accumulate; bias add in f32
        return jnp.dot(h, w_ref[...], preferred_element_type=jnp.float32) + b_ref[...]

    def hidden(h, w_ref, b_ref):
        y = lin(h, w_ref, b_ref)
        if elem_bf16:
            # one f32->bf16 cast, then ELU on the bf16 VPU/EUP; feeds the next dot directly
            return elu(y.astype(jnp.bfloat16))
        # v2-v5: ELU in f32, single cast afterwards so the next dot stays on the bf16 MXU path
        return elu(y).astype(jnp.bfloat16)

    h = x_ref[...]                 # already bf16 (cast in the wrapper), no in-kernel cast
    h = hidden(h, w1, b1)          # enc Linear(384, 192->256 pad) + ELU
    h = hidden(h, w2, b2)          # enc Linear(192->256 pad, 128) + ELU
    h = hidden(h, w3, b3)          # fused: enc Linear(128,116) . cls Linear(116,512), + ELU
    h = hidden(h, w4, b4)          # cls Linear(512,512) + ELU
    h = hidden(h, w5, b5)          # cls Linear(512,512) + ELU
    h = hidden(h, w6, b6)          # cls Linear(512,512) + ELU
    # BatchNorm (inference) folded into Linear(512, 150->256 pad); kept f32 on writeback
    out_ref[...] = lin(h, w7, b7).astype(out_ref.dtype)


def prepare_params(params, param_dtype=jnp.bfloat16):
    """Fuse / fold / pad / quantize the PyTorch-style parameters once, outside the kernel."""
    (we1, be1), (we2, be2), (we3, be3) = params["enc"]
    (wc1, bc1), (wc2, bc2), (wc3, bc3), (wc4, bc4), (wc5, bc5) = params["cls"]
    gamma, beta, mean, var = params["bn"]

    # pad the 192-wide hidden to 256 lanes (ELU(0)=0 keeps zero padding exact)
    h1p = _round_up(H1, 128)
    w1 = jnp.pad(we1, ((0, 0), (0, h1p - H1)))
    b1 = jnp.pad(be1, ((0, 0), (0, h1p - H1)))
    w2 = jnp.pad(we2, ((0, h1p - H1), (0, 0)))
    b2 = be2

    # no activation between encoder Linear(H2, SAE_DIM) and cls Linear(SAE_DIM, HID):
    # fuse them so the 116-wide dim never reaches the kernel.
    w3 = we3 @ wc1
    b3 = be3 @ wc1 + bc1

    # inference-mode BatchNorm folded into the final Linear.
    # TODO(synk): training-mode BatchNorm (batch statistics) is not implemented here.
    scale = gamma * jax.lax.rsqrt(var + BN_EPS)        # (HID,)
    shift = beta - mean * scale                        # (HID,)
    w7 = wc5 * scale[:, None]
    b7 = bc5 + shift[None, :] @ wc5

    # pad the 150-wide logits to 256 lanes (padded columns are exactly zero, sliced off later)
    outp = _round_up(CLS_DIM, 128)
    w7 = jnp.pad(w7, ((0, 0), (0, outp - CLS_DIM)))
    b7 = jnp.pad(b7, ((0, 0), (0, outp - CLS_DIM)))

    packed = []
    for w, b in ((w1, b1), (w2, b2), (w3, b3), (wc2, bc2), (wc3, bc3), (wc4, bc4), (w7, b7)):
        packed.append(w.astype(param_dtype))   # bf16 weights -> MXU fast path, half the DMA
        packed.append(b.astype(jnp.float32))   # biases stay f32 (tiny, keeps adds exact)
    return tuple(packed)


def _pick_tiling(batch):
    """Choose (batch_tile, padded_batch): pick #grid-steps first, then size the tile.

    >=2 'parallel' grid steps whenever there is meaningful work (v7x megacore), and the tile
    is just large enough -> no gross over-padding (B=300 -> 2 x 160, not 2 x 256)."""
    padded_rows = _round_up(max(batch, 16), 16)          # bf16 sublane tile = 16 rows
    if padded_rows <= 32:
        n_steps = 1
    else:
        n_steps = max(2, pl.cdiv(padded_rows, MAX_BATCH_TILE))
    tile = _round_up(pl.cdiv(padded_rows, n_steps), 16)
    return tile, tile * n_steps


def _use_bf16_elementwise():
    """bf16 VALU/EUP exists on v6e/v7x; keep elementwise f32 on v2-v5."""
    try:
        kind = jax.devices()[0].device_kind.lower()
    except Exception:
        return True
    for old in ("v2", "v3", "v4", "v5"):
        if old in kind:
            return False
    return True


@functools.partial(jax.jit, static_argnames=("elem_bf16",))
def cls_forward(x, packed_params, elem_bf16=True):
    B, F = x.shape
    assert F == FEA_DIM

    tile, padded_b = _pick_tiling(B)

    # stream x in bf16: halves the only per-step input DMA and drops the in-kernel cast
    x = x.astype(jnp.bfloat16)
    if padded_b != B:
        x = jnp.pad(x, ((0, padded_b - B), (0, 0)))

    out_w = packed_params[-2].shape[1]   # padded logits width (256)

    in_specs = [pl.BlockSpec((tile, FEA_DIM), lambda i: (i, 0))]
    for p in packed_params:
        # constant block index -> each weight/bias DMA'd once, VMEM-resident across tiles
        in_specs.append(pl.BlockSpec(p.shape, lambda i: (0, 0)))

    # ----- cost estimate so XLA can schedule around this short custom call
    weights = packed_params[0::2]
    flops = 2 * padded_b * sum(w.shape[0] * w.shape[1] for w in weights)
    transcendentals = padded_b * sum(w.shape[1] for w in weights[:-1])   # one exp per ELU elem
    param_bytes = sum(p.size * p.dtype.itemsize for p in packed_params)
    bytes_accessed = param_bytes + padded_b * (FEA_DIM * 2 + out_w * 4)

    out = pl.pallas_call(
        functools.partial(cls_kernel, elem_bf16=elem_bf16),
        out_shape=jax.ShapeDtypeStruct((padded_b, out_w), jnp.float32),
        grid_spec=pltpu.PrefetchScalarGridSpec(
            num_scalar_prefetch=0,
            grid=(padded_b // tile,),
            in_specs=in_specs,
            out_specs=pl.BlockSpec((tile, out_w), lambda i: (i, 0)),
        ),
        compiler_params=pltpu.CompilerParams(
            dimension_semantics=("parallel",),
            vmem_limit_bytes=32 * 1024 * 1024),
        cost_estimate=pl.CostEstimate(
            flops=flops,
            transcendentals=transcendentals,
            bytes_accessed=bytes_accessed),
    )(x, *packed_params)

    return out[:B, :CLS_DIM]


def init_linear(key, fan_in, fan_out):
    # mimics torch.nn.Linear's U(-1/sqrt(fan_in), 1/sqrt(fan_in)); weights stored as [in, out]
    kw, kb = jax.random.split(key)
    bound = 1.0 / jnp.sqrt(jnp.float32(fan_in))
    w = jax.random.uniform(kw, (fan_in, fan_out), jnp.float32, -bound, bound)
    b = jax.random.uniform(kb, (1, fan_out), jnp.float32, -bound, bound)
    return w, b


def cls_reference(x, params):
    # pure-JAX f32 reference matching the PyTorch module (eval-mode BatchNorm)
    (we1, be1), (we2, be2), (we3, be3) = params["enc"]
    (wc1, bc1), (wc2, bc2), (wc3, bc3), (wc4, bc4), (wc5, bc5) = params["cls"]
    gamma, beta, mean, var = params["bn"]

    def elu(v):
        return jnp.where(v > 0.0, v, jnp.expm1(jnp.minimum(v, 0.0)))

    h = x
    h = elu(h @ we1 + be1)
    h = elu(h @ we2 + be2)
    h = h @ we3 + be3                       # encoder output (no activation)
    h = elu(h @ wc1 + bc1)
    h = elu(h @ wc2 + bc2)
    h = elu(h @ wc3 + bc3)
    h = elu(h @ wc4 + bc4)
    h = (h - mean) / jnp.sqrt(var + BN_EPS) * gamma + beta
    h = h @ wc5 + bc5
    return h


if __name__ == "__main__":
    key = jax.random.PRNGKey(0)
    keys = jax.random.split(key, 13)

    # ragged batch (not a tile multiple): exercises pad-and-slice and a 2-step parallel grid
    BATCH = 300
    x = jax.random.normal(keys[0], (BATCH, FEA_DIM), jnp.float32)

    params = {
        "enc": [init_linear(keys[1], FEA_DIM, H1),
                init_linear(keys[2], H1, H2),
                init_linear(keys[3], H2, SAE_DIM)],
        "cls": [init_linear(keys[4], SAE_DIM, HID_DIM),
                init_linear(keys[5], HID_DIM, HID_DIM),
                init_linear(keys[6], HID_DIM, HID_DIM),
                init_linear(keys[7], HID_DIM, HID_DIM),
                init_linear(keys[8], HID_DIM, CLS_DIM)],
        "bn": (1.0 + 0.1 * jax.random.normal(keys[9], (HID_DIM,), jnp.float32),     # gamma
               0.1 * jax.random.normal(keys[10], (HID_DIM,), jnp.float32),          # beta
               0.1 * jax.random.normal(keys[11], (HID_DIM,), jnp.float32),          # running mean
               1.0 + 0.1 * jnp.abs(jax.random.normal(keys[12], (HID_DIM,), jnp.float32))),  # running var
    }

    packed = prepare_params(params)          # fuse / fold BN / pad / cast to bf16 (once)
    elem_bf16 = _use_bf16_elementwise()      # bf16 ELU path only where the VPU/EUP supports it
    out = cls_forward(x, packed, elem_bf16=elem_bf16)
    out = jax.block_until_ready(out)

    ref = cls_reference(x, params)
    assert out.shape == (BATCH, CLS_DIM)
    # bf16 weights + bf16 streamed activations vs f32 reference -> relaxed but tight tolerance
    assert jnp.allclose(out, ref, atol=5e-2, rtol=5e-2), "mismatch vs pure-JAX f32 reference"

    print("KERNEL_OK")
</pallas_src>

<mosaic_0001>
module attributes {stable_mosaic.version = 11 : i64} {
  func.func @cls_kernel(%arg0: i32, %arg1: memref<160x384xbf16, #tpu.memory_space<vmem>>, %arg2: memref<384x256xbf16, #tpu.memory_space<vmem>>, %arg3: memref<1x256xf32, #tpu.memory_space<vmem>>, %arg4: memref<256x128xbf16, #tpu.memory_space<vmem>>, %arg5: memref<1x128xf32, #tpu.memory_space<vmem>>, %arg6: memref<128x512xbf16, #tpu.memory_space<vmem>>, %arg7: memref<1x512xf32, #tpu.memory_space<vmem>>, %arg8: memref<512x512xbf16, #tpu.memory_space<vmem>>, %arg9: memref<1x512xf32, #tpu.memory_space<vmem>>, %arg10: memref<512x512xbf16, #tpu.memory_space<vmem>>, %arg11: memref<1x512xf32, #tpu.memory_space<vmem>>, %arg12: memref<512x512xbf16, #tpu.memory_space<vmem>>, %arg13: memref<1x512xf32, #tpu.memory_space<vmem>>, %arg14: memref<512x256xbf16, #tpu.memory_space<vmem>>, %arg15: memref<1x256xf32, #tpu.memory_space<vmem>>, %arg16: memref<160x256xf32, #tpu.memory_space<vmem>>) attributes {dimension_semantics = [#tpu.dimension_semantics<parallel>], iteration_bounds = array<i64: 2>, scalar_prefetch = 0 : i64, scratch_operands = 0 : i64, tpu.core_type = #tpu.core_type<tc>, window_params = [{transform_indices = @transform_0, window_bounds = array<i64: 160, 384>}, {pipeline_mode = #tpu.pipeline_mode<synchronous>, transform_indices = @transform_1, window_bounds = array<i64: 384, 256>}, {pipeline_mode = #tpu.pipeline_mode<synchronous>, transform_indices = @transform_2, window_bounds = array<i64: 1, 256>}, {pipeline_mode = #tpu.pipeline_mode<synchronous>, transform_indices = @transform_3, window_bounds = array<i64: 256, 128>}, {pipeline_mode = #tpu.pipeline_mode<synchronous>, transform_indices = @transform_4, window_bounds = array<i64: 1, 128>}, {pipeline_mode = #tpu.pipeline_mode<synchronous>, transform_indices = @transform_5, window_bounds = array<i64: 128, 512>}, {pipeline_mode = #tpu.pipeline_mode<synchronous>, transform_indices = @transform_6, window_bounds = array<i64: 1, 512>}, {pipeline_mode = #tpu.pipeline_mode<synchronous>, transform_indices = @transform_7, window_bounds = array<i64: 512, 512>}, {pipeline_mode = #tpu.pipeline_mode<synchronous>, transform_indices = @transform_8, window_bounds = array<i64: 1, 512>}, {pipeline_mode = #tpu.pipeline_mode<synchronous>, transform_indices = @transform_9, window_bounds = array<i64: 512, 512>}, {pipeline_mode = #tpu.pipeline_mode<synchronous>, transform_indices = @transform_10, window_bounds = array<i64: 1, 512>}, {pipeline_mode = #tpu.pipeline_mode<synchronous>, transform_indices = @transform_11, window_bounds = array<i64: 512, 512>}, {pipeline_mode = #tpu.pipeline_mode<synchronous>, transform_indices = @transform_12, window_bounds = array<i64: 1, 512>}, {pipeline_mode = #tpu.pipeline_mode<synchronous>, transform_indices = @transform_13, window_bounds = array<i64: 512, 256>}, {pipeline_mode = #tpu.pipeline_mode<synchronous>, transform_indices = @transform_14, window_bounds = array<i64: 1, 256>}, {transform_indices = @transform_15, window_bounds = array<i64: 160, 256>}]} {
    %c0 = arith.constant 0 : index
    %c0_0 = arith.constant 0 : index
    %0 = vector.load %arg1[%c0, %c0_0] : memref<160x384xbf16, #tpu.memory_space<vmem>>, vector<160x384xbf16>
    %c0_1 = arith.constant 0 : index
    %c0_2 = arith.constant 0 : index
    %1 = vector.load %arg2[%c0_1, %c0_2] : memref<384x256xbf16, #tpu.memory_space<vmem>>, vector<384x256xbf16>
    %cst = arith.constant dense<0.000000e+00> : vector<160x256xf32>
    %2 = tpu.matmul %0, %1, %cst {dimension_numbers = #tpu.dot_dimension_numbers<[1], [0], [0], [1], [0, 0, 1, 1], [], []>} : vector<160x384xbf16>, vector<384x256xbf16>, vector<160x256xf32> -> vector<160x256xf32>
    %c0_3 = arith.constant 0 : index
    %c0_4 = arith.constant 0 : index
    %3 = vector.load %arg3[%c0_3, %c0_4] : memref<1x256xf32, #tpu.memory_space<vmem>>, vector<1x256xf32>
    %4 = vector.broadcast %3 : vector<1x256xf32> to vector<160x256xf32>
    %5 = arith.addf %2, %4 : vector<160x256xf32>
    %6 = arith.truncf %5 : vector<160x256xf32> to vector<160x256xbf16>
    %cst_5 = arith.constant 0.000000e+00 : bf16
    %7 = vector.broadcast %cst_5 : bf16 to vector<160x256xbf16>
    %8 = arith.cmpf ogt, %6, %7 : vector<160x256xbf16>
    %cst_6 = arith.constant 0.000000e+00 : bf16
    %9 = vector.broadcast %cst_6 : bf16 to vector<160x256xbf16>
    %10 = arith.minimumf %6, %9 : vector<160x256xbf16>
    %11 = math.exp %10 : vector<160x256xbf16>
    %cst_7 = arith.constant 1.000000e+00 : bf16
    %12 = vector.broadcast %cst_7 : bf16 to vector<160x256xbf16>
    %13 = arith.subf %11, %12 : vector<160x256xbf16>
    %14 = arith.select %8, %6, %13 : vector<160x256xi1>, vector<160x256xbf16>
    %c0_8 = arith.constant 0 : index
    %c0_9 = arith.constant 0 : index
    %15 = vector.load %arg4[%c0_8, %c0_9] : memref<256x128xbf16, #tpu.memory_space<vmem>>, vector<256x128xbf16>
    %cst_10 = arith.constant dense<0.000000e+00> : vector<160x128xf32>
    %16 = tpu.matmul %14, %15, %cst_10 {dimension_numbers = #tpu.dot_dimension_numbers<[1], [0], [0], [1], [0, 0, 1, 1], [], []>} : vector<160x256xbf16>, vector<256x128xbf16>, vector<160x128xf32> -> vector<160x128xf32>
    %c0_11 = arith.constant 0 : index
    %c0_12 = arith.constant 0 : index
    %17 = vector.load %arg5[%c0_11, %c0_12] : memref<1x128xf32, #tpu.memory_space<vmem>>, vector<1x128xf32>
    %18 = vector.broadcast %17 : vector<1x128xf32> to vector<160x128xf32>
    %19 = arith.addf %16, %18 : vector<160x128xf32>
    %20 = arith.truncf %19 : vector<160x128xf32> to vector<160x128xbf16>
    %cst_13 = arith.constant 0.000000e+00 : bf16
    %21 = vector.broadcast %cst_13 : bf16 to vector<160x128xbf16>
    %22 = arith.cmpf ogt, %20, %21 : vector<160x128xbf16>
    %cst_14 = arith.constant 0.000000e+00 : bf16
    %23 = vector.broadcast %cst_14 : bf16 to vector<160x128xbf16>
    %24 = arith.minimumf %20, %23 : vector<160x128xbf16>
    %25 = math.exp %24 : vector<160x128xbf16>
    %cst_15 = arith.constant 1.000000e+00 : bf16
    %26 = vector.broadcast %cst_15 : bf16 to vector<160x128xbf16>
    %27 = arith.subf %25, %26 : vector<160x128xbf16>
    %28 = arith.select %22, %20, %27 : vector<160x128xi1>, vector<160x128xbf16>
    %c0_16 = arith.constant 0 : index
    %c0_17 = arith.constant 0 : index
    %29 = vector.load %arg6[%c0_16, %c0_17] : memref<128x512xbf16, #tpu.memory_space<vmem>>, vector<128x512xbf16>
    %cst_18 = arith.constant dense<0.000000e+00> : vector<160x512xf32>
    %30 = tpu.matmul %28, %29, %cst_18 {dimension_numbers = #tpu.dot_dimension_numbers<[1], [0], [0], [1], [0, 0, 1, 1], [], []>} : vector<160x128xbf16>, vector<128x512xbf16>, vector<160x512xf32> -> vector<160x512xf32>
    %c0_19 = arith.constant 0 : index
    %c0_20 = arith.constant 0 : index
    %31 = vector.load %arg7[%c0_19, %c0_20] : memref<1x512xf32, #tpu.memory_space<vmem>>, vector<1x512xf32>
    %32 = vector.broadcast %31 : vector<1x512xf32> to vector<160x512xf32>
    %33 = arith.addf %30, %32 : vector<160x512xf32>
    %34 = arith.truncf %33 : vector<160x512xf32> to vector<160x512xbf16>
    %cst_21 = arith.constant 0.000000e+00 : bf16
    %35 = vector.broadcast %cst_21 : bf16 to vector<160x512xbf16>
    %36 = arith.cmpf ogt, %34, %35 : vector<160x512xbf16>
    %cst_22 = arith.constant 0.000000e+00 : bf16
    %37 = vector.broadcast %cst_22 : bf16 to vector<160x512xbf16>
    %38 = arith.minimumf %34, %37 : vector<160x512xbf16>
    %39 = math.exp %38 : vector<160x512xbf16>
    %cst_23 = arith.constant 1.000000e+00 : bf16
    %40 = vector.broadcast %cst_23 : bf16 to vector<160x512xbf16>
    %41 = arith.subf %39, %40 : vector<160x512xbf16>
    %42 = arith.select %36, %34, %41 : vector<160x512xi1>, vector<160x512xbf16>
    %c0_24 = arith.constant 0 : index
    %c0_25 = arith.constant 0 : index
    %43 = vector.load %arg8[%c0_24, %c0_25] : memref<512x512xbf16, #tpu.memory_space<vmem>>, vector<512x512xbf16>
    %cst_26 = arith.constant dense<0.000000e+00> : vector<160x512xf32>
    %44 = tpu.matmul %42, %43, %cst_26 {dimension_numbers = #tpu.dot_dimension_numbers<[1], [0], [0], [1], [0, 0, 1, 1], [], []>} : vector<160x512xbf16>, vector<512x512xbf16>, vector<160x512xf32> -> vector<160x512xf32>
    %c0_27 = arith.constant 0 : index
    %c0_28 = arith.constant 0 : index
    %45 = vector.load %arg9[%c0_27, %c0_28] : memref<1x512xf32, #tpu.memory_space<vmem>>, vector<1x512xf32>
    %46 = vector.broadcast %45 : vector<1x512xf32> to vector<160x512xf32>
    %47 = arith.addf %44, %46 : vector<160x512xf32>
    %48 = arith.truncf %47 : vector<160x512xf32> to vector<160x512xbf16>
    %cst_29 = arith.constant 0.000000e+00 : bf16
    %49 = vector.broadcast %cst_29 : bf16 to vector<160x512xbf16>
    %50 = arith.cmpf ogt, %48, %49 : vector<160x512xbf16>
    %cst_30 = arith.constant 0.000000e+00 : bf16
    %51 = vector.broadcast %cst_30 : bf16 to vector<160x512xbf16>
    %52 = arith.minimumf %48, %51 : vector<160x512xbf16>
    %53 = math.exp %52 : vector<160x512xbf16>
    %cst_31 = arith.constant 1.000000e+00 : bf16
    %54 = vector.broadcast %cst_31 : bf16 to vector<160x512xbf16>
    %55 = arith.subf %53, %54 : vector<160x512xbf16>
    %56 = arith.select %50, %48, %55 : vector<160x512xi1>, vector<160x512xbf16>
    %c0_32 = arith.constant 0 : index
    %c0_33 = arith.constant 0 : index
    %57 = vector.load %arg10[%c0_32, %c0_33] : memref<512x512xbf16, #tpu.memory_space<vmem>>, vector<512x512xbf16>
    %cst_34 = arith.constant dense<0.000000e+00> : vector<160x512xf32>
    %58 = tpu.matmul %56, %57, %cst_34 {dimension_numbers = #tpu.dot_dimension_numbers<[1], [0], [0], [1], [0, 0, 1, 1], [], []>} : vector<160x512xbf16>, vector<512x512xbf16>, vector<160x512xf32> -> vector<160x512xf32>
    %c0_35 = arith.constant 0 : index
    %c0_36 = arith.constant 0 : index
    %59 = vector.load %arg11[%c0_35, %c0_36] : memref<1x512xf32, #tpu.memory_space<vmem>>, vector<1x512xf32>
    %60 = vector.broadcast %59 : vector<1x512xf32> to vector<160x512xf32>
    %61 = arith.addf %58, %60 : vector<160x512xf32>
    %62 = arith.truncf %61 : vector<160x512xf32> to vector<160x512xbf16>
    %cst_37 = arith.constant 0.000000e+00 : bf16
    %63 = vector.broadcast %cst_37 : bf16 to vector<160x512xbf16>
    %64 = arith.cmpf ogt, %62, %63 : vector<160x512xbf16>
    %cst_38 = arith.constant 0.000000e+00 : bf16
    %65 = vector.broadcast %cst_38 : bf16 to vector<160x512xbf16>
    %66 = arith.minimumf %62, %65 : vector<160x512xbf16>
    %67 = math.exp %66 : vector<160x512xbf16>
    %cst_39 = arith.constant 1.000000e+00 : bf16
    %68 = vector.broadcast %cst_39 : bf16 to vector<160x512xbf16>
    %69 = arith.subf %67, %68 : vector<160x512xbf16>
    %70 = arith.select %64, %62, %69 : vector<160x512xi1>, vector<160x512xbf16>
    %c0_40 = arith.constant 0 : index
    %c0_41 = arith.constant 0 : index
    %71 = vector.load %arg12[%c0_40, %c0_41] : memref<512x512xbf16, #tpu.memory_space<vmem>>, vector<512x512xbf16>
    %cst_42 = arith.constant dense<0.000000e+00> : vector<160x512xf32>
    %72 = tpu.matmul %70, %71, %cst_42 {dimension_numbers = #tpu.dot_dimension_numbers<[1], [0], [0], [1], [0, 0, 1, 1], [], []>} : vector<160x512xbf16>, vector<512x512xbf16>, vector<160x512xf32> -> vector<160x512xf32>
    %c0_43 = arith.constant 0 : index
    %c0_44 = arith.constant 0 : index
    %73 = vector.load %arg13[%c0_43, %c0_44] : memref<1x512xf32, #tpu.memory_space<vmem>>, vector<1x512xf32>
    %74 = vector.broadcast %73 : vector<1x512xf32> to vector<160x512xf32>
    %75 = arith.addf %72, %74 : vector<160x512xf32>
    %76 = arith.truncf %75 : vector<160x512xf32> to vector<160x512xbf16>
    %cst_45 = arith.constant 0.000000e+00 : bf16
    %77 = vector.broadcast %cst_45 : bf16 to vector<160x512xbf16>
    %78 = arith.cmpf ogt, %76, %77 : vector<160x512xbf16>
    %cst_46 = arith.constant 0.000000e+00 : bf16
    %79 = vector.broadcast %cst_46 : bf16 to vector<160x512xbf16>
    %80 = arith.minimumf %76, %79 : vector<160x512xbf16>
    %81 = math.exp %80 : vector<160x512xbf16>
    %cst_47 = arith.constant 1.000000e+00 : bf16
    %82 = vector.broadcast %cst_47 : bf16 to vector<160x512xbf16>
    %83 = arith.subf %81, %82 : vector<160x512xbf16>
    %84 = arith.select %78, %76, %83 : vector<160x512xi1>, vector<160x512xbf16>
    %c0_48 = arith.constant 0 : index
    %c0_49 = arith.constant 0 : index
    %85 = vector.load %arg14[%c0_48, %c0_49] : memref<512x256xbf16, #tpu.memory_space<vmem>>, vector<512x256xbf16>
    %cst_50 = arith.constant dense<0.000000e+00> : vector<160x256xf32>
    %86 = tpu.matmul %84, %85, %cst_50 {dimension_numbers = #tpu.dot_dimension_numbers<[1], [0], [0], [1], [0, 0, 1, 1], [], []>} : vector<160x512xbf16>, vector<512x256xbf16>, vector<160x256xf32> -> vector<160x256xf32>
    %c0_51 = arith.constant 0 : index
    %c0_52 = arith.constant 0 : index
    %87 = vector.load %arg15[%c0_51, %c0_52] : memref<1x256xf32, #tpu.memory_space<vmem>>, vector<1x256xf32>
    %88 = vector.broadcast %87 : vector<1x256xf32> to vector<160x256xf32>
    %89 = arith.addf %86, %88 : vector<160x256xf32>
    %c0_53 = arith.constant 0 : index
    %c0_54 = arith.constant 0 : index
    %90 = vector.load %arg16[%c0_53, %c0_54] : memref<160x256xf32, #tpu.memory_space<vmem>>, vector<160x256xf32>
    tpu.vector_store %arg16[%c0_53, %c0_54], %89 {strides = array<i32>} : memref<160x256xf32, #tpu.memory_space<vmem>>, vector<160x256xf32>,
    return
  }
  func.func @transform_0(%arg0: i32) -> (i32, i32) {
    %c0_i32 = arith.constant 0 : i32
    %c0_i32_0 = arith.constant 0 : i32
    return %arg0, %c0_i32 : i32, i32
  }
  func.func @transform_1(%arg0: i32) -> (i32, i32) {
    %c0_i32 = arith.constant 0 : i32
    %c0_i32_0 = arith.constant 0 : i32
    %c0_i32_1 = arith.constant 0 : i32
    return %c0_i32, %c0_i32_0 : i32, i32
  }
  func.func @transform_2(%arg0: i32) -> (i32, i32) {
    %c0_i32 = arith.constant 0 : i32
    %c0_i32_0 = arith.constant 0 : i32
    %c0_i32_1 = arith.constant 0 : i32
    return %c0_i32, %c0_i32_0 : i32, i32
  }
  func.func @transform_3(%arg0: i32) -> (i32, i32) {
    %c0_i32 = arith.constant 0 : i32
    %c0_i32_0 = arith.constant 0 : i32
    %c0_i32_1 = arith.constant 0 : i32
    return %c0_i32, %c0_i32_0 : i32, i32
  }
  func.func @transform_4(%arg0: i32) -> (i32, i32) {
    %c0_i32 = arith.constant 0 : i32
    %c0_i32_0 = arith.constant 0 : i32
    %c0_i32_1 = arith.constant 0 : i32
    return %c0_i32, %c0_i32_0 : i32, i32
  }
  func.func @transform_5(%arg0: i32) -> (i32, i32) {
    %c0_i32 = arith.constant 0 : i32
    %c0_i32_0 = arith.constant 0 : i32
    %c0_i32_1 = arith.constant 0 : i32
    return %c0_i32, %c0_i32_0 : i32, i32
  }
  func.func @transform_6(%arg0: i32) -> (i32, i32) {
    %c0_i32 = arith.constant 0 : i32
    %c0_i32_0 = arith.constant 0 : i32
    %c0_i32_1 = arith.constant 0 : i32
    return %c0_i32, %c0_i32_0 : i32, i32
  }
  func.func @transform_7(%arg0: i32) -> (i32, i32) {
    %c0_i32 = arith.constant 0 : i32
    %c0_i32_0 = arith.constant 0 : i32
    %c0_i32_1 = arith.constant 0 : i32
    return %c0_i32, %c0_i32_0 : i32, i32
  }
  func.func @transform_8(%arg0: i32) -> (i32, i32) {
    %c0_i32 = arith.constant 0 : i32
    %c0_i32_0 = arith.constant 0 : i32
    %c0_i32_1 = arith.constant 0 : i32
    return %c0_i32, %c0_i32_0 : i32, i32
  }
  func.func @transform_9(%arg0: i32) -> (i32, i32) {
    %c0_i32 = arith.constant 0 : i32
    %c0_i32_0 = arith.constant 0 : i32
    %c0_i32_1 = arith.constant 0 : i32
    return %c0_i32, %c0_i32_0 : i32, i32
  }
  func.func @transform_10(%arg0: i32) -> (i32, i32) {
    %c0_i32 = arith.constant 0 : i32
    %c0_i32_0 = arith.constant 0 : i32
    %c0_i32_1 = arith.constant 0 : i32
    return %c0_i32, %c0_i32_0 : i32, i32
  }
  func.func @transform_11(%arg0: i32) -> (i32, i32) {
    %c0_i32 = arith.constant 0 : i32
    %c0_i32_0 = arith.constant 0 : i32
    %c0_i32_1 = arith.constant 0 : i32
    return %c0_i32, %c0_i32_0 : i32, i32
  }
  func.func @transform_12(%arg0: i32) -> (i32, i32) {
    %c0_i32 = arith.constant 0 : i32
    %c0_i32_0 = arith.constant 0 : i32
    %c0_i32_1 = arith.constant 0 : i32
    return %c0_i32, %c0_i32_0 : i32, i32
  }
  func.func @transform_13(%arg0: i32) -> (i32, i32) {
    %c0_i32 = arith.constant 0 : i32
    %c0_i32_0 = arith.constant 0 : i32
    %c0_i32_1 = arith.constant 0 : i32
    return %c0_i32, %c0_i32_0 : i32, i32
  }
  func.func @transform_14(%arg0: i32) -> (i32, i32) {
    %c0_i32 = arith.constant 0 : i32
    %c0_i32_0 = arith.constant 0 : i32
    %c0_i32_1 = arith.constant 0 : i32
    return %c0_i32, %c0_i32_0 : i32, i32
  }
  func.func @transform_15(%arg0: i32) -> (i32, i32) {
    %c0_i32 = arith.constant 0 : i32
    %c0_i32_0 = arith.constant 0 : i32
    return %arg0, %c0_i32 : i32, i32
  }
}

</mosaic_0001>

<bundles_post_ra>
// kernel: cls_forward.1
= control target key start
LH: loop header
LB: loop body
LE: loop exit
PB: predicated region body
PF: predicated region fallthrough
CT: control target
= control target key end

     0   :  { %s14526_s0 = inlined_call_operand.vmem [shape: bf16[320,384], index: 0, kind: input, shape index: {}]   ;;  %s14527_s1 = inlined_call_operand.hbm [shape: bf16[384,256], index: 1, kind: input, shape index: {}]   ;;  %s14528_s2 = inlined_call_operand.hbm [shape: f32[1,256], index: 2, kind: input, shape index: {}]   ;;  %s14529_s3 = inlined_call_operand.hbm [shape: bf16[256,128], index: 3, kind: input, shape index: {}]   ;;  %s14530_s4 = inlined_call_operand.vmem [shape: f32[1,128], index: 4, kind: input, shape index: {}]   ;;  %s14531_s5 = inlined_call_operand.vmem [shape: bf16[128,512], index: 5, kind: input, shape index: {}]   ;;  %s14532_s6 = inlined_call_operand.hbm [shape: f32[1,512], index: 6, kind: input, shape index: {}]   ;;  %s14533_s7 = inlined_call_operand.vmem [shape: bf16[512,512], index: 7, kind: input, shape index: {}]   ;;  %s14534_s8 = inlined_call_operand.vmem [shape: f32[1,512], index: 8, kind: input, shape index: {}]   ;;  %s14535_s9 = inlined_call_operand.vmem [shape: bf16[512,512], index: 9, kind: input, shape index: {}]   ;;  %s14536_s10 = inlined_call_operand.vmem [shape: f32[1,512], index: 10, kind: input, shape index: {}]   ;;  %s14537_s11 = inlined_call_operand.hbm [shape: bf16[512,512], index: 11, kind: input, shape index: {}]   ;;  %s14538_s12 = inlined_call_operand.vmem [shape: f32[1,512], index: 12, kind: input, shape index: {}]   ;;  %s14539_s13 = inlined_call_operand.hbm [shape: bf16[512,256], index: 13, kind: input, shape index: {}]   ;;  %s14540_s14 = inlined_call_operand.vmem [shape: f32[1,256], index: 14, kind: input, shape index: {}]   ;;  %s14541_s15 = inlined_call_operand.vmem [shape: f32[320,256], index: 15, kind: output, shape index: {}]  }
   0x1   :  { %14562 = sst [smem:[#allocation26_spill]] %s14527_s1 }
   0x2   :  { %14563 = sst [smem:[#allocation27_spill]] %s14538_s12 }
   0x3   :  { %14564 = sst [smem:[#allocation28_spill]] %s14540_s14 }
   0x4   :  { %14565 = sst [smem:[#allocation29_spill]] %s14541_s15 }
   0x5   :  { %20 = vsyncpa [#allocation3], 0 }
   0x6   :  { %21 = vsyncpa [#allocation5], 0 }
   0x7   :  { %22 = vsyncpa [#allocation8], 0 }
   0x8   :  { %23 = vsyncpa [#allocation11], 0  ;;  %s11327_s18 = smov 0  }
   0x9 LB: > { %s11233_s19 = smov [#allocation4]   ;;  %s14542_s21 = sadd.s32 4294967295, %s11231_s18   ;;  %s11231_s18 = sphi %s11327_s18, %s29_s18  }
   0xa   : > { %s406_s20 = sshll.u32 %s11233_s19, 4  ;;  %p8391_p0 = scmp.ge.s32.totalorder %s11231_s18, 1  ;;  %s11341_s20 = int_to_ptr.vmem [resolvable:$true] %s406_s20 }
   0xb   : > { %p380_p1 = scmp.lt.s32.totalorder %s11231_s18, 3  ;;  %p11337_p2 = scmp.eq.s32.totalorder %s14542_s21, 0 }
   0xc   : > { %s11234_s24 = smov [#allocation7]   ;;  %s11235_s26 = smov [#allocation2]  }
   0xd   : > { %s14566_s22 = scalar_select %p11337_p2, 1, 0 }
   0xe   : > { %p11343_p3 = pnand %p8391_p0, %p380_p1  ;;  %s436_s25 = sshll.u32 %s11234_s24, 4  ;;  %s11349_s25 = int_to_ptr.vmem [resolvable:$true] %s436_s25 }
   0xf   : > { %s392_s27 = sshll.u32 %s11235_s26, 4  ;;  %s11236_s29 = smov [#allocation6]   ;;  %s11357_s27 = int_to_ptr.vmem [resolvable:$true] %s392_s27 }
  0x10   : > { %s14567_s23 = scalar_select %p11343_p3, 1, 0 }
  0x11   : > { %p9760_p4 = pneg %p11343_p3  ;;  %s11359_s30 = sshll.u32 %s11236_s29, 4  ;;  %s417_s30 = int_to_ptr.vmem [resolvable:$true] %s11359_s30 }
  0x12   : > { %s11041_s19 = scalar_lea.hbm %s14528_s2, 32 }
  0x13   : > { %p11353_p5 = pnand %p11337_p2, %p9760_p4  ;;  %p11042_p6 = scmp.ne.s32.totalorder %s14528_s2, %s11041_s19 }
  0x14   : > { %p11048_p10 = scmp.lt.u32.totalorder %s11041_s19, %s14528_s2 }
  0x15   : > { %p11369_p7 = pneg %p11353_p5 }
  0x17   : > { %p11044_p8 = pnand %p11369_p7, %p11042_p6 }
  0x19   : > { %p11045_p9 = pneg %p11044_p8 }
  0x1b   : > { %p11050_p11 = pnand %p11048_p10, %p11045_p9 }
  0x1d   : > { %11053 = shalt.err (!%p11050_p11)
}
  0x1e   : > { %s11054_s21 = scalar_lea.vmem %s11341_s20, 32  ;;  %p11062_p1 = scmp.lt.s32.totalorder %s11341_s20, %s11341_s20 }
  0x1f   : > { %p11055_p12 = scmp.ne.s32.totalorder %s11341_s20, %s11054_s21  ;;  %p11063_p4 = scmp.lt.s32.totalorder %s11054_s21, %s11054_s21 }
  0x21   : > { %p11057_p13 = pnand %p11055_p12, %p11369_p7  ;;  %p11064_p6 = por %p11063_p4, %p11062_p1 }
  0x23   : > { %p11058_p0 = pneg %p11057_p13 }
  0x25   : > { %p11065_p8 = pnand %p11064_p6, %p11058_p0 }
  0x27   : > { %11068 = shalt.err (!%p11065_p8)
}
  0x28   : > { %9766 = dma.hbm_to_vmem [thread:$0]  (!%p11353_p5), %s14528_s2, 32, %s11341_s20, [#allocation5]  }
  0x29   : > { %s11069_s24 = scalar_lea.hbm %s14532_s6, 64 }
  0x2a   : > { %p11070_p9 = scmp.ne.s32.totalorder %s14532_s6, %s11069_s24  ;;  %p11076_p12 = scmp.lt.u32.totalorder %s11069_s24, %s14532_s6 }
  0x2c   : > { %p11072_p10 = pnand %p11070_p9, %p11369_p7 }
  0x2e   : > { %p11073_p11 = pneg %p11072_p10 }
  0x30   : > { %p11078_p13 = pnand %p11076_p12, %p11073_p11 }
  0x32   : > { %11081 = shalt.err (!%p11078_p13)
}
  0x33   : > { %s11082_s20 = scalar_lea.vmem %s11349_s25, 64  ;;  %p11090_p6 = scmp.lt.s32.totalorder %s11349_s25, %s11349_s25 }
  0x34   : > { %p11083_p0 = scmp.ne.s32.totalorder %s11349_s25, %s11082_s20  ;;  %p11091_p8 = scmp.lt.s32.totalorder %s11082_s20, %s11082_s20 }
  0x36   : > { %p11085_p1 = pnand %p11083_p0, %p11369_p7  ;;  %p11092_p9 = por %p11091_p8, %p11090_p6 }
  0x38   : > { %p11086_p4 = pneg %p11085_p1 }
  0x3a   : > { %p11093_p10 = pnand %p11092_p9, %p11086_p4 }
  0x3c   : > { %11096 = shalt.err (!%p11093_p10)
}
  0x3d   : > { %9772 = dma.hbm_to_vmem [thread:$0]  (!%p11353_p5), %s14532_s6, 64, %s11349_s25, [#allocation8]  }
  0x3e   : > { %s14570_s1 = sld [smem:[#allocation26_spill]] }
  0x44   : > { %s11097_s17 = scalar_lea.hbm %s14570_s1, 6144 }
  0x45   : > { %p11098_p11 = scmp.ne.s32.totalorder %s14570_s1, %s11097_s17  ;;  %p11104_p0 = scmp.lt.u32.totalorder %s11097_s17, %s14570_s1 }
  0x47   : > { %p11100_p12 = pnand %p11098_p11, %p11369_p7 }
  0x49   : > { %p11101_p13 = pneg %p11100_p12 }
  0x4b   : > { %p11106_p1 = pnand %p11104_p0, %p11101_p13 }
  0x4d   : > { %11109 = shalt.err (!%p11106_p1)
}
  0x4e   : > { %s11110_s25 = scalar_lea.vmem %s11357_s27, 6144  ;;  %p11118_p9 = scmp.lt.s32.totalorder %s11357_s27, %s11357_s27 }
  0x4f   : > { %p11111_p4 = scmp.ne.s32.totalorder %s11357_s27, %s11110_s25  ;;  %p11119_p10 = scmp.lt.s32.totalorder %s11110_s25, %s11110_s25 }
  0x51   : > { %p11113_p6 = pnand %p11111_p4, %p11369_p7  ;;  %p11120_p11 = por %p11119_p10, %p11118_p9 }
  0x53   : > { %p11114_p8 = pneg %p11113_p6 }
  0x55   : > { %p11121_p12 = pnand %p11120_p11, %p11114_p8 }
  0x57   : > { %11124 = shalt.err (!%p11121_p12)
}
  0x58   : > { %s14546_s20 = smov 128   ;;  %s14547_s12 = smov 8  }
  0x59   : > { %9763 = dma.hbm_to_vmem [thread:$0]  (!%p11353_p5), %s14570_s1, 6144, %s11357_s27, [#allocation3], %s14546_s20, %s14546_s20, %s14547_s12  }
  0x5a   : > { %s11125_s19 = scalar_lea.hbm %s14529_s3, 2048 }
  0x5b   : > { %p11126_p13 = scmp.ne.s32.totalorder %s14529_s3, %s11125_s19  ;;  %p11132_p4 = scmp.lt.u32.totalorder %s11125_s19, %s14529_s3 }
  0x5d   : > { %p11128_p0 = pnand %p11126_p13, %p11369_p7 }
  0x5f   : > { %p11129_p1 = pneg %p11128_p0 }
  0x61   : > { %p11134_p6 = pnand %p11132_p4, %p11129_p1 }
  0x63   : > { %11137 = shalt.err (!%p11134_p6)
}
  0x64   : > { %s11138_s14 = scalar_lea.vmem %s417_s30, 2048  ;;  %p11146_p11 = scmp.lt.s32.totalorder %s417_s30, %s417_s30 }
  0x65   : > { %p11139_p8 = scmp.ne.s32.totalorder %s417_s30, %s11138_s14  ;;  %p11147_p12 = scmp.lt.s32.totalorder %s11138_s14, %s11138_s14 }
  0x67   : > { %p11141_p9 = pnand %p11139_p8, %p11369_p7  ;;  %p11148_p2 = por %p11147_p12, %p11146_p11 }
  0x69   : > { %p11142_p10 = pneg %p11141_p9 }
  0x6b   : > { %p11149_p3 = pnand %p11148_p2, %p11142_p10 }
  0x6d   : > { %11152 = shalt.err (!%p11149_p3)
}
  0x6e   : > { %s11239_s27 = smov 64   ;;  %s11240_s15 = smov 4  }
  0x6f   : > { %9769 = dma.hbm_to_vmem [thread:$0]  (!%p11353_p5), %s14529_s3, 2048, %s417_s30, [#allocation5], %s11239_s27, %s11239_s27, %s11240_s15  }
  0x70   : > { %s11241_s19 = smov [#allocation9]   ;;  %s11153_s25 = scalar_lea.hbm %s14537_s11, 16384 }
  0x71   : > { %s458_s24 = sshll.u32 %s11241_s19, 4  ;;  %p11154_p2 = scmp.ne.s32.totalorder %s14537_s11, %s11153_s25  ;;  %s459_s24 = int_to_ptr.vmem [resolvable:$true] %s458_s24 }
  0x72   : > { %p11160_p0 = scmp.lt.u32.totalorder %s11153_s25, %s14537_s11 }
  0x73   : > { %p11156_p3 = pnand %p11154_p2, %p11369_p7 }
  0x75   : > { %p11157_p13 = pneg %p11156_p3 }
  0x77   : > { %p11162_p1 = pnand %p11160_p0, %p11157_p13 }
  0x79   : > { %11165 = shalt.err (!%p11162_p1)
}
  0x7a   : > { %s11166_s30 = scalar_lea.vmem %s459_s24, 16384  ;;  %p11174_p9 = scmp.lt.s32.totalorder %s459_s24, %s459_s24 }
  0x7b   : > { %p11167_p4 = scmp.ne.s32.totalorder %s459_s24, %s11166_s30  ;;  %p11175_p10 = scmp.lt.s32.totalorder %s11166_s30, %s11166_s30 }
  0x7d   : > { %p11169_p6 = pnand %p11167_p4, %p11369_p7  ;;  %p11176_p11 = por %p11175_p10, %p11174_p9 }
  0x7f   : > { %p11170_p8 = pneg %p11169_p6 }
  0x81   : > { %p11177_p12 = pnand %p11176_p11, %p11170_p8 }
  0x83   : > { %11180 = shalt.err (!%p11177_p12)
}
  0x84   : > { %s11242_s20 = smov 256   ;;  %s11243_s27 = smov 16  }
  0x85   : > { %9775 = dma.hbm_to_vmem [thread:$0]  (!%p11353_p5), %s14537_s11, 16384, %s459_s24, [#allocation8], %s11242_s20, %s11242_s20, %s11243_s27  }
  0x86   : > { %s11244_s15 = smov [#allocation10]   ;;  %s11181_s29 = scalar_lea.hbm %s14539_s13, 8192 }
  0x87   : > { %s474_s16 = sshll.u32 %s11244_s15, 4  ;;  %p11182_p2 = scmp.ne.s32.totalorder %s14539_s13, %s11181_s29  ;;  %s475_s16 = int_to_ptr.vmem [resolvable:$true] %s474_s16 }
  0x88   : > { %p11188_p0 = scmp.lt.u32.totalorder %s11181_s29, %s14539_s13 }
  0x89   : > { %p11184_p3 = pnand %p11182_p2, %p11369_p7 }
  0x8b   : > { %p11185_p13 = pneg %p11184_p3 }
  0x8d   : > { %p11190_p1 = pnand %p11188_p0, %p11185_p13 }
  0x8f   : > { %11193 = shalt.err (!%p11190_p1)
}
  0x90   : > { %s11194_s24 = scalar_lea.vmem %s475_s16, 8192  ;;  %p11202_p9 = scmp.lt.s32.totalorder %s475_s16, %s475_s16 }
  0x91   : > { %p11195_p4 = scmp.ne.s32.totalorder %s475_s16, %s11194_s24  ;;  %p11203_p10 = scmp.lt.s32.totalorder %s11194_s24, %s11194_s24 }
  0x93   : > { %p11197_p6 = pnand %p11195_p4, %p11369_p7  ;;  %p11204_p11 = por %p11203_p10, %p11202_p9 }
  0x95   : > { %p11198_p8 = pneg %p11197_p6 }
  0x97   : > { %p11205_p12 = pnand %p11204_p11, %p11198_p8 }
  0x99   : > { %11208 = shalt.err (!%p11205_p12)
}
  0x9a   : > { %s14571_s20 = smov 8   ;;  %s14572_s27 = smov 128  }
  0x9b   : > { %9778 = dma.hbm_to_vmem [thread:$0]  (!%p11353_p5), %s14539_s13, 8192, %s475_s16, [#allocation11], %s14572_s27, %s14572_s27, %s14571_s20  }
  0x9c   : > { %p14573_p2 = scmp.ne.s32.totalorder %s14567_s23, 0 }
  0x9e   : > { %503 = sbr.rel (%p14573_p2) target bundleno = 2317 (0x90d), region = 80 }
  0xa5   : > { %p14574_p7 = scmp.ne.s32.totalorder %s14566_s22, 0 }
  0xa7   : > { %11214 = dma.done.wait (%p14574_p7), [#allocation3], 6144  }
  0xa8   : > { %11216 = vsyncadd (%p14574_p7), [#allocation3], 4294961152 }
  0xa9   : > { %11218 = dma.done.wait (%p14574_p7), [#allocation5], 2080  }
  0xaa   : > { %11220 = vsyncadd (%p14574_p7), [#allocation5], 4294965216 }
  0xab   : > { %11222 = dma.done.wait (%p14574_p7), [#allocation8], 16448  }
  0xac   : > { %11224 = vsyncadd (%p14574_p7), [#allocation8], 4294950848 }
  0xad   : > { %11226 = dma.done.wait (%p14574_p7), [#allocation11], 8192  }
  0xae   : > { %11228 = vsyncadd (%p14574_p7), [#allocation11], 4294959104  ;;  %v9813_v0 = vld [vmem:[#allocation2 + $0x4] ss:$8 sps:$4 sm:$0xff]   ;;  %v9815_v1 = vld [vmem:[#allocation2] ss:$8 sps:$4 sm:$0xff]  }
  0xaf   : > { %1089 = vmatprep.subr.bf16.mxu0 %v9813_v0  ;;  %v9816_v2 = vld [vmem:[#allocation2 + $0x14] ss:$8 sps:$4 sm:$0xff]   ;;  %v9818_v3 = vld [vmem:[#allocation2 + $0x10] ss:$8 sps:$4 sm:$0xff]   ;;  %s14575_s23 = sadd.s32 4294967295, %s11231_s18   ;;  %v9925_v57 = vld [vmem:[#allocation6 + $0x40] sm:$0xff]  }
  0xb0   : > { %1090 = vmatpush1.bf16.msra.mxu0 %v9815_v1  ;;  %s573_s28 = smul.u32 20, %s14575_s23  ;;  %v9819_v4 = vld [vmem:[#allocation2 + $0x24] ss:$8 sps:$4 sm:$0xff]   ;;  %v9821_v5 = vld [vmem:[#allocation2 + $0x20] ss:$8 sps:$4 sm:$0xff]   ;;  %8987 = vmatprep.subr.bf16.mxu1 %v9925_v57  ;;  %s14581_s30 = sld [smem:[#allocation27_spill]] }
  0xb1   : > { %1091 = vmatprep.subr.bf16.mxu0 %v9816_v2  ;;  %v9822_v6 = vld [vmem:[#allocation2 + $0x34] ss:$8 sps:$4 sm:$0xff]   ;;  %v9824_v7 = vld [vmem:[#allocation2 + $0x30] ss:$8 sps:$4 sm:$0xff]   ;;  %v9825_v8 = vld [vmem:[#allocation2 + $0x44] ss:$8 sps:$4 sm:$0xff]  }
  0xb2   : > { %p574_p5 = scmp.lt.s32.totalorder %s573_s28, 39  ;;  %v9827_v9 = vld [vmem:[#allocation2 + $0x40] ss:$8 sps:$4 sm:$0xff]   ;;  %v9828_v10 = vld [vmem:[#allocation2 + $0x54] ss:$8 sps:$4 sm:$0xff]   ;;  %s14597_s27 = sld [smem:[#allocation28_spill]] }
  0xb3   : > { %v9830_v11 = vld [vmem:[#allocation2 + $0x50] ss:$8 sps:$4 sm:$0xff]   ;;  %v9831_v12 = vld [vmem:[#allocation2 + $0x64] ss:$8 sps:$4 sm:$0xff]   ;;  %v9833_v14 = vld [vmem:[#allocation2 + $0x60] ss:$8 sps:$4 sm:$0xff]  }
  0xb4   : > { %1092 = vmatpush1.bf16.msra.mxu0 %v9818_v3  ;;  %s14602_s28 = smov (!%p574_p5, %s573_s28), 39  ;;  %v9834_v15 = vld [vmem:[#allocation2 + $0x74] ss:$8 sps:$4 sm:$0xff]   ;;  %v9836_v16 = vld [vmem:[#allocation2 + $0x70] ss:$8 sps:$4 sm:$0xff]   ;;  %v9926_v58 = vld [vmem:[#allocation6] sm:$0xff]  }
  0xb5   : > { %1093 = vmatprep.subr.bf16.mxu0 %v9819_v4  ;;  %s9735_s22 = smul.u32 12, %s14602_s28  ;;  %v9837_v17 = vld [vmem:[#allocation2 + $0x84] ss:$8 sps:$4 sm:$0xff]   ;;  %v9839_v18 = vld [vmem:[#allocation2 + $0x80] ss:$8 sps:$4 sm:$0xff]   ;;  %8988 = vmatpush3.bf16.msra.mxu1 %v9926_v58  ;;  %s8986_s1 = sshll.u32 %s14602_s28, 4 }
  0xb6   : > { %v9840_v19 = vld [vmem:[#allocation2 + $0x94] ss:$8 sps:$4 sm:$0xff]   ;;  %v9842_v20 = vld [vmem:[#allocation2 + $0x90] ss:$8 sps:$4 sm:$0xff]   ;;  %v9843_v21 = vld [vmem:[#allocation2 + $0xa4] ss:$8 sps:$4 sm:$0xff]  }
  0xb7   : > { %s11523_s16 = scalar_lea.vmem %s14526_s0, %s9735_s22  ;;  %v9845_v22 = vld [vmem:[#allocation2 + $0xa0] ss:$8 sps:$4 sm:$0xff]   ;;  %v9846_v23 = vld [vmem:[#allocation2 + $0xb4] ss:$8 sps:$4 sm:$0xff]   ;;  %v9848_v24 = vld [vmem:[#allocation2 + $0xb0] ss:$8 sps:$4 sm:$0xff]  }
  0xb8   : > { %1094 = vmatpush1.bf16.msra.mxu0 %v9821_v5  ;;  %v9863_v13 = vld [vmem:[%s11523_s16 + $0x4] ss:$12 sps:$4 sm:$0xff]   ;;  %v9851_v26 = vld [vmem:[#allocation2 + $0xc0] ss:$8 sps:$4 sm:$0xff]   ;;  %v9852_v27 = vld [vmem:[#allocation2 + $0xd4] ss:$8 sps:$4 sm:$0xff]  }
  0xb9   : > { %1095 = vmatprep.subr.bf16.mxu0 %v9822_v6  ;;  %1121 = vmatprep.mubr.bf16.mxu0 %v9863_v13  ;;  %v9849_v25 = vld [vmem:[#allocation2 + $0xc4] ss:$8 sps:$4 sm:$0xff]   ;;  %v9854_v28 = vld [vmem:[#allocation2 + $0xd0] ss:$8 sps:$4 sm:$0xff]   ;;  %v9857_v30 = vld [vmem:[#allocation2 + $0xe0] ss:$8 sps:$4 sm:$0xff]  }
  0xba   : > { %v9855_v29 = vld [vmem:[#allocation2 + $0xe4] ss:$8 sps:$4 sm:$0xff]   ;;  %v9858_v31 = vld [vmem:[#allocation2 + $0xf4] ss:$8 sps:$4 sm:$0xff]   ;;  %v9860_v32 = vld [vmem:[#allocation2 + $0xf0] ss:$8 sps:$4 sm:$0xff]  }
  0xbb   : > { %v9866_v33 = vld [vmem:[#allocation2 + $0x104] ss:$8 sps:$4 sm:$0xff]   ;;  %v9864_v35 = vld [vmem:[#allocation2 + $0x100] ss:$8 sps:$4 sm:$0xff]   ;;  %v9872_v37 = vld [vmem:[#allocation2 + $0x114] ss:$8 sps:$4 sm:$0xff]  }
  0xbc   : > { %1096 = vmatpush1.bf16.msra.mxu0 %v9824_v7  ;;  %v9861_v34 = vld [vmem:[%s11523_s16] ss:$12 sps:$4 sm:$0xff]   ;;  %v9867_v36 = vld [vmem:[%s11523_s16 + $0x1c] ss:$12 sps:$4 sm:$0xff]   ;;  %v9870_v38 = vld [vmem:[#allocation2 + $0x110] ss:$8 sps:$4 sm:$0xff]  }
  0xbd   : > { %1097 = vmatprep.subr.bf16.mxu0 %v9825_v8  ;;  %v9878_v39 = vld [vmem:[#allocation2 + $0x124] ss:$8 sps:$4 sm:$0xff]   ;;  %v9873_v41 = vld [vmem:[%s11523_s16 + $0x34] ss:$12 sps:$4 sm:$0xff]   ;;  %v9882_v44 = vld [vmem:[#allocation2 + $0x130] ss:$8 sps:$4 sm:$0xff]  }
  0xbe   : > { %v9869_v40 = vld [vmem:[%s11523_s16 + $0x18] ss:$12 sps:$4 sm:$0xff]   ;;  %v9876_v42 = vld [vmem:[#allocation2 + $0x120] ss:$8 sps:$4 sm:$0xff]   ;;  %v9884_v43 = vld [vmem:[#allocation2 + $0x134] ss:$8 sps:$4 sm:$0xff]  }
  0xbf   : > { %v9893_v45 = vld [vmem:[#allocation2 + $0x144] ss:$8 sps:$4 sm:$0xff]   ;;  %v9875_v46 = vld [vmem:[%s11523_s16 + $0x30] ss:$12 sps:$4 sm:$0xff]   ;;  %v9891_v48 = vld [vmem:[#allocation2 + $0x140] ss:$8 sps:$4 sm:$0xff]  }
  0xc0   : > { %1098 = vmatpush1.bf16.msra.mxu0 %v9827_v9  ;;  %v9879_v47 = vld [vmem:[%s11523_s16 + $0x4c] ss:$12 sps:$4 sm:$0xff]   ;;  %v9899_v49 = vld [vmem:[#allocation2 + $0x154] ss:$8 sps:$4 sm:$0xff]   ;;  %v9885_v53 = vld [vmem:[%s11523_s16 + $0x64] ss:$12 sps:$4 sm:$0xff]  }
  0xc1   : > { %1099 = vmatprep.subr.bf16.mxu0 %v9828_v10  ;;  %v9897_v50 = vld [vmem:[#allocation2 + $0x150] ss:$8 sps:$4 sm:$0xff]   ;;  %v9905_v51 = vld [vmem:[#allocation2 + $0x164] ss:$8 sps:$4 sm:$0xff]   ;;  %v9881_v52 = vld [vmem:[%s11523_s16 + $0x48] ss:$12 sps:$4 sm:$0xff]  }
  0xc2   : > { %v9903_v54 = vld [vmem:[#allocation2 + $0x160] ss:$8 sps:$4 sm:$0xff]   ;;  %v9911_v55 = vld [vmem:[#allocation2 + $0x174] ss:$8 sps:$4 sm:$0xff]   ;;  %v9909_v56 = vld [vmem:[#allocation2 + $0x170] ss:$8 sps:$4 sm:$0xff]  }
  0xc3   : > { %v9887_v59 = vld [vmem:[%s11523_s16 + $0x60] ss:$12 sps:$4 sm:$0xff]   ;;  %v9888_v60 = vld [vmem:[%s11523_s16 + $0x7c] ss:$12 sps:$4 sm:$0xff]   ;;  %v9890_v61 = vld [vmem:[%s11523_s16 + $0x78] ss:$12 sps:$4 sm:$0xff]  }
  0xc4   : > { %1100 = vmatpush1.bf16.msra.mxu0 %v9830_v11  ;;  %v9894_v62 = vld [vmem:[%s11523_s16 + $0x94] ss:$12 sps:$4 sm:$0xff]   ;;  %v9896_v63 = vld [vmem:[%s11523_s16 + $0x90] ss:$12 sps:$4 sm:$0xff]   ;;  %v9900_v0 = vld [vmem:[%s11523_s16 + $0xac] ss:$12 sps:$4 sm:$0xff]  }
  0xc5   : > { %1101 = vmatprep.subr.bf16.mxu0 %v9831_v12  ;;  %v9902_v1 = vld [vmem:[%s11523_s16 + $0xa8] ss:$12 sps:$4 sm:$0xff]   ;;  %v9906_v2 = vld [vmem:[%s11523_s16 + $0xc4] ss:$12 sps:$4 sm:$0xff]   ;;  %v9908_v3 = vld [vmem:[%s11523_s16 + $0xc0] ss:$12 sps:$4 sm:$0xff]  }
  0xc6   : > { %v9912_v4 = vld [vmem:[%s11523_s16 + $0xdc] ss:$12 sps:$4 sm:$0xff]   ;;  %v9914_v5 = vld [vmem:[%s11523_s16 + $0xd8] ss:$12 sps:$4 sm:$0xff]   ;;  %v14552_v6 = vmov 0   ;;  %s14600_s22 = sld [smem:[#allocation29_spill]] }
  0xc7   : > { %v9915_v7 = vld [vmem:[%s11523_s16 + $0x8] ss:$12 sps:$4 sm:$0xff]   ;;  %v9916_v8 = vld [vmem:[%s11523_s16 + $0x20] ss:$12 sps:$4 sm:$0xff]   ;;  %v9917_v9 = vld [vmem:[%s11523_s16 + $0x38] ss:$12 sps:$4 sm:$0xff]  }
  0xc8   : > { %1102 = vmatpush1.bf16.msra.mxu0 %v9833_v14  ;;  %v9918_v10 = vld [vmem:[%s11523_s16 + $0x50] ss:$12 sps:$4 sm:$0xff]   ;;  %v9919_v11 = vld [vmem:[%s11523_s16 + $0x68] ss:$12 sps:$4 sm:$0xff]   ;;  %v9920_v12 = vld [vmem:[%s11523_s16 + $0x80] ss:$12 sps:$4 sm:$0xff]  }
  0xc9   : > { %1103 = vmatprep.subr.bf16.mxu0 %v9834_v15  ;;  %v9921_v13 = vld [vmem:[%s11523_s16 + $0x98] ss:$12 sps:$4 sm:$0xff]   ;;  %v9922_v14 = vld [vmem:[%s11523_s16 + $0xb0] ss:$12 sps:$4 sm:$0xff]   ;;  %v9923_v15 = vld [vmem:[%s11523_s16 + $0xc8] ss:$12 sps:$4 sm:$0xff]  }
  0xcc   : > { %1104 = vmatpush1.bf16.msra.mxu0 %v9836_v16  ;;  %v9924_v16 = vld [vmem:[%s11523_s16 + $0xe0] ss:$12 sps:$4 sm:$0xff]   ;;  %s14442_s26 = scalar_lea.vmem %s14600_s22, %s8986_s1 }
  0xcd   : > { %1105 = vmatprep.subr.bf16.mxu0 %v9837_v17  ;;  %v9927_v17 = vld [vmem:[#allocation6 + $0x48] sm:$0xff]  }
  0xce   : > { %8989 = vmatprep.subr.bf16.mxu1 %v9927_v17  ;;  %v14548_v17 = vmov 1065369472  }
  0xd0   : > { %1106 = vmatpush1.bf16.msra.mxu0 %v9839_v18  ;;  %v9928_v18 = vld [vmem:[#allocation6 + $0x8] sm:$0xff]  }
  0xd1   : > { %1107 = vmatprep.subr.bf16.mxu0 %v9840_v19  ;;  %8990 = vmatpush3.bf16.msra.mxu1 %v9928_v18  ;;  %v9929_v19 = vld [vmem:[#allocation6 + $0x50] sm:$0xff]  }
  0xd2   : > { %8991 = vmatprep.subr.bf16.mxu1 %v9929_v19 }
  0xd4   : > { %1108 = vmatpush1.bf16.msra.mxu0 %v9842_v20  ;;  %v9930_v20 = vld [vmem:[#allocation6 + $0x10] sm:$0xff]  }
  0xd5   : > { %1109 = vmatprep.subr.bf16.mxu0 %v9843_v21  ;;  %8992 = vmatpush3.bf16.msra.mxu1 %v9930_v20  ;;  %v9931_v21 = vld [vmem:[#allocation6 + $0x58] sm:$0xff]  }
  0xd6   : > { %8993 = vmatprep.subr.bf16.mxu1 %v9931_v21 }
  0xd8   : > { %1110 = vmatpush1.bf16.msra.mxu0 %v9845_v22  ;;  %v9932_v22 = vld [vmem:[#allocation6 + $0x18] sm:$0xff]  }
  0xd9   : > { %1111 = vmatprep.subr.bf16.mxu0 %v9846_v23  ;;  %8994 = vmatpush3.bf16.msra.mxu1 %v9932_v22  ;;  %v9933_v23 = vld [vmem:[#allocation6 + $0x60] sm:$0xff]  }
  0xda   : > { %8995 = vmatprep.subr.bf16.mxu1 %v9933_v23 }
  0xdc   : > { %1112 = vmatpush1.bf16.msra.mxu0 %v9848_v24  ;;  %v9934_v24 = vld [vmem:[#allocation6 + $0x20] sm:$0xff]  }
  0xdd   : > { %1113 = vmatprep.subr.bf16.mxu0 %v9849_v25  ;;  %8996 = vmatpush3.bf16.msra.mxu1 %v9934_v24  ;;  %v9935_v25 = vld [vmem:[#allocation6 + $0x68] sm:$0xff]  }
  0xde   : > { %8997 = vmatprep.subr.bf16.mxu1 %v9935_v25  ;;  %v9941_v24 = vld [vmem:[%s14531_s5] ss:$16 sps:$4 sm:$0xff]  }
  0xe0   : > { %1114 = vmatpush1.bf16.msra.mxu0 %v9851_v26  ;;  %v9936_v26 = vld [vmem:[#allocation6 + $0x28] sm:$0xff]  }
  0xe1   : > { %1115 = vmatprep.subr.bf16.mxu0 %v9852_v27  ;;  %8998 = vmatpush3.bf16.msra.mxu1 %v9936_v26  ;;  %v9937_v27 = vld [vmem:[#allocation6 + $0x70] sm:$0xff]  }
  0xe2   : > { %8999 = vmatprep.subr.bf16.mxu1 %v9937_v27 }
  0xe4   : > { %1116 = vmatpush1.bf16.msra.mxu0 %v9854_v28  ;;  %v9938_v28 = vld [vmem:[#allocation6 + $0x30] sm:$0xff]  }
  0xe5   : > { %1117 = vmatprep.subr.bf16.mxu0 %v9855_v29  ;;  %9000 = vmatpush3.bf16.msra.mxu1 %v9938_v28  ;;  %v9939_v29 = vld [vmem:[#allocation6 + $0x78] sm:$0xff]   ;;  %v9946_v28 = vld [vmem:[%s14531_s5 + $0x24] ss:$16 sps:$4 sm:$0xff]  }
  0xe6   : > { %9001 = vmatprep.subr.bf16.mxu1 %v9939_v29 }
  0xe8   : > { %1118 = vmatpush1.bf16.msra.mxu0 %v9857_v30  ;;  %v9940_v30 = vld [vmem:[#allocation6 + $0x38] sm:$0xff]  }
  0xe9   : > { %1119 = vmatprep.subr.bf16.mxu0 %v9858_v31  ;;  %9002 = vmatpush3.bf16.msra.mxu1 %v9940_v30  ;;  %v9943_v31 = vld [vmem:[%s14531_s5 + $0x4] ss:$16 sps:$4 sm:$0xff]  }
  0xea   : > { %2057 = vmatprep.subr.bf16.mxu1 %v9943_v31 }
  0xec   : > { %1120 = vmatpush1.bf16.msra.mxu0 %v9860_v32  ;;  %v679_v32 = vlaneseq }
  0xed   : > { %1222 = vmatprep.subr.bf16.mxu0 %v9866_v33 }
  0xee   : > { %v11568_v33 = vshrl.u32 %v679_v32, 7 }
  0xef   : > { %1122 = vmatmul.mubr.bf16.vlgmr.msra.gmra.mrb[0].mxu0 %v9861_v34 }
  0xf0   : > { %1223 = vmatpush1.bf16.msra.mxu0 %v9864_v35  ;;  %1131 = vmatprep.mubr.bf16.mxu0 %v9867_v36  ;;  %v11571_v34 = vsub.s32 0, %v11568_v33  ;;  %v677_v35 = vld [vmem:[#allocation4] sm:$0x3]  ;;  %v11574_v36 = vsub.s32 1, %v11568_v33 }
  0xf1   : > { %1224 = vmatprep.subr.bf16.mxu0 %v9872_v37 }
  0xf2   : > { %14576 = vst [vmem:[#allocation16_spill] sm:$0xff] %v11571_v34  ;;  %14577 = vst [vmem:[#allocation17_spill] sm:$0xff] %v11574_v36  ;;  %v11577_v37 = vrot.slane %v677_v35, %v11571_v34 }
  0xf4   : > { %1225 = vmatpush1.bf16.msra.mxu0 %v9870_v38 }
  0xf5   : > { %1226 = vmatprep.subr.bf16.mxu0 %v9878_v39  ;;  %v11580_v39 = vrot.slane %v677_v35, %v11574_v36 }
  0xf7   : > { %1132 = vmatmul.mubr.bf16.gmra.mrb[4].mxu0 %v9869_v40 }
  0xf8   : > { %1141 = vmatprep.mubr.bf16.mxu0 %v9873_v41  ;;  %1227 = vmatpush1.bf16.msra.mxu0 %v9876_v42 }
  0xf9   : > { %1228 = vmatprep.subr.bf16.mxu0 %v9884_v43 }
  0xfc   : > { %1229 = vmatpush1.bf16.msra.mxu0 %v9882_v44 }
  0xfd   : > { %1230 = vmatprep.subr.bf16.mxu0 %v9893_v45 }
  0xff   : > { %1142 = vmatmul.mubr.bf16.gmra.mrb[8].mxu0 %v9875_v46 }
 0x100   : > { %1151 = vmatprep.mubr.bf16.mxu0 %v9879_v47  ;;  %1231 = vmatpush1.bf16.msra.mxu0 %v9891_v48 }
 0x101   : > { %1232 = vmatprep.subr.bf16.mxu0 %v9899_v49 }
 0x104   : > { %1233 = vmatpush1.bf16.msra.mxu0 %v9897_v50 }
 0x105   : > { %1234 = vmatprep.subr.bf16.mxu0 %v9905_v51 }
 0x107   : > { %1152 = vmatmul.mubr.bf16.gmra.mrb[12].mxu0 %v9881_v52 }
 0x108   : > { %1161 = vmatprep.mubr.bf16.mxu0 %v9885_v53  ;;  %1235 = vmatpush1.bf16.msra.mxu0 %v9903_v54 }
 0x109   : > { %1236 = vmatprep.subr.bf16.mxu0 %v9911_v55 }
 0x10c   : > { %1237 = vmatpush1.bf16.msra.mxu0 %v9909_v56 }
 0x10f   : > { %1162 = vmatmul.mubr.bf16.gmra.mrb[16].mxu0 %v9887_v59 }
 0x110   : > { %1171 = vmatprep.mubr.bf16.mxu0 %v9888_v60 }
 0x117   : > { %1172 = vmatmul.mubr.bf16.gmra.mrb[20].mxu0 %v9890_v61 }
 0x118   : > { %1181 = vmatprep.mubr.bf16.mxu0 %v9894_v62 }
 0x11f   : > { %1182 = vmatmul.mubr.bf16.gmra.mrb[24].mxu0 %v9896_v63 }
 0x120   : > { %1191 = vmatprep.mubr.bf16.mxu0 %v9900_v0 }
 0x127   : > { %1192 = vmatmul.mubr.bf16.gmra.mrb[28].mxu0 %v9902_v1 }
 0x128   : > { %1201 = vmatprep.mubr.bf16.mxu0 %v9906_v2 }
 0x12f   : > { %1202 = vmatmul.mubr.bf16.gmra.mrb[32].mxu0 %v9908_v3 }
 0x130   : > { %1211 = vmatprep.mubr.bf16.mxu0 %v9912_v4 }
 0x137   : > { %1212 = vmatmul.mubr.bf16.gmra.mrb[36].mxu0 %v9914_v5 }
 0x138   : > { %1254 = vmatprep.mubr.bf16.mxu0 %v14552_v6 }
 0x13f   : > { %1255 = vmatmul.mubr.bf16.vlgmr.msra.gmra.mrb[0].mxu0 %v9915_v7 }
 0x140   : > { %1264 = vmatprep.mubr.bf16.mxu0 %v14552_v6 }
 0x147   : > { %1265 = vmatmul.mubr.bf16.gmra.mrb[4].mxu0 %v9916_v8 }
 0x148   : > { %1274 = vmatprep.mubr.bf16.mxu0 %v14552_v6 }
 0x14f   : > { %1275 = vmatmul.mubr.bf16.gmra.mrb[8].mxu0 %v9917_v9 }
 0x150   : > { %1284 = vmatprep.mubr.bf16.mxu0 %v14552_v6 }
 0x157   : > { %1285 = vmatmul.mubr.bf16.gmra.mrb[12].mxu0 %v9918_v10 }
 0x158   : > { %1294 = vmatprep.mubr.bf16.mxu0 %v14552_v6 }
 0x15f   : > { %1295 = vmatmul.mubr.bf16.gmra.mrb[16].mxu0 %v9919_v11 }
 0x160   : > { %1304 = vmatprep.mubr.bf16.mxu0 %v14552_v6 }
 0x167   : > { %1305 = vmatmul.mubr.bf16.gmra.mrb[20].mxu0 %v9920_v12 }
 0x168   : > { %1314 = vmatprep.mubr.bf16.mxu0 %v14552_v6 }
 0x16f   : > { %1315 = vmatmul.mubr.bf16.gmra.mrb[24].mxu0 %v9921_v13 }
 0x170   : > { %1324 = vmatprep.mubr.bf16.mxu0 %v14552_v6 }
 0x177   : > { %1325 = vmatmul.mubr.bf16.gmra.mrb[28].mxu0 %v9922_v14 }
 0x178   : > { %1334 = vmatprep.mubr.bf16.mxu0 %v14552_v6 }
 0x17f   : > { %1335 = vmatmul.mubr.bf16.gmra.mrb[32].mxu0 %v9923_v15 }
 0x180   : > { %1344 = vmatprep.mubr.bf16.mxu0 %v14552_v6 }
 0x187   : > { %1345 = vmatmul.mubr.bf16.gmra.mrb[36].mxu0 %v9924_v16 }
 0x212   : > { %v1256_v38 = vpop.f32.mrb[0].mxu0 }
 0x213   : > { %v1258_v40 = vpop.f32.mrb[1].mxu0  ;;  %v9095_v42 = vadd.f32 %v1256_v38, %v11577_v37 }
 0x214   : > { %v1260_v41 = vpop.f32.mrb[2].mxu0  ;;  %v9096_v45 = vadd.f32 %v1258_v40, %v11580_v39 }
 0x215   : > { %v9097_v43 = vadd.f32 %v1260_v41, %v11577_v37  ;;  %v1262_v44 = vpop.f32.mrb[3].mxu0  ;;  %v9944_v41 = vld [vmem:[%s14531_s5 + $0x20] ss:$16 sps:$4 sm:$0xff]  }
 0x216   : > { %v9098_v46 = vadd.f32 %v1262_v44, %v11580_v39  ;;  %v9949_v44 = vld [vmem:[%s14531_s5 + $0x44] ss:$16 sps:$4 sm:$0xff]  }
 0x217   : > { %v1355_v47 = vpack.c.bf16 %v9097_v43, %v9095_v42 }
 0x218   : > { %v1356_v48 = vpack.c.bf16 %v9098_v46, %v9096_v45 }
 0x219   : > { %v1395_v49 = vmin.bf16 %v14552_v6, %v1355_v47  ;;  %vm1375_vm1 = vcmp.gt.bf16.partialorder %v1355_v47, 0 }
 0x21a   : > { %v1396_v50 = vmin.bf16 %v14552_v6, %v1356_v48  ;;  %v1266_v51 = vpop.f32.mrb[4].mxu0  ;;  %vm1376_vm0 = vcmp.gt.bf16.partialorder %v1356_v48, 0 }
 0x21b   : > { %v1416_v52 = vmul.bf16 1069105081, %v1395_v49  ;;  %v1268_v53 = vpop.f32.mrb[5].mxu0  ;;  %v9099_v56 = vadd.f32 %v1266_v51, %v11577_v37 }
 0x21c   : > { %v1419_v54 = vmul.bf16 1069105081, %v1396_v50  ;;  %v1270_v55 = vpop.f32.mrb[6].mxu0  ;;  %v9100_v59 = vadd.f32 %v1268_v53, %v11580_v39  ;;  %v9947_v53 = vld [vmem:[%s14531_s5 + $0x40] ss:$16 sps:$4 sm:$0xff]  }
 0x21d   : > { %10661 = vpow.bf16 %v1416_v52  ;;  %v9101_v57 = vadd.f32 %v1270_v55, %v11577_v37  ;;  %v1272_v58 = vpop.f32.mrb[7].mxu0 }
 0x21e   : > { %10663 = vpow.bf16 %v1419_v54  ;;  %v9102_v60 = vadd.f32 %v1272_v58, %v11580_v39 }
 0x21f   : > { %v11592_v61 = vpack.c.bf16 %v9101_v57, %v9099_v56  ;;  %v9952_v57 = vld [vmem:[%s14531_s5 + $0x64] ss:$16 sps:$4 sm:$0xff]  }
 0x220   : > { %v11594_v62 = vpack.c.bf16 %v9102_v60, %v9100_v59 }
 0x221   : > { %v1397_v63 = vmin.bf16 %v14552_v6, %v11592_v61  ;;  %vm1377_vm3 = vcmp.gt.bf16.partialorder %v11592_v61, 0 }
 0x222   : > { %v1398_v0 = vmin.bf16 %v14552_v6, %v11594_v62  ;;  %v1276_v1 = vpop.f32.mrb[8].mxu0  ;;  %vm1378_vm2 = vcmp.gt.bf16.partialorder %v11594_v62, 0 }
 0x223   : > { %v1422_v2 = vmul.bf16 1069105081, %v1397_v63  ;;  %v1278_v3 = vpop.f32.mrb[9].mxu0  ;;  %v9103_v7 = vadd.f32 %v1276_v1, %v11577_v37 }
 0x224   : > { %v1425_v4 = vmul.bf16 1069105081, %v1398_v0  ;;  %v1280_v5 = vpop.f32.mrb[10].mxu0  ;;  %v9104_v10 = vadd.f32 %v1278_v3, %v11580_v39 }
 0x225   : > { %10665 = vpow.bf16 %v1422_v2  ;;  %v9105_v8 = vadd.f32 %v1280_v5, %v11577_v37  ;;  %v1282_v9 = vpop.f32.mrb[11].mxu0  ;;  %v9950_v2 = vld [vmem:[%s14531_s5 + $0x60] ss:$16 sps:$4 sm:$0xff]  }
 0x226   : > { %10667 = vpow.bf16 %v1425_v4  ;;  %v9106_v11 = vadd.f32 %v1282_v9, %v11580_v39 }
 0x227   : > { %v11604_v12 = vpack.c.bf16 %v9105_v8, %v9103_v7 }
 0x228   : > { %v10662_v13 = vpop.eup %10661  ;;  %v11606_v14 = vpack.c.bf16 %v9106_v11, %v9104_v10 }
 0x229   : > { %v10664_v15 = vpop.eup %10663  ;;  %v1399_v16 = vmin.bf16 %v14552_v6, %v11604_v12  ;;  %v1475_v18 = vsub.bf16 %v10662_v13, %v14548_v17  ;;  %vm1379_vm5 = vcmp.gt.bf16.partialorder %v11604_v12, 0 }
 0x22a   : > { %v1400_v19 = vmin.bf16 %v14552_v6, %v11606_v14  ;;  %v1286_v20 = vpop.f32.mrb[12].mxu0  ;;  %v1476_v21 = vsub.bf16 %v10664_v15, %v14548_v17  ;;  %vm1380_vm4 = vcmp.gt.bf16.partialorder %v11606_v14, 0 }
 0x22b   : > { %v1428_v22 = vmul.bf16 1069105081, %v1399_v16  ;;  %v1288_v23 = vpop.f32.mrb[13].mxu0  ;;  %v9107_v29 = vadd.f32 %v1286_v20, %v11577_v37  ;;  %v1495_v32 = vsel %vm1375_vm1, %v1355_v47, %v1475_v18  ;;  %v9953_v16 = vld [vmem:[%s14531_s5 + $0x80] ss:$16 sps:$4 sm:$0xff]  }
 0x22c   : > { %v1431_v25 = vmul.bf16 1069105081, %v1400_v19  ;;  %v1290_v26 = vpop.f32.mrb[14].mxu0  ;;  %v1496_v27 = vsel %vm1376_vm0, %v1356_v48, %v1476_v21  ;;  %v9108_v35 = vadd.f32 %v1288_v23, %v11580_v39  ;;  %v9958_v21 = vld [vmem:[%s14531_s5 + $0xa4] ss:$16 sps:$4 sm:$0xff]  }
 0x22d   : > { %10669 = vpow.bf16 %v1428_v22  ;;  %v9109_v30 = vadd.f32 %v1290_v26, %v11577_v37  ;;  %v1292_v31 = vpop.f32.mrb[15].mxu0  ;;  %1682 = vmatprep.mubr.bf16.mxu1 %v1496_v27 }
 0x22e   : > { %10671 = vpow.bf16 %v1431_v25  ;;  %v9110_v38 = vadd.f32 %v1292_v31, %v11580_v39  ;;  %1683 = vmatmul.mubr.bf16.vlgmr.msra.gmra.mrb[0].mxu1 %v1495_v32 }
 0x22f   : > { %v11624_v40 = vpack.c.bf16 %v9109_v30, %v9107_v29  ;;  %2058 = vmatpush1.bf16.msra.mxu1 %v9941_v24 }
 0x230   : > { %v10666_v42 = vpop.eup %10665  ;;  %v11629_v43 = vpack.c.bf16 %v9110_v38, %v9108_v35  ;;  %2059 = vmatprep.subr.bf16.mxu1 %v9946_v28  ;;  %v9956_v28 = vld [vmem:[%s14531_s5 + $0xa0] ss:$16 sps:$4 sm:$0xff]  }
 0x231   : > { %v10668_v45 = vpop.eup %10667  ;;  %v1401_v46 = vmin.bf16 %v14552_v6, %v11624_v40  ;;  %v1477_v47 = vsub.bf16 %v10666_v42, %v14548_v17  ;;  %vm1381_vm7 = vcmp.gt.bf16.partialorder %v11624_v40, 0 }
 0x232   : > { %v1402_v48 = vmin.bf16 %v14552_v6, %v11629_v43  ;;  %v1296_v49 = vpop.f32.mrb[16].mxu0  ;;  %v1478_v50 = vsub.bf16 %v10668_v45, %v14548_v17  ;;  %vm1382_vm6 = vcmp.gt.bf16.partialorder %v11629_v43, 0 }
 0x233   : > { %v1434_v51 = vmul.bf16 1069105081, %v1401_v46  ;;  %v1298_v52 = vpop.f32.mrb[17].mxu0  ;;  %2060 = vmatpush1.bf16.msra.mxu1 %v9944_v41  ;;  %v9111_v58 = vadd.f32 %v1296_v49, %v11577_v37  ;;  %v1497_v63 = vsel %vm1377_vm3, %v11592_v61, %v1477_v47  ;;  %v9955_v61 = vld [vmem:[%s14531_s5 + $0x84] ss:$16 sps:$4 sm:$0xff]  }
 0x234   : > { %v1437_v54 = vmul.bf16 1069105081, %v1402_v48  ;;  %v1300_v55 = vpop.f32.mrb[18].mxu0  ;;  %v1498_v56 = vsel %vm1378_vm2, %v11594_v62, %v1478_v50  ;;  %2061 = vmatprep.subr.bf16.mxu1 %v9949_v44  ;;  %v9112_v0 = vadd.f32 %v1298_v52, %v11580_v39 }
 0x235   : > { %10673 = vpow.bf16 %v1434_v51  ;;  %v9113_v59 = vadd.f32 %v1300_v55, %v11577_v37  ;;  %v1302_v60 = vpop.f32.mrb[19].mxu0  ;;  %1690 = vmatprep.mubr.bf16.mxu1 %v1498_v56 }
 0x236   : > { %10675 = vpow.bf16 %v1437_v54  ;;  %v9114_v62 = vadd.f32 %v1302_v60, %v11580_v39  ;;  %1691 = vmatmul.mubr.bf16.gmra.mrb[4].mxu1 %v1497_v63 }
 0x237   : > { %v11654_v1 = vpack.c.bf16 %v9113_v59, %v9111_v58  ;;  %2062 = vmatpush1.bf16.msra.mxu1 %v9947_v53 }
 0x238   : > { %v10670_v3 = vpop.eup %10669  ;;  %v11659_v4 = vpack.c.bf16 %v9114_v62, %v9112_v0  ;;  %2063 = vmatprep.subr.bf16.mxu1 %v9952_v57 }
 0x239   : > { %v10672_v5 = vpop.eup %10671  ;;  %v1403_v7 = vmin.bf16 %v14552_v6, %v11654_v1  ;;  %v1479_v8 = vsub.bf16 %v10670_v3, %v14548_v17  ;;  %vm1383_vm9 = vcmp.gt.bf16.partialorder %v11654_v1, 0 }
 0x23a   : > { %v1404_v9 = vmin.bf16 %v14552_v6, %v11659_v4  ;;  %v1306_v10 = vpop.f32.mrb[20].mxu0  ;;  %v1480_v11 = vsub.bf16 %v10672_v5, %v14548_v17  ;;  %vm1384_vm8 = vcmp.gt.bf16.partialorder %v11659_v4, 0 }
 0x23b   : > { %v1440_v13 = vmul.bf16 1069105081, %v1403_v7  ;;  %v1308_v15 = vpop.f32.mrb[21].mxu0  ;;  %2064 = vmatpush1.bf16.msra.mxu1 %v9950_v2  ;;  %v9115_v22 = vadd.f32 %v1306_v10, %v11577_v37  ;;  %v1499_v25 = vsel %vm1379_vm5, %v11604_v12, %v1479_v8 }
 0x23c   : > { %v1443_v18 = vmul.bf16 1069105081, %v1404_v9  ;;  %v1310_v19 = vpop.f32.mrb[22].mxu0  ;;  %v1500_v20 = vsel %vm1380_vm4, %v11606_v14, %v1480_v11  ;;  %2065 = vmatprep.subr.bf16.mxu1 %v9955_v61  ;;  %v9116_v26 = vadd.f32 %v1308_v15, %v11580_v39 }
 0x23d   : > { %10677 = vpow.bf16 %v1440_v13  ;;  %v9117_v23 = vadd.f32 %v1310_v19, %v11577_v37  ;;  %v1312_v24 = vpop.f32.mrb[23].mxu0  ;;  %1698 = vmatprep.mubr.bf16.mxu1 %v1500_v20 }
 0x23e   : > { %10679 = vpow.bf16 %v1443_v18  ;;  %v9118_v14 = vadd.f32 %v1312_v24, %v11580_v39  ;;  %1699 = vmatmul.mubr.bf16.gmra.mrb[8].mxu1 %v1499_v25 }
 0x23f   : > { %v11684_v27 = vpack.c.bf16 %v9117_v23, %v9115_v22  ;;  %2066 = vmatpush1.bf16.msra.mxu1 %v9953_v16 }
 0x240   : > { %v10674_v29 = vpop.eup %10673  ;;  %v11689_v30 = vpack.c.bf16 %v9118_v14, %v9116_v26  ;;  %2067 = vmatprep.subr.bf16.mxu1 %v9958_v21 }
 0x241   : > { %v10676_v31 = vpop.eup %10675  ;;  %v1405_v12 = vmin.bf16 %v14552_v6, %v11684_v27  ;;  %v1481_v32 = vsub.bf16 %v10674_v29, %v14548_v17  ;;  %vm1385_vm11 = vcmp.gt.bf16.partialorder %v11684_v27, 0 }
 0x242   : > { %v1406_v35 = vmin.bf16 %v14552_v6, %v11689_v30  ;;  %v1316_v38 = vpop.f32.mrb[24].mxu0  ;;  %v1482_v41 = vsub.bf16 %v10676_v31, %v14548_v17  ;;  %vm1386_vm10 = vcmp.gt.bf16.partialorder %v11689_v30, 0 }
 0x243   : > { %v1446_v42 = vmul.bf16 1069105081, %v1405_v12  ;;  %v1318_v44 = vpop.f32.mrb[25].mxu0  ;;  %2068 = vmatpush1.bf16.msra.mxu1 %v9956_v28  ;;  %v9119_v48 = vadd.f32 %v1316_v38, %v11577_v37  ;;  %v1501_v51 = vsel %vm1381_vm7, %v11624_v40, %v1481_v32 }
 0x244   : > { %v1449_v45 = vmul.bf16 1069105081, %v1406_v35  ;;  %v1320_v46 = vpop.f32.mrb[26].mxu0  ;;  %v1502_v47 = vsel %vm1382_vm6, %v11629_v43, %v1482_v41  ;;  %v9120_v52 = vadd.f32 %v1318_v44, %v11580_v39 }
 0x245   : > { %10681 = vpow.bf16 %v1446_v42  ;;  %v9121_v49 = vadd.f32 %v1320_v46, %v11577_v37  ;;  %v1322_v50 = vpop.f32.mrb[27].mxu0  ;;  %1706 = vmatprep.mubr.bf16.mxu1 %v1502_v47 }
 0x246   : > { %10683 = vpow.bf16 %v1449_v45  ;;  %v9122_v53 = vadd.f32 %v1322_v50, %v11580_v39  ;;  %1707 = vmatmul.mubr.bf16.gmra.mrb[12].mxu1 %v1501_v51 }
 0x247   : > { %v11705_v54 = vpack.c.bf16 %v9121_v49, %v9119_v48 }
 0x248   : > { %v10678_v43 = vpop.eup %10677  ;;  %v11707_v55 = vpack.c.bf16 %v9122_v53, %v9120_v52 }
 0x249   : > { %v10680_v56 = vpop.eup %10679  ;;  %v1407_v57 = vmin.bf16 %v14552_v6, %v11705_v54  ;;  %v1483_v58 = vsub.bf16 %v10678_v43, %v14548_v17  ;;  %vm1387_vm13 = vcmp.gt.bf16.partialorder %v11705_v54, 0 }
 0x24a   : > { %v1408_v40 = vmin.bf16 %v14552_v6, %v11707_v55  ;;  %v1326_v59 = vpop.f32.mrb[28].mxu0  ;;  %v1484_v60 = vsub.bf16 %v10680_v56, %v14548_v17  ;;  %vm1388_vm12 = vcmp.gt.bf16.partialorder %v11707_v55, 0 }
 0x24b   : > { %v1452_v63 = vmul.bf16 1069105081, %v1407_v57  ;;  %v1328_v0 = vpop.f32.mrb[29].mxu0  ;;  %v9123_v61 = vadd.f32 %v1326_v59, %v11577_v37  ;;  %v1503_v8 = vsel %vm1383_vm9, %v11654_v1, %v1483_v58 }
 0x24c   : > { %v1455_v62 = vmul.bf16 1069105081, %v1408_v40  ;;  %v1330_v2 = vpop.f32.mrb[30].mxu0  ;;  %v1504_v3 = vsel %vm1384_vm8, %v11659_v4, %v1484_v60  ;;  %v9124_v9 = vadd.f32 %v1328_v0, %v11580_v39 }
 0x24d   : > { %10685 = vpow.bf16 %v1452_v63  ;;  %v9125_v5 = vadd.f32 %v1330_v2, %v11577_v37  ;;  %v1332_v7 = vpop.f32.mrb[31].mxu0  ;;  %1714 = vmatprep.mubr.bf16.mxu1 %v1504_v3 }
 0x24e   : > { %10687 = vpow.bf16 %v1455_v62  ;;  %v9126_v10 = vadd.f32 %v1332_v7, %v11580_v39  ;;  %1715 = vmatmul.mubr.bf16.gmra.mrb[16].mxu1 %v1503_v8 }
 0x24f   : > { %v11723_v11 = vpack.c.bf16 %v9125_v5, %v9123_v61 }
 0x250   : > { %v10682_v4 = vpop.eup %10681  ;;  %v1370_v13 = vpack.c.bf16 %v9126_v10, %v9124_v9 }
 0x251   : > { %v10684_v15 = vpop.eup %10683  ;;  %v1409_v16 = vmin.bf16 %v14552_v6, %v11723_v11  ;;  %v1485_v18 = vsub.bf16 %v10682_v4, %v14548_v17  ;;  %vm1389_vm15 = vcmp.gt.bf16.partialorder %v11723_v11, 0 }
 0x252   : > { %v1410_v19 = vmin.bf16 %v14552_v6, %v1370_v13  ;;  %v1336_v20 = vpop.f32.mrb[32].mxu0  ;;  %v1486_v1 = vsub.bf16 %v10684_v15, %v14548_v17  ;;  %vm1390_vm14 = vcmp.gt.bf16.partialorder %v1370_v13, 0 }
 0x253   : > { %v1458_v21 = vmul.bf16 1069105081, %v1409_v16  ;;  %v1338_v22 = vpop.f32.mrb[33].mxu0  ;;  %v9127_v26 = vadd.f32 %v1336_v20, %v11577_v37  ;;  %v1505_v29 = vsel %vm1385_vm11, %v11684_v27, %v1485_v18  ;;  %v9959_v18 = vld [vmem:[%s14531_s5 + $0xc0] ss:$16 sps:$4 sm:$0xff]  }
 0x254   : > { %v1461_v23 = vmul.bf16 1069105081, %v1410_v19  ;;  %v1340_v24 = vpop.f32.mrb[34].mxu0  ;;  %v1506_v25 = vsel %vm1386_vm10, %v11689_v30, %v1486_v1  ;;  %v9128_v31 = vadd.f32 %v1338_v22, %v11580_v39  ;;  %v9961_v19 = vld [vmem:[%s14531_s5 + $0xc4] ss:$16 sps:$4 sm:$0xff]  }
 0x255   : > { %10689 = vpow.bf16 %v1458_v21  ;;  %v9129_v14 = vadd.f32 %v1340_v24, %v11577_v37  ;;  %v1342_v28 = vpop.f32.mrb[35].mxu0  ;;  %1722 = vmatprep.mubr.bf16.mxu1 %v1506_v25  ;;  %2069 = vmatprep.subr.bf16.mxu1 %v9961_v19  ;;  %v9962_v20 = vld [vmem:[%s14531_s5 + $0xe0] ss:$16 sps:$4 sm:$0xff]   ;;  %v9964_v1 = vld [vmem:[%s14531_s5 + $0xe4] ss:$16 sps:$4 sm:$0xff]  }
 0x256   : > { %10691 = vpow.bf16 %v1461_v23  ;;  %v9130_v12 = vadd.f32 %v1342_v28, %v11580_v39  ;;  %1723 = vmatmul.mubr.bf16.gmra.mrb[20].mxu1 %v1505_v29  ;;  %v9967_v21 = vld [vmem:[%s14531_s5 + $0xc] ss:$16 sps:$4 sm:$0xff]  }
 0x257   : > { %v1371_v32 = vpack.c.bf16 %v9129_v14, %v9127_v26  ;;  %2070 = vmatpush1.bf16.msra.mxu1 %v9959_v18  ;;  %v11779_v26 = vld [vmem:[%s14530_s4] ss:$0 sm:$0xff] }
 0x258   : > { %v10686_v35 = vpop.eup %10685  ;;  %v1372_v30 = vpack.c.bf16 %v9130_v12, %v9128_v31  ;;  %2071 = vmatprep.subr.bf16.mxu1 %v9964_v1  ;;  %v9971_v1 = vld [vmem:[%s14531_s5 + $0x48] ss:$16 sps:$4 sm:$0xff]  }
 0x259   : > { %v10688_v38 = vpop.eup %10687  ;;  %v1411_v41 = vmin.bf16 %v14552_v6, %v1371_v32  ;;  %v1487_v42 = vsub.bf16 %v10686_v35, %v14548_v17  ;;  %vm1391_vm1 = vcmp.gt.bf16.partialorder %v1371_v32, 0 }
 0x25a   : > { %v1412_v44 = vmin.bf16 %v14552_v6, %v1372_v30  ;;  %v1346_v45 = vpop.f32.mrb[36].mxu0  ;;  %v1488_v46 = vsub.bf16 %v10688_v38, %v14548_v17  ;;  %vm1392_vm0 = vcmp.gt.bf16.partialorder %v1372_v30, 0 }
 0x25b   : > { %v1464_v27 = vmul.bf16 1069105081, %v1411_v41  ;;  %v1348_v47 = vpop.f32.mrb[37].mxu0  ;;  %v9131_v51 = vadd.f32 %v1346_v45, %v11577_v37  ;;  %v1507_v43 = vsel %vm1387_vm13, %v11705_v54, %v1487_v42  ;;  %2072 = vmatpush1.bf16.msra.mxu1 %v9962_v20 }
 0x25c   : > { %v1467_v48 = vmul.bf16 1069105081, %v1412_v44  ;;  %v1350_v49 = vpop.f32.mrb[38].mxu0  ;;  %v1508_v50 = vsel %vm1388_vm12, %v11707_v55, %v1488_v46  ;;  %v9132_v56 = vadd.f32 %v1348_v47, %v11580_v39  ;;  %2190 = vmatprep.subr.bf16.mxu1 %v9967_v21 }
 0x25d   : > { %10693 = vpow.bf16 %v1464_v27  ;;  %v9133_v52 = vadd.f32 %v1350_v49, %v11577_v37  ;;  %v1352_v53 = vpop.f32.mrb[39].mxu0  ;;  %1730 = vmatprep.mubr.bf16.mxu1 %v1508_v50 }
 0x25e   : > { %10695 = vpow.bf16 %v1467_v48  ;;  %v9134_v57 = vadd.f32 %v1352_v53, %v11580_v39  ;;  %1731 = vmatmul.mubr.bf16.gmra.mrb[24].mxu1 %v1507_v43 }
 0x25f   : > { %v1373_v58 = vpack.c.bf16 %v9133_v52, %v9131_v51 }
 0x260   : > { %v10690_v40 = vpop.eup %10689  ;;  %v1374_v55 = vpack.c.bf16 %v9134_v57, %v9132_v56 }
 0x261   : > { %v10692_v59 = vpop.eup %10691  ;;  %v1413_v60 = vmin.bf16 %v14552_v6, %v1373_v58  ;;  %v1489_v63 = vsub.bf16 %v10690_v40, %v14548_v17  ;;  %vm1393_vm3 = vcmp.gt.bf16.partialorder %v1373_v58, 0 }
 0x262   : > { %v1414_v37 = vmin.bf16 %v14552_v6, %v1374_v55  ;;  %v1490_v0 = vsub.bf16 %v10692_v59, %v14548_v17  ;;  %vm1394_vm2 = vcmp.gt.bf16.partialorder %v1374_v55, 0 }
 0x263   : > { %v1470_v62 = vmul.bf16 1069105081, %v1413_v60  ;;  %v1509_v39 = vsel %vm1389_vm15, %v11723_v11, %v1489_v63 }
 0x264   : > { %v1473_v54 = vmul.bf16 1069105081, %v1414_v37  ;;  %v1510_v2 = vsel %vm1390_vm14, %v1370_v13, %v1490_v0 }
 0x265   : > { %10697 = vpow.bf16 %v1470_v62  ;;  %1738 = vmatprep.mubr.bf16.mxu1 %v1510_v2  ;;  %v9965_v62 = vld [vmem:[%s14531_s5 + $0x8] ss:$16 sps:$4 sm:$0xff]  }
 0x266   : > { %10699 = vpow.bf16 %v1473_v54  ;;  %1739 = vmatmul.mubr.bf16.gmra.mrb[28].mxu1 %v1509_v39  ;;  %v9970_v39 = vld [vmem:[%s14531_s5 + $0x2c] ss:$16 sps:$4 sm:$0xff]  }
 0x268   : > { %v10694_v3 = vpop.eup %10693 }
 0x269   : > { %v10696_v61 = vpop.eup %10695  ;;  %v1491_v5 = vsub.bf16 %v10694_v3, %v14548_v17 }
 0x26a   : > { %v1492_v7 = vsub.bf16 %v10696_v61, %v14548_v17 }
 0x26b   : > { %v1511_v9 = vsel %vm1391_vm1, %v1371_v32, %v1491_v5 }
 0x26c   : > { %v1512_v8 = vsel %vm1392_vm0, %v1372_v30, %v1492_v7 }
 0x26d   : > { %1746 = vmatprep.mubr.bf16.mxu1 %v1512_v8 }
 0x26e   : > { %1747 = vmatmul.mubr.bf16.gmra.mrb[32].mxu1 %v1511_v9  ;;  %v9968_v9 = vld [vmem:[%s14531_s5 + $0x28] ss:$16 sps:$4 sm:$0xff]  }
 0x270   : > { %v10698_v10 = vpop.eup %10697 }
 0x271   : > { %v10700_v4 = vpop.eup %10699  ;;  %v1493_v13 = vsub.bf16 %v10698_v10, %v14548_v17  ;;  %v9973_v10 = vld [vmem:[%s14531_s5 + $0x4c] ss:$16 sps:$4 sm:$0xff]  }
 0x272   : > { %v1494_v11 = vsub.bf16 %v10700_v4, %v14548_v17 }
 0x273   : > { %v1513_v16 = vsel %vm1393_vm3, %v1373_v58, %v1493_v13 }
 0x274   : > { %v1514_v15 = vsel %vm1394_vm2, %v1374_v55, %v1494_v11 }
 0x275   : > { %1754 = vmatprep.mubr.bf16.mxu1 %v1514_v15 }
 0x276   : > { %1755 = vmatmul.mubr.bf16.gmra.mrb[36].mxu1 %v1513_v16 }
 0x277   : > { %2089 = vmatprep.mubr.bf16.mxu1 %v14552_v6 }
 0x301   : > { %v9003_v22 = vpop.f32.mrb[0].mxu1 }
 0x302   : > { %v9004_v23 = vpop.f32.mrb[1].mxu1 }
 0x303   : > { %v9005_v24 = vadd.f32 %v9004_v23, %v9003_v22  ;;  %v9006_v25 = vpop.f32.mrb[2].mxu1  ;;  %v9976_v22 = vld [vmem:[%s14531_s5 + $0x6c] ss:$16 sps:$4 sm:$0xff]  }
 0x304   : > { %v9007_v14 = vpop.f32.mrb[3].mxu1 }
 0x305   : > { %v9008_v28 = vadd.f32 %v9007_v14, %v9006_v25  ;;  %v1685_v29 = vadd.f32 %v9005_v24, %v11779_v26 }
 0x307   : > { %v1688_v31 = vadd.f32 %v9008_v28, %v11779_v26 }
 0x309   : > { %v1763_v12 = vpack.c.bf16 %v1688_v31, %v1685_v29  ;;  %v9009_v32 = vpop.f32.mrb[4].mxu1  ;;  %v9974_v29 = vld [vmem:[%s14531_s5 + $0x68] ss:$16 sps:$4 sm:$0xff]   ;;  %v9979_v31 = vld [vmem:[%s14531_s5 + $0x8c] ss:$16 sps:$4 sm:$0xff]  }
 0x30a   : > { %v9010_v35 = vpop.f32.mrb[5].mxu1 }
 0x30b   : > { %v1783_v30 = vmin.bf16 %v14552_v6, %v1763_v12  ;;  %v9011_v38 = vadd.f32 %v9010_v35, %v9009_v32  ;;  %v9012_v41 = vpop.f32.mrb[6].mxu1  ;;  %vm1773_vm4 = vcmp.gt.bf16.partialorder %v1763_v12, 0 }
 0x30c   : > { %v9013_v42 = vpop.f32.mrb[7].mxu1 }
 0x30d   : > { %v1794_v44 = vmul.bf16 1069105081, %v1783_v30  ;;  %v9014_v45 = vadd.f32 %v9013_v42, %v9012_v41  ;;  %v1693_v46 = vadd.f32 %v9011_v38, %v11779_v26 }
 0x30f   : > { %10701 = vpow.bf16 %v1794_v44  ;;  %v1696_v27 = vadd.f32 %v9014_v45, %v11779_v26  ;;  %v9977_v45 = vld [vmem:[%s14531_s5 + $0x88] ss:$16 sps:$4 sm:$0xff]  }
 0x311   : > { %v9015_v47 = vpop.f32.mrb[8].mxu1  ;;  %v1764_v48 = vpack.c.bf16 %v1696_v27, %v1693_v46  ;;  %v9982_v27 = vld [vmem:[%s14531_s5 + $0xac] ss:$16 sps:$4 sm:$0xff]  }
 0x312   : > { %v9016_v49 = vpop.f32.mrb[9].mxu1 }
 0x313   : > { %v9017_v50 = vadd.f32 %v9016_v49, %v9015_v47  ;;  %v9018_v51 = vpop.f32.mrb[10].mxu1  ;;  %v1784_v52 = vmin.bf16 %v14552_v6, %v1764_v48  ;;  %vm1774_vm5 = vcmp.gt.bf16.partialorder %v1764_v48, 0 }
 0x314   : > { %v9019_v53 = vpop.f32.mrb[11].mxu1 }
 0x315   : > { %v9020_v43 = vadd.f32 %v9019_v53, %v9018_v51  ;;  %v1797_v56 = vmul.bf16 1069105081, %v1784_v52  ;;  %v1701_v57 = vadd.f32 %v9017_v50, %v11779_v26  ;;  %v9980_v52 = vld [vmem:[%s14531_s5 + $0xa8] ss:$16 sps:$4 sm:$0xff]   ;;  %v9985_v53 = vld [vmem:[%s14531_s5 + $0xcc] ss:$16 sps:$4 sm:$0xff]  }
 0x317   : > { %v1704_v58 = vadd.f32 %v9020_v43, %v11779_v26  ;;  %10703 = vpow.bf16 %v1797_v56 }
 0x319   : > { %v9021_v40 = vpop.f32.mrb[12].mxu1  ;;  %v11789_v55 = vpack.c.bf16 %v1704_v58, %v1701_v57 }
 0x31a   : > { %v10702_v59 = vpop.eup %10701  ;;  %v9022_v60 = vpop.f32.mrb[13].mxu1 }
 0x31b   : > { %v9023_v63 = vadd.f32 %v9022_v60, %v9021_v40  ;;  %v9024_v37 = vpop.f32.mrb[14].mxu1  ;;  %v1823_v0 = vsub.bf16 %v10702_v59, %v14548_v17  ;;  %v1785_v54 = vmin.bf16 %v14552_v6, %v11789_v55  ;;  %vm1775_vm6 = vcmp.gt.bf16.partialorder %v11789_v55, 0 }
 0x31c   : > { %v9025_v2 = vpop.f32.mrb[15].mxu1 }
 0x31d   : > { %v9026_v3 = vadd.f32 %v9025_v2, %v9024_v37  ;;  %v11800_v61 = vsel %vm1773_vm4, %v1763_v12, %v1823_v0  ;;  %v1800_v5 = vmul.bf16 1069105081, %v1785_v54  ;;  %v1709_v7 = vadd.f32 %v9023_v63, %v11779_v26  ;;  %v9983_v63 = vld [vmem:[%s14531_s5 + $0xc8] ss:$16 sps:$4 sm:$0xff]   ;;  %v9988_v0 = vld [vmem:[%s14531_s5 + $0xec] ss:$16 sps:$4 sm:$0xff]  }
 0x31e   : > { %2090 = vmatmul.mubr.bf16.vlgmr.msra.gmra.mrb[40].mxu1 %v11800_v61 }
 0x31f   : > { %v1712_v8 = vadd.f32 %v9026_v3, %v11779_v26  ;;  %2191 = vmatpush1.bf16.msra.mxu1 %v9965_v62  ;;  %2099 = vmatprep.mubr.bf16.mxu1 %v14552_v6  ;;  %10705 = vpow.bf16 %v1800_v5  ;;  %v9991_v3 = vld [vmem:[%s14533_s7 + $0x4] ss:$16 sps:$4 sm:$0xff]  }
 0x320   : > { %2192 = vmatprep.subr.bf16.mxu1 %v9970_v39  ;;  %v9989_v39 = vld [vmem:[%s14533_s7] ss:$16 sps:$4 sm:$0xff]   ;;  %3433 = vmatprep.subr.bf16.mxu0 %v9991_v3 }
 0x321   : > { %v11812_v4 = vpack.c.bf16 %v1712_v8, %v1709_v7  ;;  %v9027_v13 = vpop.f32.mrb[16].mxu1  ;;  %v9986_v8 = vld [vmem:[%s14531_s5 + $0xe8] ss:$16 sps:$4 sm:$0xff]   ;;  %3434 = vmatpush1.bf16.msra.mxu0 %v9989_v39 }
 0x322   : > { %v10704_v11 = vpop.eup %10703  ;;  %v9028_v15 = vpop.f32.mrb[17].mxu1 }
 0x323   : > { %v1786_v16 = vmin.bf16 %v14552_v6, %v11812_v4  ;;  %v9029_v18 = vadd.f32 %v9028_v15, %v9027_v13  ;;  %v9030_v19 = vpop.f32.mrb[18].mxu1  ;;  %v1824_v20 = vsub.bf16 %v10704_v11, %v14548_v17  ;;  %2193 = vmatpush1.bf16.msra.mxu1 %v9968_v9  ;;  %vm1776_vm7 = vcmp.gt.bf16.partialorder %v11812_v4, 0  ;;  %v9994_v9 = vld [vmem:[%s14533_s7 + $0x24] ss:$16 sps:$4 sm:$0xff]   ;;  %v9992_v13 = vld [vmem:[%s14533_s7 + $0x20] ss:$16 sps:$4 sm:$0xff]  }
 0x324   : > { %v9031_v21 = vpop.f32.mrb[19].mxu1  ;;  %2194 = vmatprep.subr.bf16.mxu1 %v9973_v10  ;;  %v10003_v11 = vld [vmem:[%s14533_s7 + $0xc] ss:$16 sps:$4 sm:$0xff]   ;;  %3435 = vmatprep.subr.bf16.mxu0 %v9994_v9 }
 0x325   : > { %v1803_v23 = vmul.bf16 1069105081, %v1786_v16  ;;  %v9032_v24 = vadd.f32 %v9031_v21, %v9030_v19  ;;  %v11823_v25 = vsel %vm1774_vm5, %v1764_v48, %v1824_v20  ;;  %v1717_v14 = vadd.f32 %v9029_v18, %v11779_v26  ;;  %v9997_v18 = vld [vmem:[%s14533_s7 + $0x44] ss:$16 sps:$4 sm:$0xff]   ;;  %3436 = vmatpush1.bf16.msra.mxu0 %v9992_v13  ;;  %v10025_v13 = vld [vmem:[%s14533_s7 + $0xe0] ss:$16 sps:$4 sm:$0xff]  }
 0x326   : > { %2100 = vmatmul.mubr.bf16.gmra.mrb[44].mxu1 %v11823_v25  ;;  %3437 = vmatprep.subr.bf16.mxu0 %v9997_v18 }
 0x327   : > { %10707 = vpow.bf16 %v1803_v23  ;;  %v1720_v28 = vadd.f32 %v9032_v24, %v11779_v26  ;;  %2109 = vmatprep.mubr.bf16.mxu1 %v14552_v6  ;;  %2195 = vmatpush1.bf16.msra.mxu1 %v9971_v1 }
 0x328   : > { %2196 = vmatprep.subr.bf16.mxu1 %v9976_v22 }
 0x329   : > { %v11835_v12 = vpack.c.bf16 %v1720_v28, %v1717_v14  ;;  %v9033_v32 = vpop.f32.mrb[20].mxu1  ;;  %v9995_v28 = vld [vmem:[%s14533_s7 + $0x40] ss:$16 sps:$4 sm:$0xff]  }
 0x32a   : > { %v10706_v35 = vpop.eup %10705  ;;  %v9034_v30 = vpop.f32.mrb[21].mxu1  ;;  %3438 = vmatpush1.bf16.msra.mxu0 %v9995_v28 }
 0x32b   : > { %v1787_v38 = vmin.bf16 %v14552_v6, %v11835_v12  ;;  %v9035_v41 = vadd.f32 %v9034_v30, %v9033_v32  ;;  %v9036_v42 = vpop.f32.mrb[22].mxu1  ;;  %v1825_v44 = vsub.bf16 %v10706_v35, %v14548_v17  ;;  %2197 = vmatpush1.bf16.msra.mxu1 %v9974_v29  ;;  %vm1777_vm8 = vcmp.gt.bf16.partialorder %v11835_v12, 0  ;;  %v10000_v29 = vld [vmem:[%s14533_s7 + $0x64] ss:$16 sps:$4 sm:$0xff]   ;;  %v9998_v30 = vld [vmem:[%s14533_s7 + $0x60] ss:$16 sps:$4 sm:$0xff]  }
 0x32c   : > { %v9037_v46 = vpop.f32.mrb[23].mxu1  ;;  %2198 = vmatprep.subr.bf16.mxu1 %v9979_v31  ;;  %3439 = vmatprep.subr.bf16.mxu0 %v10000_v29  ;;  %v10046_v29 = vld [vmem:[%s14533_s7 + $0x140] ss:$16 sps:$4 sm:$0xff]  }
 0x32d   : > { %v1806_v47 = vmul.bf16 1069105081, %v1787_v38  ;;  %v9038_v48 = vadd.f32 %v9037_v46, %v9036_v42  ;;  %v11848_v49 = vsel %vm1775_vm6, %v11789_v55, %v1825_v44  ;;  %v1725_v50 = vadd.f32 %v9035_v41, %v11779_v26  ;;  %v10006_v42 = vld [vmem:[%s14533_s7 + $0x84] ss:$16 sps:$4 sm:$0xff]  }
 0x32e   : > { %2110 = vmatmul.mubr.bf16.gmra.mrb[48].mxu1 %v11848_v49  ;;  %3440 = vmatpush1.bf16.msra.mxu0 %v9998_v30  ;;  %v10009_v30 = vld [vmem:[%s14533_s7 + $0x2c] ss:$16 sps:$4 sm:$0xff]  }
 0x32f   : > { %10709 = vpow.bf16 %v1806_v47  ;;  %v1728_v51 = vadd.f32 %v9038_v48, %v11779_v26  ;;  %2119 = vmatprep.mubr.bf16.mxu1 %v14552_v6  ;;  %2199 = vmatpush1.bf16.msra.mxu1 %v9977_v45 }
 0x330   : > { %2200 = vmatprep.subr.bf16.mxu1 %v9982_v27  ;;  %3441 = vmatprep.subr.bf16.mxu0 %v10006_v42  ;;  %v10010_v42 = vld [vmem:[%s14533_s7 + $0x48] ss:$16 sps:$4 sm:$0xff]  }
 0x331   : > { %v11860_v43 = vpack.c.bf16 %v1728_v51, %v1725_v50  ;;  %v9039_v56 = vpop.f32.mrb[24].mxu1 }
 0x332   : > { %v10708_v57 = vpop.eup %10707  ;;  %v9040_v58 = vpop.f32.mrb[25].mxu1 }
 0x333   : > { %v1788_v40 = vmin.bf16 %v14552_v6, %v11860_v43  ;;  %v9041_v55 = vadd.f32 %v9040_v58, %v9039_v56  ;;  %v9042_v59 = vpop.f32.mrb[26].mxu1  ;;  %v1826_v60 = vsub.bf16 %v10708_v57, %v14548_v17  ;;  %2201 = vmatpush1.bf16.msra.mxu1 %v9980_v52  ;;  %vm1778_vm9 = vcmp.gt.bf16.partialorder %v11860_v43, 0  ;;  %v10004_v52 = vld [vmem:[%s14533_s7 + $0x80] ss:$16 sps:$4 sm:$0xff]  }
 0x334   : > { %v9043_v37 = vpop.f32.mrb[27].mxu1  ;;  %2202 = vmatprep.subr.bf16.mxu1 %v9985_v53  ;;  %v10015_v53 = vld [vmem:[%s14533_s7 + $0xa4] ss:$16 sps:$4 sm:$0xff]   ;;  %3442 = vmatpush1.bf16.msra.mxu0 %v10004_v52  ;;  %v10028_v52 = vld [vmem:[%s14533_s7 + $0xa8] ss:$16 sps:$4 sm:$0xff]  }
 0x335   : > { %v1809_v62 = vmul.bf16 1069105081, %v1788_v40  ;;  %v9044_v54 = vadd.f32 %v9043_v37, %v9042_v59  ;;  %v11873_v2 = vsel %vm1776_vm7, %v11812_v4, %v1826_v60  ;;  %v1733_v5 = vadd.f32 %v9041_v55, %v11779_v26  ;;  %v10013_v40 = vld [vmem:[%s14533_s7 + $0xa0] ss:$16 sps:$4 sm:$0xff]   ;;  %3443 = vmatprep.subr.bf16.mxu0 %v10015_v53  ;;  %v10021_v60 = vld [vmem:[%s14533_s7 + $0xc4] ss:$16 sps:$4 sm:$0xff]  }
 0x336   : > { %2120 = vmatmul.mubr.bf16.gmra.mrb[52].mxu1 %v11873_v2  ;;  %v10069_v53 = vld [vmem:[%s14533_s7 + $0x1a4] ss:$16 sps:$4 sm:$0xff]  }
 0x337   : > { %10711 = vpow.bf16 %v1809_v62  ;;  %v1736_v7 = vadd.f32 %v9044_v54, %v11779_v26  ;;  %2129 = vmatprep.mubr.bf16.mxu1 %v14552_v6  ;;  %2203 = vmatpush1.bf16.msra.mxu1 %v9983_v63 }
 0x338   : > { %2204 = vmatprep.subr.bf16.mxu1 %v9988_v0  ;;  %3444 = vmatpush1.bf16.msra.mxu0 %v10013_v40  ;;  %v10073_v40 = vld [vmem:[%s14533_s7 + $0x1c0] ss:$16 sps:$4 sm:$0xff]  }
 0x339   : > { %v11891_v10 = vpack.c.bf16 %v1736_v7, %v1733_v5  ;;  %v9045_v4 = vpop.f32.mrb[28].mxu1  ;;  %v10019_v7 = vld [vmem:[%s14533_s7 + $0xc0] ss:$16 sps:$4 sm:$0xff]   ;;  %3445 = vmatprep.subr.bf16.mxu0 %v10021_v60  ;;  %v10045_v60 = vld [vmem:[%s14533_s7 + $0x10c] ss:$16 sps:$4 sm:$0xff]  }
 0x33a   : > { %v10710_v15 = vpop.eup %10709  ;;  %v9046_v16 = vpop.f32.mrb[29].mxu1 }
 0x33b   : > { %v1789_v19 = vmin.bf16 %v14552_v6, %v11891_v10  ;;  %v9047_v20 = vadd.f32 %v9046_v16, %v9045_v4  ;;  %v9048_v1 = vpop.f32.mrb[30].mxu1  ;;  %v1827_v21 = vsub.bf16 %v10710_v15, %v14548_v17  ;;  %2205 = vmatpush1.bf16.msra.mxu1 %v9986_v8  ;;  %vm1779_vm10 = vcmp.gt.bf16.partialorder %v11891_v10, 0  ;;  %v10027_v8 = vld [vmem:[%s14533_s7 + $0xe4] ss:$16 sps:$4 sm:$0xff]  }
 0x33c   : > { %v9049_v22 = vpop.f32.mrb[31].mxu1  ;;  %3699 = vmatprep.subr.bf16.mxu1 %v10003_v11  ;;  %3446 = vmatpush1.bf16.msra.mxu0 %v10019_v7  ;;  %v10033_v15 = vld [vmem:[%s14533_s7 + $0x104] ss:$16 sps:$4 sm:$0xff]   ;;  %v10066_v7 = vld [vmem:[%s14533_s7 + $0x18c] ss:$16 sps:$4 sm:$0xff]  }
 0x33d   : > { %v1812_v23 = vmul.bf16 1069105081, %v1789_v19  ;;  %v9050_v24 = vadd.f32 %v9049_v22, %v9048_v1  ;;  %v11907_v14 = vsel %vm1777_vm8, %v11835_v12, %v1827_v21  ;;  %v1741_v31 = vadd.f32 %v9047_v20, %v11779_v26  ;;  %3447 = vmatprep.subr.bf16.mxu0 %v10027_v8  ;;  %v10031_v20 = vld [vmem:[%s14533_s7 + $0x100] ss:$16 sps:$4 sm:$0xff]   ;;  %v10042_v1 = vld [vmem:[%s14533_s7 + $0x124] ss:$16 sps:$4 sm:$0xff]  }
 0x33e   : > { %2130 = vmatmul.mubr.bf16.gmra.mrb[56].mxu1 %v11907_v14  ;;  %v10040_v21 = vld [vmem:[%s14533_s7 + $0x120] ss:$16 sps:$4 sm:$0xff]   ;;  %v10064_v8 = vld [vmem:[%s14533_s7 + $0x188] ss:$16 sps:$4 sm:$0xff]  }
 0x33f   : > { %10713 = vpow.bf16 %v1812_v23  ;;  %v1744_v32 = vadd.f32 %v9050_v24, %v11779_v26  ;;  %2139 = vmatprep.mubr.bf16.mxu1 %v14552_v6  ;;  %v10048_v23 = vld [vmem:[%s14533_s7 + $0x144] ss:$16 sps:$4 sm:$0xff]  }
 0x340   : > { %3448 = vmatpush1.bf16.msra.mxu0 %v10025_v13  ;;  %v10082_v13 = vld [vmem:[%s14533_s7 + $0x1e8] ss:$16 sps:$4 sm:$0xff]  }
 0x341   : > { %v11919_v12 = vpack.c.bf16 %v1744_v32, %v1741_v31  ;;  %v9051_v35 = vpop.f32.mrb[32].mxu1  ;;  %3449 = vmatprep.subr.bf16.mxu0 %v10033_v15  ;;  %v12153_v15 = vld [vmem:[#allocation7] sm:$0xf] }
 0x342   : > { %v10712_v38 = vpop.eup %10711  ;;  %v9052_v41 = vpop.f32.mrb[33].mxu1 }
 0x343   : > { %v1790_v44 = vmin.bf16 %v14552_v6, %v11919_v12  ;;  %v9053_v45 = vadd.f32 %v9052_v41, %v9051_v35  ;;  %v9054_v46 = vpop.f32.mrb[34].mxu1  ;;  %v1828_v27 = vsub.bf16 %v10712_v38, %v14548_v17  ;;  %vm1780_vm11 = vcmp.gt.bf16.partialorder %v11919_v12, 0  ;;  %v10001_v35 = vld [vmem:[%s14533_s7 + $0x8] ss:$16 sps:$4 sm:$0xff]   ;;  %v10012_v41 = vld [vmem:[%s14533_s7 + $0x4c] ss:$16 sps:$4 sm:$0xff]  }
 0x344   : > { %v9055_v47 = vpop.f32.mrb[35].mxu1  ;;  %3450 = vmatpush1.bf16.msra.mxu0 %v10031_v20  ;;  %v10007_v38 = vld [vmem:[%s14533_s7 + $0x28] ss:$16 sps:$4 sm:$0xff]  }
 0x345   : > { %v1815_v48 = vmul.bf16 1069105081, %v1790_v44  ;;  %v9056_v50 = vadd.f32 %v9055_v47, %v9054_v46  ;;  %v11932_v51 = vsel %vm1778_vm9, %v11860_v43, %v1828_v27  ;;  %v1749_v56 = vadd.f32 %v9053_v45, %v11779_v26  ;;  %3451 = vmatprep.subr.bf16.mxu0 %v10042_v1  ;;  %v10016_v44 = vld [vmem:[%s14533_s7 + $0x68] ss:$16 sps:$4 sm:$0xff]   ;;  %v10054_v45 = vld [vmem:[%s14533_s7 + $0x164] ss:$16 sps:$4 sm:$0xff]  }
 0x346   : > { %2140 = vmatmul.mubr.bf16.gmra.mrb[60].mxu1 %v11932_v51  ;;  %v10024_v46 = vld [vmem:[%s14533_s7 + $0x8c] ss:$16 sps:$4 sm:$0xff]   ;;  %v10022_v27 = vld [vmem:[%s14533_s7 + $0x88] ss:$16 sps:$4 sm:$0xff]   ;;  %v10060_v47 = vld [vmem:[%s14533_s7 + $0x184] ss:$16 sps:$4 sm:$0xff]  }
 0x347   : > { %10715 = vpow.bf16 %v1815_v48  ;;  %v1752_v57 = vadd.f32 %v9056_v50, %v11779_v26  ;;  %2149 = vmatprep.mubr.bf16.mxu1 %v14552_v6  ;;  %v10030_v48 = vld [vmem:[%s14533_s7 + $0xac] ss:$16 sps:$4 sm:$0xff]   ;;  %v10058_v50 = vld [vmem:[%s14533_s7 + $0x180] ss:$16 sps:$4 sm:$0xff]  }
 0x348   : > { %3452 = vmatpush1.bf16.msra.mxu0 %v10040_v21 }
 0x349   : > { %v1771_v43 = vpack.c.bf16 %v1752_v57, %v1749_v56  ;;  %v9057_v58 = vpop.f32.mrb[36].mxu1  ;;  %3453 = vmatprep.subr.bf16.mxu0 %v10048_v23  ;;  %v10036_v56 = vld [vmem:[%s14533_s7 + $0xcc] ss:$16 sps:$4 sm:$0xff]   ;;  %v10034_v57 = vld [vmem:[%s14533_s7 + $0xc8] ss:$16 sps:$4 sm:$0xff]  }
 0x34a   : > { %v10714_v55 = vpop.eup %10713  ;;  %v9058_v59 = vpop.f32.mrb[37].mxu1 }
 0x34b   : > { %v1791_v63 = vmin.bf16 %v14552_v6, %v1771_v43  ;;  %v9059_v37 = vadd.f32 %v9058_v59, %v9057_v58  ;;  %v9060_v0 = vpop.f32.mrb[38].mxu1  ;;  %v1829_v62 = vsub.bf16 %v10714_v55, %v14548_v17  ;;  %vm1781_vm12 = vcmp.gt.bf16.partialorder %v1771_v43, 0  ;;  %v10039_v58 = vld [vmem:[%s14533_s7 + $0xec] ss:$16 sps:$4 sm:$0xff]   ;;  %v10037_v55 = vld [vmem:[%s14533_s7 + $0xe8] ss:$16 sps:$4 sm:$0xff]  }
 0x34c   : > { %v9061_v54 = vpop.f32.mrb[39].mxu1  ;;  %3454 = vmatpush1.bf16.msra.mxu0 %v10046_v29  ;;  %v10081_v59 = vld [vmem:[%s14533_s7 + $0x1e4] ss:$16 sps:$4 sm:$0xff]  }
 0x34d   : > { %v1818_v39 = vmul.bf16 1069105081, %v1791_v63  ;;  %v9062_v3 = vadd.f32 %v9061_v54, %v9060_v0  ;;  %v11954_v5 = vsel %vm1779_vm10, %v11891_v10, %v1829_v62  ;;  %v1757_v9 = vadd.f32 %v9059_v37, %v11779_v26  ;;  %3455 = vmatprep.subr.bf16.mxu0 %v10054_v45  ;;  %v10043_v63 = vld [vmem:[%s14533_s7 + $0x108] ss:$16 sps:$4 sm:$0xff]   ;;  %v10051_v37 = vld [vmem:[%s14533_s7 + $0x12c] ss:$16 sps:$4 sm:$0xff]  }
 0x34e   : > { %2150 = vmatmul.mubr.bf16.gmra.mrb[64].mxu1 %v11954_v5  ;;  %v10049_v0 = vld [vmem:[%s14533_s7 + $0x128] ss:$16 sps:$4 sm:$0xff]   ;;  %v10057_v62 = vld [vmem:[%s14533_s7 + $0x14c] ss:$16 sps:$4 sm:$0xff]  }
 0x34f   : > { %10717 = vpow.bf16 %v1818_v39  ;;  %v1760_v4 = vadd.f32 %v9062_v3, %v11779_v26  ;;  %2159 = vmatprep.mubr.bf16.mxu1 %v14552_v6  ;;  %v10055_v54 = vld [vmem:[%s14533_s7 + $0x148] ss:$16 sps:$4 sm:$0xff]   ;;  %v10087_v39 = vld [vmem:[%s14533_s7 + $0x204] ss:$16 sps:$4 sm:$0xff]  }
 0x350   : > { %v10061_v3 = vld [vmem:[%s14533_s7 + $0x168] ss:$16 sps:$4 sm:$0xff]  }
 0x351   : > { %v1772_v10 = vpack.c.bf16 %v1760_v4, %v1757_v9  ;;  %v10070_v9 = vld [vmem:[%s14533_s7 + $0x1a8] ss:$16 sps:$4 sm:$0xff]   ;;  %v10078_v4 = vld [vmem:[%s14533_s7 + $0x1cc] ss:$16 sps:$4 sm:$0xff]  }
 0x352   : > { %v10716_v11 = vpop.eup %10715 }
 0x353   : > { %v1792_v16 = vmin.bf16 %v14552_v6, %v1772_v10  ;;  %v1830_v18 = vsub.bf16 %v10716_v11, %v14548_v17  ;;  %vm1782_vm13 = vcmp.gt.bf16.partialorder %v1772_v10, 0  ;;  %v10099_v11 = vld [vmem:[%s14533_s7 + $0x20c] ss:$16 sps:$4 sm:$0xff]  }
 0x355   : > { %v1821_v26 = vmul.bf16 1069105081, %v1792_v16  ;;  %v11976_v19 = vsel %vm1780_vm11, %v11919_v12, %v1830_v18  ;;  %v12157_v16 = vrot.slane %v12153_v15, %v11571_v34 }
 0x356   : > { %2160 = vmatmul.mubr.bf16.gmra.mrb[68].mxu1 %v11976_v19 }
 0x357   : > { %10719 = vpow.bf16 %v1821_v26  ;;  %2169 = vmatprep.mubr.bf16.mxu1 %v14552_v6  ;;  %v12161_v26 = vrot.slane %v12153_v15, %v11574_v36 }
 0x35a   : > { %v10718_v22 = vpop.eup %10717 }
 0x35b   : > { %v1831_v24 = vsub.bf16 %v10718_v22, %v14548_v17 }
 0x35d   : > { %v11993_v28 = vsel %vm1781_vm12, %v1771_v43, %v1831_v24  ;;  %v10075_v43 = vld [vmem:[%s14533_s7 + $0x1c4] ss:$16 sps:$4 sm:$0xff]  }
 0x35e   : > { %2170 = vmatmul.mubr.bf16.gmra.mrb[72].mxu1 %v11993_v28 }
 0x35f   : > { %2179 = vmatprep.mubr.bf16.mxu1 %v14552_v6 }
 0x362   : > { %v10720_v31 = vpop.eup %10719 }
 0x363   : > { %v1832_v32 = vsub.bf16 %v10720_v31, %v14548_v17 }
 0x365   : > { %v12001_v12 = vsel %vm1782_vm13, %v1772_v10, %v1832_v32  ;;  %v10076_v10 = vld [vmem:[%s14533_s7 + $0x1c8] ss:$16 sps:$4 sm:$0xff]  }
 0x366   : > { %2180 = vmatmul.mubr.bf16.gmra.mrb[76].mxu1 %v12001_v12 }
 0x367   : > { %2222 = vmatprep.mubr.bf16.mxu1 %v14552_v6 }
 0x36e   : > { %2223 = vmatmul.mubr.bf16.vlgmr.msra.gmra.mrb[80].mxu1 %v11800_v61  ;;  %v10018_v61 = vld [vmem:[%s14533_s7 + $0x6c] ss:$16 sps:$4 sm:$0xff]  }
 0x36f   : > { %2232 = vmatprep.mubr.bf16.mxu1 %v14552_v6  ;;  %3700 = vmatpush1.bf16.msra.mxu1 %v10001_v35 }
 0x370   : > { %3701 = vmatprep.subr.bf16.mxu1 %v10009_v30 }
 0x373   : > { %3702 = vmatpush1.bf16.msra.mxu1 %v10007_v38 }
 0x374   : > { %3703 = vmatprep.subr.bf16.mxu1 %v10012_v41 }
 0x376   : > { %2233 = vmatmul.mubr.bf16.gmra.mrb[84].mxu1 %v11823_v25  ;;  %v10052_v25 = vld [vmem:[%s14533_s7 + $0x160] ss:$16 sps:$4 sm:$0xff]  }
 0x377   : > { %2242 = vmatprep.mubr.bf16.mxu1 %v14552_v6  ;;  %3704 = vmatpush1.bf16.msra.mxu1 %v10010_v42 }
 0x378   : > { %3705 = vmatprep.subr.bf16.mxu1 %v10018_v61  ;;  %3456 = vmatpush1.bf16.msra.mxu0 %v10052_v25 }
 0x379   : > { %3457 = vmatprep.subr.bf16.mxu0 %v10060_v47 }
 0x37b   : > { %3706 = vmatpush1.bf16.msra.mxu1 %v10016_v44 }
 0x37c   : > { %3707 = vmatprep.subr.bf16.mxu1 %v10024_v46  ;;  %3458 = vmatpush1.bf16.msra.mxu0 %v10058_v50 }
 0x37d   : > { %3459 = vmatprep.subr.bf16.mxu0 %v10069_v53 }
 0x37e   : > { %2243 = vmatmul.mubr.bf16.gmra.mrb[88].mxu1 %v11848_v49  ;;  %v10067_v49 = vld [vmem:[%s14533_s7 + $0x1a0] ss:$16 sps:$4 sm:$0xff]  }
 0x37f   : > { %2252 = vmatprep.mubr.bf16.mxu1 %v14552_v6  ;;  %3708 = vmatpush1.bf16.msra.mxu1 %v10022_v27 }
 0x380   : > { %3709 = vmatprep.subr.bf16.mxu1 %v10030_v48  ;;  %3460 = vmatpush1.bf16.msra.mxu0 %v10067_v49 }
 0x381   : > { %3461 = vmatprep.subr.bf16.mxu0 %v10075_v43 }
 0x383   : > { %3710 = vmatpush1.bf16.msra.mxu1 %v10028_v52 }
 0x384   : > { %3711 = vmatprep.subr.bf16.mxu1 %v10036_v56  ;;  %3462 = vmatpush1.bf16.msra.mxu0 %v10073_v40 }
 0x385   : > { %3463 = vmatprep.subr.bf16.mxu0 %v10081_v59 }
 0x386   : > { %2253 = vmatmul.mubr.bf16.gmra.mrb[92].mxu1 %v11873_v2  ;;  %v10079_v2 = vld [vmem:[%s14533_s7 + $0x1e0] ss:$16 sps:$4 sm:$0xff]  }
 0x387   : > { %2262 = vmatprep.mubr.bf16.mxu1 %v14552_v6  ;;  %3712 = vmatpush1.bf16.msra.mxu1 %v10034_v57 }
 0x388   : > { %3713 = vmatprep.subr.bf16.mxu1 %v10039_v58  ;;  %3464 = vmatpush1.bf16.msra.mxu0 %v10079_v2 }
 0x389   : > { %3566 = vmatprep.subr.bf16.mxu0 %v10087_v39  ;;  %v10085_v39 = vld [vmem:[%s14533_s7 + $0x200] ss:$16 sps:$4 sm:$0xff]  }
 0x38b   : > { %3714 = vmatpush1.bf16.msra.mxu1 %v10037_v55 }
 0x38c   : > { %3715 = vmatprep.subr.bf16.mxu1 %v10045_v60 }
 0x38e   : > { %2263 = vmatmul.mubr.bf16.gmra.mrb[96].mxu1 %v11907_v14  ;;  %v10063_v14 = vld [vmem:[%s14533_s7 + $0x16c] ss:$16 sps:$4 sm:$0xff]  }
 0x38f   : > { %2272 = vmatprep.mubr.bf16.mxu1 %v14552_v6  ;;  %3716 = vmatpush1.bf16.msra.mxu1 %v10043_v63 }
 0x390   : > { %3717 = vmatprep.subr.bf16.mxu1 %v10051_v37 }
 0x393   : > { %3718 = vmatpush1.bf16.msra.mxu1 %v10049_v0 }
 0x394   : > { %3719 = vmatprep.subr.bf16.mxu1 %v10057_v62 }
 0x396   : > { %2273 = vmatmul.mubr.bf16.gmra.mrb[100].mxu1 %v11932_v51  ;;  %v10072_v51 = vld [vmem:[%s14533_s7 + $0x1ac] ss:$16 sps:$4 sm:$0xff]  }
 0x397   : > { %2282 = vmatprep.mubr.bf16.mxu1 %v14552_v6  ;;  %3720 = vmatpush1.bf16.msra.mxu1 %v10055_v54 }
 0x398   : > { %3721 = vmatprep.subr.bf16.mxu1 %v10063_v14 }
 0x39b   : > { %3722 = vmatpush1.bf16.msra.mxu1 %v10061_v3  ;;  %v10090_v3 = vld [vmem:[%s14533_s7 + $0x224] ss:$16 sps:$4 sm:$0xff]  }
 0x39c   : > { %3723 = vmatprep.subr.bf16.mxu1 %v10066_v7 }
 0x39e   : > { %2283 = vmatmul.mubr.bf16.gmra.mrb[104].mxu1 %v11954_v5  ;;  %v10084_v5 = vld [vmem:[%s14533_s7 + $0x1ec] ss:$16 sps:$4 sm:$0xff]  }
 0x39f   : > { %2292 = vmatprep.mubr.bf16.mxu1 %v14552_v6  ;;  %3724 = vmatpush1.bf16.msra.mxu1 %v10064_v8 }
 0x3a0   : > { %3725 = vmatprep.subr.bf16.mxu1 %v10072_v51  ;;  %v10097_v51 = vld [vmem:[%s14533_s7 + $0x208] ss:$16 sps:$4 sm:$0xff]  }
 0x3a3   : > { %3726 = vmatpush1.bf16.msra.mxu1 %v10070_v9 }
 0x3a4   : > { %3727 = vmatprep.subr.bf16.mxu1 %v10078_v4 }
 0x3a6   : > { %2293 = vmatmul.mubr.bf16.gmra.mrb[108].mxu1 %v11976_v19 }
 0x3a7   : > { %2302 = vmatprep.mubr.bf16.mxu1 %v14552_v6  ;;  %3728 = vmatpush1.bf16.msra.mxu1 %v10076_v10 }
 0x3a8   : > { %3729 = vmatprep.subr.bf16.mxu1 %v10084_v5  ;;  %v10105_v5 = vld [vmem:[%s14533_s7 + $0x22c] ss:$16 sps:$4 sm:$0xff]  }
 0x3ab   : > { %3730 = vmatpush1.bf16.msra.mxu1 %v10082_v13 }
 0x3ac   : > { %3832 = vmatprep.subr.bf16.mxu1 %v10099_v11 }
 0x3ae   : > { %2303 = vmatmul.mubr.bf16.gmra.mrb[112].mxu1 %v11993_v28 }
 0x3af   : > { %2312 = vmatprep.mubr.bf16.mxu1 %v14552_v6 }
 0x3b6   : > { %2313 = vmatmul.mubr.bf16.gmra.mrb[116].mxu1 %v12001_v12 }
 0x3f1   : > { %v2091_v18 = vpop.f32.mrb[40].mxu1 }
 0x3f2   : > { %v2093_v19 = vpop.f32.mrb[41].mxu1  ;;  %v2092_v1 = vadd.f32 %v2091_v18, %v12157_v16 }
 0x3f3   : > { %v2095_v20 = vpop.f32.mrb[42].mxu1  ;;  %v2094_v23 = vadd.f32 %v2093_v19, %v12161_v26 }
 0x3f4   : > { %v2096_v21 = vadd.f32 %v2095_v20, %v12157_v16  ;;  %v2097_v22 = vpop.f32.mrb[43].mxu1 }
 0x3f5   : > { %v2098_v24 = vadd.f32 %v2097_v22, %v12161_v26  ;;  %v10088_v22 = vld [vmem:[%s14533_s7 + $0x220] ss:$16 sps:$4 sm:$0xff]  }
 0x3f6   : > { %v2323_v28 = vpack.c.bf16 %v2096_v21, %v2092_v1 }
 0x3f7   : > { %v2324_v29 = vpack.c.bf16 %v2098_v24, %v2094_v23  ;;  %v10103_v23 = vld [vmem:[%s14533_s7 + $0x228] ss:$16 sps:$4 sm:$0xff]  }
 0x3f8   : > { %v2403_v31 = vmin.bf16 %v14552_v6, %v2323_v28  ;;  %vm2363_vm15 = vcmp.gt.bf16.partialorder %v2323_v28, 0 }
 0x3f9   : > { %v2404_v32 = vmin.bf16 %v14552_v6, %v2324_v29  ;;  %v2101_v12 = vpop.f32.mrb[44].mxu1  ;;  %vm2364_vm14 = vcmp.gt.bf16.partialorder %v2324_v29, 0 }
 0x3fa   : > { %v2444_v35 = vmul.bf16 1069105081, %v2403_v31  ;;  %v2103_v30 = vpop.f32.mrb[45].mxu1  ;;  %v2102_v42 = vadd.f32 %v2101_v12, %v12157_v16  ;;  %v10108_v31 = vld [vmem:[%s14533_s7 + $0x24c] ss:$16 sps:$4 sm:$0xff]  }
 0x3fb   : > { %v2447_v38 = vmul.bf16 1069105081, %v2404_v32  ;;  %v2105_v41 = vpop.f32.mrb[46].mxu1  ;;  %v2104_v45 = vadd.f32 %v2103_v30, %v12161_v26 }
 0x3fc   : > { %10721 = vpow.bf16 %v2444_v35  ;;  %v2106_v61 = vadd.f32 %v2105_v41, %v12157_v16  ;;  %v2107_v44 = vpop.f32.mrb[47].mxu1 }
 0x3fd   : > { %10723 = vpow.bf16 %v2447_v38  ;;  %v2108_v46 = vadd.f32 %v2107_v44, %v12161_v26 }
 0x3fe   : > { %v12173_v25 = vpack.c.bf16 %v2106_v61, %v2102_v42  ;;  %v10091_v42 = vld [vmem:[%s14533_s7 + $0x240] ss:$16 sps:$4 sm:$0xff]   ;;  %v10106_v61 = vld [vmem:[%s14533_s7 + $0x248] ss:$16 sps:$4 sm:$0xff]  }
 0x3ff   : > { %v12175_v27 = vpack.c.bf16 %v2108_v46, %v2104_v45  ;;  %v10096_v46 = vld [vmem:[%s14533_s7 + $0x264] ss:$16 sps:$4 sm:$0xff]  }
 0x400   : > { %v2407_v47 = vmin.bf16 %v14552_v6, %v12173_v25  ;;  %vm2367_vm1 = vcmp.gt.bf16.partialorder %v12173_v25, 0 }
 0x401   : > { %v2408_v48 = vmin.bf16 %v14552_v6, %v12175_v27  ;;  %v2111_v50 = vpop.f32.mrb[48].mxu1  ;;  %vm2368_vm0 = vcmp.gt.bf16.partialorder %v12175_v27, 0 }
 0x402   : > { %v2456_v52 = vmul.bf16 1069105081, %v2407_v47  ;;  %v2113_v53 = vpop.f32.mrb[49].mxu1  ;;  %v2112_v57 = vadd.f32 %v2111_v50, %v12157_v16 }
 0x403   : > { %v2459_v56 = vmul.bf16 1069105081, %v2408_v48  ;;  %v2115_v49 = vpop.f32.mrb[50].mxu1  ;;  %v2114_v40 = vadd.f32 %v2113_v53, %v12161_v26 }
 0x404   : > { %10725 = vpow.bf16 %v2456_v52  ;;  %v2116_v43 = vadd.f32 %v2115_v49, %v12157_v16  ;;  %v2117_v58 = vpop.f32.mrb[51].mxu1  ;;  %v10114_v52 = vld [vmem:[%s14533_s7 + $0x26c] ss:$16 sps:$4 sm:$0xff]  }
 0x405   : > { %10727 = vpow.bf16 %v2459_v56  ;;  %v2118_v55 = vadd.f32 %v2117_v58, %v12161_v26 }
 0x406   : > { %v12185_v59 = vpack.c.bf16 %v2116_v43, %v2112_v57 }
 0x407   : > { %v10722_v60 = vpop.eup %10721  ;;  %v12187_v2 = vpack.c.bf16 %v2118_v55, %v2114_v40  ;;  %v10094_v40 = vld [vmem:[%s14533_s7 + $0x260] ss:$16 sps:$4 sm:$0xff]   ;;  %v10112_v55 = vld [vmem:[%s14533_s7 + $0x268] ss:$16 sps:$4 sm:$0xff]  }
 0x408   : > { %v10724_v63 = vpop.eup %10723  ;;  %v2411_v37 = vmin.bf16 %v14552_v6, %v12185_v59  ;;  %v2563_v0 = vsub.bf16 %v10722_v60, %v14548_v17  ;;  %vm2371_vm3 = vcmp.gt.bf16.partialorder %v12185_v59, 0 }
 0x409   : > { %v2412_v62 = vmin.bf16 %v14552_v6, %v12187_v2  ;;  %v2121_v54 = vpop.f32.mrb[52].mxu1  ;;  %v2564_v14 = vsub.bf16 %v10724_v63, %v14548_v17  ;;  %v10102_v63 = vld [vmem:[%s14533_s7 + $0x284] ss:$16 sps:$4 sm:$0xff]   ;;  %vm2372_vm2 = vcmp.gt.bf16.partialorder %v12187_v2, 0 }
 0x40a   : > { %v2468_v7 = vmul.bf16 1069105081, %v2411_v37  ;;  %v2123_v8 = vpop.f32.mrb[53].mxu1  ;;  %v2122_v13 = vadd.f32 %v2121_v54, %v12157_v16  ;;  %v2603_v19 = vsel %vm2363_vm15, %v2323_v28, %v2563_v0  ;;  %v10120_v37 = vld [vmem:[%s14533_s7 + $0x28c] ss:$16 sps:$4 sm:$0xff]  }
 0x40b   : > { %v2471_v9 = vmul.bf16 1069105081, %v2412_v62  ;;  %v2125_v4 = vpop.f32.mrb[54].mxu1  ;;  %v2604_v10 = vsel %vm2364_vm14, %v2324_v29, %v2564_v14  ;;  %v2124_v20 = vadd.f32 %v2123_v8, %v12161_v26  ;;  %v10093_v29 = vld [vmem:[%s14533_s7 + $0x244] ss:$16 sps:$4 sm:$0xff]  }
 0x40c   : > { %10729 = vpow.bf16 %v2468_v7  ;;  %v2126_v11 = vadd.f32 %v2125_v4, %v12157_v16  ;;  %v2127_v18 = vpop.f32.mrb[55].mxu1  ;;  %3465 = vmatprep.mubr.bf16.mxu0 %v2604_v10  ;;  %3731 = vmatprep.mubr.bf16.mxu1 %v2604_v10  ;;  %v10100_v7 = vld [vmem:[%s14533_s7 + $0x280] ss:$16 sps:$4 sm:$0xff]   ;;  %v10118_v8 = vld [vmem:[%s14533_s7 + $0x288] ss:$16 sps:$4 sm:$0xff]  }
 0x40d   : > { %10731 = vpow.bf16 %v2471_v9  ;;  %v2128_v1 = vadd.f32 %v2127_v18, %v12161_v26  ;;  %3466 = vmatmul.mubr.bf16.vlgmr.msra.gmra.mrb[40].mxu0 %v2603_v19  ;;  %3732 = vmatmul.mubr.bf16.vlgmr.msra.gmra.mrb[120].mxu1 %v2603_v19  ;;  %v10111_v4 = vld [vmem:[%s14533_s7 + $0x2a4] ss:$16 sps:$4 sm:$0xff]  }
 0x40e   : > { %v12211_v21 = vpack.c.bf16 %v2126_v11, %v2122_v13  ;;  %3567 = vmatpush1.bf16.msra.mxu0 %v10085_v39  ;;  %3833 = vmatpush1.bf16.msra.mxu1 %v10097_v51  ;;  %v10126_v11 = vld [vmem:[%s14533_s7 + $0x2ac] ss:$16 sps:$4 sm:$0xff]  }
 0x40f   : > { %v10726_v24 = vpop.eup %10725  ;;  %v12219_v28 = vpack.c.bf16 %v2128_v1, %v2124_v20  ;;  %3568 = vmatprep.subr.bf16.mxu0 %v10090_v3  ;;  %3834 = vmatprep.subr.bf16.mxu1 %v10105_v5 }
 0x410   : > { %v10728_v32 = vpop.eup %10727  ;;  %v2415_v12 = vmin.bf16 %v14552_v6, %v12211_v21  ;;  %v2567_v35 = vsub.bf16 %v10726_v24, %v14548_v17  ;;  %v10109_v24 = vld [vmem:[%s14533_s7 + $0x2a0] ss:$16 sps:$4 sm:$0xff]   ;;  %vm2375_vm5 = vcmp.gt.bf16.partialorder %v12211_v21, 0 }
 0x411   : > { %v2416_v30 = vmin.bf16 %v14552_v6, %v12219_v28  ;;  %v2131_v38 = vpop.f32.mrb[56].mxu1  ;;  %v2568_v41 = vsub.bf16 %v10728_v32, %v14548_v17  ;;  %v10117_v32 = vld [vmem:[%s14533_s7 + $0x2c4] ss:$16 sps:$4 sm:$0xff]   ;;  %vm2376_vm4 = vcmp.gt.bf16.partialorder %v12219_v28, 0 }
 0x412   : > { %v2480_v44 = vmul.bf16 1069105081, %v2415_v12  ;;  %v2133_v45 = vpop.f32.mrb[57].mxu1  ;;  %3569 = vmatpush1.bf16.msra.mxu0 %v10088_v22  ;;  %3835 = vmatpush1.bf16.msra.mxu1 %v10103_v23  ;;  %v2132_v53 = vadd.f32 %v2131_v38, %v12157_v16  ;;  %v2607_v57 = vsel %vm2367_vm1, %v12173_v25, %v2567_v35  ;;  %v10132_v12 = vld [vmem:[%s14533_s7 + $0x2cc] ss:$16 sps:$4 sm:$0xff]  }
 0x413   : > { %v2483_v47 = vmul.bf16 1069105081, %v2416_v30  ;;  %v2135_v48 = vpop.f32.mrb[58].mxu1  ;;  %v2608_v50 = vsel %vm2368_vm0, %v12175_v27, %v2568_v41  ;;  %3570 = vmatprep.subr.bf16.mxu0 %v10093_v29  ;;  %3836 = vmatprep.subr.bf16.mxu1 %v10108_v31  ;;  %v2134_v27 = vadd.f32 %v2133_v45, %v12161_v26  ;;  %v10124_v29 = vld [vmem:[%s14533_s7 + $0x2a8] ss:$16 sps:$4 sm:$0xff]  }
 0x414   : > { %10733 = vpow.bf16 %v2480_v44  ;;  %v2136_v56 = vadd.f32 %v2135_v48, %v12157_v16  ;;  %v2137_v49 = vpop.f32.mrb[59].mxu1  ;;  %3475 = vmatprep.mubr.bf16.mxu0 %v2608_v50  ;;  %3741 = vmatprep.mubr.bf16.mxu1 %v2608_v50  ;;  %v10115_v44 = vld [vmem:[%s14533_s7 + $0x2c0] ss:$16 sps:$4 sm:$0xff]   ;;  %v10130_v45 = vld [vmem:[%s14533_s7 + $0x2c8] ss:$16 sps:$4 sm:$0xff]  }
 0x415   : > { %10735 = vpow.bf16 %v2483_v47  ;;  %v2138_v43 = vadd.f32 %v2137_v49, %v12161_v26  ;;  %3476 = vmatmul.mubr.bf16.gmra.mrb[44].mxu0 %v2607_v57  ;;  %3742 = vmatmul.mubr.bf16.gmra.mrb[124].mxu1 %v2607_v57  ;;  %v10123_v48 = vld [vmem:[%s14533_s7 + $0x2e4] ss:$16 sps:$4 sm:$0xff]  }
 0x416   : > { %v12253_v58 = vpack.c.bf16 %v2136_v56, %v2132_v53  ;;  %3571 = vmatpush1.bf16.msra.mxu0 %v10091_v42  ;;  %3837 = vmatpush1.bf16.msra.mxu1 %v10106_v61  ;;  %v10135_v56 = vld [vmem:[%s14533_s7 + $0x2ec] ss:$16 sps:$4 sm:$0xff]  }
 0x417   : > { %v10730_v25 = vpop.eup %10729  ;;  %v12261_v60 = vpack.c.bf16 %v2138_v43, %v2134_v27  ;;  %3572 = vmatprep.subr.bf16.mxu0 %v10096_v46  ;;  %3838 = vmatprep.subr.bf16.mxu1 %v10114_v52 }
 0x418   : > { %v10732_v0 = vpop.eup %10731  ;;  %v2419_v62 = vmin.bf16 %v14552_v6, %v12253_v58  ;;  %v2571_v54 = vsub.bf16 %v10730_v25, %v14548_v17  ;;  %v10121_v25 = vld [vmem:[%s14533_s7 + $0x2e0] ss:$16 sps:$4 sm:$0xff]   ;;  %vm2379_vm7 = vcmp.gt.bf16.partialorder %v12253_v58, 0 }
 0x419   : > { %v2420_v14 = vmin.bf16 %v14552_v6, %v12261_v60  ;;  %v2141_v39 = vpop.f32.mrb[60].mxu1  ;;  %v2572_v3 = vsub.bf16 %v10732_v0, %v14548_v17  ;;  %v10129_v0 = vld [vmem:[%s14533_s7 + $0x304] ss:$16 sps:$4 sm:$0xff]   ;;  %vm2380_vm6 = vcmp.gt.bf16.partialorder %v12261_v60, 0 }
 0x41a   : > { %v2492_v51 = vmul.bf16 1069105081, %v2419_v62  ;;  %v2143_v9 = vpop.f32.mrb[61].mxu1  ;;  %3573 = vmatpush1.bf16.msra.mxu0 %v10094_v40  ;;  %3839 = vmatpush1.bf16.msra.mxu1 %v10112_v55  ;;  %v2142_v18 = vadd.f32 %v2141_v39, %v12157_v16  ;;  %v2611_v1 = vsel %vm2371_vm3, %v12185_v59, %v2571_v54  ;;  %v10141_v62 = vld [vmem:[%s14533_s7 + $0x30c] ss:$16 sps:$4 sm:$0xff]  }
 0x41b   : > { %v2495_v10 = vmul.bf16 1069105081, %v2420_v14  ;;  %v2145_v5 = vpop.f32.mrb[62].mxu1  ;;  %v2612_v13 = vsel %vm2372_vm2, %v12187_v2, %v2572_v3  ;;  %3574 = vmatprep.subr.bf16.mxu0 %v10102_v63  ;;  %3840 = vmatprep.subr.bf16.mxu1 %v10120_v37  ;;  %v2144_v2 = vadd.f32 %v2143_v9, %v12161_v26  ;;  %v10133_v63 = vld [vmem:[%s14533_s7 + $0x2e8] ss:$16 sps:$4 sm:$0xff]  }
 0x41c   : > { %10737 = vpow.bf16 %v2492_v51  ;;  %v2146_v19 = vadd.f32 %v2145_v5, %v12157_v16  ;;  %v2147_v20 = vpop.f32.mrb[63].mxu1  ;;  %3485 = vmatprep.mubr.bf16.mxu0 %v2612_v13  ;;  %3751 = vmatprep.mubr.bf16.mxu1 %v2612_v13  ;;  %v10127_v51 = vld [vmem:[%s14533_s7 + $0x300] ss:$16 sps:$4 sm:$0xff]   ;;  %v10139_v9 = vld [vmem:[%s14533_s7 + $0x308] ss:$16 sps:$4 sm:$0xff]  }
 0x41d   : > { %10739 = vpow.bf16 %v2495_v10  ;;  %v2148_v22 = vadd.f32 %v2147_v20, %v12161_v26  ;;  %3486 = vmatmul.mubr.bf16.gmra.mrb[48].mxu0 %v2611_v1  ;;  %3752 = vmatmul.mubr.bf16.gmra.mrb[128].mxu1 %v2611_v1  ;;  %v10138_v5 = vld [vmem:[%s14533_s7 + $0x324] ss:$16 sps:$4 sm:$0xff]  }
 0x41e   : > { %v12295_v23 = vpack.c.bf16 %v2146_v19, %v2142_v18  ;;  %3575 = vmatpush1.bf16.msra.mxu0 %v10100_v7  ;;  %3841 = vmatpush1.bf16.msra.mxu1 %v10118_v8  ;;  %v10147_v19 = vld [vmem:[%s14533_s7 + $0x32c] ss:$16 sps:$4 sm:$0xff]  }
 0x41f   : > { %v10734_v59 = vpop.eup %10733  ;;  %v12303_v31 = vpack.c.bf16 %v2148_v22, %v2144_v2  ;;  %3576 = vmatprep.subr.bf16.mxu0 %v10111_v4  ;;  %3842 = vmatprep.subr.bf16.mxu1 %v10126_v11 }
 0x420   : > { %v10736_v35 = vpop.eup %10735  ;;  %v2423_v30 = vmin.bf16 %v14552_v6, %v12295_v23  ;;  %v2575_v38 = vsub.bf16 %v10734_v59, %v14548_v17  ;;  %v10136_v59 = vld [vmem:[%s14533_s7 + $0x320] ss:$16 sps:$4 sm:$0xff]   ;;  %vm2383_vm9 = vcmp.gt.bf16.partialorder %v12295_v23, 0 }
 0x421   : > { %v2424_v41 = vmin.bf16 %v14552_v6, %v12303_v31  ;;  %v2151_v42 = vpop.f32.mrb[64].mxu1  ;;  %v2576_v61 = vsub.bf16 %v10736_v35, %v14548_v17  ;;  %v10144_v35 = vld [vmem:[%s14533_s7 + $0x344] ss:$16 sps:$4 sm:$0xff]   ;;  %vm2384_vm8 = vcmp.gt.bf16.partialorder %v12303_v31, 0 }
 0x422   : > { %v2504_v46 = vmul.bf16 1069105081, %v2423_v30  ;;  %v2153_v47 = vpop.f32.mrb[65].mxu1  ;;  %3577 = vmatpush1.bf16.msra.mxu0 %v10109_v24  ;;  %3843 = vmatpush1.bf16.msra.mxu1 %v10124_v29  ;;  %v2152_v49 = vadd.f32 %v2151_v42, %v12157_v16  ;;  %v2615_v43 = vsel %vm2375_vm5, %v12211_v21, %v2575_v38  ;;  %v10153_v30 = vld [vmem:[%s14533_s7 + $0x34c] ss:$16 sps:$4 sm:$0xff]  }
 0x423   : > { %v2507_v50 = vmul.bf16 1069105081, %v2424_v41  ;;  %v2155_v52 = vpop.f32.mrb[66].mxu1  ;;  %v2616_v53 = vsel %vm2376_vm4, %v12219_v28, %v2576_v61  ;;  %3578 = vmatprep.subr.bf16.mxu0 %v10117_v32  ;;  %3844 = vmatprep.subr.bf16.mxu1 %v10132_v12  ;;  %v2154_v28 = vadd.f32 %v2153_v47, %v12161_v26  ;;  %v10145_v32 = vld [vmem:[%s14533_s7 + $0x328] ss:$16 sps:$4 sm:$0xff]  }
 0x424   : > { %10741 = vpow.bf16 %v2504_v46  ;;  %v2156_v57 = vadd.f32 %v2155_v52, %v12157_v16  ;;  %v2157_v27 = vpop.f32.mrb[67].mxu1  ;;  %3495 = vmatprep.mubr.bf16.mxu0 %v2616_v53  ;;  %3761 = vmatprep.mubr.bf16.mxu1 %v2616_v53  ;;  %v10142_v46 = vld [vmem:[%s14533_s7 + $0x340] ss:$16 sps:$4 sm:$0xff]   ;;  %v10151_v47 = vld [vmem:[%s14533_s7 + $0x348] ss:$16 sps:$4 sm:$0xff]  }
 0x425   : > { %10743 = vpow.bf16 %v2507_v50  ;;  %v2158_v40 = vadd.f32 %v2157_v27, %v12161_v26  ;;  %3496 = vmatmul.mubr.bf16.gmra.mrb[52].mxu0 %v2615_v43  ;;  %3762 = vmatmul.mubr.bf16.gmra.mrb[132].mxu1 %v2615_v43  ;;  %v10150_v52 = vld [vmem:[%s14533_s7 + $0x364] ss:$16 sps:$4 sm:$0xff]  }
 0x426   : > { %v12337_v55 = vpack.c.bf16 %v2156_v57, %v2152_v49  ;;  %3579 = vmatpush1.bf16.msra.mxu0 %v10115_v44  ;;  %3845 = vmatpush1.bf16.msra.mxu1 %v10130_v45  ;;  %v10159_v57 = vld [vmem:[%s14533_s7 + $0x36c] ss:$16 sps:$4 sm:$0xff]  }
 0x427   : > { %v10738_v21 = vpop.eup %10737  ;;  %v12345_v37 = vpack.c.bf16 %v2158_v40, %v2154_v28  ;;  %3580 = vmatprep.subr.bf16.mxu0 %v10123_v48  ;;  %3846 = vmatprep.subr.bf16.mxu1 %v10135_v56 }
 0x428   : > { %v10740_v54 = vpop.eup %10739  ;;  %v2427_v14 = vmin.bf16 %v14552_v6, %v12337_v55  ;;  %v2579_v39 = vsub.bf16 %v10738_v21, %v14548_v17  ;;  %v10148_v21 = vld [vmem:[%s14533_s7 + $0x360] ss:$16 sps:$4 sm:$0xff]   ;;  %vm2387_vm11 = vcmp.gt.bf16.partialorder %v12337_v55, 0 }
 0x429   : > { %v2428_v3 = vmin.bf16 %v14552_v6, %v12345_v37  ;;  %v2161_v7 = vpop.f32.mrb[68].mxu1  ;;  %v2580_v8 = vsub.bf16 %v10740_v54, %v14548_v17  ;;  %v10156_v54 = vld [vmem:[%s14533_s7 + $0x384] ss:$16 sps:$4 sm:$0xff]   ;;  %vm2388_vm10 = vcmp.gt.bf16.partialorder %v12345_v37, 0 }
 0x42a   : > { %v2516_v4 = vmul.bf16 1069105081, %v2427_v14  ;;  %v2163_v10 = vpop.f32.mrb[69].mxu1  ;;  %3581 = vmatpush1.bf16.msra.mxu0 %v10121_v25  ;;  %3847 = vmatpush1.bf16.msra.mxu1 %v10133_v63  ;;  %v2162_v20 = vadd.f32 %v2161_v7, %v12157_v16  ;;  %v2619_v22 = vsel %vm2379_vm7, %v12253_v58, %v2579_v39  ;;  %v10162_v14 = vld [vmem:[%s14533_s7 + $0x38c] ss:$16 sps:$4 sm:$0xff]  }
 0x42b   : > { %v2519_v13 = vmul.bf16 1069105081, %v2428_v3  ;;  %v2165_v11 = vpop.f32.mrb[70].mxu1  ;;  %v2620_v18 = vsel %vm2380_vm6, %v12261_v60, %v2580_v8  ;;  %3582 = vmatprep.subr.bf16.mxu0 %v10129_v0  ;;  %3848 = vmatprep.subr.bf16.mxu1 %v10141_v62  ;;  %v2164_v60 = vadd.f32 %v2163_v10, %v12161_v26  ;;  %v10157_v0 = vld [vmem:[%s14533_s7 + $0x368] ss:$16 sps:$4 sm:$0xff]  }
 0x42c   : > { %10745 = vpow.bf16 %v2516_v4  ;;  %v2166_v1 = vadd.f32 %v2165_v11, %v12157_v16  ;;  %v2167_v2 = vpop.f32.mrb[71].mxu1  ;;  %3505 = vmatprep.mubr.bf16.mxu0 %v2620_v18  ;;  %3771 = vmatprep.mubr.bf16.mxu1 %v2620_v18  ;;  %v12444_v4 = vsub.s32 2, %v11568_v33  ;;  %v10154_v10 = vld [vmem:[%s14533_s7 + $0x380] ss:$16 sps:$4 sm:$0xff]   ;;  %v10165_v18 = vld [vmem:[%s14533_s7 + $0x3a4] ss:$16 sps:$4 sm:$0xff]  }
 0x42d   : > { %10747 = vpow.bf16 %v2519_v13  ;;  %v2168_v24 = vadd.f32 %v2167_v2, %v12161_v26  ;;  %3506 = vmatmul.mubr.bf16.gmra.mrb[56].mxu0 %v2619_v22  ;;  %3772 = vmatmul.mubr.bf16.gmra.mrb[136].mxu1 %v2619_v22  ;;  %v10168_v2 = vld [vmem:[%s14533_s7 + $0x3ac] ss:$16 sps:$4 sm:$0xff]  }
 0x42e   : > { %v12379_v29 = vpack.c.bf16 %v2166_v1, %v2162_v20  ;;  %3583 = vmatpush1.bf16.msra.mxu0 %v10127_v51  ;;  %3849 = vmatpush1.bf16.msra.mxu1 %v10139_v9 }
 0x42f   : > { %v10742_v58 = vpop.eup %10741  ;;  %v12387_v12 = vpack.c.bf16 %v2168_v24, %v2164_v60  ;;  %3584 = vmatprep.subr.bf16.mxu0 %v10138_v5  ;;  %3850 = vmatprep.subr.bf16.mxu1 %v10147_v19  ;;  %v10160_v5 = vld [vmem:[%s14533_s7 + $0x388] ss:$16 sps:$4 sm:$0xff]  }
 0x430   : > { %v10744_v38 = vpop.eup %10743  ;;  %v2431_v41 = vmin.bf16 %v14552_v6, %v12379_v29  ;;  %v2583_v42 = vsub.bf16 %v10742_v58, %v14548_v17  ;;  %v12467_v58 = vsub.s32 3, %v11568_v33  ;;  %v10171_v33 = vld [vmem:[%s14533_s7 + $0x3c4] ss:$16 sps:$4 sm:$0xff]   ;;  %vm2391_vm13 = vcmp.gt.bf16.partialorder %v12379_v29, 0 }
 0x431   : > { %v2432_v61 = vmin.bf16 %v14552_v6, %v12387_v12  ;;  %v2171_v44 = vpop.f32.mrb[72].mxu1  ;;  %v2584_v45 = vsub.bf16 %v10744_v38, %v14548_v17  ;;  %vm2392_vm12 = vcmp.gt.bf16.partialorder %v12387_v12, 0 }
 0x432   : > { %v2528_v48 = vmul.bf16 1069105081, %v2431_v41  ;;  %v2173_v50 = vpop.f32.mrb[73].mxu1  ;;  %3585 = vmatpush1.bf16.msra.mxu0 %v10136_v59  ;;  %3851 = vmatpush1.bf16.msra.mxu1 %v10145_v32  ;;  %v2172_v27 = vadd.f32 %v2171_v44, %v12157_v16  ;;  %v2623_v40 = vsel %vm2383_vm9, %v12295_v23, %v2583_v42 }
 0x433   : > { %v2531_v53 = vmul.bf16 1069105081, %v2432_v61  ;;  %v2175_v56 = vpop.f32.mrb[74].mxu1  ;;  %v2624_v49 = vsel %vm2384_vm8, %v12303_v31, %v2584_v45  ;;  %3586 = vmatprep.subr.bf16.mxu0 %v10144_v35  ;;  %3852 = vmatprep.subr.bf16.mxu1 %v10153_v30  ;;  %v2174_v31 = vadd.f32 %v2173_v50, %v12161_v26  ;;  %v12489_v61 = vrot.slane %v12153_v15, %v12444_v4  ;;  %v10169_v50 = vld [vmem:[%s14533_s7 + $0x3c0] ss:$16 sps:$4 sm:$0xff]  }
 0x434   : > { %10749 = vpow.bf16 %v2528_v48  ;;  %v2176_v43 = vadd.f32 %v2175_v56, %v12157_v16  ;;  %v2177_v28 = vpop.f32.mrb[75].mxu1  ;;  %3515 = vmatprep.mubr.bf16.mxu0 %v2624_v49  ;;  %3781 = vmatprep.mubr.bf16.mxu1 %v2624_v49 }
 0x435   : > { %10751 = vpow.bf16 %v2531_v53  ;;  %v2178_v25 = vadd.f32 %v2177_v28, %v12161_v26  ;;  %3516 = vmatmul.mubr.bf16.gmra.mrb[60].mxu0 %v2623_v40  ;;  %3782 = vmatmul.mubr.bf16.gmra.mrb[140].mxu1 %v2623_v40 }
 0x436   : > { %v12421_v63 = vpack.c.bf16 %v2176_v43, %v2172_v27  ;;  %3587 = vmatpush1.bf16.msra.mxu0 %v10142_v46  ;;  %3853 = vmatpush1.bf16.msra.mxu1 %v10151_v47  ;;  %v12496_v47 = vrot.slane %v12153_v15, %v12467_v58  ;;  %v10177_v15 = vld [vmem:[%s14533_s7 + $0x3e4] ss:$16 sps:$4 sm:$0xff]   ;;  %v10180_v43 = vld [vmem:[%s14533_s7 + $0x3ec] ss:$16 sps:$4 sm:$0xff]  }
 0x437   : > { %v10746_v23 = vpop.eup %10745  ;;  %v12429_v62 = vpack.c.bf16 %v2178_v25, %v2174_v31  ;;  %3588 = vmatprep.subr.bf16.mxu0 %v10150_v52  ;;  %3854 = vmatprep.subr.bf16.mxu1 %v10159_v57  ;;  %v10172_v52 = vld [vmem:[%s14533_s7 + $0x3c8] ss:$16 sps:$4 sm:$0xff]  }
 0x438   : > { %v10748_v39 = vpop.eup %10747  ;;  %v2435_v3 = vmin.bf16 %v14552_v6, %v12421_v63  ;;  %v2587_v7 = vsub.bf16 %v10746_v23, %v14548_v17  ;;  %v10175_v23 = vld [vmem:[%s14533_s7 + $0x3e0] ss:$16 sps:$4 sm:$0xff]   ;;  %vm2395_vm15 = vcmp.gt.bf16.partialorder %v12421_v63, 0 }
 0x439   : > { %v2436_v8 = vmin.bf16 %v14552_v6, %v12429_v62  ;;  %v2181_v51 = vpop.f32.mrb[76].mxu1  ;;  %v2588_v9 = vsub.bf16 %v10748_v39, %v14548_v17  ;;  %v10183_v39 = vld [vmem:[%s14535_s9 + $0x4] ss:$16 sps:$4 sm:$0xff]   ;;  %vm2396_vm14 = vcmp.gt.bf16.partialorder %v12429_v62, 0 }
 0x43a   : > { %v2540_v13 = vmul.bf16 1069105081, %v2435_v3  ;;  %v2183_v11 = vpop.f32.mrb[77].mxu1  ;;  %3589 = vmatpush1.bf16.msra.mxu0 %v10148_v21  ;;  %3855 = vmatpush1.bf16.msra.mxu1 %v10157_v0  ;;  %v2182_v22 = vadd.f32 %v2181_v51, %v12157_v16  ;;  %v2627_v59 = vsel %vm2387_vm11, %v12337_v55, %v2587_v7  ;;  %v10166_v55 = vld [vmem:[%s14533_s7 + $0x3a8] ss:$16 sps:$4 sm:$0xff]  }
 0x43b   : > { %v2543_v19 = vmul.bf16 1069105081, %v2436_v8  ;;  %v2185_v20 = vpop.f32.mrb[78].mxu1  ;;  %v2628_v1 = vsel %vm2388_vm10, %v12345_v37, %v2588_v9  ;;  %3590 = vmatprep.subr.bf16.mxu0 %v10156_v54  ;;  %3856 = vmatprep.subr.bf16.mxu1 %v10162_v14  ;;  %v2184_v37 = vadd.f32 %v2183_v11, %v12161_v26  ;;  %v10178_v54 = vld [vmem:[%s14533_s7 + $0x3e8] ss:$16 sps:$4 sm:$0xff]  }
 0x43c   : > { %10753 = vpow.bf16 %v2540_v13  ;;  %v2186_v60 = vadd.f32 %v2185_v20, %v12157_v16  ;;  %v2187_v24 = vpop.f32.mrb[79].mxu1  ;;  %3525 = vmatprep.mubr.bf16.mxu0 %v2628_v1  ;;  %3791 = vmatprep.mubr.bf16.mxu1 %v2628_v1  ;;  %v10163_v16 = vld [vmem:[%s14533_s7 + $0x3a0] ss:$16 sps:$4 sm:$0xff]   ;;  %v10195_v3 = vld [vmem:[%s14535_s9 + $0xc] ss:$16 sps:$4 sm:$0xff]  }
 0x43d   : > { %10755 = vpow.bf16 %v2543_v19  ;;  %v2188_v32 = vadd.f32 %v2187_v24, %v12161_v26  ;;  %3526 = vmatmul.mubr.bf16.gmra.mrb[64].mxu0 %v2627_v59  ;;  %3792 = vmatmul.mubr.bf16.gmra.mrb[144].mxu1 %v2627_v59  ;;  %v10174_v26 = vld [vmem:[%s14533_s7 + $0x3cc] ss:$16 sps:$4 sm:$0xff]  }
 0x43e   : > { %v12469_v35 = vpack.c.bf16 %v2186_v60, %v2182_v22  ;;  %3591 = vmatpush1.bf16.msra.mxu0 %v10154_v10  ;;  %3857 = vmatpush1.bf16.msra.mxu1 %v10160_v5 }
 0x43f   : > { %v10750_v30 = vpop.eup %10749  ;;  %v12477_v38 = vpack.c.bf16 %v2188_v32, %v2184_v37  ;;  %3592 = vmatprep.subr.bf16.mxu0 %v10165_v18  ;;  %3858 = vmatprep.subr.bf16.mxu1 %v10168_v2 }
 0x440   : > { %v10752_v41 = vpop.eup %10751  ;;  %v2439_v42 = vmin.bf16 %v14552_v6, %v12469_v35  ;;  %v2591_v44 = vsub.bf16 %v10750_v30, %v14548_v17  ;;  %vm2399_vm1 = vcmp.gt.bf16.partialorder %v12469_v35, 0 }
 0x441   : > { %v2440_v45 = vmin.bf16 %v14552_v6, %v12477_v38  ;;  %v2224_v46 = vpop.f32.mrb[80].mxu1  ;;  %v2592_v48 = vsub.bf16 %v10752_v41, %v14548_v17  ;;  %vm2400_vm0 = vcmp.gt.bf16.partialorder %v12477_v38, 0 }
 0x442   : > { %v2552_v53 = vmul.bf16 1069105081, %v2439_v42  ;;  %v2226_v56 = vpop.f32.mrb[81].mxu1  ;;  %3593 = vmatpush1.bf16.msra.mxu0 %v10163_v16  ;;  %3859 = vmatpush1.bf16.msra.mxu1 %v10166_v55  ;;  %v2225_v28 = vadd.f32 %v2224_v46, %v12489_v61  ;;  %v2631_v25 = vsel %vm2391_vm13, %v12379_v29, %v2591_v44 }
 0x443   : > { %v2555_v49 = vmul.bf16 1069105081, %v2440_v45  ;;  %v2228_v57 = vpop.f32.mrb[82].mxu1  ;;  %v2632_v27 = vsel %vm2392_vm12, %v12387_v12, %v2592_v48  ;;  %3594 = vmatprep.subr.bf16.mxu0 %v10171_v33  ;;  %3860 = vmatprep.subr.bf16.mxu1 %v10174_v26  ;;  %v2227_v12 = vadd.f32 %v2226_v56, %v12496_v47 }
 0x444   : > { %10757 = vpow.bf16 %v2552_v53  ;;  %v2229_v40 = vadd.f32 %v2228_v57, %v12489_v61  ;;  %v2230_v31 = vpop.f32.mrb[83].mxu1  ;;  %3535 = vmatprep.mubr.bf16.mxu0 %v2632_v27  ;;  %3801 = vmatprep.mubr.bf16.mxu1 %v2632_v27 }
 0x445   : > { %10759 = vpow.bf16 %v2555_v49  ;;  %v2231_v21 = vadd.f32 %v2230_v31, %v12496_v47  ;;  %3536 = vmatmul.mubr.bf16.gmra.mrb[68].mxu0 %v2631_v25  ;;  %3802 = vmatmul.mubr.bf16.gmra.mrb[148].mxu1 %v2631_v25  ;;  %v10181_v25 = vld [vmem:[%s14535_s9] ss:$16 sps:$4 sm:$0xff]  }
 0x446   : > { %v12519_v0 = vpack.c.bf16 %v2229_v40, %v2225_v28  ;;  %3595 = vmatpush1.bf16.msra.mxu0 %v10169_v50  ;;  %3861 = vmatpush1.bf16.msra.mxu1 %v10172_v52 }
 0x447   : > { %v10754_v29 = vpop.eup %10753  ;;  %v12527_v14 = vpack.c.bf16 %v2231_v21, %v2227_v12  ;;  %3596 = vmatprep.subr.bf16.mxu0 %v10177_v15  ;;  %3862 = vmatprep.subr.bf16.mxu1 %v10180_v43  ;;  %v10186_v12 = vld [vmem:[%s14535_s9 + $0x24] ss:$16 sps:$4 sm:$0xff]  }
 0x448   : > { %v10756_v7 = vpop.eup %10755  ;;  %v2405_v8 = vmin.bf16 %v14552_v6, %v12519_v0  ;;  %v2595_v51 = vsub.bf16 %v10754_v29, %v14548_v17  ;;  %vm2365_vm3 = vcmp.gt.bf16.partialorder %v12519_v0, 0 }
 0x449   : > { %v2406_v9 = vmin.bf16 %v14552_v6, %v12527_v14  ;;  %v2234_v10 = vpop.f32.mrb[84].mxu1  ;;  %v2596_v5 = vsub.bf16 %v10756_v7, %v14548_v17  ;;  %vm2366_vm2 = vcmp.gt.bf16.partialorder %v12527_v14, 0  ;;  %v10201_v7 = vld [vmem:[%s14535_s9 + $0x2c] ss:$16 sps:$4 sm:$0xff]  }
 0x44a   : > { %v2450_v13 = vmul.bf16 1069105081, %v2405_v8  ;;  %v2236_v11 = vpop.f32.mrb[85].mxu1  ;;  %3597 = vmatpush1.bf16.msra.mxu0 %v10175_v23  ;;  %3863 = vmatpush1.bf16.msra.mxu1 %v10178_v54  ;;  %v2235_v1 = vadd.f32 %v2234_v10, %v12489_v61  ;;  %v2635_v60 = vsel %vm2395_vm15, %v12421_v63, %v2595_v51  ;;  %v10193_v54 = vld [vmem:[%s14535_s9 + $0x8] ss:$16 sps:$4 sm:$0xff]  }
 0x44b   : > { %v2453_v18 = vmul.bf16 1069105081, %v2406_v9  ;;  %v2238_v19 = vpop.f32.mrb[86].mxu1  ;;  %v2636_v20 = vsel %vm2396_vm14, %v12429_v62, %v2596_v5  ;;  %5075 = vmatprep.subr.bf16.mxu0 %v10183_v39  ;;  %5341 = vmatprep.subr.bf16.mxu1 %v10195_v3  ;;  %v2237_v24 = vadd.f32 %v2236_v11, %v12496_v47  ;;  %v10184_v11 = vld [vmem:[%s14535_s9 + $0x20] ss:$16 sps:$4 sm:$0xff]  }
 0x44c   : > { %10761 = vpow.bf16 %v2450_v13  ;;  %v2239_v2 = vadd.f32 %v2238_v19, %v12489_v61  ;;  %v2240_v22 = vpop.f32.mrb[87].mxu1  ;;  %3545 = vmatprep.mubr.bf16.mxu0 %v2636_v20  ;;  %3811 = vmatprep.mubr.bf16.mxu1 %v2636_v20  ;;  %v10189_v20 = vld [vmem:[%s14535_s9 + $0x44] ss:$16 sps:$4 sm:$0xff]  }
 0x44d   : > { %10763 = vpow.bf16 %v2453_v18  ;;  %v2241_v59 = vadd.f32 %v2240_v22, %v12496_v47  ;;  %3546 = vmatmul.mubr.bf16.gmra.mrb[72].mxu0 %v2635_v60  ;;  %3812 = vmatmul.mubr.bf16.gmra.mrb[152].mxu1 %v2635_v60  ;;  %v10199_v18 = vld [vmem:[%s14535_s9 + $0x28] ss:$16 sps:$4 sm:$0xff]  }
 0x44e   : > { %v12549_v62 = vpack.c.bf16 %v2239_v2, %v2235_v1  ;;  %v10204_v1 = vld [vmem:[%s14535_s9 + $0x4c] ss:$16 sps:$4 sm:$0xff]  }
 0x44f   : > { %v10758_v37 = vpop.eup %10757  ;;  %v12551_v32 = vpack.c.bf16 %v2241_v59, %v2237_v24 }
 0x450   : > { %v10760_v16 = vpop.eup %10759  ;;  %v2409_v55 = vmin.bf16 %v14552_v6, %v12549_v62  ;;  %v2599_v30 = vsub.bf16 %v10758_v37, %v14548_v17  ;;  %vm2369_vm5 = vcmp.gt.bf16.partialorder %v12549_v62, 0 }
 0x451   : > { %v2410_v63 = vmin.bf16 %v14552_v6, %v12551_v32  ;;  %v2244_v33 = vpop.f32.mrb[88].mxu1  ;;  %v2600_v26 = vsub.bf16 %v10760_v16, %v14548_v17  ;;  %v10187_v16 = vld [vmem:[%s14535_s9 + $0x40] ss:$16 sps:$4 sm:$0xff]   ;;  %vm2370_vm4 = vcmp.gt.bf16.partialorder %v12551_v32, 0 }
 0x452   : > { %v2462_v41 = vmul.bf16 1069105081, %v2409_v55  ;;  %v2246_v42 = vpop.f32.mrb[89].mxu1  ;;  %v2245_v48 = vadd.f32 %v2244_v33, %v12489_v61  ;;  %v2639_v53 = vsel %vm2399_vm1, %v12469_v35, %v2599_v30  ;;  %v10192_v55 = vld [vmem:[%s14535_s9 + $0x64] ss:$16 sps:$4 sm:$0xff]  }
 0x453   : > { %v2465_v44 = vmul.bf16 1069105081, %v2410_v63  ;;  %v2248_v45 = vpop.f32.mrb[90].mxu1  ;;  %v2640_v46 = vsel %vm2400_vm0, %v12477_v38, %v2600_v26  ;;  %v2247_v56 = vadd.f32 %v2246_v42, %v12496_v47  ;;  %v10202_v33 = vld [vmem:[%s14535_s9 + $0x48] ss:$16 sps:$4 sm:$0xff]  }
 0x454   : > { %10765 = vpow.bf16 %v2462_v41  ;;  %v2249_v50 = vadd.f32 %v2248_v45, %v12489_v61  ;;  %v2250_v52 = vpop.f32.mrb[91].mxu1  ;;  %3555 = vmatprep.mubr.bf16.mxu0 %v2640_v46  ;;  %3821 = vmatprep.mubr.bf16.mxu1 %v2640_v46 }
 0x455   : > { %10767 = vpow.bf16 %v2465_v44  ;;  %v2251_v15 = vadd.f32 %v2250_v52, %v12496_v47  ;;  %3556 = vmatmul.mubr.bf16.gmra.mrb[76].mxu0 %v2639_v53  ;;  %3822 = vmatmul.mubr.bf16.gmra.mrb[156].mxu1 %v2639_v53  ;;  %v10210_v44 = vld [vmem:[%s14535_s9 + $0x6c] ss:$16 sps:$4 sm:$0xff]  }
 0x456   : > { %v12567_v38 = vpack.c.bf16 %v2249_v50, %v2245_v48 }
 0x457   : > { %v10762_v49 = vpop.eup %10761  ;;  %v12569_v57 = vpack.c.bf16 %v2251_v15, %v2247_v56  ;;  %v10190_v56 = vld [vmem:[%s14535_s9 + $0x60] ss:$16 sps:$4 sm:$0xff]   ;;  %v10208_v15 = vld [vmem:[%s14535_s9 + $0x68] ss:$16 sps:$4 sm:$0xff]  }
 0x458   : > { %v10764_v27 = vpop.eup %10763  ;;  %v2413_v43 = vmin.bf16 %v14552_v6, %v12567_v38  ;;  %v2565_v28 = vsub.bf16 %v10762_v49, %v14548_v17  ;;  %vm2373_vm7 = vcmp.gt.bf16.partialorder %v12567_v38, 0 }
 0x459   : > { %v2414_v35 = vmin.bf16 %v14552_v6, %v12569_v57  ;;  %v2254_v40 = vpop.f32.mrb[92].mxu1  ;;  %v2566_v31 = vsub.bf16 %v10764_v27, %v14548_v17  ;;  %v10198_v27 = vld [vmem:[%s14535_s9 + $0x84] ss:$16 sps:$4 sm:$0xff]   ;;  %vm2374_vm6 = vcmp.gt.bf16.partialorder %v12569_v57, 0 }
 0x45a   : > { %v2474_v21 = vmul.bf16 1069105081, %v2413_v43  ;;  %v2256_v23 = vpop.f32.mrb[93].mxu1  ;;  %v2255_v8 = vadd.f32 %v2254_v40, %v12489_v61  ;;  %v2605_v10 = vsel %vm2365_vm3, %v12519_v0, %v2565_v28  ;;  %v10216_v43 = vld [vmem:[%s14535_s9 + $0x8c] ss:$16 sps:$4 sm:$0xff]  }
 0x45b   : > { %v2477_v29 = vmul.bf16 1069105081, %v2414_v35  ;;  %v2258_v39 = vpop.f32.mrb[94].mxu1  ;;  %v2606_v3 = vsel %vm2366_vm2, %v12527_v14, %v2566_v31  ;;  %v2257_v5 = vadd.f32 %v2256_v23, %v12496_v47  ;;  %v10207_v23 = vld [vmem:[%s14535_s9 + $0xa4] ss:$16 sps:$4 sm:$0xff]  }
 0x45c   : > { %10769 = vpow.bf16 %v2474_v21  ;;  %v2259_v51 = vadd.f32 %v2258_v39, %v12489_v61  ;;  %v2260_v9 = vpop.f32.mrb[95].mxu1  ;;  %3598 = vmatprep.mubr.bf16.mxu0 %v2606_v3  ;;  %3864 = vmatprep.mubr.bf16.mxu1 %v2606_v3  ;;  %v10196_v21 = vld [vmem:[%s14535_s9 + $0x80] ss:$16 sps:$4 sm:$0xff]   ;;  %v10214_v39 = vld [vmem:[%s14535_s9 + $0x88] ss:$16 sps:$4 sm:$0xff]  }
 0x45d   : > { %10771 = vpow.bf16 %v2477_v29  ;;  %v2261_v13 = vadd.f32 %v2260_v9, %v12496_v47  ;;  %3599 = vmatmul.mubr.bf16.vlgmr.msra.gmra.mrb[40].mxu0 %v2605_v10  ;;  %3865 = vmatmul.mubr.bf16.vlgmr.msra.gmra.mrb[120].mxu1 %v2605_v10 }
 0x45e   : > { %v12597_v14 = vpack.c.bf16 %v2259_v51, %v2255_v8  ;;  %5076 = vmatpush1.bf16.msra.mxu0 %v10181_v25  ;;  %5342 = vmatpush1.bf16.msra.mxu1 %v10193_v54  ;;  %v10222_v51 = vld [vmem:[%s14535_s9 + $0xac] ss:$16 sps:$4 sm:$0xff]  }
 0x45f   : > { %v10766_v0 = vpop.eup %10765  ;;  %v12605_v19 = vpack.c.bf16 %v2261_v13, %v2257_v5  ;;  %5077 = vmatprep.subr.bf16.mxu0 %v10186_v12  ;;  %5343 = vmatprep.subr.bf16.mxu1 %v10201_v7 }
 0x460   : > { %v10768_v2 = vpop.eup %10767  ;;  %v2417_v22 = vmin.bf16 %v14552_v6, %v12597_v14  ;;  %v2569_v60 = vsub.bf16 %v10766_v0, %v14548_v17  ;;  %v10205_v0 = vld [vmem:[%s14535_s9 + $0xa0] ss:$16 sps:$4 sm:$0xff]   ;;  %vm2377_vm9 = vcmp.gt.bf16.partialorder %v12597_v14, 0 }
 0x461   : > { %v2418_v24 = vmin.bf16 %v14552_v6, %v12605_v19  ;;  %v2264_v59 = vpop.f32.mrb[96].mxu1  ;;  %v2570_v37 = vsub.bf16 %v10768_v2, %v14548_v17  ;;  %v10213_v2 = vld [vmem:[%s14535_s9 + $0xc4] ss:$16 sps:$4 sm:$0xff]   ;;  %vm2378_vm8 = vcmp.gt.bf16.partialorder %v12605_v19, 0 }
 0x462   : > { %v2486_v30 = vmul.bf16 1069105081, %v2417_v22  ;;  %v2266_v63 = vpop.f32.mrb[97].mxu1  ;;  %5078 = vmatpush1.bf16.msra.mxu0 %v10184_v11  ;;  %5344 = vmatpush1.bf16.msra.mxu1 %v10199_v18  ;;  %v2265_v45 = vadd.f32 %v2264_v59, %v12489_v61  ;;  %v2609_v50 = vsel %vm2369_vm5, %v12549_v62, %v2569_v60  ;;  %v10228_v22 = vld [vmem:[%s14535_s9 + $0xcc] ss:$16 sps:$4 sm:$0xff]  }
 0x463   : > { %v2489_v26 = vmul.bf16 1069105081, %v2418_v24  ;;  %v2268_v41 = vpop.f32.mrb[98].mxu1  ;;  %v2610_v42 = vsel %vm2370_vm4, %v12551_v32, %v2570_v37  ;;  %5079 = vmatprep.subr.bf16.mxu0 %v10189_v20  ;;  %5345 = vmatprep.subr.bf16.mxu1 %v10204_v1  ;;  %v2267_v32 = vadd.f32 %v2266_v63, %v12496_v47  ;;  %v10220_v20 = vld [vmem:[%s14535_s9 + $0xa8] ss:$16 sps:$4 sm:$0xff]  }
 0x464   : > { %10773 = vpow.bf16 %v2486_v30  ;;  %v2269_v46 = vadd.f32 %v2268_v41, %v12489_v61  ;;  %v2270_v48 = vpop.f32.mrb[99].mxu1  ;;  %3608 = vmatprep.mubr.bf16.mxu0 %v2610_v42  ;;  %3874 = vmatprep.mubr.bf16.mxu1 %v2610_v42  ;;  %v10211_v30 = vld [vmem:[%s14535_s9 + $0xc0] ss:$16 sps:$4 sm:$0xff]   ;;  %v10219_v63 = vld [vmem:[%s14535_s9 + $0xe4] ss:$16 sps:$4 sm:$0xff]  }
 0x465   : > { %10775 = vpow.bf16 %v2489_v26  ;;  %v2271_v52 = vadd.f32 %v2270_v48, %v12496_v47  ;;  %3609 = vmatmul.mubr.bf16.gmra.mrb[44].mxu0 %v2609_v50  ;;  %3875 = vmatmul.mubr.bf16.gmra.mrb[124].mxu1 %v2609_v50  ;;  %v10226_v41 = vld [vmem:[%s14535_s9 + $0xc8] ss:$16 sps:$4 sm:$0xff]  }
 0x466   : > { %v12639_v53 = vpack.c.bf16 %v2269_v46, %v2265_v45  ;;  %5080 = vmatpush1.bf16.msra.mxu0 %v10187_v16  ;;  %5346 = vmatpush1.bf16.msra.mxu1 %v10202_v33  ;;  %v10231_v46 = vld [vmem:[%s14535_s9 + $0xec] ss:$16 sps:$4 sm:$0xff]  }
 0x467   : > { %v10770_v62 = vpop.eup %10769  ;;  %v12647_v49 = vpack.c.bf16 %v2271_v52, %v2267_v32  ;;  %5081 = vmatprep.subr.bf16.mxu0 %v10192_v55  ;;  %5347 = vmatprep.subr.bf16.mxu1 %v10210_v44 }
 0x468   : > { %v10772_v28 = vpop.eup %10771  ;;  %v2421_v35 = vmin.bf16 %v14552_v6, %v12639_v53  ;;  %v2573_v40 = vsub.bf16 %v10770_v62, %v14548_v17  ;;  %v10217_v62 = vld [vmem:[%s14535_s9 + $0xe0] ss:$16 sps:$4 sm:$0xff]   ;;  %vm2381_vm11 = vcmp.gt.bf16.partialorder %v12639_v53, 0 }
 0x469   : > { %v2422_v31 = vmin.bf16 %v14552_v6, %v12647_v49  ;;  %v2274_v25 = vpop.f32.mrb[100].mxu1  ;;  %v2574_v12 = vsub.bf16 %v10772_v28, %v14548_v17  ;;  %v10225_v28 = vld [vmem:[%s14535_s9 + $0x104] ss:$16 sps:$4 sm:$0xff]   ;;  %vm2382_vm10 = vcmp.gt.bf16.partialorder %v12647_v49, 0 }
 0x46a   : > { %v2498_v54 = vmul.bf16 1069105081, %v2421_v35  ;;  %v2276_v29 = vpop.f32.mrb[101].mxu1  ;;  %5082 = vmatpush1.bf16.msra.mxu0 %v10190_v56  ;;  %5348 = vmatpush1.bf16.msra.mxu1 %v10208_v15  ;;  %v2275_v9 = vadd.f32 %v2274_v25, %v12489_v61  ;;  %v2613_v13 = vsel %vm2373_vm7, %v12567_v38, %v2573_v40  ;;  %v10237_v35 = vld [vmem:[%s14535_s9 + $0x10c] ss:$16 sps:$4 sm:$0xff]  }
 0x46b   : > { %v2501_v3 = vmul.bf16 1069105081, %v2422_v31  ;;  %v2278_v7 = vpop.f32.mrb[102].mxu1  ;;  %v2614_v8 = vsel %vm2374_vm6, %v12569_v57, %v2574_v12  ;;  %5083 = vmatprep.subr.bf16.mxu0 %v10198_v27  ;;  %5349 = vmatprep.subr.bf16.mxu1 %v10216_v43  ;;  %v2277_v57 = vadd.f32 %v2276_v29, %v12496_v47  ;;  %v10229_v27 = vld [vmem:[%s14535_s9 + $0xe8] ss:$16 sps:$4 sm:$0xff]  }
 0x46c   : > { %10777 = vpow.bf16 %v2498_v54  ;;  %v2279_v10 = vadd.f32 %v2278_v7, %v12489_v61  ;;  %v2280_v5 = vpop.f32.mrb[103].mxu1  ;;  %3618 = vmatprep.mubr.bf16.mxu0 %v2614_v8  ;;  %3884 = vmatprep.mubr.bf16.mxu1 %v2614_v8  ;;  %v10223_v54 = vld [vmem:[%s14535_s9 + $0x100] ss:$16 sps:$4 sm:$0xff]  }
 0x46d   : > { %10779 = vpow.bf16 %v2501_v3  ;;  %v2281_v11 = vadd.f32 %v2280_v5, %v12496_v47  ;;  %3619 = vmatmul.mubr.bf16.gmra.mrb[48].mxu0 %v2613_v13  ;;  %3885 = vmatmul.mubr.bf16.gmra.mrb[128].mxu1 %v2613_v13  ;;  %v10235_v3 = vld [vmem:[%s14535_s9 + $0x108] ss:$16 sps:$4 sm:$0xff]  }
 0x46e   : > { %v12681_v18 = vpack.c.bf16 %v2279_v10, %v2275_v9  ;;  %5084 = vmatpush1.bf16.msra.mxu0 %v10196_v21  ;;  %5350 = vmatpush1.bf16.msra.mxu1 %v10214_v39  ;;  %v10234_v9 = vld [vmem:[%s14535_s9 + $0x124] ss:$16 sps:$4 sm:$0xff]  }
 0x46f   : > { %v10774_v38 = vpop.eup %10773  ;;  %v12689_v1 = vpack.c.bf16 %v2281_v11, %v2277_v57  ;;  %5085 = vmatprep.subr.bf16.mxu0 %v10207_v23  ;;  %5351 = vmatprep.subr.bf16.mxu1 %v10222_v51 }
 0x470   : > { %v10776_v60 = vpop.eup %10775  ;;  %v2425_v24 = vmin.bf16 %v14552_v6, %v12681_v18  ;;  %v2577_v59 = vsub.bf16 %v10774_v38, %v14548_v17  ;;  %vm2385_vm13 = vcmp.gt.bf16.partialorder %v12681_v18, 0 }
 0x471   : > { %v2426_v37 = vmin.bf16 %v14552_v6, %v12689_v1  ;;  %v2284_v16 = vpop.f32.mrb[104].mxu1  ;;  %v2578_v55 = vsub.bf16 %v10776_v60, %v14548_v17  ;;  %vm2386_vm12 = vcmp.gt.bf16.partialorder %v12689_v1, 0 }
 0x472   : > { %v2510_v33 = vmul.bf16 1069105081, %v2425_v24  ;;  %v2286_v26 = vpop.f32.mrb[105].mxu1  ;;  %5086 = vmatpush1.bf16.msra.mxu0 %v10205_v0  ;;  %5352 = vmatpush1.bf16.msra.mxu1 %v10220_v20  ;;  %v2285_v48 = vadd.f32 %v2284_v16, %v12489_v61  ;;  %v2617_v52 = vsel %vm2377_vm9, %v12597_v14, %v2577_v59  ;;  %v10232_v20 = vld [vmem:[%s14535_s9 + $0x120] ss:$16 sps:$4 sm:$0xff]  }
 0x473   : > { %v2513_v42 = vmul.bf16 1069105081, %v2426_v37  ;;  %v2288_v44 = vpop.f32.mrb[106].mxu1  ;;  %v2618_v45 = vsel %vm2378_vm8, %v12605_v19, %v2578_v55  ;;  %5087 = vmatprep.subr.bf16.mxu0 %v10213_v2  ;;  %5353 = vmatprep.subr.bf16.mxu1 %v10228_v22  ;;  %v2287_v19 = vadd.f32 %v2286_v26, %v12496_v47 }
 0x474   : > { %10781 = vpow.bf16 %v2510_v33  ;;  %v2289_v50 = vadd.f32 %v2288_v44, %v12489_v61  ;;  %v2290_v32 = vpop.f32.mrb[107].mxu1  ;;  %3628 = vmatprep.mubr.bf16.mxu0 %v2618_v45  ;;  %3894 = vmatprep.mubr.bf16.mxu1 %v2618_v45 }
 0x475   : > { %10783 = vpow.bf16 %v2513_v42  ;;  %v2291_v56 = vadd.f32 %v2290_v32, %v12496_v47  ;;  %3629 = vmatmul.mubr.bf16.gmra.mrb[52].mxu0 %v2617_v52  ;;  %3895 = vmatmul.mubr.bf16.gmra.mrb[132].mxu1 %v2617_v52 }
 0x476   : > { %v12723_v15 = vpack.c.bf16 %v2289_v50, %v2285_v48  ;;  %5088 = vmatpush1.bf16.msra.mxu0 %v10211_v30  ;;  %5354 = vmatpush1.bf16.msra.mxu1 %v10226_v41 }
 0x477   : > { %v10778_v14 = vpop.eup %10777  ;;  %v12731_v43 = vpack.c.bf16 %v2291_v56, %v2287_v19  ;;  %5089 = vmatprep.subr.bf16.mxu0 %v10219_v63  ;;  %5355 = vmatprep.subr.bf16.mxu1 %v10231_v46  ;;  %v10238_v63 = vld [vmem:[%s14535_s9 + $0x140] ss:$16 sps:$4 sm:$0xff]  }
 0x478   : > { %v10780_v40 = vpop.eup %10779  ;;  %v2429_v31 = vmin.bf16 %v14552_v6, %v12723_v15  ;;  %v2581_v25 = vsub.bf16 %v10778_v14, %v14548_v17  ;;  %vm2389_vm15 = vcmp.gt.bf16.partialorder %v12723_v15, 0 }
 0x479   : > { %v2430_v12 = vmin.bf16 %v14552_v6, %v12731_v43  ;;  %v2294_v21 = vpop.f32.mrb[108].mxu1  ;;  %v2582_v23 = vsub.bf16 %v10780_v40, %v14548_v17  ;;  %vm2390_vm14 = vcmp.gt.bf16.partialorder %v12731_v43, 0 }
 0x47a   : > { %v2522_v29 = vmul.bf16 1069105081, %v2429_v31  ;;  %v2296_v39 = vpop.f32.mrb[109].mxu1  ;;  %5090 = vmatpush1.bf16.msra.mxu0 %v10217_v62  ;;  %5356 = vmatpush1.bf16.msra.mxu1 %v10229_v27  ;;  %v2295_v10 = vadd.f32 %v2294_v21, %v12489_v61  ;;  %v2621_v57 = vsel %vm2381_vm11, %v12639_v53, %v2581_v25  ;;  %v10240_v53 = vld [vmem:[%s14535_s9 + $0x144] ss:$16 sps:$4 sm:$0xff]  }
 0x47b   : > { %v2525_v7 = vmul.bf16 1069105081, %v2430_v12  ;;  %v2298_v8 = vpop.f32.mrb[110].mxu1  ;;  %v2622_v51 = vsel %vm2382_vm10, %v12647_v49, %v2582_v23  ;;  %5091 = vmatprep.subr.bf16.mxu0 %v10225_v28  ;;  %5357 = vmatprep.subr.bf16.mxu1 %v10237_v35  ;;  %v2297_v49 = vadd.f32 %v2296_v39, %v12496_v47 }
 0x47c   : > { %10785 = vpow.bf16 %v2522_v29  ;;  %v2299_v5 = vadd.f32 %v2298_v8, %v12489_v61  ;;  %v2300_v13 = vpop.f32.mrb[111].mxu1  ;;  %3638 = vmatprep.mubr.bf16.mxu0 %v2622_v51  ;;  %3904 = vmatprep.mubr.bf16.mxu1 %v2622_v51 }
 0x47d   : > { %10787 = vpow.bf16 %v2525_v7  ;;  %v2301_v11 = vadd.f32 %v2300_v13, %v12496_v47  ;;  %3639 = vmatmul.mubr.bf16.gmra.mrb[56].mxu0 %v2621_v57  ;;  %3905 = vmatmul.mubr.bf16.gmra.mrb[136].mxu1 %v2621_v57 }
 0x47e   : > { %v12762_v0 = vpack.c.bf16 %v2299_v5, %v2295_v10  ;;  %5092 = vmatpush1.bf16.msra.mxu0 %v10223_v54  ;;  %5358 = vmatpush1.bf16.msra.mxu1 %v10235_v3 }
 0x47f   : > { %v10782_v38 = vpop.eup %10781  ;;  %v12767_v2 = vpack.c.bf16 %v2301_v11, %v2297_v49  ;;  %5093 = vmatprep.subr.bf16.mxu0 %v10234_v9 }
 0x480   : > { %v10784_v22 = vpop.eup %10783  ;;  %v2433_v60 = vmin.bf16 %v14552_v6, %v12762_v0  ;;  %v2585_v24 = vsub.bf16 %v10782_v38, %v14548_v17  ;;  %vm2393_vm1 = vcmp.gt.bf16.partialorder %v12762_v0, 0 }
 0x481   : > { %v2434_v59 = vmin.bf16 %v14552_v6, %v12767_v2  ;;  %v2304_v37 = vpop.f32.mrb[112].mxu1  ;;  %v2586_v16 = vsub.bf16 %v10784_v22, %v14548_v17  ;;  %vm2394_vm0 = vcmp.gt.bf16.partialorder %v12767_v2, 0 }
 0x482   : > { %v2534_v55 = vmul.bf16 1069105081, %v2433_v60  ;;  %v2306_v30 = vpop.f32.mrb[113].mxu1  ;;  %5094 = vmatpush1.bf16.msra.mxu0 %v10232_v20  ;;  %v2305_v42 = vadd.f32 %v2304_v37, %v12489_v61  ;;  %v2625_v46 = vsel %vm2385_vm13, %v12681_v18, %v2585_v24  ;;  %v10243_v37 = vld [vmem:[%s14535_s9 + $0x12c] ss:$16 sps:$4 sm:$0xff]  }
 0x483   : > { %v2537_v33 = vmul.bf16 1069105081, %v2434_v59  ;;  %v2308_v26 = vpop.f32.mrb[114].mxu1  ;;  %v2626_v41 = vsel %vm2386_vm12, %v12689_v1, %v2586_v16  ;;  %5095 = vmatprep.subr.bf16.mxu0 %v10240_v53  ;;  %v2307_v48 = vadd.f32 %v2306_v30, %v12496_v47  ;;  %v10241_v16 = vld [vmem:[%s14535_s9 + $0x128] ss:$16 sps:$4 sm:$0xff]   ;;  %5359 = vmatprep.subr.bf16.mxu1 %v10243_v37 }
 0x484   : > { %10789 = vpow.bf16 %v2534_v55  ;;  %v2309_v44 = vadd.f32 %v2308_v26, %v12489_v61  ;;  %v2310_v45 = vpop.f32.mrb[115].mxu1  ;;  %3648 = vmatprep.mubr.bf16.mxu0 %v2626_v41  ;;  %3914 = vmatprep.mubr.bf16.mxu1 %v2626_v41  ;;  %v10249_v55 = vld [vmem:[%s14535_s9 + $0x14c] ss:$16 sps:$4 sm:$0xff]   ;;  %v10247_v30 = vld [vmem:[%s14535_s9 + $0x148] ss:$16 sps:$4 sm:$0xff]  }
 0x485   : > { %10791 = vpow.bf16 %v2537_v33  ;;  %v2311_v50 = vadd.f32 %v2310_v45, %v12496_v47  ;;  %3649 = vmatmul.mubr.bf16.gmra.mrb[60].mxu0 %v2625_v46  ;;  %3915 = vmatmul.mubr.bf16.gmra.mrb[140].mxu1 %v2625_v46  ;;  %v10255_v33 = vld [vmem:[%s14535_s9 + $0x16c] ss:$16 sps:$4 sm:$0xff]   ;;  %v10244_v26 = vld [vmem:[%s14535_s9 + $0x160] ss:$16 sps:$4 sm:$0xff]   ;;  %v10253_v41 = vld [vmem:[%s14535_s9 + $0x168] ss:$16 sps:$4 sm:$0xff]  }
 0x486   : > { %v2357_v1 = vpack.c.bf16 %v2309_v44, %v2305_v42  ;;  %5096 = vmatpush1.bf16.msra.mxu0 %v10238_v63  ;;  %5360 = vmatpush1.bf16.msra.mxu1 %v10241_v16  ;;  %v10246_v63 = vld [vmem:[%s14535_s9 + $0x164] ss:$16 sps:$4 sm:$0xff]   ;;  %v10258_v44 = vld [vmem:[%s14535_s9 + $0x18c] ss:$16 sps:$4 sm:$0xff]   ;;  %v10250_v45 = vld [vmem:[%s14535_s9 + $0x180] ss:$16 sps:$4 sm:$0xff]  }
 0x487   : > { %v10786_v32 = vpop.eup %10785  ;;  %v2358_v52 = vpack.c.bf16 %v2311_v50, %v2307_v48  ;;  %5361 = vmatprep.subr.bf16.mxu1 %v10249_v55  ;;  %5097 = vmatprep.subr.bf16.mxu0 %v10246_v63  ;;  %v10252_v42 = vld [vmem:[%s14535_s9 + $0x184] ss:$16 sps:$4 sm:$0xff]   ;;  %v10256_v46 = vld [vmem:[%s14535_s9 + $0x188] ss:$16 sps:$4 sm:$0xff]   ;;  %v10264_v50 = vld [vmem:[%s14535_s9 + $0x1ac] ss:$16 sps:$4 sm:$0xff]  }
 0x488   : > { %v10788_v19 = vpop.eup %10787  ;;  %v2437_v56 = vmin.bf16 %v14552_v6, %v2357_v1  ;;  %v2589_v62 = vsub.bf16 %v10786_v32, %v14548_v17  ;;  %vm2397_vm3 = vcmp.gt.bf16.partialorder %v2357_v1, 0  ;;  %v10261_v48 = vld [vmem:[%s14535_s9 + $0x1a4] ss:$16 sps:$4 sm:$0xff]   ;;  %v10262_v32 = vld [vmem:[%s14535_s9 + $0x1a8] ss:$16 sps:$4 sm:$0xff]  }
 0x489   : > { %v2438_v27 = vmin.bf16 %v14552_v6, %v2358_v52  ;;  %v2314_v14 = vpop.f32.mrb[116].mxu1  ;;  %v2590_v18 = vsub.bf16 %v10788_v19, %v14548_v17  ;;  %vm2398_vm2 = vcmp.gt.bf16.partialorder %v2358_v52, 0  ;;  %v10270_v19 = vld [vmem:[%s14535_s9 + $0x1cc] ss:$16 sps:$4 sm:$0xff]  }
 0x48a   : > { %v2546_v28 = vmul.bf16 1069105081, %v2437_v56  ;;  %v2316_v35 = vpop.f32.mrb[117].mxu1  ;;  %v2315_v12 = vadd.f32 %v2314_v14, %v12489_v61  ;;  %v2629_v54 = vsel %vm2389_vm15, %v12723_v15, %v2589_v62  ;;  %5362 = vmatpush1.bf16.msra.mxu1 %v10247_v30  ;;  %5098 = vmatpush1.bf16.msra.mxu0 %v10244_v26  ;;  %v10265_v56 = vld [vmem:[%s14535_s9 + $0x1c0] ss:$16 sps:$4 sm:$0xff]  }
 0x48b   : > { %v2549_v40 = vmul.bf16 1069105081, %v2438_v27  ;;  %v2318_v31 = vpop.f32.mrb[118].mxu1  ;;  %v2630_v25 = vsel %vm2390_vm14, %v12731_v43, %v2590_v18  ;;  %v2317_v29 = vadd.f32 %v2316_v35, %v12496_v47  ;;  %5363 = vmatprep.subr.bf16.mxu1 %v10255_v33  ;;  %5099 = vmatprep.subr.bf16.mxu0 %v10252_v42  ;;  %v10268_v62 = vld [vmem:[%s14535_s9 + $0x1c8] ss:$16 sps:$4 sm:$0xff]  }
 0x48c   : > { %10793 = vpow.bf16 %v2546_v28  ;;  %v2319_v21 = vadd.f32 %v2318_v31, %v12489_v61  ;;  %v2320_v23 = vpop.f32.mrb[119].mxu1  ;;  %3658 = vmatprep.mubr.bf16.mxu0 %v2630_v25  ;;  %3924 = vmatprep.mubr.bf16.mxu1 %v2630_v25  ;;  %v10273_v27 = vld [vmem:[%s14535_s9 + $0x1e4] ss:$16 sps:$4 sm:$0xff]   ;;  %v10276_v14 = vld [vmem:[%s14535_s9 + $0x1ec] ss:$16 sps:$4 sm:$0xff]  }
 0x48d   : > { %10795 = vpow.bf16 %v2549_v40  ;;  %v2321_v39 = vadd.f32 %v2320_v23, %v12496_v47  ;;  %3659 = vmatmul.mubr.bf16.gmra.mrb[64].mxu0 %v2629_v54  ;;  %3925 = vmatmul.mubr.bf16.gmra.mrb[144].mxu1 %v2629_v54  ;;  %v10271_v18 = vld [vmem:[%s14535_s9 + $0x1e0] ss:$16 sps:$4 sm:$0xff]   ;;  %v10274_v28 = vld [vmem:[%s14535_s9 + $0x1e8] ss:$16 sps:$4 sm:$0xff]   ;;  %v10279_v35 = vld [vmem:[%s14535_s9 + $0x204] ss:$16 sps:$4 sm:$0xff]  }
 0x48e   : > { %v2361_v43 = vpack.c.bf16 %v2319_v21, %v2315_v12  ;;  %5364 = vmatpush1.bf16.msra.mxu1 %v10253_v41  ;;  %5100 = vmatpush1.bf16.msra.mxu0 %v10250_v45  ;;  %v10291_v40 = vld [vmem:[%s14535_s9 + $0x20c] ss:$16 sps:$4 sm:$0xff]   ;;  %v2771_v31 = vld [vmem:[%s14534_s8] sm:$0xf] }
 0x48f   : > { %v10790_v3 = vpop.eup %10789  ;;  %v2362_v7 = vpack.c.bf16 %v2321_v39, %v2317_v29  ;;  %5365 = vmatprep.subr.bf16.mxu1 %v10258_v44  ;;  %5101 = vmatprep.subr.bf16.mxu0 %v10261_v48  ;;  %v12895_v25 = vrot.slane %v2771_v31, %v11571_v34  ;;  %v12898_v12 = vrot.slane %v2771_v31, %v12444_v4 }
 0x490   : > { %v10792_v8 = vpop.eup %10791  ;;  %v2441_v51 = vmin.bf16 %v14552_v6, %v2361_v43  ;;  %v2593_v61 = vsub.bf16 %v10790_v3, %v14548_v17  ;;  %vm2401_vm5 = vcmp.gt.bf16.partialorder %v2361_v43, 0  ;;  %v12901_v54 = vrot.slane %v2771_v31, %v11574_v36 }
 0x491   : > { %v2442_v9 = vmin.bf16 %v14552_v6, %v2362_v7  ;;  %v2594_v10 = vsub.bf16 %v10792_v8, %v14548_v17  ;;  %vm2402_vm4 = vcmp.gt.bf16.partialorder %v2362_v7, 0  ;;  %v12904_v29 = vrot.slane %v2771_v31, %v12467_v58 }
 0x492   : > { %v2558_v15 = vmul.bf16 1069105081, %v2441_v51  ;;  %v2633_v13 = vsel %vm2393_vm1, %v12762_v0, %v2593_v61  ;;  %5366 = vmatpush1.bf16.msra.mxu1 %v10256_v46 }
 0x493   : > { %v2561_v5 = vmul.bf16 1069105081, %v2442_v9  ;;  %v2634_v47 = vsel %vm2394_vm0, %v12767_v2, %v2594_v10  ;;  %5367 = vmatprep.subr.bf16.mxu1 %v10264_v50 }
 0x494   : > { %10797 = vpow.bf16 %v2558_v15  ;;  %3668 = vmatprep.mubr.bf16.mxu0 %v2634_v47  ;;  %3934 = vmatprep.mubr.bf16.mxu1 %v2634_v47 }
 0x495   : > { %10799 = vpow.bf16 %v2561_v5  ;;  %3669 = vmatmul.mubr.bf16.gmra.mrb[68].mxu0 %v2633_v13  ;;  %3935 = vmatmul.mubr.bf16.gmra.mrb[148].mxu1 %v2633_v13 }
 0x496   : > { %5368 = vmatpush1.bf16.msra.mxu1 %v10262_v32 }
 0x497   : > { %v10794_v57 = vpop.eup %10793  ;;  %5369 = vmatprep.subr.bf16.mxu1 %v10270_v19 }
 0x498   : > { %v10796_v49 = vpop.eup %10795  ;;  %v2597_v11 = vsub.bf16 %v10794_v57, %v14548_v17 }
 0x499   : > { %v2598_v20 = vsub.bf16 %v10796_v49, %v14548_v17 }
 0x49a   : > { %v2637_v2 = vsel %vm2397_vm3, %v2357_v1, %v2597_v11  ;;  %v10259_v1 = vld [vmem:[%s14535_s9 + $0x1a0] ss:$16 sps:$4 sm:$0xff]   ;;  %5370 = vmatpush1.bf16.msra.mxu1 %v10268_v62 }
 0x49b   : > { %v2638_v38 = vsel %vm2398_vm2, %v2358_v52, %v2598_v20  ;;  %5102 = vmatpush1.bf16.msra.mxu0 %v10259_v1  ;;  %v10267_v52 = vld [vmem:[%s14535_s9 + $0x1c4] ss:$16 sps:$4 sm:$0xff]   ;;  %5371 = vmatprep.subr.bf16.mxu1 %v10276_v14 }
 0x49c   : > { %3678 = vmatprep.mubr.bf16.mxu0 %v2638_v38  ;;  %3944 = vmatprep.mubr.bf16.mxu1 %v2638_v38 }
 0x49d   : > { %3679 = vmatmul.mubr.bf16.gmra.mrb[72].mxu0 %v2637_v2  ;;  %3945 = vmatmul.mubr.bf16.gmra.mrb[152].mxu1 %v2637_v2 }
 0x49e   : > { %5103 = vmatprep.subr.bf16.mxu0 %v10267_v52  ;;  %5372 = vmatpush1.bf16.msra.mxu1 %v10274_v28 }
 0x49f   : > { %v10798_v53 = vpop.eup %10797  ;;  %5104 = vmatpush1.bf16.msra.mxu0 %v10265_v56  ;;  %5474 = vmatprep.subr.bf16.mxu1 %v10291_v40 }
 0x4a0   : > { %v10800_v22 = vpop.eup %10799  ;;  %v2601_v0 = vsub.bf16 %v10798_v53, %v14548_v17  ;;  %5105 = vmatprep.subr.bf16.mxu0 %v10273_v27 }
 0x4a1   : > { %v2602_v60 = vsub.bf16 %v10800_v22, %v14548_v17 }
 0x4a2   : > { %v2641_v59 = vsel %vm2401_vm5, %v2361_v43, %v2601_v0 }
 0x4a3   : > { %v2642_v24 = vsel %vm2402_vm4, %v2362_v7, %v2602_v60  ;;  %5106 = vmatpush1.bf16.msra.mxu0 %v10271_v18 }
 0x4a4   : > { %3688 = vmatprep.mubr.bf16.mxu0 %v2642_v24  ;;  %3954 = vmatprep.mubr.bf16.mxu1 %v2642_v24 }
 0x4a5   : > { %3689 = vmatmul.mubr.bf16.gmra.mrb[76].mxu0 %v2641_v59  ;;  %3955 = vmatmul.mubr.bf16.gmra.mrb[156].mxu1 %v2641_v59 }
 0x4a6   : > { %5208 = vmatprep.subr.bf16.mxu0 %v10279_v35 }
 0x530   : > { %v3600_v21 = vpop.f32.mrb[40].mxu0  ;;  %v3866_v23 = vpop.f32.mrb[120].mxu1 }
 0x531   : > { %v3602_v39 = vpop.f32.mrb[41].mxu0  ;;  %v3868_v43 = vpop.f32.mrb[121].mxu1  ;;  %v9135_v8 = vadd.f32 %v3600_v21, %v12895_v25  ;;  %v9175_v51 = vadd.f32 %v3866_v23, %v12898_v12 }
 0x532   : > { %v3604_v3 = vpop.f32.mrb[42].mxu0  ;;  %v3870_v7 = vpop.f32.mrb[122].mxu1  ;;  %v9136_v5 = vadd.f32 %v3602_v39, %v12901_v54  ;;  %v9176_v47 = vadd.f32 %v3868_v43, %v12904_v29 }
 0x533   : > { %v9137_v61 = vadd.f32 %v3604_v3, %v12895_v25  ;;  %v9177_v9 = vadd.f32 %v3870_v7, %v12898_v12  ;;  %v3606_v10 = vpop.f32.mrb[43].mxu0  ;;  %v3872_v15 = vpop.f32.mrb[123].mxu1 }
 0x534   : > { %v9138_v13 = vadd.f32 %v3606_v10, %v12901_v54  ;;  %v9178_v57 = vadd.f32 %v3872_v15, %v12904_v29 }
 0x535   : > { %v12914_v49 = vpack.c.bf16 %v9137_v61, %v9135_v8  ;;  %v12916_v11 = vpack.c.bf16 %v9177_v9, %v9175_v51 }
 0x536   : > { %v12918_v20 = vpack.c.bf16 %v9138_v13, %v9136_v5  ;;  %v12920_v38 = vpack.c.bf16 %v9178_v57, %v9176_v47 }
 0x537   : > { %v4045_v2 = vmin.bf16 %v14552_v6, %v12914_v49  ;;  %vm4005_vm6 = vcmp.gt.bf16.partialorder %v12914_v49, 0 }
 0x538   : > { %v4046_v53 = vmin.bf16 %v14552_v6, %v12918_v20  ;;  %v3610_v22 = vpop.f32.mrb[44].mxu0  ;;  %v3876_v0 = vpop.f32.mrb[124].mxu1  ;;  %vm4006_vm7 = vcmp.gt.bf16.partialorder %v12918_v20, 0 }
 0x539   : > { %v4086_v60 = vmul.bf16 1069105081, %v4045_v2  ;;  %v3612_v24 = vpop.f32.mrb[45].mxu0  ;;  %v3878_v59 = vpop.f32.mrb[125].mxu1  ;;  %v9139_v16 = vadd.f32 %v3610_v22, %v12895_v25  ;;  %v9179_v63 = vadd.f32 %v3876_v0, %v12898_v12 }
 0x53a   : > { %v4089_v37 = vmul.bf16 1069105081, %v4046_v53  ;;  %v3614_v55 = vpop.f32.mrb[46].mxu0  ;;  %v3880_v30 = vpop.f32.mrb[126].mxu1  ;;  %v9140_v33 = vadd.f32 %v3612_v24, %v12901_v54  ;;  %v9180_v45 = vadd.f32 %v3878_v59, %v12904_v29 }
 0x53b   : > { %v9141_v26 = vadd.f32 %v3614_v55, %v12895_v25  ;;  %v9181_v41 = vadd.f32 %v3880_v30, %v12898_v12  ;;  %v3616_v42 = vpop.f32.mrb[47].mxu0  ;;  %v3882_v44 = vpop.f32.mrb[127].mxu1  ;;  %10801 = vpow.bf16 %v4086_v60 }
 0x53c   : > { %v9142_v46 = vadd.f32 %v3616_v42, %v12901_v54  ;;  %v9182_v48 = vadd.f32 %v3882_v44, %v12904_v29  ;;  %10803 = vpow.bf16 %v4089_v37 }
 0x53d   : > { %v12934_v50 = vpack.c.bf16 %v9141_v26, %v9139_v16  ;;  %v12936_v1 = vpack.c.bf16 %v9181_v41, %v9179_v63 }
 0x53e   : > { %v12938_v32 = vpack.c.bf16 %v9142_v46, %v9140_v33  ;;  %v12940_v52 = vpack.c.bf16 %v9182_v48, %v9180_v45 }
 0x53f   : > { %v4049_v19 = vmin.bf16 %v14552_v6, %v12934_v50  ;;  %vm4009_vm9 = vcmp.gt.bf16.partialorder %v12934_v50, 0 }
 0x540   : > { %v4050_v56 = vmin.bf16 %v14552_v6, %v12938_v32  ;;  %v3620_v62 = vpop.f32.mrb[48].mxu0  ;;  %v3886_v27 = vpop.f32.mrb[128].mxu1  ;;  %vm4010_vm8 = vcmp.gt.bf16.partialorder %v12938_v32, 0 }
 0x541   : > { %v4098_v14 = vmul.bf16 1069105081, %v4049_v19  ;;  %v3622_v18 = vpop.f32.mrb[49].mxu0  ;;  %v3888_v28 = vpop.f32.mrb[129].mxu1  ;;  %v9143_v40 = vadd.f32 %v3620_v62, %v12895_v25  ;;  %v9183_v23 = vadd.f32 %v3886_v27, %v12898_v12  ;;  %v10277_v62 = vld [vmem:[%s14535_s9 + $0x200] ss:$16 sps:$4 sm:$0xff]  }
 0x542   : > { %v4101_v35 = vmul.bf16 1069105081, %v4050_v56  ;;  %v3624_v31 = vpop.f32.mrb[50].mxu0  ;;  %v3890_v21 = vpop.f32.mrb[130].mxu1  ;;  %v9144_v39 = vadd.f32 %v3622_v18, %v12901_v54  ;;  %v9184_v51 = vadd.f32 %v3888_v28, %v12904_v29  ;;  %v10289_v27 = vld [vmem:[%s14535_s9 + $0x208] ss:$16 sps:$4 sm:$0xff]  }
 0x543   : > { %v9145_v43 = vadd.f32 %v3624_v31, %v12895_v25  ;;  %v9185_v3 = vadd.f32 %v3890_v21, %v12898_v12  ;;  %v3626_v7 = vpop.f32.mrb[51].mxu0  ;;  %v3892_v8 = vpop.f32.mrb[131].mxu1  ;;  %10805 = vpow.bf16 %v4098_v14 }
 0x544   : > { %v9146_v61 = vadd.f32 %v3626_v7, %v12901_v54  ;;  %v9186_v9 = vadd.f32 %v3892_v8, %v12904_v29  ;;  %10807 = vpow.bf16 %v4101_v35  ;;  %v10282_v35 = vld [vmem:[%s14535_s9 + $0x224] ss:$16 sps:$4 sm:$0xff]  }
 0x545   : > { %v12954_v10 = vpack.c.bf16 %v9145_v43, %v9143_v40  ;;  %v12956_v15 = vpack.c.bf16 %v9185_v3, %v9183_v23  ;;  %v10297_v40 = vld [vmem:[%s14535_s9 + $0x22c] ss:$16 sps:$4 sm:$0xff]   ;;  %v10280_v43 = vld [vmem:[%s14535_s9 + $0x220] ss:$16 sps:$4 sm:$0xff]   ;;  %v10285_v3 = vld [vmem:[%s14535_s9 + $0x244] ss:$16 sps:$4 sm:$0xff]  }
 0x546   : > { %v12958_v5 = vpack.c.bf16 %v9146_v61, %v9144_v39  ;;  %v12960_v47 = vpack.c.bf16 %v9186_v9, %v9184_v51  ;;  %v10802_v13 = vpop.eup %10801  ;;  %v10295_v61 = vld [vmem:[%s14535_s9 + $0x228] ss:$16 sps:$4 sm:$0xff]   ;;  %v10300_v9 = vld [vmem:[%s14535_s9 + $0x24c] ss:$16 sps:$4 sm:$0xff]  }
 0x547   : > { %v4053_v57 = vmin.bf16 %v14552_v6, %v12954_v10  ;;  %v10804_v2 = vpop.eup %10803  ;;  %v4205_v33 = vsub.bf16 %v10802_v13, %v14548_v17  ;;  %vm4013_vm11 = vcmp.gt.bf16.partialorder %v12954_v10, 0 }
 0x548   : > { %v4054_v53 = vmin.bf16 %v14552_v6, %v12958_v5  ;;  %v3630_v22 = vpop.f32.mrb[52].mxu0  ;;  %v3896_v0 = vpop.f32.mrb[132].mxu1  ;;  %v4206_v46 = vsub.bf16 %v10804_v2, %v14548_v17  ;;  %vm4014_vm10 = vcmp.gt.bf16.partialorder %v12958_v5, 0 }
 0x549   : > { %v4110_v60 = vmul.bf16 1069105081, %v4053_v57  ;;  %v3632_v24 = vpop.f32.mrb[53].mxu0  ;;  %v3898_v59 = vpop.f32.mrb[133].mxu1  ;;  %v9147_v16 = vadd.f32 %v3630_v22, %v12895_v25  ;;  %v9187_v55 = vadd.f32 %v3896_v0, %v12898_v12  ;;  %v4245_v23 = vsel %vm4005_vm6, %v12914_v49, %v4205_v33 }
 0x54a   : > { %v4113_v37 = vmul.bf16 1069105081, %v4054_v53  ;;  %v3634_v30 = vpop.f32.mrb[54].mxu0  ;;  %v3900_v63 = vpop.f32.mrb[134].mxu1  ;;  %v9148_v26 = vadd.f32 %v3632_v24, %v12901_v54  ;;  %v9188_v48 = vadd.f32 %v3898_v59, %v12904_v29  ;;  %v4246_v28 = vsel %vm4006_vm7, %v12918_v20, %v4206_v46 }
 0x54b   : > { %v9149_v41 = vadd.f32 %v3634_v30, %v12895_v25  ;;  %v9189_v42 = vadd.f32 %v3900_v63, %v12898_v12  ;;  %v3636_v44 = vpop.f32.mrb[55].mxu0  ;;  %v3902_v45 = vpop.f32.mrb[135].mxu1  ;;  %10809 = vpow.bf16 %v4110_v60  ;;  %5107 = vmatprep.mubr.bf16.mxu0 %v4246_v28  ;;  %5373 = vmatprep.mubr.bf16.mxu1 %v4246_v28 }
 0x54c   : > { %v9150_v19 = vadd.f32 %v3636_v44, %v12901_v54  ;;  %v9190_v56 = vadd.f32 %v3902_v45, %v12904_v29  ;;  %10811 = vpow.bf16 %v4113_v37  ;;  %5108 = vmatmul.mubr.bf16.vlgmr.msra.gmra.mrb[80].mxu0 %v4245_v23  ;;  %5374 = vmatmul.mubr.bf16.vlgmr.msra.gmra.mrb[160].mxu1 %v4245_v23  ;;  %v10283_v44 = vld [vmem:[%s14535_s9 + $0x240] ss:$16 sps:$4 sm:$0xff]   ;;  %v10298_v45 = vld [vmem:[%s14535_s9 + $0x248] ss:$16 sps:$4 sm:$0xff]  }
 0x54d   : > { %v12984_v14 = vpack.c.bf16 %v9149_v41, %v9147_v16  ;;  %v12986_v18 = vpack.c.bf16 %v9189_v42, %v9187_v55  ;;  %5209 = vmatpush1.bf16.msra.mxu0 %v10277_v62  ;;  %5475 = vmatpush1.bf16.msra.mxu1 %v10289_v27  ;;  %v10306_v62 = vld [vmem:[%s14535_s9 + $0x26c] ss:$16 sps:$4 sm:$0xff]   ;;  %v10286_v23 = vld [vmem:[%s14535_s9 + $0x260] ss:$16 sps:$4 sm:$0xff]  }
 0x54e   : > { %v12997_v31 = vpack.c.bf16 %v9150_v19, %v9148_v26  ;;  %v12999_v21 = vpack.c.bf16 %v9190_v56, %v9188_v48  ;;  %v10806_v39 = vpop.eup %10805  ;;  %5210 = vmatprep.subr.bf16.mxu0 %v10282_v35  ;;  %5476 = vmatprep.subr.bf16.mxu1 %v10297_v40  ;;  %v10288_v56 = vld [vmem:[%s14535_s9 + $0x264] ss:$16 sps:$4 sm:$0xff]  }
 0x54f   : > { %v4057_v20 = vmin.bf16 %v14552_v6, %v12984_v14  ;;  %v10808_v7 = vpop.eup %10807  ;;  %v4209_v59 = vsub.bf16 %v10806_v39, %v14548_v17  ;;  %v10294_v39 = vld [vmem:[%s14535_s9 + $0x284] ss:$16 sps:$4 sm:$0xff]   ;;  %vm4017_vm13 = vcmp.gt.bf16.partialorder %v12984_v14, 0 }
 0x550   : > { %v4058_v8 = vmin.bf16 %v14552_v6, %v12997_v31  ;;  %v3640_v49 = vpop.f32.mrb[56].mxu0  ;;  %v3906_v51 = vpop.f32.mrb[136].mxu1  ;;  %v4210_v33 = vsub.bf16 %v10808_v7, %v14548_v17  ;;  %v10304_v7 = vld [vmem:[%s14535_s9 + $0x268] ss:$16 sps:$4 sm:$0xff]   ;;  %vm4018_vm12 = vcmp.gt.bf16.partialorder %v12997_v31, 0 }
 0x551   : > { %v4122_v13 = vmul.bf16 1069105081, %v4057_v20  ;;  %v3642_v57 = vpop.f32.mrb[57].mxu0  ;;  %v3908_v2 = vpop.f32.mrb[137].mxu1  ;;  %v9151_v22 = vadd.f32 %v3640_v49, %v12895_v25  ;;  %v9191_v0 = vadd.f32 %v3906_v51, %v12898_v12  ;;  %5211 = vmatpush1.bf16.msra.mxu0 %v10280_v43  ;;  %5477 = vmatpush1.bf16.msra.mxu1 %v10295_v61 }
 0x552   : > { %v4125_v53 = vmul.bf16 1069105081, %v4058_v8  ;;  %v3644_v60 = vpop.f32.mrb[58].mxu0  ;;  %v3910_v24 = vpop.f32.mrb[138].mxu1  ;;  %v9152_v37 = vadd.f32 %v3642_v57, %v12901_v54  ;;  %v9192_v26 = vadd.f32 %v3908_v2, %v12904_v29  ;;  %v4250_v19 = vsel %vm4010_vm8, %v12938_v32, %v4210_v33  ;;  %5212 = vmatprep.subr.bf16.mxu0 %v10285_v3  ;;  %5478 = vmatprep.subr.bf16.mxu1 %v10300_v9  ;;  %v10312_v8 = vld [vmem:[%s14535_s9 + $0x28c] ss:$16 sps:$4 sm:$0xff]  }
 0x553   : > { %v9153_v16 = vadd.f32 %v3644_v60, %v12895_v25  ;;  %v9193_v55 = vadd.f32 %v3910_v24, %v12898_v12  ;;  %v3646_v30 = vpop.f32.mrb[59].mxu0  ;;  %v3912_v63 = vpop.f32.mrb[139].mxu1  ;;  %10813 = vpow.bf16 %v4122_v13  ;;  %5117 = vmatprep.mubr.bf16.mxu0 %v4250_v19  ;;  %5383 = vmatprep.mubr.bf16.mxu1 %v4250_v19  ;;  %v4249_v32 = vsel %vm4009_vm9, %v12934_v50, %v4209_v59  ;;  %v10292_v33 = vld [vmem:[%s14535_s9 + $0x280] ss:$16 sps:$4 sm:$0xff]   ;;  %v10318_v19 = vld [vmem:[%s14535_s9 + $0x2ac] ss:$16 sps:$4 sm:$0xff]  }
 0x554   : > { %v9154_v41 = vadd.f32 %v3646_v30, %v12901_v54  ;;  %v9194_v42 = vadd.f32 %v3912_v63, %v12904_v29  ;;  %10815 = vpow.bf16 %v4125_v53  ;;  %5118 = vmatmul.mubr.bf16.gmra.mrb[84].mxu0 %v4249_v32  ;;  %5384 = vmatmul.mubr.bf16.gmra.mrb[164].mxu1 %v4249_v32 }
 0x555   : > { %v13038_v46 = vpack.c.bf16 %v9153_v16, %v9151_v22  ;;  %v13040_v48 = vpack.c.bf16 %v9193_v55, %v9191_v0  ;;  %5213 = vmatpush1.bf16.msra.mxu0 %v10283_v44  ;;  %5479 = vmatpush1.bf16.msra.mxu1 %v10298_v45  ;;  %v10303_v45 = vld [vmem:[%s14535_s9 + $0x2a4] ss:$16 sps:$4 sm:$0xff]  }
 0x556   : > { %v13051_v27 = vpack.c.bf16 %v9154_v41, %v9152_v37  ;;  %v13053_v28 = vpack.c.bf16 %v9194_v42, %v9192_v26  ;;  %v10810_v35 = vpop.eup %10809  ;;  %5214 = vmatprep.subr.bf16.mxu0 %v10288_v56  ;;  %5480 = vmatprep.subr.bf16.mxu1 %v10306_v62  ;;  %v10310_v26 = vld [vmem:[%s14535_s9 + $0x288] ss:$16 sps:$4 sm:$0xff]  }
 0x557   : > { %v4061_v40 = vmin.bf16 %v14552_v6, %v13038_v46  ;;  %v10812_v20 = vpop.eup %10811  ;;  %v4213_v22 = vsub.bf16 %v10810_v35, %v14548_v17  ;;  %vm4021_vm15 = vcmp.gt.bf16.partialorder %v13038_v46, 0 }
 0x558   : > { %v4062_v43 = vmin.bf16 %v14552_v6, %v13051_v27  ;;  %v3650_v50 = vpop.f32.mrb[60].mxu0  ;;  %v3916_v3 = vpop.f32.mrb[140].mxu1  ;;  %v4214_v16 = vsub.bf16 %v10812_v20, %v14548_v17  ;;  %vm4022_vm14 = vcmp.gt.bf16.partialorder %v13051_v27, 0 }
 0x559   : > { %v4134_v49 = vmul.bf16 1069105081, %v4061_v40  ;;  %v3652_v51 = vpop.f32.mrb[61].mxu0  ;;  %v3918_v61 = vpop.f32.mrb[141].mxu1  ;;  %v9155_v13 = vadd.f32 %v3650_v50, %v12895_v25  ;;  %v9195_v57 = vadd.f32 %v3916_v3, %v12898_v12  ;;  %5215 = vmatpush1.bf16.msra.mxu0 %v10286_v23  ;;  %5481 = vmatpush1.bf16.msra.mxu1 %v10304_v7  ;;  %v10301_v40 = vld [vmem:[%s14535_s9 + $0x2a0] ss:$16 sps:$4 sm:$0xff]  }
 0x55a   : > { %v4137_v9 = vmul.bf16 1069105081, %v4062_v43  ;;  %v3654_v2 = vpop.f32.mrb[62].mxu0  ;;  %v3920_v53 = vpop.f32.mrb[142].mxu1  ;;  %v9156_v0 = vadd.f32 %v3652_v51, %v12901_v54  ;;  %v9196_v55 = vadd.f32 %v3918_v61, %v12904_v29  ;;  %v4254_v44 = vsel %vm4014_vm10, %v12958_v5, %v4214_v16  ;;  %5216 = vmatprep.subr.bf16.mxu0 %v10294_v39  ;;  %5482 = vmatprep.subr.bf16.mxu1 %v10312_v8  ;;  %v10316_v23 = vld [vmem:[%s14535_s9 + $0x2a8] ss:$16 sps:$4 sm:$0xff]  }
 0x55b   : > { %v9157_v60 = vadd.f32 %v3654_v2, %v12895_v25  ;;  %v9197_v24 = vadd.f32 %v3920_v53, %v12898_v12  ;;  %v3656_v59 = vpop.f32.mrb[63].mxu0  ;;  %v3922_v37 = vpop.f32.mrb[143].mxu1  ;;  %10817 = vpow.bf16 %v4134_v49  ;;  %5127 = vmatprep.mubr.bf16.mxu0 %v4254_v44  ;;  %5393 = vmatprep.mubr.bf16.mxu1 %v4254_v44  ;;  %v4253_v5 = vsel %vm4013_vm11, %v12954_v10, %v4213_v22  ;;  %v10309_v50 = vld [vmem:[%s14535_s9 + $0x2c4] ss:$16 sps:$4 sm:$0xff]   ;;  %v10324_v3 = vld [vmem:[%s14535_s9 + $0x2cc] ss:$16 sps:$4 sm:$0xff]  }
 0x55c   : > { %v9158_v30 = vadd.f32 %v3656_v59, %v12901_v54  ;;  %v9198_v63 = vadd.f32 %v3922_v37, %v12904_v29  ;;  %10819 = vpow.bf16 %v4137_v9  ;;  %5128 = vmatmul.mubr.bf16.gmra.mrb[88].mxu0 %v4253_v5  ;;  %5394 = vmatmul.mubr.bf16.gmra.mrb[168].mxu1 %v4253_v5  ;;  %vm4008_vm10 = vcmp.gt.bf16.partialorder %v12920_v38, 0 }
 0x55d   : > { %v13092_v41 = vpack.c.bf16 %v9157_v60, %v9155_v13  ;;  %v13094_v42 = vpack.c.bf16 %v9197_v24, %v9195_v57  ;;  %5217 = vmatpush1.bf16.msra.mxu0 %v10292_v33  ;;  %5483 = vmatpush1.bf16.msra.mxu1 %v10310_v26  ;;  %vm4007_vm11 = vcmp.gt.bf16.partialorder %v12916_v11, 0 }
 0x55e   : > { %v13105_v56 = vpack.c.bf16 %v9158_v30, %v9156_v0  ;;  %v13107_v62 = vpack.c.bf16 %v9198_v63, %v9196_v55  ;;  %v10814_v32 = vpop.eup %10813  ;;  %5218 = vmatprep.subr.bf16.mxu0 %v10303_v45  ;;  %5484 = vmatprep.subr.bf16.mxu1 %v10318_v19  ;;  %v10307_v30 = vld [vmem:[%s14535_s9 + $0x2c0] ss:$16 sps:$4 sm:$0xff]   ;;  %v10322_v63 = vld [vmem:[%s14535_s9 + $0x2c8] ss:$16 sps:$4 sm:$0xff]   ;;  %v10315_v45 = vld [vmem:[%s14535_s9 + $0x2e4] ss:$16 sps:$4 sm:$0xff]  }
 0x55f   : > { %v4065_v35 = vmin.bf16 %v14552_v6, %v13092_v41  ;;  %v10816_v39 = vpop.eup %10815  ;;  %v4217_v2 = vsub.bf16 %v10814_v32, %v14548_v17  ;;  %v10327_v19 = vld [vmem:[%s14535_s9 + $0x2ec] ss:$16 sps:$4 sm:$0xff]   ;;  %vm4025_vm1 = vcmp.gt.bf16.partialorder %v13092_v41, 0 }
 0x560   : > { %v4066_v20 = vmin.bf16 %v14552_v6, %v13105_v56  ;;  %v3660_v43 = vpop.f32.mrb[64].mxu0  ;;  %v3926_v10 = vpop.f32.mrb[144].mxu1  ;;  %v4218_v59 = vsub.bf16 %v10816_v39, %v14548_v17  ;;  %v10325_v39 = vld [vmem:[%s14535_s9 + $0x2e8] ss:$16 sps:$4 sm:$0xff]   ;;  %vm4026_vm0 = vcmp.gt.bf16.partialorder %v13105_v56, 0 }
 0x561   : > { %v4146_v7 = vmul.bf16 1069105081, %v4065_v35  ;;  %v3662_v8 = vpop.f32.mrb[65].mxu0  ;;  %v3928_v49 = vpop.f32.mrb[145].mxu1  ;;  %v9159_v61 = vadd.f32 %v3660_v43, %v12895_v25  ;;  %v9199_v9 = vadd.f32 %v3926_v10, %v12898_v12  ;;  %5219 = vmatpush1.bf16.msra.mxu0 %v10301_v40  ;;  %5485 = vmatpush1.bf16.msra.mxu1 %v10316_v23  ;;  %v10313_v23 = vld [vmem:[%s14535_s9 + $0x2e0] ss:$16 sps:$4 sm:$0xff]  }
 0x562   : > { %v4149_v51 = vmul.bf16 1069105081, %v4066_v20  ;;  %v3664_v13 = vpop.f32.mrb[66].mxu0  ;;  %v3930_v57 = vpop.f32.mrb[146].mxu1  ;;  %v9160_v53 = vadd.f32 %v3662_v8, %v12901_v54  ;;  %v9200_v37 = vadd.f32 %v3928_v49, %v12904_v29  ;;  %v4258_v44 = vsel %vm4018_vm12, %v12997_v31, %v4218_v59  ;;  %5220 = vmatprep.subr.bf16.mxu0 %v10309_v50  ;;  %5486 = vmatprep.subr.bf16.mxu1 %v10324_v3  ;;  %v10321_v50 = vld [vmem:[%s14535_s9 + $0x304] ss:$16 sps:$4 sm:$0xff]  }
 0x563   : > { %v9161_v22 = vadd.f32 %v3664_v13, %v12895_v25  ;;  %v9201_v0 = vadd.f32 %v3930_v57, %v12898_v12  ;;  %v3666_v60 = vpop.f32.mrb[67].mxu0  ;;  %v3932_v24 = vpop.f32.mrb[147].mxu1  ;;  %10821 = vpow.bf16 %v4146_v7  ;;  %5137 = vmatprep.mubr.bf16.mxu0 %v4258_v44  ;;  %5403 = vmatprep.mubr.bf16.mxu1 %v4258_v44  ;;  %v4257_v31 = vsel %vm4017_vm13, %v12984_v14, %v4217_v2  ;;  %v10333_v3 = vld [vmem:[%s14535_s9 + $0x30c] ss:$16 sps:$4 sm:$0xff]  }
 0x564   : > { %v9162_v16 = vadd.f32 %v3666_v60, %v12901_v54  ;;  %v9202_v55 = vadd.f32 %v3932_v24, %v12904_v29  ;;  %10823 = vpow.bf16 %v4149_v51  ;;  %5138 = vmatmul.mubr.bf16.gmra.mrb[92].mxu0 %v4257_v31  ;;  %5404 = vmatmul.mubr.bf16.gmra.mrb[172].mxu1 %v4257_v31  ;;  %v10330_v31 = vld [vmem:[%s14535_s9 + $0x324] ss:$16 sps:$4 sm:$0xff]   ;;  %vm4012_vm12 = vcmp.gt.bf16.partialorder %v12940_v52, 0 }
 0x565   : > { %v13146_v33 = vpack.c.bf16 %v9161_v22, %v9159_v61  ;;  %v13148_v26 = vpack.c.bf16 %v9201_v0, %v9199_v9  ;;  %5221 = vmatpush1.bf16.msra.mxu0 %v10307_v30  ;;  %5487 = vmatpush1.bf16.msra.mxu1 %v10322_v63  ;;  %v10319_v30 = vld [vmem:[%s14535_s9 + $0x300] ss:$16 sps:$4 sm:$0xff]   ;;  %v10331_v63 = vld [vmem:[%s14535_s9 + $0x308] ss:$16 sps:$4 sm:$0xff]   ;;  %vm4011_vm13 = vcmp.gt.bf16.partialorder %v12936_v1, 0 }
 0x566   : > { %v13159_v5 = vpack.c.bf16 %v9162_v16, %v9160_v53  ;;  %v13161_v32 = vpack.c.bf16 %v9202_v55, %v9200_v37  ;;  %v10818_v35 = vpop.eup %10817  ;;  %5222 = vmatprep.subr.bf16.mxu0 %v10315_v45  ;;  %5488 = vmatprep.subr.bf16.mxu1 %v10327_v19 }
 0x567   : > { %v4069_v40 = vmin.bf16 %v14552_v6, %v13146_v33  ;;  %v10820_v20 = vpop.eup %10819  ;;  %v4221_v2 = vsub.bf16 %v10818_v35, %v14548_v17  ;;  %v10339_v35 = vld [vmem:[%s14535_s9 + $0x32c] ss:$16 sps:$4 sm:$0xff]   ;;  %vm4029_vm3 = vcmp.gt.bf16.partialorder %v13146_v33, 0 }
 0x568   : > { %v4070_v43 = vmin.bf16 %v14552_v6, %v13159_v5  ;;  %v3670_v10 = vpop.f32.mrb[68].mxu0  ;;  %v3936_v14 = vpop.f32.mrb[148].mxu1  ;;  %v4222_v59 = vsub.bf16 %v10820_v20, %v14548_v17  ;;  %vm4030_vm2 = vcmp.gt.bf16.partialorder %v13159_v5, 0 }
 0x569   : > { %v4158_v7 = vmul.bf16 1069105081, %v4069_v40  ;;  %v3672_v8 = vpop.f32.mrb[69].mxu0  ;;  %v3938_v49 = vpop.f32.mrb[149].mxu1  ;;  %v9163_v61 = vadd.f32 %v3670_v10, %v12895_v25  ;;  %v9203_v9 = vadd.f32 %v3936_v14, %v12898_v12  ;;  %5223 = vmatpush1.bf16.msra.mxu0 %v10313_v23  ;;  %5489 = vmatpush1.bf16.msra.mxu1 %v10325_v39  ;;  %v10337_v10 = vld [vmem:[%s14535_s9 + $0x328] ss:$16 sps:$4 sm:$0xff]  }
 0x56a   : > { %v4161_v51 = vmul.bf16 1069105081, %v4070_v43  ;;  %v3674_v13 = vpop.f32.mrb[70].mxu0  ;;  %v3940_v57 = vpop.f32.mrb[150].mxu1  ;;  %v9164_v53 = vadd.f32 %v3672_v8, %v12901_v54  ;;  %v9204_v37 = vadd.f32 %v3938_v49, %v12904_v29  ;;  %v4262_v19 = vsel %vm4022_vm14, %v13051_v27, %v4222_v59  ;;  %5224 = vmatprep.subr.bf16.mxu0 %v10321_v50  ;;  %5490 = vmatprep.subr.bf16.mxu1 %v10333_v3  ;;  %v10328_v43 = vld [vmem:[%s14535_s9 + $0x320] ss:$16 sps:$4 sm:$0xff]  }
 0x56b   : > { %v9165_v22 = vadd.f32 %v3674_v13, %v12895_v25  ;;  %v9205_v0 = vadd.f32 %v3940_v57, %v12898_v12  ;;  %v3676_v60 = vpop.f32.mrb[71].mxu0  ;;  %v3942_v24 = vpop.f32.mrb[151].mxu1  ;;  %10825 = vpow.bf16 %v4158_v7  ;;  %5147 = vmatprep.mubr.bf16.mxu0 %v4262_v19  ;;  %5413 = vmatprep.mubr.bf16.mxu1 %v4262_v19  ;;  %v4261_v27 = vsel %vm4021_vm15, %v13038_v46, %v4221_v2  ;;  %v10336_v7 = vld [vmem:[%s14535_s9 + $0x344] ss:$16 sps:$4 sm:$0xff]   ;;  %v10345_v8 = vld [vmem:[%s14535_s9 + $0x34c] ss:$16 sps:$4 sm:$0xff]  }
 0x56c   : > { %v9166_v16 = vadd.f32 %v3676_v60, %v12901_v54  ;;  %v9206_v55 = vadd.f32 %v3942_v24, %v12904_v29  ;;  %10827 = vpow.bf16 %v4161_v51  ;;  %5148 = vmatmul.mubr.bf16.gmra.mrb[96].mxu0 %v4261_v27  ;;  %5414 = vmatmul.mubr.bf16.gmra.mrb[176].mxu1 %v4261_v27  ;;  %v10334_v19 = vld [vmem:[%s14535_s9 + $0x340] ss:$16 sps:$4 sm:$0xff]   ;;  %vm4016_vm14 = vcmp.gt.bf16.partialorder %v12960_v47, 0 }
 0x56d   : > { %v13200_v44 = vpack.c.bf16 %v9165_v22, %v9163_v61  ;;  %v13202_v45 = vpack.c.bf16 %v9205_v0, %v9203_v9  ;;  %5225 = vmatpush1.bf16.msra.mxu0 %v10319_v30  ;;  %5491 = vmatpush1.bf16.msra.mxu1 %v10331_v63  ;;  %vm4015_vm15 = vcmp.gt.bf16.partialorder %v12956_v15, 0 }
 0x56e   : > { %v13213_v40 = vpack.c.bf16 %v9166_v16, %v9164_v53  ;;  %v13215_v23 = vpack.c.bf16 %v9206_v55, %v9204_v37  ;;  %v10822_v39 = vpop.eup %10821  ;;  %5226 = vmatprep.subr.bf16.mxu0 %v10330_v31  ;;  %5492 = vmatprep.subr.bf16.mxu1 %v10339_v35  ;;  %v10343_v31 = vld [vmem:[%s14535_s9 + $0x348] ss:$16 sps:$4 sm:$0xff]  }
 0x56f   : > { %v4073_v20 = vmin.bf16 %v14552_v6, %v13200_v44  ;;  %v10824_v14 = vpop.eup %10823  ;;  %v4225_v22 = vsub.bf16 %v10822_v39, %v14548_v17  ;;  %vm4033_vm5 = vcmp.gt.bf16.partialorder %v13200_v44, 0 }
 0x570   : > { %v4074_v50 = vmin.bf16 %v14552_v6, %v13213_v40  ;;  %v3680_v3 = vpop.f32.mrb[72].mxu0  ;;  %v3946_v46 = vpop.f32.mrb[152].mxu1  ;;  %v4226_v16 = vsub.bf16 %v10824_v14, %v14548_v17  ;;  %vm4034_vm4 = vcmp.gt.bf16.partialorder %v13213_v40, 0 }
 0x571   : > { %v4170_v49 = vmul.bf16 1069105081, %v4073_v20  ;;  %v3682_v51 = vpop.f32.mrb[73].mxu0  ;;  %v3948_v61 = vpop.f32.mrb[153].mxu1  ;;  %v9167_v13 = vadd.f32 %v3680_v3, %v12895_v25  ;;  %v9207_v57 = vadd.f32 %v3946_v46, %v12898_v12  ;;  %5227 = vmatpush1.bf16.msra.mxu0 %v10328_v43  ;;  %5493 = vmatpush1.bf16.msra.mxu1 %v10337_v10  ;;  %v10342_v20 = vld [vmem:[%s14535_s9 + $0x364] ss:$16 sps:$4 sm:$0xff]  }
 0x572   : > { %v4173_v9 = vmul.bf16 1069105081, %v4074_v50  ;;  %v3684_v2 = vpop.f32.mrb[74].mxu0  ;;  %v3950_v53 = vpop.f32.mrb[154].mxu1  ;;  %v9168_v0 = vadd.f32 %v3682_v51, %v12901_v54  ;;  %v9208_v55 = vadd.f32 %v3948_v61, %v12904_v29  ;;  %v4266_v39 = vsel %vm4026_vm0, %v13105_v56, %v4226_v16  ;;  %5228 = vmatprep.subr.bf16.mxu0 %v10336_v7  ;;  %5494 = vmatprep.subr.bf16.mxu1 %v10345_v8  ;;  %v10351_v43 = vld [vmem:[%s14535_s9 + $0x36c] ss:$16 sps:$4 sm:$0xff]  }
 0x573   : > { %v9169_v60 = vadd.f32 %v3684_v2, %v12895_v25  ;;  %v9209_v24 = vadd.f32 %v3950_v53, %v12898_v12  ;;  %v3686_v59 = vpop.f32.mrb[75].mxu0  ;;  %v3952_v37 = vpop.f32.mrb[155].mxu1  ;;  %10829 = vpow.bf16 %v4170_v49  ;;  %5157 = vmatprep.mubr.bf16.mxu0 %v4266_v39  ;;  %5423 = vmatprep.mubr.bf16.mxu1 %v4266_v39  ;;  %v4265_v56 = vsel %vm4025_vm1, %v13092_v41, %v4225_v22  ;;  %v10340_v46 = vld [vmem:[%s14535_s9 + $0x360] ss:$16 sps:$4 sm:$0xff]   ;;  %v10348_v7 = vld [vmem:[%s14535_s9 + $0x384] ss:$16 sps:$4 sm:$0xff]  }
 0x574   : > { %v9170_v30 = vadd.f32 %v3686_v59, %v12901_v54  ;;  %v9210_v63 = vadd.f32 %v3952_v37, %v12904_v29  ;;  %10831 = vpow.bf16 %v4173_v9  ;;  %5158 = vmatmul.mubr.bf16.gmra.mrb[100].mxu0 %v4265_v56  ;;  %5424 = vmatmul.mubr.bf16.gmra.mrb[180].mxu1 %v4265_v56  ;;  %v10349_v61 = vld [vmem:[%s14535_s9 + $0x368] ss:$16 sps:$4 sm:$0xff]   ;;  %v10354_v9 = vld [vmem:[%s14535_s9 + $0x38c] ss:$16 sps:$4 sm:$0xff]   ;;  %v10346_v56 = vld [vmem:[%s14535_s9 + $0x380] ss:$16 sps:$4 sm:$0xff]  }
 0x575   : > { %v13254_v35 = vpack.c.bf16 %v9169_v60, %v9167_v13  ;;  %v13256_v27 = vpack.c.bf16 %v9209_v24, %v9207_v57  ;;  %5229 = vmatpush1.bf16.msra.mxu0 %v10334_v19  ;;  %5495 = vmatpush1.bf16.msra.mxu1 %v10343_v31  ;;  %v4048_v13 = vmin.bf16 %v14552_v6, %v12920_v38  ;;  %vm4020_vm0 = vcmp.gt.bf16.partialorder %v12999_v21, 0 }
 0x576   : > { %v13267_v10 = vpack.c.bf16 %v9170_v30, %v9168_v0  ;;  %v13269_v14 = vpack.c.bf16 %v9210_v63, %v9208_v55  ;;  %v10826_v50 = vpop.eup %10825  ;;  %5230 = vmatprep.subr.bf16.mxu0 %v10342_v20  ;;  %5496 = vmatprep.subr.bf16.mxu1 %v10351_v43  ;;  %vm4019_vm1 = vcmp.gt.bf16.partialorder %v12986_v18, 0 }
 0x577   : > { %v4077_v3 = vmin.bf16 %v14552_v6, %v13254_v35  ;;  %v10828_v8 = vpop.eup %10827  ;;  %v4229_v37 = vsub.bf16 %v10826_v50, %v14548_v17  ;;  %vm4037_vm7 = vcmp.gt.bf16.partialorder %v13254_v35, 0 }
 0x578   : > { %v4078_v49 = vmin.bf16 %v14552_v6, %v13267_v10  ;;  %v3690_v51 = vpop.f32.mrb[76].mxu0  ;;  %v3956_v41 = vpop.f32.mrb[156].mxu1  ;;  %v4230_v31 = vsub.bf16 %v10828_v8, %v14548_v17  ;;  %vm4038_vm6 = vcmp.gt.bf16.partialorder %v13267_v10, 0 }
 0x579   : > { %v4182_v57 = vmul.bf16 1069105081, %v4077_v3  ;;  %v3692_v2 = vpop.f32.mrb[77].mxu0  ;;  %v3958_v53 = vpop.f32.mrb[157].mxu1  ;;  %v9171_v0 = vadd.f32 %v3690_v51, %v12895_v25  ;;  %v9211_v60 = vadd.f32 %v3956_v41, %v12898_v12  ;;  %5231 = vmatpush1.bf16.msra.mxu0 %v10340_v46  ;;  %5497 = vmatpush1.bf16.msra.mxu1 %v10349_v61  ;;  %v10360_v3 = vld [vmem:[%s14535_s9 + $0x3ac] ss:$16 sps:$4 sm:$0xff]  }
 0x57a   : > { %v4185_v22 = vmul.bf16 1069105081, %v4078_v49  ;;  %v3694_v24 = vpop.f32.mrb[78].mxu0  ;;  %v3960_v59 = vpop.f32.mrb[158].mxu1  ;;  %v9172_v16 = vadd.f32 %v3692_v2, %v12901_v54  ;;  %v9212_v39 = vadd.f32 %v3958_v53, %v12904_v29  ;;  %5232 = vmatprep.subr.bf16.mxu0 %v10348_v7  ;;  %5498 = vmatprep.subr.bf16.mxu1 %v10354_v9  ;;  %v4095_v49 = vmul.bf16 1069105081, %v4048_v13 }
 0x57b   : > { %v9173_v55 = vadd.f32 %v3694_v24, %v12895_v25  ;;  %v9213_v30 = vadd.f32 %v3960_v59, %v12898_v12  ;;  %v3696_v63 = vpop.f32.mrb[79].mxu0  ;;  %v3962_v19 = vpop.f32.mrb[159].mxu1  ;;  %10833 = vpow.bf16 %v4182_v57  ;;  %v10352_v25 = vld [vmem:[%s14535_s9 + $0x388] ss:$16 sps:$4 sm:$0xff]   ;;  %v10355_v9 = vld [vmem:[%s14535_s9 + $0x3a0] ss:$16 sps:$4 sm:$0xff]   ;;  %v4047_v24 = vmin.bf16 %v14552_v6, %v12916_v11 }
 0x57c   : > { %v9174_v20 = vadd.f32 %v3696_v63, %v12901_v54  ;;  %v9214_v43 = vadd.f32 %v3962_v19, %v12904_v29  ;;  %10835 = vpow.bf16 %v4185_v22  ;;  %v4270_v54 = vsel %vm4030_vm2, %v13159_v5, %v4230_v31  ;;  %v10357_v29 = vld [vmem:[%s14535_s9 + $0x3a4] ss:$16 sps:$4 sm:$0xff]   ;;  %v10358_v13 = vld [vmem:[%s14535_s9 + $0x3a8] ss:$16 sps:$4 sm:$0xff]  }
 0x57d   : > { %v13310_v12 = vpack.c.bf16 %v9173_v55, %v9171_v0  ;;  %v13312_v50 = vpack.c.bf16 %v9213_v30, %v9211_v60  ;;  %5167 = vmatprep.mubr.bf16.mxu0 %v4270_v54  ;;  %5433 = vmatprep.mubr.bf16.mxu1 %v4270_v54  ;;  %v4269_v5 = vsel %vm4029_vm3, %v13146_v33, %v4229_v37  ;;  %v10363_v2 = vld [vmem:[%s14535_s9 + $0x3c4] ss:$16 sps:$4 sm:$0xff]   ;;  %v10366_v0 = vld [vmem:[%s14535_s9 + $0x3cc] ss:$16 sps:$4 sm:$0xff]   ;;  %10837 = vpow.bf16 %v4095_v49  ;;  %v10361_v37 = vld [vmem:[%s14535_s9 + $0x3c0] ss:$16 sps:$4 sm:$0xff]  }
 0x57e   : > { %v13323_v46 = vpack.c.bf16 %v9174_v20, %v9172_v16  ;;  %v13325_v8 = vpack.c.bf16 %v9214_v43, %v9212_v39  ;;  %v10830_v7 = vpop.eup %10829  ;;  %5168 = vmatmul.mubr.bf16.gmra.mrb[104].mxu0 %v4269_v5  ;;  %5434 = vmatmul.mubr.bf16.gmra.mrb[184].mxu1 %v4269_v5  ;;  %v4052_v59 = vmin.bf16 %v14552_v6, %v12940_v52  ;;  %v10369_v55 = vld [vmem:[%s14535_s9 + $0x3e4] ss:$16 sps:$4 sm:$0xff]   ;;  %v10372_v30 = vld [vmem:[%s14535_s9 + $0x3ec] ss:$16 sps:$4 sm:$0xff]   ;;  %v4092_v31 = vmul.bf16 1069105081, %v4047_v24 }
 0x57f   : > { %v4081_v51 = vmin.bf16 %v14552_v6, %v13310_v12  ;;  %v10832_v41 = vpop.eup %10831  ;;  %5233 = vmatpush1.bf16.msra.mxu0 %v10346_v56  ;;  %5499 = vmatpush1.bf16.msra.mxu1 %v10352_v25  ;;  %v4233_v22 = vsub.bf16 %v10830_v7, %v14548_v17  ;;  %v10370_v43 = vld [vmem:[%s14535_s9 + $0x3e8] ss:$16 sps:$4 sm:$0xff]   ;;  %v10387_v54 = vld [vmem:[#allocation9 + $0xc] ss:$16 sps:$4 sm:$0xff]   ;;  %v4056_v5 = vmin.bf16 %v14552_v6, %v12960_v47  ;;  %vm4041_vm9 = vcmp.gt.bf16.partialorder %v13310_v12, 0 }
 0x580   : > { %v4082_v61 = vmin.bf16 %v14552_v6, %v13323_v46  ;;  %v4234_v33 = vsub.bf16 %v10832_v41, %v14548_v17  ;;  %5234 = vmatprep.subr.bf16.mxu0 %v10357_v29  ;;  %5500 = vmatprep.subr.bf16.mxu1 %v10360_v3  ;;  %v4107_v39 = vmul.bf16 1069105081, %v4052_v59  ;;  %v10375_v25 = vld [vmem:[#allocation9 + $0x4] ss:$16 sps:$4 sm:$0xff]   ;;  %v4051_v3 = vmin.bf16 %v14552_v6, %v12936_v1 }
 0x581   : > { %v4194_v57 = vmul.bf16 1069105081, %v4081_v51  ;;  %v4273_v16 = vsel %vm4033_vm5, %v13200_v44, %v4233_v22  ;;  %v10367_v44 = vld [vmem:[%s14535_s9 + $0x3e0] ss:$16 sps:$4 sm:$0xff]   ;;  %vm4042_vm8 = vcmp.gt.bf16.partialorder %v13323_v46, 0  ;;  %vm4024_vm2 = vcmp.gt.bf16.partialorder %v13053_v28, 0 }
 0x582   : > { %v4197_v53 = vmul.bf16 1069105081, %v4082_v61  ;;  %v4274_v60 = vsel %vm4034_vm4, %v13213_v40, %v4234_v33  ;;  %v10364_v40 = vld [vmem:[%s14535_s9 + $0x3c8] ss:$16 sps:$4 sm:$0xff]   ;;  %v4104_v41 = vmul.bf16 1069105081, %v4051_v3  ;;  %v4068_v3 = vmin.bf16 %v14552_v6, %v13107_v62 }
 0x583   : > { %10839 = vpow.bf16 %v4194_v57  ;;  %5177 = vmatprep.mubr.bf16.mxu0 %v4274_v60  ;;  %5443 = vmatprep.mubr.bf16.mxu1 %v4274_v60  ;;  %v4119_v61 = vmul.bf16 1069105081, %v4056_v5  ;;  %v10379_v5 = vld [vmem:[#allocation9 + $0x40] ss:$16 sps:$4 sm:$0xff]   ;;  %vm4023_vm3 = vcmp.gt.bf16.partialorder %v13040_v48, 0  ;;  %vm4028_vm4 = vcmp.gt.bf16.partialorder %v13107_v62, 0 }
 0x584   : > { %10841 = vpow.bf16 %v4197_v53  ;;  %5235 = vmatpush1.bf16.msra.mxu0 %v10355_v9  ;;  %5501 = vmatpush1.bf16.msra.mxu1 %v10358_v13  ;;  %vm4027_vm5 = vcmp.gt.bf16.partialorder %v13094_v42, 0 }
 0x585   : > { %5236 = vmatprep.subr.bf16.mxu0 %v10363_v2  ;;  %5502 = vmatprep.subr.bf16.mxu1 %v10366_v0  ;;  %10843 = vpow.bf16 %v4092_v31  ;;  %v4060_v2 = vmin.bf16 %v14552_v6, %v12999_v21 }
 0x586   : > { %v10834_v63 = vpop.eup %10833  ;;  %5178 = vmatmul.mubr.bf16.gmra.mrb[108].mxu0 %v4273_v16  ;;  %5444 = vmatmul.mubr.bf16.gmra.mrb[188].mxu1 %v4273_v16  ;;  %10845 = vpow.bf16 %v4107_v39  ;;  %v10385_v16 = vld [vmem:[#allocation9 + $0x8] ss:$16 sps:$4 sm:$0xff]  }
 0x587   : > { %v10836_v19 = vpop.eup %10835  ;;  %v4237_v56 = vsub.bf16 %v10834_v63, %v14548_v17  ;;  %10847 = vpow.bf16 %v4104_v41  ;;  %v4131_v24 = vmul.bf16 1069105081, %v4060_v2  ;;  %v10393_v63 = vld [vmem:[#allocation9 + $0x2c] ss:$16 sps:$4 sm:$0xff]   ;;  %v10390_v2 = vld [vmem:[#allocation9 + $0x84] ss:$16 sps:$4 sm:$0xff]  }
 0x588   : > { %v4238_v20 = vsub.bf16 %v10836_v19, %v14548_v17  ;;  %5237 = vmatpush1.bf16.msra.mxu0 %v10361_v37  ;;  %5503 = vmatpush1.bf16.msra.mxu1 %v10364_v40  ;;  %v10838_v7 = vpop.eup %10837  ;;  %10849 = vpow.bf16 %v4119_v61  ;;  %v4064_v40 = vmin.bf16 %v14552_v6, %v13053_v28 }
 0x589   : > { %5238 = vmatprep.subr.bf16.mxu0 %v10369_v55  ;;  %5504 = vmatprep.subr.bf16.mxu1 %v10372_v30  ;;  %v4277_v49 = vsel %vm4037_vm7, %v13254_v35, %v4237_v56  ;;  %v4208_v13 = vsub.bf16 %v10838_v7, %v14548_v17  ;;  %v4055_v35 = vmin.bf16 %v14552_v6, %v12956_v15  ;;  %v10378_v30 = vld [vmem:[#allocation9 + $0x24] ss:$16 sps:$4 sm:$0xff]   ;;  %v10391_v56 = vld [vmem:[#allocation9 + $0x28] ss:$16 sps:$4 sm:$0xff]   ;;  %vm4031_vm7 = vcmp.gt.bf16.partialorder %v13148_v26, 0 }
 0x58a   : > { %v4278_v29 = vsel %vm4038_vm6, %v13267_v10, %v4238_v20  ;;  %v10394_v7 = vld [vmem:[#allocation9 + $0x48] ss:$16 sps:$4 sm:$0xff]   ;;  %vm4032_vm6 = vcmp.gt.bf16.partialorder %v13161_v32, 0 }
 0x58b   : > { %5187 = vmatprep.mubr.bf16.mxu0 %v4278_v29  ;;  %5453 = vmatprep.mubr.bf16.mxu1 %v4278_v29  ;;  %v4116_v60 = vmul.bf16 1069105081, %v4055_v35 }
 0x58c   : > { %5239 = vmatpush1.bf16.msra.mxu0 %v10367_v44  ;;  %5505 = vmatpush1.bf16.msra.mxu1 %v10370_v43  ;;  %v4143_v44 = vmul.bf16 1069105081, %v4064_v40  ;;  %v10376_v43 = vld [vmem:[#allocation9 + $0x20] ss:$16 sps:$4 sm:$0xff]  }
 0x58d   : > { %6717 = vmatprep.subr.bf16.mxu0 %v10375_v25  ;;  %6983 = vmatprep.subr.bf16.mxu1 %v10387_v54  ;;  %10851 = vpow.bf16 %v4116_v60  ;;  %v10381_v25 = vld [vmem:[#allocation9 + $0x44] ss:$16 sps:$4 sm:$0xff]   ;;  %v10396_v54 = vld [vmem:[#allocation9 + $0x4c] ss:$16 sps:$4 sm:$0xff]   ;;  %v10406_v60 = vld [vmem:[#allocation9 + $0x88] ss:$16 sps:$4 sm:$0xff]  }
 0x58e   : > { %v10840_v10 = vpop.eup %10839  ;;  %5188 = vmatmul.mubr.bf16.gmra.mrb[112].mxu0 %v4277_v49  ;;  %5454 = vmatmul.mubr.bf16.gmra.mrb[192].mxu1 %v4277_v49  ;;  %10853 = vpow.bf16 %v4131_v24 }
 0x58f   : > { %v10842_v51 = vpop.eup %10841  ;;  %v4241_v57 = vsub.bf16 %v10840_v10, %v14548_v17  ;;  %v10384_v10 = vld [vmem:[#allocation9 + $0x64] ss:$16 sps:$4 sm:$0xff]  }
 0x590   : > { %v4242_v9 = vsub.bf16 %v10842_v51, %v14548_v17  ;;  %v10844_v22 = vpop.eup %10843  ;;  %v10402_v51 = vld [vmem:[#allocation9 + $0x6c] ss:$16 sps:$4 sm:$0xff]  }
 0x591   : > { %v4281_v53 = vsel %vm4041_vm9, %v13310_v12, %v4241_v57  ;;  %v10846_v0 = vpop.eup %10845  ;;  %v4207_v59 = vsub.bf16 %v10844_v22, %v14548_v17  ;;  %v4059_v12 = vmin.bf16 %v14552_v6, %v12986_v18  ;;  %vm4035_vm9 = vcmp.gt.bf16.partialorder %v13202_v45, 0 }
 0x592   : > { %v4282_v33 = vsel %vm4042_vm8, %v13323_v46, %v4242_v9  ;;  %v4248_v46 = vsel %vm4008_vm10, %v12920_v38, %v4208_v13  ;;  %v4212_v37 = vsub.bf16 %v10846_v0, %v14548_v17  ;;  %v10373_v38 = vld [vmem:[#allocation9] ss:$16 sps:$4 sm:$0xff]   ;;  %v10848_v19 = vpop.eup %10847  ;;  %vm4036_vm8 = vcmp.gt.bf16.partialorder %v13215_v23, 0 }
 0x593   : > { %5197 = vmatprep.mubr.bf16.mxu0 %v4282_v33  ;;  %5463 = vmatprep.mubr.bf16.mxu1 %v4282_v33  ;;  %v4247_v55 = vsel %vm4007_vm11, %v12916_v11, %v4207_v59  ;;  %v10850_v39 = vpop.eup %10849  ;;  %v4128_v20 = vmul.bf16 1069105081, %v4059_v12  ;;  %v4211_v11 = vsub.bf16 %v10848_v19, %v14548_v17  ;;  %v4155_v33 = vmul.bf16 1069105081, %v4068_v3  ;;  %v10382_v13 = vld [vmem:[#allocation9 + $0x60] ss:$16 sps:$4 sm:$0xff]  }
 0x594   : > { %v4252_v31 = vsel %vm4012_vm12, %v12940_v52, %v4212_v37  ;;  %v4216_v29 = vsub.bf16 %v10850_v39, %v14548_v17  ;;  %v4063_v52 = vmin.bf16 %v14552_v6, %v13040_v48  ;;  %v10388_v0 = vld [vmem:[#allocation9 + $0x80] ss:$16 sps:$4 sm:$0xff]   ;;  %v10399_v59 = vld [vmem:[#allocation9 + $0xa4] ss:$16 sps:$4 sm:$0xff]   ;;  %v10414_v37 = vld [vmem:[#allocation9 + $0xac] ss:$16 sps:$4 sm:$0xff]  }
 0x595   : > { %10855 = vpow.bf16 %v4128_v20  ;;  %v4251_v49 = vsel %vm4011_vm13, %v12936_v1, %v4211_v11  ;;  %v10400_v1 = vld [vmem:[#allocation9 + $0x68] ss:$16 sps:$4 sm:$0xff]   ;;  %v10405_v19 = vld [vmem:[#allocation9 + $0xc4] ss:$16 sps:$4 sm:$0xff]   ;;  %v4076_v20 = vmin.bf16 %v14552_v6, %v13215_v23  ;;  %vm4040_vm10 = vcmp.gt.bf16.partialorder %v13269_v14, 0 }
 0x596   : > { %5198 = vmatmul.mubr.bf16.gmra.mrb[116].mxu0 %v4281_v53  ;;  %5464 = vmatmul.mubr.bf16.gmra.mrb[196].mxu1 %v4281_v53  ;;  %10857 = vpow.bf16 %v4143_v44  ;;  %v4256_v61 = vsel %vm4016_vm14, %v12960_v47, %v4216_v29  ;;  %v4140_v57 = vmul.bf16 1069105081, %v4063_v52  ;;  %v10408_v53 = vld [vmem:[#allocation9 + $0x8c] ss:$16 sps:$4 sm:$0xff]   ;;  %v4067_v47 = vmin.bf16 %v14552_v6, %v13094_v42  ;;  %v10403_v44 = vld [vmem:[#allocation9 + $0xc0] ss:$16 sps:$4 sm:$0xff]  }
 0x597   : > { %5240 = vmatprep.mubr.bf16.mxu0 %v4248_v46  ;;  %5506 = vmatprep.mubr.bf16.mxu1 %v4248_v46  ;;  %v4072_v46 = vmin.bf16 %v14552_v6, %v13161_v32  ;;  %v10411_v11 = vld [vmem:[#allocation9 + $0xe4] ss:$16 sps:$4 sm:$0xff]   ;;  %vm4039_vm11 = vcmp.gt.bf16.partialorder %v13256_v27, 0  ;;  %vm4044_vm12 = vcmp.gt.bf16.partialorder %v13325_v8, 0  ;;  %vm4043_vm13 = vcmp.gt.bf16.partialorder %v13312_v50, 0 }
 0x598   : > { %v10852_v41 = vpop.eup %10851  ;;  %10859 = vpow.bf16 %v4140_v57  ;;  %v10427_v57 = vld [vmem:[#allocation9 + $0x108] ss:$16 sps:$4 sm:$0xff]  }
 0x599   : > { %v10854_v9 = vpop.eup %10853  ;;  %v4215_v35 = vsub.bf16 %v10852_v41, %v14548_v17  ;;  %10861 = vpow.bf16 %v4155_v33 }
 0x59a   : > { %v4220_v22 = vsub.bf16 %v10854_v9, %v14548_v17  ;;  %v10415_v9 = vld [vmem:[#allocation9 + $0x100] ss:$16 sps:$4 sm:$0xff]  }
 0x59b   : > { %v4255_v24 = vsel %vm4015_vm15, %v12956_v15, %v4215_v35  ;;  %v10412_v15 = vld [vmem:[#allocation9 + $0xa8] ss:$16 sps:$4 sm:$0xff]  }
 0x59c   : > { %v4260_v40 = vsel %vm4020_vm0, %v12999_v21, %v4220_v22  ;;  %v4071_v21 = vmin.bf16 %v14552_v6, %v13148_v26 }
 0x59e   : > { %5241 = vmatmul.mubr.bf16.vlgmr.msra.gmra.mrb[80].mxu0 %v4247_v55  ;;  %5507 = vmatmul.mubr.bf16.vlgmr.msra.gmra.mrb[160].mxu1 %v4247_v55  ;;  %v4167_v55 = vmul.bf16 1069105081, %v4072_v46  ;;  %v4164_v3 = vmul.bf16 1069105081, %v4071_v21  ;;  %v10432_v46 = vld [vmem:[#allocation9 + $0x144] ss:$16 sps:$4 sm:$0xff]  }
 0x59f   : > { %5250 = vmatprep.mubr.bf16.mxu0 %v4252_v31  ;;  %5516 = vmatprep.mubr.bf16.mxu1 %v4252_v31  ;;  %v10420_v31 = vld [vmem:[#allocation9 + $0xcc] ss:$16 sps:$4 sm:$0xff]  }
 0x5a0   : > { %6718 = vmatpush1.bf16.msra.mxu0 %v10373_v38  ;;  %6984 = vmatpush1.bf16.msra.mxu1 %v10385_v16  ;;  %v10856_v12 = vpop.eup %10855  ;;  %v4152_v16 = vmul.bf16 1069105081, %v4067_v47  ;;  %v10424_v47 = vld [vmem:[#allocation9 + $0x120] ss:$16 sps:$4 sm:$0xff]  }
 0x5a1   : > { %6719 = vmatprep.subr.bf16.mxu0 %v10378_v30  ;;  %6985 = vmatprep.subr.bf16.mxu1 %v10393_v63  ;;  %v10858_v38 = vpop.eup %10857  ;;  %v10397_v30 = vld [vmem:[#allocation9 + $0xa0] ss:$16 sps:$4 sm:$0xff]   ;;  %v4219_v63 = vsub.bf16 %v10856_v12, %v14548_v17 }
 0x5a2   : > { %v4224_v39 = vsub.bf16 %v10858_v38, %v14548_v17  ;;  %10863 = vpow.bf16 %v4152_v16 }
 0x5a3   : > { %10865 = vpow.bf16 %v4167_v55 }
 0x5a4   : > { %6720 = vmatpush1.bf16.msra.mxu0 %v10376_v43  ;;  %6986 = vmatpush1.bf16.msra.mxu1 %v10391_v56  ;;  %v10418_v43 = vld [vmem:[#allocation9 + $0xc8] ss:$16 sps:$4 sm:$0xff]   ;;  %v4259_v56 = vsel %vm4019_vm1, %v12986_v18, %v4219_v63  ;;  %v4264_v29 = vsel %vm4024_vm2, %v13053_v28, %v4224_v39  ;;  %10867 = vpow.bf16 %v4164_v3  ;;  %v4075_v28 = vmin.bf16 %v14552_v6, %v13202_v45  ;;  %v10438_v3 = vld [vmem:[#allocation9 + $0x164] ss:$16 sps:$4 sm:$0xff]  }
 0x5a5   : > { %6721 = vmatprep.subr.bf16.mxu0 %v10381_v25  ;;  %6987 = vmatprep.subr.bf16.mxu1 %v10396_v54  ;;  %v10423_v25 = vld [vmem:[#allocation9 + $0xec] ss:$16 sps:$4 sm:$0xff]   ;;  %v10860_v54 = vpop.eup %10859  ;;  %v10421_v18 = vld [vmem:[#allocation9 + $0xe8] ss:$16 sps:$4 sm:$0xff]  }
 0x5a6   : > { %5251 = vmatmul.mubr.bf16.gmra.mrb[84].mxu0 %v4251_v49  ;;  %5517 = vmatmul.mubr.bf16.gmra.mrb[164].mxu1 %v4251_v49  ;;  %v10862_v52 = vpop.eup %10861  ;;  %v4223_v49 = vsub.bf16 %v10860_v54, %v14548_v17 }
 0x5a7   : > { %5260 = vmatprep.mubr.bf16.mxu0 %v4256_v61  ;;  %5526 = vmatprep.mubr.bf16.mxu1 %v4256_v61  ;;  %v4228_v41 = vsub.bf16 %v10862_v52, %v14548_v17  ;;  %v4080_v61 = vmin.bf16 %v14552_v6, %v13269_v14  ;;  %v10435_v52 = vld [vmem:[#allocation9 + $0x12c] ss:$16 sps:$4 sm:$0xff]  }
 0x5a8   : > { %6722 = vmatpush1.bf16.msra.mxu0 %v10379_v5  ;;  %6988 = vmatpush1.bf16.msra.mxu1 %v10394_v7  ;;  %v4179_v5 = vmul.bf16 1069105081, %v4076_v20  ;;  %v10409_v7 = vld [vmem:[#allocation9 + $0xe0] ss:$16 sps:$4 sm:$0xff]   ;;  %v4263_v33 = vsel %vm4023_vm3, %v13040_v48, %v4223_v49 }
 0x5a9   : > { %6723 = vmatprep.subr.bf16.mxu0 %v10384_v10  ;;  %6989 = vmatprep.subr.bf16.mxu1 %v10402_v51  ;;  %v10417_v10 = vld [vmem:[#allocation9 + $0x104] ss:$16 sps:$4 sm:$0xff]   ;;  %v10429_v51 = vld [vmem:[#allocation9 + $0x10c] ss:$16 sps:$4 sm:$0xff]   ;;  %v4268_v35 = vsel %vm4028_vm4, %v13107_v62, %v4228_v41  ;;  %v4191_v22 = vmul.bf16 1069105081, %v4080_v61  ;;  %v4084_v62 = vmin.bf16 %v14552_v6, %v13325_v8 }
 0x5aa   : > { %10869 = vpow.bf16 %v4179_v5  ;;  %v10439_v5 = vld [vmem:[#allocation9 + $0x148] ss:$16 sps:$4 sm:$0xff]   ;;  %v10442_v49 = vld [vmem:[#allocation9 + $0x180] ss:$16 sps:$4 sm:$0xff]   ;;  %v10456_v61 = vld [vmem:[#allocation9 + $0x1ac] ss:$16 sps:$4 sm:$0xff]  }
 0x5ab   : > { %v4203_v16 = vmul.bf16 1069105081, %v4084_v62  ;;  %v10451_v41 = vld [vmem:[#allocation9 + $0x1a0] ss:$16 sps:$4 sm:$0xff]  }
 0x5ac   : > { %6724 = vmatpush1.bf16.msra.mxu0 %v10382_v13  ;;  %6990 = vmatpush1.bf16.msra.mxu1 %v10400_v1  ;;  %v10426_v13 = vld [vmem:[#allocation9 + $0x124] ss:$16 sps:$4 sm:$0xff]  }
 0x5ad   : > { %6725 = vmatprep.subr.bf16.mxu0 %v10390_v2  ;;  %6991 = vmatprep.subr.bf16.mxu1 %v10408_v53  ;;  %v10864_v1 = vpop.eup %10863  ;;  %v4176_v53 = vmul.bf16 1069105081, %v4075_v28  ;;  %v10453_v28 = vld [vmem:[#allocation9 + $0x1a4] ss:$16 sps:$4 sm:$0xff]  }
 0x5ae   : > { %5261 = vmatmul.mubr.bf16.gmra.mrb[88].mxu0 %v4255_v24  ;;  %5527 = vmatmul.mubr.bf16.gmra.mrb[168].mxu1 %v4255_v24  ;;  %v10866_v2 = vpop.eup %10865  ;;  %v4227_v48 = vsub.bf16 %v10864_v1, %v14548_v17  ;;  %v10430_v24 = vld [vmem:[#allocation9 + $0x140] ss:$16 sps:$4 sm:$0xff]   ;;  %v10462_v1 = vld [vmem:[#allocation9 + $0x1cc] ss:$16 sps:$4 sm:$0xff]  }
 0x5af   : > { %5270 = vmatprep.mubr.bf16.mxu0 %v4260_v40  ;;  %5536 = vmatprep.mubr.bf16.mxu1 %v4260_v40  ;;  %10871 = vpow.bf16 %v4176_v53  ;;  %v10468_v53 = vld [vmem:[#allocation9 + $0x1ec] ss:$16 sps:$4 sm:$0xff]  }
 0x5b0   : > { %6726 = vmatpush1.bf16.msra.mxu0 %v10388_v0  ;;  %6992 = vmatpush1.bf16.msra.mxu1 %v10406_v60  ;;  %v4232_v0 = vsub.bf16 %v10866_v2, %v14548_v17  ;;  %v4079_v60 = vmin.bf16 %v14552_v6, %v13256_v27  ;;  %10873 = vpow.bf16 %v4191_v22  ;;  %v10465_v2 = vld [vmem:[#allocation9 + $0x1e4] ss:$16 sps:$4 sm:$0xff]   ;;  %v10466_v22 = vld [vmem:[#allocation9 + $0x1e8] ss:$16 sps:$4 sm:$0xff]  }
 0x5b1   : > { %6727 = vmatprep.subr.bf16.mxu0 %v10399_v59  ;;  %6993 = vmatprep.subr.bf16.mxu1 %v10414_v37  ;;  %v4267_v59 = vsel %vm4027_vm5, %v13094_v42, %v4227_v48  ;;  %v10868_v37 = vpop.eup %10867  ;;  %v4083_v42 = vmin.bf16 %v14552_v6, %v13312_v50  ;;  %v10483_v48 = vld [vmem:[#allocation9 + $0x20c] ss:$16 sps:$4 sm:$0xff]  }
 0x5b2   : > { %v4272_v12 = vsel %vm4032_vm6, %v13161_v32, %v4232_v0  ;;  %v4188_v38 = vmul.bf16 1069105081, %v4079_v60  ;;  %v4231_v55 = vsub.bf16 %v10868_v37, %v14548_v17 }
 0x5b4   : > { %6728 = vmatpush1.bf16.msra.mxu0 %v10397_v30  ;;  %6994 = vmatpush1.bf16.msra.mxu1 %v10412_v15  ;;  %10875 = vpow.bf16 %v4188_v38  ;;  %v4271_v15 = vsel %vm4031_vm7, %v13148_v26, %v4231_v55 }
 0x5b5   : > { %6729 = vmatprep.subr.bf16.mxu0 %v10405_v19  ;;  %6995 = vmatprep.subr.bf16.mxu1 %v10420_v31  ;;  %v10870_v40 = vpop.eup %10869  ;;  %10877 = vpow.bf16 %v4203_v16  ;;  %v4200_v31 = vmul.bf16 1069105081, %v4083_v42 }
 0x5b6   : > { %5271 = vmatmul.mubr.bf16.gmra.mrb[92].mxu0 %v4259_v56  ;;  %5537 = vmatmul.mubr.bf16.gmra.mrb[172].mxu1 %v4259_v56  ;;  %v4236_v30 = vsub.bf16 %v10870_v40, %v14548_v17 }
 0x5b7   : > { %5280 = vmatprep.mubr.bf16.mxu0 %v4264_v29  ;;  %5546 = vmatprep.mubr.bf16.mxu1 %v4264_v29  ;;  %10879 = vpow.bf16 %v4200_v31  ;;  %v10433_v29 = vld [vmem:[#allocation9 + $0x128] ss:$16 sps:$4 sm:$0xff]  }
 0x5b8   : > { %6730 = vmatpush1.bf16.msra.mxu0 %v10403_v44  ;;  %6996 = vmatpush1.bf16.msra.mxu1 %v10418_v43  ;;  %v4276_v63 = vsel %vm4036_vm8, %v13215_v23, %v4236_v30 }
 0x5b9   : > { %6731 = vmatprep.subr.bf16.mxu0 %v10411_v11  ;;  %6997 = vmatprep.subr.bf16.mxu1 %v10423_v25 }
 0x5ba   : > { %v10872_v32 = vpop.eup %10871 }
 0x5bb   : > { %v10874_v19 = vpop.eup %10873  ;;  %v4235_v39 = vsub.bf16 %v10872_v32, %v14548_v17 }
 0x5bc   : > { %6732 = vmatpush1.bf16.msra.mxu0 %v10409_v7  ;;  %6998 = vmatpush1.bf16.msra.mxu1 %v10421_v18  ;;  %v4240_v21 = vsub.bf16 %v10874_v19, %v14548_v17  ;;  %v10441_v7 = vld [vmem:[#allocation9 + $0x14c] ss:$16 sps:$4 sm:$0xff]   ;;  %v10444_v18 = vld [vmem:[#allocation9 + $0x184] ss:$16 sps:$4 sm:$0xff]  }
 0x5bd   : > { %6733 = vmatprep.subr.bf16.mxu0 %v10417_v10  ;;  %6999 = vmatprep.subr.bf16.mxu1 %v10429_v51  ;;  %v4275_v26 = vsel %vm4035_vm9, %v13202_v45, %v4235_v39  ;;  %v10445_v10 = vld [vmem:[#allocation9 + $0x168] ss:$16 sps:$4 sm:$0xff]   ;;  %v10450_v51 = vld [vmem:[#allocation9 + $0x18c] ss:$16 sps:$4 sm:$0xff]  }
 0x5be   : > { %5281 = vmatmul.mubr.bf16.gmra.mrb[96].mxu0 %v4263_v33  ;;  %5547 = vmatmul.mubr.bf16.gmra.mrb[176].mxu1 %v4263_v33  ;;  %v4280_v23 = vsel %vm4040_vm10, %v13269_v14, %v4240_v21  ;;  %v10459_v33 = vld [vmem:[#allocation9 + $0x1c4] ss:$16 sps:$4 sm:$0xff]  }
 0x5bf   : > { %5290 = vmatprep.mubr.bf16.mxu0 %v4268_v35  ;;  %5556 = vmatprep.mubr.bf16.mxu1 %v4268_v35  ;;  %v10876_v20 = vpop.eup %10875  ;;  %v10463_v35 = vld [vmem:[#allocation9 + $0x1e0] ss:$16 sps:$4 sm:$0xff]  }
 0x5c0   : > { %6734 = vmatpush1.bf16.msra.mxu0 %v10415_v9  ;;  %7000 = vmatpush1.bf16.msra.mxu1 %v10427_v57  ;;  %v10878_v44 = vpop.eup %10877  ;;  %v4239_v43 = vsub.bf16 %v10876_v20, %v14548_v17  ;;  %v10454_v9 = vld [vmem:[#allocation9 + $0x1a8] ss:$16 sps:$4 sm:$0xff]   ;;  %v10457_v57 = vld [vmem:[#allocation9 + $0x1c0] ss:$16 sps:$4 sm:$0xff]  }
 0x5c1   : > { %6735 = vmatprep.subr.bf16.mxu0 %v10426_v13  ;;  %v4244_v56 = vsub.bf16 %v10878_v44, %v14548_v17  ;;  %7001 = vmatprep.subr.bf16.mxu1 %v10435_v52  ;;  %v10460_v13 = vld [vmem:[#allocation9 + $0x1c8] ss:$16 sps:$4 sm:$0xff]  }
 0x5c2   : > { %v4279_v11 = vsel %vm4039_vm11, %v13256_v27, %v4239_v43  ;;  %v10880_v45 = vpop.eup %10879  ;;  %v10436_v27 = vld [vmem:[#allocation9 + $0x160] ss:$16 sps:$4 sm:$0xff]  }
 0x5c3   : > { %v4284_v25 = vsel %vm4044_vm12, %v13325_v8, %v4244_v56  ;;  %v4243_v14 = vsub.bf16 %v10880_v45, %v14548_v17  ;;  %v10447_v8 = vld [vmem:[#allocation9 + $0x16c] ss:$16 sps:$4 sm:$0xff]  }
 0x5c4   : > { %6736 = vmatpush1.bf16.msra.mxu0 %v10424_v47  ;;  %7002 = vmatpush1.bf16.msra.mxu1 %v10433_v29  ;;  %v10471_v47 = vld [vmem:[#allocation9 + $0x204] ss:$16 sps:$4 sm:$0xff]  }
 0x5c5   : > { %6737 = vmatprep.subr.bf16.mxu0 %v10432_v46  ;;  %v4283_v54 = vsel %vm4043_vm13, %v13312_v50, %v4243_v14  ;;  %7003 = vmatprep.subr.bf16.mxu1 %v10441_v7  ;;  %v10448_v50 = vld [vmem:[#allocation9 + $0x188] ss:$16 sps:$4 sm:$0xff]  }
 0x5c6   : > { %5291 = vmatmul.mubr.bf16.gmra.mrb[100].mxu0 %v4267_v59  ;;  %5557 = vmatmul.mubr.bf16.gmra.mrb[180].mxu1 %v4267_v59  ;;  %v4413_v46 = vld [vmem:[%s14536_s10] sm:$0xf] }
 0x5c7   : > { %5300 = vmatprep.mubr.bf16.mxu0 %v4272_v12  ;;  %5566 = vmatprep.mubr.bf16.mxu1 %v4272_v12  ;;  %v13484_v0 = vrot.slane %v4413_v46, %v11571_v34  ;;  %v13487_v60 = vrot.slane %v4413_v46, %v12444_v4  ;;  %v13490_v59 = vrot.slane %v4413_v46, %v11574_v36 }
 0x5c8   : > { %6738 = vmatpush1.bf16.msra.mxu0 %v10430_v24  ;;  %7004 = vmatpush1.bf16.msra.mxu1 %v10439_v5  ;;  %v13493_v37 = vrot.slane %v4413_v46, %v12467_v58 }
 0x5c9   : > { %6739 = vmatprep.subr.bf16.mxu0 %v10438_v3  ;;  %7005 = vmatprep.subr.bf16.mxu1 %v10447_v8 }
 0x5cc   : > { %6740 = vmatpush1.bf16.msra.mxu0 %v10436_v27  ;;  %7006 = vmatpush1.bf16.msra.mxu1 %v10445_v10 }
 0x5cd   : > { %6741 = vmatprep.subr.bf16.mxu0 %v10444_v18  ;;  %7007 = vmatprep.subr.bf16.mxu1 %v10450_v51 }
 0x5ce   : > { %5301 = vmatmul.mubr.bf16.gmra.mrb[104].mxu0 %v4271_v15  ;;  %5567 = vmatmul.mubr.bf16.gmra.mrb[184].mxu1 %v4271_v15 }
 0x5cf   : > { %5310 = vmatprep.mubr.bf16.mxu0 %v4276_v63  ;;  %5576 = vmatprep.mubr.bf16.mxu1 %v4276_v63 }
 0x5d0   : > { %6742 = vmatpush1.bf16.msra.mxu0 %v10442_v49  ;;  %7008 = vmatpush1.bf16.msra.mxu1 %v10448_v50 }
 0x5d1   : > { %6743 = vmatprep.subr.bf16.mxu0 %v10453_v28  ;;  %7009 = vmatprep.subr.bf16.mxu1 %v10456_v61 }
 0x5d4   : > { %6744 = vmatpush1.bf16.msra.mxu0 %v10451_v41  ;;  %7010 = vmatpush1.bf16.msra.mxu1 %v10454_v9 }
 0x5d5   : > { %6745 = vmatprep.subr.bf16.mxu0 %v10459_v33  ;;  %7011 = vmatprep.subr.bf16.mxu1 %v10462_v1 }
 0x5d6   : > { %5311 = vmatmul.mubr.bf16.gmra.mrb[108].mxu0 %v4275_v26  ;;  %5577 = vmatmul.mubr.bf16.gmra.mrb[188].mxu1 %v4275_v26 }
 0x5d7   : > { %5320 = vmatprep.mubr.bf16.mxu0 %v4280_v23  ;;  %5586 = vmatprep.mubr.bf16.mxu1 %v4280_v23 }
 0x5d8   : > { %6746 = vmatpush1.bf16.msra.mxu0 %v10457_v57  ;;  %7012 = vmatpush1.bf16.msra.mxu1 %v10460_v13 }
 0x5d9   : > { %6747 = vmatprep.subr.bf16.mxu0 %v10465_v2  ;;  %7013 = vmatprep.subr.bf16.mxu1 %v10468_v53 }
 0x5dc   : > { %6748 = vmatpush1.bf16.msra.mxu0 %v10463_v35  ;;  %7014 = vmatpush1.bf16.msra.mxu1 %v10466_v22 }
 0x5dd   : > { %6850 = vmatprep.subr.bf16.mxu0 %v10471_v47  ;;  %7116 = vmatprep.subr.bf16.mxu1 %v10483_v48 }
 0x5de   : > { %5321 = vmatmul.mubr.bf16.gmra.mrb[112].mxu0 %v4279_v11  ;;  %5587 = vmatmul.mubr.bf16.gmra.mrb[192].mxu1 %v4279_v11 }
 0x5df   : > { %5330 = vmatprep.mubr.bf16.mxu0 %v4284_v25  ;;  %5596 = vmatprep.mubr.bf16.mxu1 %v4284_v25 }
 0x5e6   : > { %5331 = vmatmul.mubr.bf16.gmra.mrb[116].mxu0 %v4283_v54  ;;  %5597 = vmatmul.mubr.bf16.gmra.mrb[196].mxu1 %v4283_v54 }
 0x671   : > { %v5242_v62 = vpop.f32.mrb[80].mxu0  ;;  %v5508_v24 = vpop.f32.mrb[160].mxu1 }
 0x672   : > { %v5244_v12 = vpop.f32.mrb[81].mxu0  ;;  %v5510_v40 = vpop.f32.mrb[161].mxu1  ;;  %v9215_v55 = vadd.f32 %v5242_v62, %v13484_v0  ;;  %v9255_v30 = vadd.f32 %v5508_v24, %v13487_v60 }
 0x673   : > { %v5246_v38 = vpop.f32.mrb[82].mxu0  ;;  %v5512_v16 = vpop.f32.mrb[162].mxu1  ;;  %v9216_v19 = vadd.f32 %v5244_v12, %v13490_v59  ;;  %v9256_v31 = vadd.f32 %v5510_v40, %v13493_v37 }
 0x674   : > { %v9217_v42 = vadd.f32 %v5246_v38, %v13484_v0  ;;  %v9257_v15 = vadd.f32 %v5512_v16, %v13487_v60  ;;  %v5248_v32 = vpop.f32.mrb[83].mxu0  ;;  %v5514_v63 = vpop.f32.mrb[163].mxu1 }
 0x675   : > { %v9218_v39 = vadd.f32 %v5248_v32, %v13490_v59  ;;  %v9258_v21 = vadd.f32 %v5514_v63, %v13493_v37 }
 0x676   : > { %v13503_v26 = vpack.c.bf16 %v9217_v42, %v9215_v55  ;;  %v13505_v20 = vpack.c.bf16 %v9257_v15, %v9255_v30 }
 0x677   : > { %v13507_v23 = vpack.c.bf16 %v9218_v39, %v9216_v19  ;;  %v13509_v44 = vpack.c.bf16 %v9258_v21, %v9256_v31 }
 0x678   : > { %v5687_v43 = vmin.bf16 %v14552_v6, %v13503_v26  ;;  %vm5647_vm14 = vcmp.gt.bf16.partialorder %v13503_v26, 0 }
 0x679   : > { %v5688_v56 = vmin.bf16 %v14552_v6, %v13507_v23  ;;  %v5252_v11 = vpop.f32.mrb[84].mxu0  ;;  %v5518_v45 = vpop.f32.mrb[164].mxu1  ;;  %vm5648_vm15 = vcmp.gt.bf16.partialorder %v13507_v23, 0 }
 0x67a   : > { %v5728_v25 = vmul.bf16 1069105081, %v5687_v43  ;;  %v5254_v14 = vpop.f32.mrb[85].mxu0  ;;  %v5520_v54 = vpop.f32.mrb[165].mxu1  ;;  %v9219_v52 = vadd.f32 %v5252_v11, %v13484_v0  ;;  %v9259_v5 = vadd.f32 %v5518_v45, %v13487_v60 }
 0x67b   : > { %v5731_v29 = vmul.bf16 1069105081, %v5688_v56  ;;  %v5256_v27 = vpop.f32.mrb[86].mxu0  ;;  %v5522_v3 = vpop.f32.mrb[166].mxu1  ;;  %v9220_v7 = vadd.f32 %v5254_v14, %v13490_v59  ;;  %v9260_v50 = vadd.f32 %v5520_v54, %v13493_v37 }
 0x67c   : > { %v9221_v18 = vadd.f32 %v5256_v27, %v13484_v0  ;;  %v9261_v8 = vadd.f32 %v5522_v3, %v13487_v60  ;;  %v5258_v49 = vpop.f32.mrb[87].mxu0  ;;  %v5524_v10 = vpop.f32.mrb[167].mxu1  ;;  %10881 = vpow.bf16 %v5728_v25 }
 0x67d   : > { %v9222_v51 = vadd.f32 %v5258_v49, %v13490_v59  ;;  %v9262_v41 = vadd.f32 %v5524_v10, %v13493_v37  ;;  %10883 = vpow.bf16 %v5731_v29 }
 0x67e   : > { %v13523_v28 = vpack.c.bf16 %v9221_v18, %v9219_v52  ;;  %v13525_v61 = vpack.c.bf16 %v9261_v8, %v9259_v5 }
 0x67f   : > { %v13527_v9 = vpack.c.bf16 %v9222_v51, %v9220_v7  ;;  %v13529_v57 = vpack.c.bf16 %v9262_v41, %v9260_v50 }
 0x680   : > { %v5691_v33 = vmin.bf16 %v14552_v6, %v13523_v28  ;;  %vm5651_vm1 = vcmp.gt.bf16.partialorder %v13523_v28, 0 }
 0x681   : > { %v5692_v13 = vmin.bf16 %v14552_v6, %v13527_v9  ;;  %v5262_v1 = vpop.f32.mrb[88].mxu0  ;;  %v5528_v35 = vpop.f32.mrb[168].mxu1  ;;  %vm5652_vm0 = vcmp.gt.bf16.partialorder %v13527_v9, 0 }
 0x682   : > { %v5740_v2 = vmul.bf16 1069105081, %v5691_v33  ;;  %v5264_v53 = vpop.f32.mrb[89].mxu0  ;;  %v5530_v22 = vpop.f32.mrb[169].mxu1  ;;  %v9223_v48 = vadd.f32 %v5262_v1, %v13484_v0  ;;  %v9263_v24 = vadd.f32 %v5528_v35, %v13487_v60  ;;  %v10469_v1 = vld [vmem:[#allocation9 + $0x200] ss:$16 sps:$4 sm:$0xff]  }
 0x683   : > { %v5743_v47 = vmul.bf16 1069105081, %v5692_v13  ;;  %v5266_v46 = vpop.f32.mrb[90].mxu0  ;;  %v5532_v62 = vpop.f32.mrb[170].mxu1  ;;  %v9224_v12 = vadd.f32 %v5264_v53, %v13490_v59  ;;  %v9264_v30 = vadd.f32 %v5530_v22, %v13493_v37  ;;  %v10481_v35 = vld [vmem:[#allocation9 + $0x208] ss:$16 sps:$4 sm:$0xff]  }
 0x684   : > { %v9225_v40 = vadd.f32 %v5266_v46, %v13484_v0  ;;  %v9265_v38 = vadd.f32 %v5532_v62, %v13487_v60  ;;  %v5268_v16 = vpop.f32.mrb[91].mxu0  ;;  %v5534_v55 = vpop.f32.mrb[171].mxu1  ;;  %10885 = vpow.bf16 %v5740_v2 }
 0x685   : > { %v9226_v42 = vadd.f32 %v5268_v16, %v13490_v59  ;;  %v9266_v15 = vadd.f32 %v5534_v55, %v13493_v37  ;;  %10887 = vpow.bf16 %v5743_v47  ;;  %v10474_v47 = vld [vmem:[#allocation9 + $0x224] ss:$16 sps:$4 sm:$0xff]  }
 0x686   : > { %v13543_v32 = vpack.c.bf16 %v9225_v40, %v9223_v48  ;;  %v13545_v63 = vpack.c.bf16 %v9265_v38, %v9263_v24  ;;  %v10489_v48 = vld [vmem:[#allocation9 + $0x22c] ss:$16 sps:$4 sm:$0xff]   ;;  %v10472_v38 = vld [vmem:[#allocation9 + $0x220] ss:$16 sps:$4 sm:$0xff]  }
 0x687   : > { %v13547_v19 = vpack.c.bf16 %v9226_v42, %v9224_v12  ;;  %v13549_v31 = vpack.c.bf16 %v9266_v15, %v9264_v30  ;;  %v10882_v39 = vpop.eup %10881  ;;  %v10487_v15 = vld [vmem:[#allocation9 + $0x228] ss:$16 sps:$4 sm:$0xff]  }
 0x688   : > { %v5695_v21 = vmin.bf16 %v14552_v6, %v13543_v32  ;;  %v10884_v43 = vpop.eup %10883  ;;  %v5847_v7 = vsub.bf16 %v10882_v39, %v14548_v17  ;;  %v10492_v39 = vld [vmem:[#allocation9 + $0x24c] ss:$16 sps:$4 sm:$0xff]   ;;  %vm5655_vm3 = vcmp.gt.bf16.partialorder %v13543_v32, 0 }
 0x689   : > { %v5696_v56 = vmin.bf16 %v14552_v6, %v13547_v19  ;;  %v5272_v11 = vpop.f32.mrb[92].mxu0  ;;  %v5538_v45 = vpop.f32.mrb[172].mxu1  ;;  %v5848_v51 = vsub.bf16 %v10884_v43, %v14548_v17  ;;  %vm5656_vm2 = vcmp.gt.bf16.partialorder %v13547_v19, 0 }
 0x68a   : > { %v5752_v25 = vmul.bf16 1069105081, %v5695_v21  ;;  %v5274_v14 = vpop.f32.mrb[93].mxu0  ;;  %v5540_v54 = vpop.f32.mrb[173].mxu1  ;;  %v9227_v52 = vadd.f32 %v5272_v11, %v13484_v0  ;;  %v9267_v27 = vadd.f32 %v5538_v45, %v13487_v60  ;;  %v5887_v24 = vsel %vm5647_vm14, %v13503_v26, %v5847_v7 }
 0x68b   : > { %v5755_v29 = vmul.bf16 1069105081, %v5696_v56  ;;  %v5276_v3 = vpop.f32.mrb[94].mxu0  ;;  %v5542_v5 = vpop.f32.mrb[174].mxu1  ;;  %v9228_v18 = vadd.f32 %v5274_v14, %v13490_v59  ;;  %v9268_v41 = vadd.f32 %v5540_v54, %v13493_v37  ;;  %v5888_v22 = vsel %vm5648_vm15, %v13507_v23, %v5848_v51  ;;  %v10477_v23 = vld [vmem:[#allocation9 + $0x244] ss:$16 sps:$4 sm:$0xff]  }
 0x68c   : > { %v9229_v8 = vadd.f32 %v5276_v3, %v13484_v0  ;;  %v9269_v49 = vadd.f32 %v5542_v5, %v13487_v60  ;;  %v5278_v10 = vpop.f32.mrb[95].mxu0  ;;  %v5544_v50 = vpop.f32.mrb[175].mxu1  ;;  %10889 = vpow.bf16 %v5752_v25  ;;  %6749 = vmatprep.mubr.bf16.mxu0 %v5888_v22  ;;  %7015 = vmatprep.mubr.bf16.mxu1 %v5888_v22 }
 0x68d   : > { %v9230_v33 = vadd.f32 %v5278_v10, %v13490_v59  ;;  %v9270_v13 = vadd.f32 %v5544_v50, %v13493_v37  ;;  %10891 = vpow.bf16 %v5755_v29  ;;  %6750 = vmatmul.mubr.bf16.vlgmr.msra.gmra.mrb[120].mxu0 %v5887_v24  ;;  %7016 = vmatmul.mubr.bf16.vlgmr.msra.gmra.mrb[200].mxu1 %v5887_v24  ;;  %v10475_v10 = vld [vmem:[#allocation9 + $0x240] ss:$16 sps:$4 sm:$0xff]   ;;  %v10490_v50 = vld [vmem:[#allocation9 + $0x248] ss:$16 sps:$4 sm:$0xff]  }
 0x68e   : > { %v13567_v2 = vpack.c.bf16 %v9229_v8, %v9227_v52  ;;  %v13569_v53 = vpack.c.bf16 %v9269_v49, %v9267_v27  ;;  %6851 = vmatpush1.bf16.msra.mxu0 %v10469_v1  ;;  %7117 = vmatpush1.bf16.msra.mxu1 %v10481_v35  ;;  %v10498_v1 = vld [vmem:[#allocation9 + $0x26c] ss:$16 sps:$4 sm:$0xff]  }
 0x68f   : > { %v13574_v46 = vpack.c.bf16 %v9230_v33, %v9228_v18  ;;  %v13576_v62 = vpack.c.bf16 %v9270_v13, %v9268_v41  ;;  %v10886_v12 = vpop.eup %10885  ;;  %6852 = vmatprep.subr.bf16.mxu0 %v10474_v47  ;;  %7118 = vmatprep.subr.bf16.mxu1 %v10489_v48  ;;  %v10480_v13 = vld [vmem:[#allocation9 + $0x264] ss:$16 sps:$4 sm:$0xff]  }
 0x690   : > { %v5699_v40 = vmin.bf16 %v14552_v6, %v13567_v2  ;;  %v10888_v16 = vpop.eup %10887  ;;  %v5851_v54 = vsub.bf16 %v10886_v12, %v14548_v17  ;;  %v10486_v12 = vld [vmem:[#allocation9 + $0x284] ss:$16 sps:$4 sm:$0xff]   ;;  %vm5659_vm5 = vcmp.gt.bf16.partialorder %v13567_v2, 0 }
 0x691   : > { %v5700_v55 = vmin.bf16 %v14552_v6, %v13574_v46  ;;  %v5282_v30 = vpop.f32.mrb[96].mxu0  ;;  %v5548_v42 = vpop.f32.mrb[176].mxu1  ;;  %v5852_v7 = vsub.bf16 %v10888_v16, %v14548_v17  ;;  %vm5660_vm4 = vcmp.gt.bf16.partialorder %v13574_v46, 0 }
 0x692   : > { %v5764_v21 = vmul.bf16 1069105081, %v5699_v40  ;;  %v5284_v26 = vpop.f32.mrb[97].mxu0  ;;  %v5550_v43 = vpop.f32.mrb[177].mxu1  ;;  %v9231_v11 = vadd.f32 %v5282_v30, %v13484_v0  ;;  %v9271_v45 = vadd.f32 %v5548_v42, %v13487_v60  ;;  %6853 = vmatpush1.bf16.msra.mxu0 %v10472_v38  ;;  %7119 = vmatpush1.bf16.msra.mxu1 %v10487_v15  ;;  %v5891_v47 = vsel %vm5651_vm1, %v13523_v28, %v5851_v54  ;;  %v10504_v30 = vld [vmem:[#allocation9 + $0x28c] ss:$16 sps:$4 sm:$0xff]  }
 0x693   : > { %v5767_v56 = vmul.bf16 1069105081, %v5700_v55  ;;  %v5286_v25 = vpop.f32.mrb[98].mxu0  ;;  %v5552_v14 = vpop.f32.mrb[178].mxu1  ;;  %v9232_v29 = vadd.f32 %v5284_v26, %v13490_v59  ;;  %v9272_v18 = vadd.f32 %v5550_v43, %v13493_v37  ;;  %v5892_v33 = vsel %vm5652_vm0, %v13527_v9, %v5852_v7  ;;  %6854 = vmatprep.subr.bf16.mxu0 %v10477_v23  ;;  %7120 = vmatprep.subr.bf16.mxu1 %v10492_v39  ;;  %v10478_v9 = vld [vmem:[#allocation9 + $0x260] ss:$16 sps:$4 sm:$0xff]  }
 0x694   : > { %v9233_v52 = vadd.f32 %v5286_v25, %v13484_v0  ;;  %v9273_v27 = vadd.f32 %v5552_v14, %v13487_v60  ;;  %v5288_v3 = vpop.f32.mrb[99].mxu0  ;;  %v5554_v5 = vpop.f32.mrb[179].mxu1  ;;  %10893 = vpow.bf16 %v5764_v21  ;;  %6759 = vmatprep.mubr.bf16.mxu0 %v5892_v33  ;;  %7025 = vmatprep.mubr.bf16.mxu1 %v5892_v33  ;;  %v10496_v55 = vld [vmem:[#allocation9 + $0x268] ss:$16 sps:$4 sm:$0xff]   ;;  %v10484_v7 = vld [vmem:[#allocation9 + $0x280] ss:$16 sps:$4 sm:$0xff]  }
 0x695   : > { %v9234_v8 = vadd.f32 %v5288_v3, %v13490_v59  ;;  %v9274_v49 = vadd.f32 %v5554_v5, %v13493_v37  ;;  %10895 = vpow.bf16 %v5767_v56  ;;  %6760 = vmatmul.mubr.bf16.gmra.mrb[124].mxu0 %v5891_v47  ;;  %7026 = vmatmul.mubr.bf16.gmra.mrb[204].mxu1 %v5891_v47  ;;  %v10510_v33 = vld [vmem:[#allocation9 + $0x2ac] ss:$16 sps:$4 sm:$0xff]  }
 0x696   : > { %v13597_v51 = vpack.c.bf16 %v9233_v52, %v9231_v11  ;;  %v13599_v41 = vpack.c.bf16 %v9273_v27, %v9271_v45  ;;  %6855 = vmatpush1.bf16.msra.mxu0 %v10475_v10  ;;  %7121 = vmatpush1.bf16.msra.mxu1 %v10490_v50  ;;  %v10495_v50 = vld [vmem:[#allocation9 + $0x2a4] ss:$16 sps:$4 sm:$0xff]  }
 0x697   : > { %v13604_v35 = vpack.c.bf16 %v9234_v8, %v9232_v29  ;;  %v13606_v22 = vpack.c.bf16 %v9274_v49, %v9272_v18  ;;  %v10890_v48 = vpop.eup %10889  ;;  %6856 = vmatprep.subr.bf16.mxu0 %v10480_v13  ;;  %7122 = vmatprep.subr.bf16.mxu1 %v10498_v1  ;;  %v10502_v18 = vld [vmem:[#allocation9 + $0x288] ss:$16 sps:$4 sm:$0xff]  }
 0x698   : > { %v5703_v24 = vmin.bf16 %v14552_v6, %v13597_v51  ;;  %v10892_v40 = vpop.eup %10891  ;;  %v5855_v11 = vsub.bf16 %v10890_v48, %v14548_v17  ;;  %vm5663_vm7 = vcmp.gt.bf16.partialorder %v13597_v51, 0 }
 0x699   : > { %v5704_v38 = vmin.bf16 %v14552_v6, %v13604_v35  ;;  %v5292_v23 = vpop.f32.mrb[100].mxu0  ;;  %v5558_v16 = vpop.f32.mrb[180].mxu1  ;;  %v5856_v52 = vsub.bf16 %v10892_v40, %v14548_v17  ;;  %vm5664_vm6 = vcmp.gt.bf16.partialorder %v13604_v35, 0 }
 0x69a   : > { %v5776_v42 = vmul.bf16 1069105081, %v5703_v24  ;;  %v5294_v28 = vpop.f32.mrb[101].mxu0  ;;  %v5560_v15 = vpop.f32.mrb[181].mxu1  ;;  %v9235_v21 = vadd.f32 %v5292_v23, %v13484_v0  ;;  %v9275_v26 = vadd.f32 %v5558_v16, %v13487_v60  ;;  %6857 = vmatpush1.bf16.msra.mxu0 %v10478_v9  ;;  %7123 = vmatpush1.bf16.msra.mxu1 %v10496_v55  ;;  %v5895_v47 = vsel %vm5655_vm3, %v13543_v32, %v5855_v11  ;;  %v10501_v9 = vld [vmem:[#allocation9 + $0x2c4] ss:$16 sps:$4 sm:$0xff]  }
 0x69b   : > { %v5779_v39 = vmul.bf16 1069105081, %v5704_v38  ;;  %v5296_v43 = vpop.f32.mrb[102].mxu0  ;;  %v5562_v56 = vpop.f32.mrb[182].mxu1  ;;  %v9236_v45 = vadd.f32 %v5294_v28, %v13490_v59  ;;  %v9276_v27 = vadd.f32 %v5560_v15, %v13493_v37  ;;  %v5896_v10 = vsel %vm5656_vm2, %v13547_v19, %v5856_v52  ;;  %6858 = vmatprep.subr.bf16.mxu0 %v10486_v12  ;;  %7124 = vmatprep.subr.bf16.mxu1 %v10504_v30  ;;  %v10493_v19 = vld [vmem:[#allocation9 + $0x2a0] ss:$16 sps:$4 sm:$0xff]  }
 0x69c   : > { %v9237_v25 = vadd.f32 %v5296_v43, %v13484_v0  ;;  %v9277_v14 = vadd.f32 %v5562_v56, %v13487_v60  ;;  %v5298_v54 = vpop.f32.mrb[103].mxu0  ;;  %v5564_v29 = vpop.f32.mrb[183].mxu1  ;;  %10897 = vpow.bf16 %v5776_v42  ;;  %6769 = vmatprep.mubr.bf16.mxu0 %v5896_v10  ;;  %7035 = vmatprep.mubr.bf16.mxu1 %v5896_v10  ;;  %v10508_v16 = vld [vmem:[#allocation9 + $0x2a8] ss:$16 sps:$4 sm:$0xff]   ;;  %v10516_v55 = vld [vmem:[#allocation9 + $0x2cc] ss:$16 sps:$4 sm:$0xff]  }
 0x69d   : > { %v9238_v3 = vadd.f32 %v5298_v54, %v13490_v59  ;;  %v9278_v5 = vadd.f32 %v5564_v29, %v13493_v37  ;;  %10899 = vpow.bf16 %v5779_v39  ;;  %6770 = vmatmul.mubr.bf16.gmra.mrb[128].mxu0 %v5895_v47  ;;  %7036 = vmatmul.mubr.bf16.gmra.mrb[208].mxu1 %v5895_v47  ;;  %vm5650_vm2 = vcmp.gt.bf16.partialorder %v13509_v44, 0 }
 0x69e   : > { %v13627_v8 = vpack.c.bf16 %v9237_v25, %v9235_v21  ;;  %v13629_v49 = vpack.c.bf16 %v9277_v14, %v9275_v26  ;;  %6859 = vmatpush1.bf16.msra.mxu0 %v10484_v7  ;;  %7125 = vmatpush1.bf16.msra.mxu1 %v10502_v18  ;;  %vm5649_vm3 = vcmp.gt.bf16.partialorder %v13505_v20, 0 }
 0x69f   : > { %v13634_v13 = vpack.c.bf16 %v9238_v3, %v9236_v45  ;;  %v13636_v1 = vpack.c.bf16 %v9278_v5, %v9276_v27  ;;  %v10894_v48 = vpop.eup %10893  ;;  %6860 = vmatprep.subr.bf16.mxu0 %v10495_v50  ;;  %7126 = vmatprep.subr.bf16.mxu1 %v10510_v33  ;;  %v10499_v3 = vld [vmem:[#allocation9 + $0x2c0] ss:$16 sps:$4 sm:$0xff]   ;;  %v10514_v5 = vld [vmem:[#allocation9 + $0x2c8] ss:$16 sps:$4 sm:$0xff]   ;;  %v10507_v50 = vld [vmem:[#allocation9 + $0x2e4] ss:$16 sps:$4 sm:$0xff]  }
 0x6a0   : > { %v5707_v24 = vmin.bf16 %v14552_v6, %v13627_v8  ;;  %v10896_v12 = vpop.eup %10895  ;;  %v5859_v43 = vsub.bf16 %v10894_v48, %v14548_v17  ;;  %v10519_v33 = vld [vmem:[#allocation9 + $0x2ec] ss:$16 sps:$4 sm:$0xff]   ;;  %vm5667_vm9 = vcmp.gt.bf16.partialorder %v13627_v8, 0 }
 0x6a1   : > { %v5708_v40 = vmin.bf16 %v14552_v6, %v13634_v13  ;;  %v5302_v38 = vpop.f32.mrb[104].mxu0  ;;  %v5568_v23 = vpop.f32.mrb[184].mxu1  ;;  %v5860_v54 = vsub.bf16 %v10896_v12, %v14548_v17  ;;  %vm5668_vm8 = vcmp.gt.bf16.partialorder %v13634_v13, 0 }
 0x6a2   : > { %v5788_v30 = vmul.bf16 1069105081, %v5707_v24  ;;  %v5304_v32 = vpop.f32.mrb[105].mxu0  ;;  %v5570_v42 = vpop.f32.mrb[185].mxu1  ;;  %v9239_v15 = vadd.f32 %v5302_v38, %v13484_v0  ;;  %v9279_v39 = vadd.f32 %v5568_v23, %v13487_v60  ;;  %6861 = vmatpush1.bf16.msra.mxu0 %v10493_v19  ;;  %7127 = vmatpush1.bf16.msra.mxu1 %v10508_v16  ;;  %v5899_v24 = vsel %vm5659_vm5, %v13567_v2, %v5859_v43 }
 0x6a3   : > { %v5791_v28 = vmul.bf16 1069105081, %v5708_v40  ;;  %v5306_v21 = vpop.f32.mrb[106].mxu0  ;;  %v5572_v26 = vpop.f32.mrb[186].mxu1  ;;  %v9240_v56 = vadd.f32 %v5304_v32, %v13490_v59  ;;  %v9280_v29 = vadd.f32 %v5570_v42, %v13493_v37  ;;  %v5900_v10 = vsel %vm5660_vm4, %v13574_v46, %v5860_v54  ;;  %6862 = vmatprep.subr.bf16.mxu0 %v10501_v9  ;;  %7128 = vmatprep.subr.bf16.mxu1 %v10516_v55  ;;  %v10505_v46 = vld [vmem:[#allocation9 + $0x2e0] ss:$16 sps:$4 sm:$0xff]  }
 0x6a4   : > { %v9241_v11 = vadd.f32 %v5306_v21, %v13484_v0  ;;  %v9281_v45 = vadd.f32 %v5572_v26, %v13487_v60  ;;  %v5308_v25 = vpop.f32.mrb[107].mxu0  ;;  %v5574_v14 = vpop.f32.mrb[187].mxu1  ;;  %10901 = vpow.bf16 %v5788_v30  ;;  %6779 = vmatprep.mubr.bf16.mxu0 %v5900_v10  ;;  %7045 = vmatprep.mubr.bf16.mxu1 %v5900_v10  ;;  %v10513_v9 = vld [vmem:[#allocation9 + $0x304] ss:$16 sps:$4 sm:$0xff]   ;;  %v10517_v55 = vld [vmem:[#allocation9 + $0x2e8] ss:$16 sps:$4 sm:$0xff]  }
 0x6a5   : > { %v9242_v52 = vadd.f32 %v5308_v25, %v13490_v59  ;;  %v9282_v27 = vadd.f32 %v5574_v14, %v13493_v37  ;;  %10903 = vpow.bf16 %v5791_v28  ;;  %6780 = vmatmul.mubr.bf16.gmra.mrb[132].mxu0 %v5899_v24  ;;  %7046 = vmatmul.mubr.bf16.gmra.mrb[212].mxu1 %v5899_v24  ;;  %v10525_v30 = vld [vmem:[#allocation9 + $0x30c] ss:$16 sps:$4 sm:$0xff]   ;;  %v10522_v24 = vld [vmem:[#allocation9 + $0x324] ss:$16 sps:$4 sm:$0xff]   ;;  %vm5654_vm4 = vcmp.gt.bf16.partialorder %v13529_v57, 0 }
 0x6a6   : > { %v13657_v7 = vpack.c.bf16 %v9241_v11, %v9239_v15  ;;  %v13659_v18 = vpack.c.bf16 %v9281_v45, %v9279_v39  ;;  %6863 = vmatpush1.bf16.msra.mxu0 %v10499_v3  ;;  %7129 = vmatpush1.bf16.msra.mxu1 %v10514_v5  ;;  %v10511_v3 = vld [vmem:[#allocation9 + $0x300] ss:$16 sps:$4 sm:$0xff]   ;;  %v10523_v5 = vld [vmem:[#allocation9 + $0x308] ss:$16 sps:$4 sm:$0xff]   ;;  %vm5653_vm5 = vcmp.gt.bf16.partialorder %v13525_v61, 0 }
 0x6a7   : > { %v13664_v47 = vpack.c.bf16 %v9242_v52, %v9240_v56  ;;  %v13666_v48 = vpack.c.bf16 %v9282_v27, %v9280_v29  ;;  %v10898_v19 = vpop.eup %10897  ;;  %6864 = vmatprep.subr.bf16.mxu0 %v10507_v50  ;;  %7130 = vmatprep.subr.bf16.mxu1 %v10519_v33 }
 0x6a8   : > { %v5711_v12 = vmin.bf16 %v14552_v6, %v13657_v7  ;;  %v10900_v40 = vpop.eup %10899  ;;  %v5863_v43 = vsub.bf16 %v10898_v19, %v14548_v17  ;;  %v10531_v19 = vld [vmem:[#allocation9 + $0x32c] ss:$16 sps:$4 sm:$0xff]   ;;  %vm5671_vm11 = vcmp.gt.bf16.partialorder %v13657_v7, 0 }
 0x6a9   : > { %v5712_v38 = vmin.bf16 %v14552_v6, %v13664_v47  ;;  %v5312_v23 = vpop.f32.mrb[108].mxu0  ;;  %v5578_v16 = vpop.f32.mrb[188].mxu1  ;;  %v5864_v54 = vsub.bf16 %v10900_v40, %v14548_v17  ;;  %vm5672_vm10 = vcmp.gt.bf16.partialorder %v13664_v47, 0 }
 0x6aa   : > { %v5800_v32 = vmul.bf16 1069105081, %v5711_v12  ;;  %v5314_v2 = vpop.f32.mrb[109].mxu0  ;;  %v5580_v42 = vpop.f32.mrb[189].mxu1  ;;  %v9243_v15 = vadd.f32 %v5312_v23, %v13484_v0  ;;  %v9283_v39 = vadd.f32 %v5578_v16, %v13487_v60  ;;  %6865 = vmatpush1.bf16.msra.mxu0 %v10505_v46  ;;  %7131 = vmatpush1.bf16.msra.mxu1 %v10517_v55  ;;  %v5903_v46 = vsel %vm5663_vm7, %v13597_v51, %v5863_v43 }
 0x6ab   : > { %v5803_v28 = vmul.bf16 1069105081, %v5712_v38  ;;  %v5316_v21 = vpop.f32.mrb[110].mxu0  ;;  %v5582_v26 = vpop.f32.mrb[190].mxu1  ;;  %v9244_v56 = vadd.f32 %v5314_v2, %v13490_v59  ;;  %v9284_v29 = vadd.f32 %v5580_v42, %v13493_v37  ;;  %v5904_v33 = vsel %vm5664_vm6, %v13604_v35, %v5864_v54  ;;  %6866 = vmatprep.subr.bf16.mxu0 %v10513_v9  ;;  %7132 = vmatprep.subr.bf16.mxu1 %v10525_v30  ;;  %v10520_v35 = vld [vmem:[#allocation9 + $0x320] ss:$16 sps:$4 sm:$0xff]  }
 0x6ac   : > { %v9245_v11 = vadd.f32 %v5316_v21, %v13484_v0  ;;  %v9285_v45 = vadd.f32 %v5582_v26, %v13487_v60  ;;  %v5318_v25 = vpop.f32.mrb[111].mxu0  ;;  %v5584_v14 = vpop.f32.mrb[191].mxu1  ;;  %10905 = vpow.bf16 %v5800_v32  ;;  %6789 = vmatprep.mubr.bf16.mxu0 %v5904_v33  ;;  %7055 = vmatprep.mubr.bf16.mxu1 %v5904_v33  ;;  %v10528_v9 = vld [vmem:[#allocation9 + $0x344] ss:$16 sps:$4 sm:$0xff]   ;;  %v10529_v2 = vld [vmem:[#allocation9 + $0x328] ss:$16 sps:$4 sm:$0xff]  }
 0x6ad   : > { %v9246_v52 = vadd.f32 %v5318_v25, %v13490_v59  ;;  %v9286_v27 = vadd.f32 %v5584_v14, %v13493_v37  ;;  %10907 = vpow.bf16 %v5803_v28  ;;  %6790 = vmatmul.mubr.bf16.gmra.mrb[136].mxu0 %v5903_v46  ;;  %7056 = vmatmul.mubr.bf16.gmra.mrb[216].mxu1 %v5903_v46  ;;  %v10537_v42 = vld [vmem:[#allocation9 + $0x34c] ss:$16 sps:$4 sm:$0xff]   ;;  %v10526_v33 = vld [vmem:[#allocation9 + $0x340] ss:$16 sps:$4 sm:$0xff]   ;;  %vm5658_vm6 = vcmp.gt.bf16.partialorder %v13549_v31, 0 }
 0x6ae   : > { %v13687_v10 = vpack.c.bf16 %v9245_v11, %v9243_v15  ;;  %v13689_v50 = vpack.c.bf16 %v9285_v45, %v9283_v39  ;;  %6867 = vmatpush1.bf16.msra.mxu0 %v10511_v3  ;;  %7133 = vmatpush1.bf16.msra.mxu1 %v10523_v5  ;;  %vm5657_vm7 = vcmp.gt.bf16.partialorder %v13545_v63, 0 }
 0x6af   : > { %v13694_v12 = vpack.c.bf16 %v9246_v52, %v9244_v56  ;;  %v13696_v40 = vpack.c.bf16 %v9286_v27, %v9284_v29  ;;  %v10902_v38 = vpop.eup %10901  ;;  %6868 = vmatprep.subr.bf16.mxu0 %v10522_v24  ;;  %7134 = vmatprep.subr.bf16.mxu1 %v10531_v19  ;;  %v10535_v24 = vld [vmem:[#allocation9 + $0x348] ss:$16 sps:$4 sm:$0xff]  }
 0x6b0   : > { %v5715_v23 = vmin.bf16 %v14552_v6, %v13687_v10  ;;  %v10904_v16 = vpop.eup %10903  ;;  %v5867_v11 = vsub.bf16 %v10902_v38, %v14548_v17  ;;  %vm5675_vm13 = vcmp.gt.bf16.partialorder %v13687_v10, 0 }
 0x6b1   : > { %v5716_v55 = vmin.bf16 %v14552_v6, %v13694_v12  ;;  %v5322_v30 = vpop.f32.mrb[112].mxu0  ;;  %v5588_v32 = vpop.f32.mrb[192].mxu1  ;;  %v5868_v52 = vsub.bf16 %v10904_v16, %v14548_v17  ;;  %v10543_v16 = vld [vmem:[#allocation9 + $0x36c] ss:$16 sps:$4 sm:$0xff]   ;;  %vm5676_vm12 = vcmp.gt.bf16.partialorder %v13694_v12, 0 }
 0x6b2   : > { %v5812_v28 = vmul.bf16 1069105081, %v5715_v23  ;;  %v5324_v51 = vpop.f32.mrb[113].mxu0  ;;  %v5590_v15 = vpop.f32.mrb[193].mxu1  ;;  %v9247_v21 = vadd.f32 %v5322_v30, %v13484_v0  ;;  %v9287_v26 = vadd.f32 %v5588_v32, %v13487_v60  ;;  %6869 = vmatpush1.bf16.msra.mxu0 %v10520_v35  ;;  %7135 = vmatpush1.bf16.msra.mxu1 %v10529_v2  ;;  %v10534_v23 = vld [vmem:[#allocation9 + $0x364] ss:$16 sps:$4 sm:$0xff]   ;;  %v5907_v35 = vsel %vm5667_vm9, %v13627_v8, %v5867_v11 }
 0x6b3   : > { %v5815_v39 = vmul.bf16 1069105081, %v5716_v55  ;;  %v5326_v43 = vpop.f32.mrb[114].mxu0  ;;  %v5592_v56 = vpop.f32.mrb[194].mxu1  ;;  %v9248_v45 = vadd.f32 %v5324_v51, %v13490_v59  ;;  %v9288_v27 = vadd.f32 %v5590_v15, %v13493_v37  ;;  %v5908_v38 = vsel %vm5668_vm8, %v13634_v13, %v5868_v52  ;;  %6870 = vmatprep.subr.bf16.mxu0 %v10528_v9  ;;  %7136 = vmatprep.subr.bf16.mxu1 %v10537_v42  ;;  %v10532_v13 = vld [vmem:[#allocation9 + $0x360] ss:$16 sps:$4 sm:$0xff]  }
 0x6b4   : > { %v9249_v25 = vadd.f32 %v5326_v43, %v13484_v0  ;;  %v9289_v14 = vadd.f32 %v5592_v56, %v13487_v60  ;;  %v5328_v54 = vpop.f32.mrb[115].mxu0  ;;  %v5594_v29 = vpop.f32.mrb[195].mxu1  ;;  %10909 = vpow.bf16 %v5812_v28  ;;  %6799 = vmatprep.mubr.bf16.mxu0 %v5908_v38  ;;  %7065 = vmatprep.mubr.bf16.mxu1 %v5908_v38  ;;  %v10540_v9 = vld [vmem:[#allocation9 + $0x384] ss:$16 sps:$4 sm:$0xff]   ;;  %v5690_v8 = vmin.bf16 %v14552_v6, %v13509_v44 }
 0x6b5   : > { %v9250_v3 = vadd.f32 %v5328_v54, %v13490_v59  ;;  %v9290_v5 = vadd.f32 %v5594_v29, %v13493_v37  ;;  %10911 = vpow.bf16 %v5815_v39  ;;  %6800 = vmatmul.mubr.bf16.gmra.mrb[140].mxu0 %v5907_v35  ;;  %7066 = vmatmul.mubr.bf16.gmra.mrb[220].mxu1 %v5907_v35  ;;  %v10541_v39 = vld [vmem:[#allocation9 + $0x368] ss:$16 sps:$4 sm:$0xff]   ;;  %v10538_v35 = vld [vmem:[#allocation9 + $0x380] ss:$16 sps:$4 sm:$0xff]   ;;  %vm5662_vm8 = vcmp.gt.bf16.partialorder %v13576_v62, 0 }
 0x6b6   : > { %v13717_v19 = vpack.c.bf16 %v9249_v25, %v9247_v21  ;;  %v13719_v46 = vpack.c.bf16 %v9289_v14, %v9287_v26  ;;  %6871 = vmatpush1.bf16.msra.mxu0 %v10526_v33  ;;  %7137 = vmatpush1.bf16.msra.mxu1 %v10535_v24  ;;  %v10546_v21 = vld [vmem:[#allocation9 + $0x38c] ss:$16 sps:$4 sm:$0xff]   ;;  %vm5661_vm9 = vcmp.gt.bf16.partialorder %v13569_v53, 0 }
 0x6b7   : > { %v13724_v55 = vpack.c.bf16 %v9250_v3, %v9248_v45  ;;  %v13726_v30 = vpack.c.bf16 %v9290_v5, %v9288_v27  ;;  %v10906_v32 = vpop.eup %10905  ;;  %6872 = vmatprep.subr.bf16.mxu0 %v10534_v23  ;;  %7138 = vmatprep.subr.bf16.mxu1 %v10543_v16 }
 0x6b8   : > { %v5719_v2 = vmin.bf16 %v14552_v6, %v13717_v19  ;;  %v10908_v42 = vpop.eup %10907  ;;  %v5871_v29 = vsub.bf16 %v10906_v32, %v14548_v17  ;;  %v10544_v32 = vld [vmem:[#allocation9 + $0x388] ss:$16 sps:$4 sm:$0xff]   ;;  %vm5679_vm15 = vcmp.gt.bf16.partialorder %v13717_v19, 0 }
 0x6b9   : > { %v5720_v28 = vmin.bf16 %v14552_v6, %v13724_v55  ;;  %v5332_v51 = vpop.f32.mrb[116].mxu0  ;;  %v5598_v15 = vpop.f32.mrb[196].mxu1  ;;  %v5872_v24 = vsub.bf16 %v10908_v42, %v14548_v17  ;;  %v10549_v42 = vld [vmem:[#allocation9 + $0x3a4] ss:$16 sps:$4 sm:$0xff]   ;;  %vm5680_vm14 = vcmp.gt.bf16.partialorder %v13724_v55, 0 }
 0x6ba   : > { %v5824_v26 = vmul.bf16 1069105081, %v5719_v2  ;;  %v5334_v43 = vpop.f32.mrb[117].mxu0  ;;  %v5600_v56 = vpop.f32.mrb[197].mxu1  ;;  %v9251_v45 = vadd.f32 %v5332_v51, %v13484_v0  ;;  %v9291_v25 = vadd.f32 %v5598_v15, %v13487_v60  ;;  %6873 = vmatpush1.bf16.msra.mxu0 %v10532_v13  ;;  %7139 = vmatpush1.bf16.msra.mxu1 %v10541_v39  ;;  %v5911_v13 = vsel %vm5671_vm11, %v13657_v7, %v5871_v29  ;;  %v10555_v7 = vld [vmem:[#allocation9 + $0x3c4] ss:$16 sps:$4 sm:$0xff]  }
 0x6bb   : > { %v5827_v11 = vmul.bf16 1069105081, %v5720_v28  ;;  %v5336_v14 = vpop.f32.mrb[118].mxu0  ;;  %v5602_v54 = vpop.f32.mrb[198].mxu1  ;;  %v9252_v52 = vadd.f32 %v5334_v43, %v13490_v59  ;;  %v9292_v38 = vadd.f32 %v5600_v56, %v13493_v37  ;;  %6874 = vmatprep.subr.bf16.mxu0 %v10540_v9  ;;  %7140 = vmatprep.subr.bf16.mxu1 %v10546_v21  ;;  %v10552_v28 = vld [vmem:[#allocation9 + $0x3ac] ss:$16 sps:$4 sm:$0xff]  }
 0x6bc   : > { %v9253_v27 = vadd.f32 %v5336_v14, %v13484_v0  ;;  %v9293_v3 = vadd.f32 %v5602_v54, %v13487_v60  ;;  %v5338_v5 = vpop.f32.mrb[119].mxu0  ;;  %v5604_v33 = vpop.f32.mrb[199].mxu1  ;;  %10913 = vpow.bf16 %v5824_v26  ;;  %v5912_v60 = vsel %vm5672_vm10, %v13664_v47, %v5872_v24  ;;  %v10547_v21 = vld [vmem:[#allocation9 + $0x3a0] ss:$16 sps:$4 sm:$0xff]   ;;  %v10550_v56 = vld [vmem:[#allocation9 + $0x3a8] ss:$16 sps:$4 sm:$0xff]  }
 0x6bd   : > { %v9254_v23 = vadd.f32 %v5338_v5, %v13490_v59  ;;  %v9294_v16 = vadd.f32 %v5604_v33, %v13493_v37  ;;  %10915 = vpow.bf16 %v5827_v11  ;;  %6809 = vmatprep.mubr.bf16.mxu0 %v5912_v60  ;;  %7075 = vmatprep.mubr.bf16.mxu1 %v5912_v60  ;;  %v5737_v15 = vmul.bf16 1069105081, %v5690_v8  ;;  %v10553_v29 = vld [vmem:[#allocation9 + $0x3c0] ss:$16 sps:$4 sm:$0xff]   ;;  %v13780_v60 = vld [vmem:[#allocation10 + $0x104] ss:$8 sps:$4 sm:$0xff]  }
 0x6be   : > { %v13749_v2 = vpack.c.bf16 %v9253_v27, %v9251_v45  ;;  %v13751_v0 = vpack.c.bf16 %v9293_v3, %v9291_v25  ;;  %6810 = vmatmul.mubr.bf16.gmra.mrb[144].mxu0 %v5911_v13  ;;  %7076 = vmatmul.mubr.bf16.gmra.mrb[224].mxu1 %v5911_v13  ;;  %v10558_v45 = vld [vmem:[#allocation9 + $0x3cc] ss:$16 sps:$4 sm:$0xff]   ;;  %v5689_v14 = vmin.bf16 %v14552_v6, %v13505_v20  ;;  %vm5666_vm10 = vcmp.gt.bf16.partialorder %v13606_v22, 0 }
 0x6bf   : > { %v13756_v59 = vpack.c.bf16 %v9254_v23, %v9252_v52  ;;  %v13758_v37 = vpack.c.bf16 %v9294_v16, %v9292_v38  ;;  %v10910_v51 = vpop.eup %10909  ;;  %6875 = vmatpush1.bf16.msra.mxu0 %v10538_v35  ;;  %7141 = vmatpush1.bf16.msra.mxu1 %v10544_v32  ;;  %10917 = vpow.bf16 %v5737_v15  ;;  %v5694_v54 = vmin.bf16 %v14552_v6, %v13529_v57  ;;  %v10556_v52 = vld [vmem:[#allocation9 + $0x3c8] ss:$16 sps:$4 sm:$0xff]   ;;  %v10564_v3 = vld [vmem:[#allocation9 + $0x3ec] ss:$16 sps:$4 sm:$0xff]   ;;  %v10559_v16 = vld [vmem:[#allocation9 + $0x3e0] ss:$16 sps:$4 sm:$0xff]  }
 0x6c0   : > { %v5723_v39 = vmin.bf16 %v14552_v6, %v13749_v2  ;;  %v10912_v47 = vpop.eup %10911  ;;  %6876 = vmatprep.subr.bf16.mxu0 %v10549_v42  ;;  %7142 = vmatprep.subr.bf16.mxu1 %v10552_v28  ;;  %v5875_v11 = vsub.bf16 %v10910_v51, %v14548_v17  ;;  %v5734_v24 = vmul.bf16 1069105081, %v5689_v14  ;;  %v10562_v35 = vld [vmem:[#allocation9 + $0x3e8] ss:$16 sps:$4 sm:$0xff]   ;;  %v10567_v32 = vld [vmem:[#allocation10 + $0x4] ss:$8 sps:$4 sm:$0xff]   ;;  %v5693_v28 = vmin.bf16 %v14552_v6, %v13525_v61 }
 0x6c1   : > { %v5724_v9 = vmin.bf16 %v14552_v6, %v13756_v59  ;;  %v5876_v43 = vsub.bf16 %v10912_v47, %v14548_v17  ;;  %v5749_v38 = vmul.bf16 1069105081, %v5694_v54  ;;  %v5698_v13 = vmin.bf16 %v14552_v6, %v13549_v31 }
 0x6c2   : > { %v5836_v26 = vmul.bf16 1069105081, %v5723_v39  ;;  %v5915_v27 = vsel %vm5675_vm13, %v13687_v10, %v5875_v11  ;;  %v5746_v47 = vmul.bf16 1069105081, %v5693_v28  ;;  %vm5684_vm0 = vcmp.gt.bf16.partialorder %v13756_v59, 0 }
 0x6c3   : > { %v5839_v8 = vmul.bf16 1069105081, %v5724_v9  ;;  %v5916_v25 = vsel %vm5676_vm12, %v13694_v12, %v5876_v43  ;;  %6877 = vmatpush1.bf16.msra.mxu0 %v10547_v21  ;;  %7143 = vmatpush1.bf16.msra.mxu1 %v10550_v56  ;;  %v10561_v12 = vld [vmem:[#allocation9 + $0x3e4] ss:$16 sps:$4 sm:$0xff]   ;;  %v5761_v9 = vmul.bf16 1069105081, %v5698_v13  ;;  %v5705_v28 = vmin.bf16 %v14552_v6, %v13599_v41 }
 0x6c4   : > { %10919 = vpow.bf16 %v5836_v26  ;;  %6819 = vmatprep.mubr.bf16.mxu0 %v5916_v25  ;;  %7085 = vmatprep.mubr.bf16.mxu1 %v5916_v25  ;;  %vm5683_vm1 = vcmp.gt.bf16.partialorder %v13749_v2, 0  ;;  %v5710_v13 = vmin.bf16 %v14552_v6, %v13636_v1  ;;  %vm5665_vm11 = vcmp.gt.bf16.partialorder %v13599_v41, 0 }
 0x6c5   : > { %10921 = vpow.bf16 %v5839_v8  ;;  %6878 = vmatprep.subr.bf16.mxu0 %v10555_v7  ;;  %7144 = vmatprep.subr.bf16.mxu1 %v10558_v45  ;;  %v5702_v7 = vmin.bf16 %v14552_v6, %v13576_v62  ;;  %vm5670_vm12 = vcmp.gt.bf16.partialorder %v13636_v1, 0  ;;  %vm5669_vm13 = vcmp.gt.bf16.partialorder %v13629_v49, 0 }
 0x6c6   : > { %6820 = vmatmul.mubr.bf16.gmra.mrb[148].mxu0 %v5915_v27  ;;  %7086 = vmatmul.mubr.bf16.gmra.mrb[228].mxu1 %v5915_v27  ;;  %10923 = vpow.bf16 %v5734_v24  ;;  %v13810_v27 = vld [vmem:[#allocation10 + $0x100] ss:$8 sps:$4 sm:$0xff]  }
 0x6c7   : > { %v10914_v5 = vpop.eup %10913  ;;  %6879 = vmatpush1.bf16.msra.mxu0 %v10553_v29  ;;  %7145 = vmatpush1.bf16.msra.mxu1 %v10556_v52  ;;  %10925 = vpow.bf16 %v5749_v38  ;;  %v5773_v14 = vmul.bf16 1069105081, %v5702_v7  ;;  %v5706_v52 = vmin.bf16 %v14552_v6, %v13606_v22 }
 0x6c8   : > { %v10916_v33 = vpop.eup %10915  ;;  %v5879_v10 = vsub.bf16 %v10914_v5, %v14548_v17  ;;  %6880 = vmatprep.subr.bf16.mxu0 %v10561_v12  ;;  %7146 = vmatprep.subr.bf16.mxu1 %v10564_v3  ;;  %10927 = vpow.bf16 %v5746_v47  ;;  %v10570_v3 = vld [vmem:[#allocation10 + $0x14] ss:$8 sps:$4 sm:$0xff]  }
 0x6c9   : > { %v5880_v23 = vsub.bf16 %v10916_v33, %v14548_v17  ;;  %10929 = vpow.bf16 %v5761_v9  ;;  %v13814_v5 = vld [vmem:[#allocation10 + $0x114] ss:$8 sps:$4 sm:$0xff]  }
 0x6ca   : > { %v10918_v51 = vpop.eup %10917  ;;  %v5919_v15 = vsel %vm5679_vm15, %v13717_v19, %v5879_v10  ;;  %v5697_v19 = vmin.bf16 %v14552_v6, %v13545_v63  ;;  %vm5673_vm15 = vcmp.gt.bf16.partialorder %v13659_v18, 0 }
 0x6cb   : > { %v5920_v42 = vsel %vm5680_vm14, %v13724_v55, %v5880_v23  ;;  %6881 = vmatpush1.bf16.msra.mxu0 %v10559_v16  ;;  %7147 = vmatpush1.bf16.msra.mxu1 %v10562_v35  ;;  %v5850_v56 = vsub.bf16 %v10918_v51, %v14548_v17  ;;  %v5785_v16 = vmul.bf16 1069105081, %v5706_v52  ;;  %v10568_v35 = vld [vmem:[#allocation10 + $0x10] ss:$8 sps:$4 sm:$0xff]   ;;  %v10571_v51 = vld [vmem:[#allocation10 + $0x20] ss:$8 sps:$4 sm:$0xff]  }
 0x6cc   : > { %6829 = vmatprep.mubr.bf16.mxu0 %v5920_v42  ;;  %7095 = vmatprep.mubr.bf16.mxu1 %v5920_v42  ;;  %v5758_v25 = vmul.bf16 1069105081, %v5697_v19  ;;  %v13822_v42 = vld [vmem:[#allocation10 + $0x124] ss:$8 sps:$4 sm:$0xff]   ;;  %v10580_v52 = vld [vmem:[#allocation10 + $0x50] ss:$8 sps:$4 sm:$0xff]  }
 0x6cd   : > { %7965 = vmatprep.subr.bf16.mxu0 %v10567_v32  ;;  %9063 = vmatprep.subr.bf16.mxu1 %v13780_v60  ;;  %v10573_v32 = vld [vmem:[#allocation10 + $0x24] ss:$8 sps:$4 sm:$0xff]   ;;  %vm5674_vm14 = vcmp.gt.bf16.partialorder %v13666_v48, 0 }
 0x6ce   : > { %6830 = vmatmul.mubr.bf16.gmra.mrb[152].mxu0 %v5919_v15  ;;  %7096 = vmatmul.mubr.bf16.gmra.mrb[232].mxu1 %v5919_v15  ;;  %10931 = vpow.bf16 %v5758_v25  ;;  %v13831_v15 = vld [vmem:[#allocation10 + $0x120] ss:$8 sps:$4 sm:$0xff]   ;;  %v10579_v19 = vld [vmem:[#allocation10 + $0x44] ss:$8 sps:$4 sm:$0xff]  }
 0x6cf   : > { %v10920_v55 = vpop.eup %10919  ;;  %10933 = vpow.bf16 %v5773_v14 }
 0x6d0   : > { %v10922_v39 = vpop.eup %10921  ;;  %v5883_v26 = vsub.bf16 %v10920_v55, %v14548_v17 }
 0x6d1   : > { %v5884_v21 = vsub.bf16 %v10922_v39, %v14548_v17  ;;  %v10924_v11 = vpop.eup %10923  ;;  %v10576_v39 = vld [vmem:[#allocation10 + $0x34] ss:$8 sps:$4 sm:$0xff]  }
 0x6d2   : > { %v5923_v8 = vsel %vm5683_vm1, %v13749_v2, %v5883_v26  ;;  %v10926_v45 = vpop.eup %10925  ;;  %v5849_v54 = vsub.bf16 %v10924_v11, %v14548_v17  ;;  %v5701_v2 = vmin.bf16 %v14552_v6, %v13569_v53  ;;  %v5782_v26 = vmul.bf16 1069105081, %v5705_v28  ;;  %v10577_v11 = vld [vmem:[#allocation10 + $0x40] ss:$8 sps:$4 sm:$0xff]  }
 0x6d3   : > { %v5924_v43 = vsel %vm5684_vm0, %v13756_v59, %v5884_v21  ;;  %v5890_v59 = vsel %vm5650_vm2, %v13509_v44, %v5850_v56  ;;  %v5854_v29 = vsub.bf16 %v10926_v45, %v14548_v17  ;;  %v10565_v44 = vld [vmem:[#allocation10] ss:$8 sps:$4 sm:$0xff]   ;;  %v10928_v33 = vpop.eup %10927  ;;  %v10574_v56 = vld [vmem:[#allocation10 + $0x30] ss:$8 sps:$4 sm:$0xff]   ;;  %v10582_v45 = vld [vmem:[#allocation10 + $0x54] ss:$8 sps:$4 sm:$0xff]  }
 0x6d4   : > { %6839 = vmatprep.mubr.bf16.mxu0 %v5924_v43  ;;  %7105 = vmatprep.mubr.bf16.mxu1 %v5924_v43  ;;  %v5889_v12 = vsel %vm5649_vm3, %v13505_v20, %v5849_v54  ;;  %v10930_v38 = vpop.eup %10929  ;;  %v5770_v23 = vmul.bf16 1069105081, %v5701_v2  ;;  %v13818_v20 = vld [vmem:[#allocation10 + $0x110] ss:$8 sps:$4 sm:$0xff]   ;;  %v5853_v10 = vsub.bf16 %v10928_v33, %v14548_v17  ;;  %v5797_v43 = vmul.bf16 1069105081, %v5710_v13 }
 0x6d5   : > { %v5894_v24 = vsel %vm5654_vm4, %v13529_v57, %v5854_v29  ;;  %v5858_v57 = vsub.bf16 %v10930_v38, %v14548_v17  ;;  %v10583_v33 = vld [vmem:[#allocation10 + $0x60] ss:$8 sps:$4 sm:$0xff]   ;;  %v10588_v38 = vld [vmem:[#allocation10 + $0x74] ss:$8 sps:$4 sm:$0xff]   ;;  %vm5678_vm0 = vcmp.gt.bf16.partialorder %v13696_v40, 0  ;;  %vm5677_vm1 = vcmp.gt.bf16.partialorder %v13689_v50, 0 }
 0x6d6   : > { %6840 = vmatmul.mubr.bf16.gmra.mrb[156].mxu0 %v5923_v8  ;;  %7106 = vmatmul.mubr.bf16.gmra.mrb[236].mxu1 %v5923_v8  ;;  %10935 = vpow.bf16 %v5770_v23  ;;  %v5893_v55 = vsel %vm5653_vm5, %v13525_v61, %v5853_v10  ;;  %v5709_v8 = vmin.bf16 %v14552_v6, %v13629_v49  ;;  %vm5682_vm2 = vcmp.gt.bf16.partialorder %v13726_v30, 0 }
 0x6d7   : > { %6882 = vmatprep.mubr.bf16.mxu0 %v5890_v59  ;;  %7148 = vmatprep.mubr.bf16.mxu1 %v5890_v59  ;;  %10937 = vpow.bf16 %v5785_v16  ;;  %v5898_v9 = vsel %vm5658_vm6, %v13549_v31, %v5858_v57  ;;  %v5714_v31 = vmin.bf16 %v14552_v6, %v13666_v48  ;;  %v10586_v57 = vld [vmem:[#allocation10 + $0x70] ss:$8 sps:$4 sm:$0xff]   ;;  %vm5681_vm3 = vcmp.gt.bf16.partialorder %v13719_v46, 0 }
 0x6d8   : > { %10939 = vpow.bf16 %v5782_v26  ;;  %v5794_v29 = vmul.bf16 1069105081, %v5709_v8  ;;  %v5721_v8 = vmin.bf16 %v14552_v6, %v13719_v46  ;;  %vm5686_vm4 = vcmp.gt.bf16.partialorder %v13758_v37, 0 }
 0x6d9   : > { %v10932_v47 = vpop.eup %10931  ;;  %10941 = vpow.bf16 %v5797_v43  ;;  %v5809_v2 = vmul.bf16 1069105081, %v5714_v31  ;;  %v10604_v31 = vld [vmem:[#allocation10 + $0xa0] ss:$8 sps:$4 sm:$0xff]   ;;  %vm5685_vm5 = vcmp.gt.bf16.partialorder %v13751_v0, 0 }
 0x6da   : > { %v10934_v21 = vpop.eup %10933  ;;  %v5857_v61 = vsub.bf16 %v10932_v47, %v14548_v17  ;;  %10943 = vpow.bf16 %v5794_v29  ;;  %v10600_v47 = vld [vmem:[#allocation10 + $0x94] ss:$8 sps:$4 sm:$0xff]  }
 0x6db   : > { %v5862_v7 = vsub.bf16 %v10934_v21, %v14548_v17  ;;  %10945 = vpow.bf16 %v5809_v2 }
 0x6dc   : > { %v5897_v59 = vsel %vm5657_vm7, %v13545_v63, %v5857_v61  ;;  %v10585_v63 = vld [vmem:[#allocation10 + $0x64] ss:$8 sps:$4 sm:$0xff]   ;;  %v10598_v61 = vld [vmem:[#allocation10 + $0x90] ss:$8 sps:$4 sm:$0xff]  }
 0x6dd   : > { %v5902_v14 = vsel %vm5662_vm8, %v13576_v62, %v5862_v7  ;;  %v5718_v62 = vmin.bf16 %v14552_v6, %v13696_v40 }
 0x6de   : > { %6883 = vmatmul.mubr.bf16.vlgmr.msra.gmra.mrb[120].mxu0 %v5889_v12  ;;  %7149 = vmatmul.mubr.bf16.vlgmr.msra.gmra.mrb[200].mxu1 %v5889_v12 }
 0x6df   : > { %6892 = vmatprep.mubr.bf16.mxu0 %v5894_v24  ;;  %7158 = vmatprep.mubr.bf16.mxu1 %v5894_v24 }
 0x6e0   : > { %7966 = vmatpush1.bf16.msra.mxu0 %v10565_v44  ;;  %9079 = vmatpush1.bf16.msra.mxu1 %v13810_v27 }
 0x6e1   : > { %7967 = vmatprep.subr.bf16.mxu0 %v10570_v3  ;;  %9064 = vmatprep.subr.bf16.mxu1 %v13814_v5  ;;  %v10936_v25 = vpop.eup %10935  ;;  %v5713_v3 = vmin.bf16 %v14552_v6, %v13659_v18 }
 0x6e2   : > { %v10938_v54 = vpop.eup %10937  ;;  %v5861_v44 = vsub.bf16 %v10936_v25, %v14548_v17 }
 0x6e3   : > { %v5866_v12 = vsub.bf16 %v10938_v54, %v14548_v17  ;;  %v10940_v23 = vpop.eup %10939  ;;  %v5806_v10 = vmul.bf16 1069105081, %v5713_v3 }
 0x6e4   : > { %7968 = vmatpush1.bf16.msra.mxu0 %v10568_v35  ;;  %9080 = vmatpush1.bf16.msra.mxu1 %v13818_v20  ;;  %v5901_v24 = vsel %vm5661_vm9, %v13569_v53, %v5861_v44  ;;  %v10942_v35 = vpop.eup %10941  ;;  %v5865_v28 = vsub.bf16 %v10940_v23, %v14548_v17  ;;  %v10591_v53 = vld [vmem:[#allocation10 + $0x84] ss:$8 sps:$4 sm:$0xff]  }
 0x6e5   : > { %7969 = vmatprep.subr.bf16.mxu0 %v10573_v32  ;;  %9065 = vmatprep.subr.bf16.mxu1 %v13822_v42  ;;  %v5906_v16 = vsel %vm5666_vm10, %v13606_v22, %v5866_v12  ;;  %v5821_v32 = vmul.bf16 1069105081, %v5718_v62  ;;  %v5870_v13 = vsub.bf16 %v10942_v35, %v14548_v17  ;;  %10947 = vpow.bf16 %v5806_v10 }
 0x6e6   : > { %6893 = vmatmul.mubr.bf16.gmra.mrb[124].mxu0 %v5893_v55  ;;  %7159 = vmatmul.mubr.bf16.gmra.mrb[204].mxu1 %v5893_v55  ;;  %v5722_v22 = vmin.bf16 %v14552_v6, %v13726_v30  ;;  %v10589_v55 = vld [vmem:[#allocation10 + $0x80] ss:$8 sps:$4 sm:$0xff]  }
 0x6e7   : > { %6902 = vmatprep.mubr.bf16.mxu0 %v5898_v9  ;;  %7168 = vmatprep.mubr.bf16.mxu1 %v5898_v9  ;;  %10949 = vpow.bf16 %v5821_v32  ;;  %v10944_v9 = vpop.eup %10943  ;;  %v5910_v21 = vsel %vm5670_vm12, %v13636_v1, %v5870_v13  ;;  %v5726_v1 = vmin.bf16 %v14552_v6, %v13758_v37  ;;  %v13901_v32 = vld [vmem:[#allocation10 + $0x130] ss:$8 sps:$4 sm:$0xff]   ;;  %v10618_v13 = vld [vmem:[#allocation10 + $0xc4] ss:$8 sps:$4 sm:$0xff]  }
 0x6e8   : > { %7970 = vmatpush1.bf16.msra.mxu0 %v10571_v51  ;;  %9081 = vmatpush1.bf16.msra.mxu1 %v13831_v15  ;;  %v5717_v51 = vmin.bf16 %v14552_v6, %v13689_v50  ;;  %v10946_v26 = vpop.eup %10945 }
 0x6e9   : > { %7971 = vmatprep.subr.bf16.mxu0 %v10576_v39  ;;  %v5905_v39 = vsel %vm5665_vm11, %v13599_v41, %v5865_v28  ;;  %v10606_v41 = vld [vmem:[#allocation10 + $0xa4] ss:$8 sps:$4 sm:$0xff]   ;;  %v5874_v7 = vsub.bf16 %v10946_v26, %v14548_v17  ;;  %v5845_v54 = vmul.bf16 1069105081, %v5726_v1  ;;  %v13907_v28 = vld [vmem:[#allocation10 + $0x140] ss:$8 sps:$4 sm:$0xff]  }
 0x6ea   : > { %v5818_v43 = vmul.bf16 1069105081, %v5717_v51  ;;  %v13911_v51 = vld [vmem:[#allocation10 + $0x154] ss:$8 sps:$4 sm:$0xff]   ;;  %v13927_v26 = vld [vmem:[#allocation10 + $0x170] ss:$8 sps:$4 sm:$0xff]  }
 0x6eb   : > { %v13939_v1 = vld [vmem:[#allocation10 + $0x190] ss:$8 sps:$4 sm:$0xff]  }
 0x6ec   : > { %7972 = vmatpush1.bf16.msra.mxu0 %v10574_v56  ;;  %v5833_v56 = vmul.bf16 1069105081, %v5722_v22  ;;  %10951 = vpow.bf16 %v5818_v43  ;;  %v13915_v22 = vld [vmem:[#allocation10 + $0x150] ss:$8 sps:$4 sm:$0xff]   ;;  %v10631_v43 = vld [vmem:[#allocation10 + $0xe0] ss:$8 sps:$4 sm:$0xff]  }
 0x6ed   : > { %7973 = vmatprep.subr.bf16.mxu0 %v10579_v19  ;;  %v5869_v19 = vsub.bf16 %v10944_v9, %v14548_v17  ;;  %v10627_v9 = vld [vmem:[#allocation10 + $0xd4] ss:$8 sps:$4 sm:$0xff]  }
 0x6ee   : > { %6903 = vmatmul.mubr.bf16.gmra.mrb[128].mxu0 %v5897_v59  ;;  %7169 = vmatmul.mubr.bf16.gmra.mrb[208].mxu1 %v5897_v59  ;;  %10953 = vpow.bf16 %v5833_v56  ;;  %v10633_v56 = vld [vmem:[#allocation10 + $0xe4] ss:$8 sps:$4 sm:$0xff]  }
 0x6ef   : > { %6912 = vmatprep.mubr.bf16.mxu0 %v5902_v14  ;;  %7178 = vmatprep.mubr.bf16.mxu1 %v5902_v14  ;;  %v5830_v14 = vmul.bf16 1069105081, %v5721_v8  ;;  %v13935_v8 = vld [vmem:[#allocation10 + $0x194] ss:$8 sps:$4 sm:$0xff]  }
 0x6f0   : > { %7974 = vmatpush1.bf16.msra.mxu0 %v10577_v11  ;;  %v5909_v11 = vsel %vm5669_vm13, %v13629_v49, %v5869_v19  ;;  %v10948_v59 = vpop.eup %10947  ;;  %v5725_v49 = vmin.bf16 %v14552_v6, %v13751_v0  ;;  %v13933_v19 = vld [vmem:[#allocation10 + $0x184] ss:$8 sps:$4 sm:$0xff]  }
 0x6f1   : > { %7975 = vmatprep.subr.bf16.mxu0 %v10582_v45  ;;  %v5914_v45 = vsel %vm5674_vm14, %v13666_v48, %v5874_v7  ;;  %v5873_v29 = vsub.bf16 %v10948_v59, %v14548_v17  ;;  %10955 = vpow.bf16 %v5830_v14  ;;  %v10639_v7 = vld [vmem:[#allocation10 + $0xf4] ss:$8 sps:$4 sm:$0xff]  }
 0x6f2   : > { %v10950_v25 = vpop.eup %10949  ;;  %10957 = vpow.bf16 %v5845_v54  ;;  %v5842_v12 = vmul.bf16 1069105081, %v5725_v49  ;;  %v13948_v59 = vld [vmem:[#allocation10 + $0x1b4] ss:$8 sps:$4 sm:$0xff]   ;;  %v13964_v54 = vld [vmem:[#allocation10 + $0x1d0] ss:$8 sps:$4 sm:$0xff]  }
 0x6f3   : > { %v5878_v2 = vsub.bf16 %v10950_v25, %v14548_v17  ;;  %v13956_v25 = vld [vmem:[#allocation10 + $0x1c0] ss:$8 sps:$4 sm:$0xff]   ;;  %v13960_v14 = vld [vmem:[#allocation10 + $0x1d4] ss:$8 sps:$4 sm:$0xff]  }
 0x6f4   : > { %7976 = vmatpush1.bf16.msra.mxu0 %v10580_v52  ;;  %v5913_v52 = vsel %vm5673_vm15, %v13659_v18, %v5873_v29  ;;  %10959 = vpow.bf16 %v5842_v12  ;;  %v13968_v29 = vld [vmem:[#allocation10 + $0x1e0] ss:$8 sps:$4 sm:$0xff]   ;;  %v13972_v49 = vld [vmem:[#allocation10 + $0x1f4] ss:$8 sps:$4 sm:$0xff]  }
 0x6f5   : > { %7977 = vmatprep.subr.bf16.mxu0 %v10585_v63  ;;  %v5918_v44 = vsel %vm5678_vm0, %v13696_v40, %v5878_v2  ;;  %14578 = vst [vmem:[#allocation18_spill] sm:$0xff] %v13968_v29  ;;  %v13970_v2 = vld [vmem:[#allocation10 + $0x1e4] ss:$8 sps:$4 sm:$0xff]   ;;  %14579 = vst [vmem:[#allocation19_spill] sm:$0xff] %v13972_v49 }
 0x6f6   : > { %6913 = vmatmul.mubr.bf16.gmra.mrb[132].mxu0 %v5901_v24  ;;  %7179 = vmatmul.mubr.bf16.gmra.mrb[212].mxu1 %v5901_v24 }
 0x6f7   : > { %6922 = vmatprep.mubr.bf16.mxu0 %v5906_v16  ;;  %7188 = vmatprep.mubr.bf16.mxu1 %v5906_v16  ;;  %v10952_v48 = vpop.eup %10951 }
 0x6f8   : > { %7978 = vmatpush1.bf16.msra.mxu0 %v10583_v33  ;;  %v5877_v3 = vsub.bf16 %v10952_v48, %v14548_v17  ;;  %v6055_v48 = vld [vmem:[%s14581_s30] sm:$0xf] }
 0x6f9   : > { %7979 = vmatprep.subr.bf16.mxu0 %v10588_v38  ;;  %v10954_v63 = vpop.eup %10953 }
 0x6fa   : > { %v5882_v62 = vsub.bf16 %v10954_v63, %v14548_v17  ;;  %v5917_v18 = vsel %vm5677_vm1, %v13689_v50, %v5877_v3  ;;  %v13987_v63 = vrot.slane %v6055_v48, %v12444_v4 }
 0x6fc   : > { %7980 = vmatpush1.bf16.msra.mxu0 %v10586_v57  ;;  %v10956_v33 = vpop.eup %10955  ;;  %v5922_v40 = vsel %vm5682_vm2, %v13726_v30, %v5882_v62  ;;  %v10610_v57 = vld [vmem:[#allocation10 + $0xb0] ss:$8 sps:$4 sm:$0xff]   ;;  %v13990_v62 = vrot.slane %v6055_v48, %v11574_v36 }
 0x6fd   : > { %7981 = vmatprep.subr.bf16.mxu0 %v10591_v53  ;;  %v10958_v24 = vpop.eup %10957  ;;  %v5881_v38 = vsub.bf16 %v10956_v33, %v14548_v17  ;;  %v13909_v53 = vld [vmem:[#allocation10 + $0x144] ss:$8 sps:$4 sm:$0xff]  }
 0x6fe   : > { %6923 = vmatmul.mubr.bf16.gmra.mrb[136].mxu0 %v5905_v39  ;;  %7189 = vmatmul.mubr.bf16.gmra.mrb[216].mxu1 %v5905_v39  ;;  %v5886_v23 = vsub.bf16 %v10958_v24, %v14548_v17  ;;  %v13921_v39 = vld [vmem:[#allocation10 + $0x164] ss:$8 sps:$4 sm:$0xff]  }
 0x6ff   : > { %6932 = vmatprep.mubr.bf16.mxu0 %v5910_v21  ;;  %7198 = vmatprep.mubr.bf16.mxu1 %v5910_v21  ;;  %v5921_v16 = vsel %vm5681_vm3, %v13719_v46, %v5881_v38  ;;  %v10960_v50 = vpop.eup %10959  ;;  %v13903_v46 = vld [vmem:[#allocation10 + $0x134] ss:$8 sps:$4 sm:$0xff]  }
 0x700   : > { %7982 = vmatpush1.bf16.msra.mxu0 %v10589_v55  ;;  %v5926_v35 = vsel %vm5686_vm4, %v13758_v37, %v5886_v23  ;;  %v5885_v30 = vsub.bf16 %v10960_v50, %v14548_v17  ;;  %9066 = vmatprep.subr.bf16.mxu1 %v13903_v46  ;;  %v10612_v37 = vld [vmem:[#allocation10 + $0xb4] ss:$8 sps:$4 sm:$0xff]   ;;  %v13919_v55 = vld [vmem:[#allocation10 + $0x160] ss:$8 sps:$4 sm:$0xff]  }
 0x701   : > { %7983 = vmatprep.subr.bf16.mxu0 %v10600_v47  ;;  %9082 = vmatpush1.bf16.msra.mxu1 %v13901_v32  ;;  %v10625_v47 = vld [vmem:[#allocation10 + $0xd0] ss:$8 sps:$4 sm:$0xff]   ;;  %v13923_v21 = vld [vmem:[#allocation10 + $0x174] ss:$8 sps:$4 sm:$0xff]  }
 0x702   : > { %v5925_v10 = vsel %vm5685_vm5, %v13751_v0, %v5885_v30  ;;  %9067 = vmatprep.subr.bf16.mxu1 %v13909_v53  ;;  %v10616_v0 = vld [vmem:[#allocation10 + $0xc0] ss:$8 sps:$4 sm:$0xff]  }
 0x704   : > { %7984 = vmatpush1.bf16.msra.mxu0 %v10598_v61  ;;  %v13931_v61 = vld [vmem:[#allocation10 + $0x180] ss:$8 sps:$4 sm:$0xff]  }
 0x705   : > { %7985 = vmatprep.subr.bf16.mxu0 %v10606_v41  ;;  %9083 = vmatpush1.bf16.msra.mxu1 %v13907_v28  ;;  %v10637_v41 = vld [vmem:[#allocation10 + $0xf0] ss:$8 sps:$4 sm:$0xff]  }
 0x706   : > { %6933 = vmatmul.mubr.bf16.gmra.mrb[140].mxu0 %v5909_v11  ;;  %7199 = vmatmul.mubr.bf16.gmra.mrb[220].mxu1 %v5909_v11  ;;  %v13946_v11 = vld [vmem:[#allocation10 + $0x1a4] ss:$8 sps:$4 sm:$0xff]  }
 0x707   : > { %6942 = vmatprep.mubr.bf16.mxu0 %v5914_v45  ;;  %7208 = vmatprep.mubr.bf16.mxu1 %v5914_v45  ;;  %v13952_v45 = vld [vmem:[#allocation10 + $0x1b0] ss:$8 sps:$4 sm:$0xff]  }
 0x708   : > { %7986 = vmatpush1.bf16.msra.mxu0 %v10604_v31  ;;  %9068 = vmatprep.subr.bf16.mxu1 %v13911_v51  ;;  %v13944_v31 = vld [vmem:[#allocation10 + $0x1a0] ss:$8 sps:$4 sm:$0xff]  }
 0x709   : > { %7987 = vmatprep.subr.bf16.mxu0 %v10612_v37  ;;  %9084 = vmatpush1.bf16.msra.mxu1 %v13915_v22 }
 0x70a   : > { %9069 = vmatprep.subr.bf16.mxu1 %v13921_v39 }
 0x70c   : > { %7988 = vmatpush1.bf16.msra.mxu0 %v10610_v57 }
 0x70d   : > { %7989 = vmatprep.subr.bf16.mxu0 %v10618_v13  ;;  %9085 = vmatpush1.bf16.msra.mxu1 %v13919_v55 }
 0x70e   : > { %6943 = vmatmul.mubr.bf16.gmra.mrb[144].mxu0 %v5913_v52  ;;  %7209 = vmatmul.mubr.bf16.gmra.mrb[224].mxu1 %v5913_v52  ;;  %v13976_v52 = vld [vmem:[#allocation10 + $0x1f0] ss:$8 sps:$4 sm:$0xff]  }
 0x70f   : > { %6952 = vmatprep.mubr.bf16.mxu0 %v5918_v44  ;;  %7218 = vmatprep.mubr.bf16.mxu1 %v5918_v44  ;;  %14580 = vst [vmem:[#allocation20_spill] sm:$0xff] %v13976_v52  ;;  %v13984_v44 = vrot.slane %v6055_v48, %v11571_v34 }
 0x710   : > { %7990 = vmatpush1.bf16.msra.mxu0 %v10616_v0  ;;  %9070 = vmatprep.subr.bf16.mxu1 %v13923_v21 }
 0x711   : > { %7991 = vmatprep.subr.bf16.mxu0 %v10627_v9  ;;  %9086 = vmatpush1.bf16.msra.mxu1 %v13927_v26 }
 0x712   : > { %9071 = vmatprep.subr.bf16.mxu1 %v13933_v19 }
 0x714   : > { %7992 = vmatpush1.bf16.msra.mxu0 %v10625_v47 }
 0x715   : > { %7993 = vmatprep.subr.bf16.mxu0 %v10633_v56  ;;  %9087 = vmatpush1.bf16.msra.mxu1 %v13931_v61 }
 0x716   : > { %6953 = vmatmul.mubr.bf16.gmra.mrb[148].mxu0 %v5917_v18  ;;  %7219 = vmatmul.mubr.bf16.gmra.mrb[228].mxu1 %v5917_v18  ;;  %v13993_v18 = vrot.slane %v6055_v48, %v12467_v58 }
 0x717   : > { %6962 = vmatprep.mubr.bf16.mxu0 %v5922_v40  ;;  %7228 = vmatprep.mubr.bf16.mxu1 %v5922_v40 }
 0x718   : > { %7994 = vmatpush1.bf16.msra.mxu0 %v10631_v43  ;;  %9072 = vmatprep.subr.bf16.mxu1 %v13935_v8 }
 0x719   : > { %7995 = vmatprep.subr.bf16.mxu0 %v10639_v7  ;;  %9088 = vmatpush1.bf16.msra.mxu1 %v13939_v1 }
 0x71a   : > { %9073 = vmatprep.subr.bf16.mxu1 %v13946_v11 }
 0x71c   : > { %7996 = vmatpush1.bf16.msra.mxu0 %v10637_v41 }
 0x71d   : > { %8098 = vmatprep.subr.bf16.mxu0 %v13780_v60  ;;  %9089 = vmatpush1.bf16.msra.mxu1 %v13944_v31  ;;  %v13958_v60 = vld [vmem:[#allocation10 + $0x1c4] ss:$8 sps:$4 sm:$0xff]  }
 0x71e   : > { %6963 = vmatmul.mubr.bf16.gmra.mrb[152].mxu0 %v5921_v16  ;;  %7229 = vmatmul.mubr.bf16.gmra.mrb[232].mxu1 %v5921_v16 }
 0x71f   : > { %6972 = vmatprep.mubr.bf16.mxu0 %v5926_v35  ;;  %7238 = vmatprep.mubr.bf16.mxu1 %v5926_v35 }
 0x720   : > { %9074 = vmatprep.subr.bf16.mxu1 %v13948_v59 }
 0x721   : > { %9090 = vmatpush1.bf16.msra.mxu1 %v13952_v45 }
 0x722   : > { %9075 = vmatprep.subr.bf16.mxu1 %v13958_v60 }
 0x725   : > { %9091 = vmatpush1.bf16.msra.mxu1 %v13956_v25 }
 0x726   : > { %6973 = vmatmul.mubr.bf16.gmra.mrb[156].mxu0 %v5925_v10  ;;  %7239 = vmatmul.mubr.bf16.gmra.mrb[236].mxu1 %v5925_v10 }
 0x727   : > { %9076 = vmatprep.subr.bf16.mxu1 %v13960_v14 }
 0x729   : > { %9092 = vmatpush1.bf16.msra.mxu1 %v13964_v54 }
 0x72a   : > { %9077 = vmatprep.subr.bf16.mxu1 %v13970_v2 }
 0x72d   : > { %9093 = vmatpush1.bf16.msra.mxu1 %v13968_v29 }
 0x72e   : > { %9078 = vmatprep.subr.bf16.mxu1 %v13972_v49 }
 0x731   : > { %9094 = vmatpush1.bf16.msra.mxu1 %v13976_v52 }
 0x7b1   : > { %v6884_v12 = vpop.f32.mrb[120].mxu0  ;;  %v7150_v3 = vpop.f32.mrb[200].mxu1 }
 0x7b2   : > { %v6886_v33 = vpop.f32.mrb[121].mxu0  ;;  %v7152_v40 = vpop.f32.mrb[201].mxu1  ;;  %v9295_v23 = vadd.f32 %v6884_v12, %v13984_v44  ;;  %v9335_v16 = vadd.f32 %v7150_v3, %v13987_v63 }
 0x7b3   : > { %v6888_v24 = vpop.f32.mrb[122].mxu0  ;;  %v7154_v38 = vpop.f32.mrb[202].mxu1  ;;  %v9296_v10 = vadd.f32 %v6886_v33, %v13990_v62  ;;  %v9336_v57 = vadd.f32 %v7152_v40, %v13993_v18 }
 0x7b4   : > { %v9297_v50 = vadd.f32 %v6888_v24, %v13984_v44  ;;  %v9337_v4 = vadd.f32 %v7154_v38, %v13987_v63  ;;  %v6890_v35 = vpop.f32.mrb[123].mxu0  ;;  %v7156_v30 = vpop.f32.mrb[203].mxu1 }
 0x7b5   : > { %v9298_v58 = vadd.f32 %v6890_v35, %v13990_v62  ;;  %v9338_v37 = vadd.f32 %v7156_v30, %v13993_v18 }
 0x7b6   : > { %v14003_v13 = vpack.c.bf16 %v9297_v50, %v9295_v23  ;;  %v14005_v0 = vpack.c.bf16 %v9337_v4, %v9335_v16 }
 0x7b7   : > { %v14007_v47 = vpack.c.bf16 %v9298_v58, %v9296_v10  ;;  %v14009_v9 = vpack.c.bf16 %v9338_v37, %v9336_v57 }
 0x7b8   : > { %14582 = vst [vmem:[#allocation21_spill] sm:$0xff] %v14005_v0  ;;  %v7329_v43 = vmin.bf16 %v14552_v6, %v14003_v13  ;;  %vm7289_vm6 = vcmp.gt.bf16.partialorder %v14003_v13, 0 }
 0x7b9   : > { %v7330_v56 = vmin.bf16 %v14552_v6, %v14007_v47  ;;  %v6894_v41 = vpop.f32.mrb[124].mxu0  ;;  %v7160_v7 = vpop.f32.mrb[204].mxu1  ;;  %vm7290_vm7 = vcmp.gt.bf16.partialorder %v14007_v47, 0 }
 0x7ba   : > { %v7370_v48 = vmul.bf16 1069105081, %v7329_v43  ;;  %v6896_v12 = vpop.f32.mrb[125].mxu0  ;;  %v7162_v3 = vpop.f32.mrb[205].mxu1  ;;  %v9299_v40 = vadd.f32 %v6894_v41, %v13984_v44  ;;  %v9339_v23 = vadd.f32 %v7160_v7, %v13987_v63 }
 0x7bb   : > { %v7373_v33 = vmul.bf16 1069105081, %v7330_v56  ;;  %v6898_v24 = vpop.f32.mrb[126].mxu0  ;;  %v7164_v38 = vpop.f32.mrb[206].mxu1  ;;  %v9300_v16 = vadd.f32 %v6896_v12, %v13990_v62  ;;  %v9340_v10 = vadd.f32 %v7162_v3, %v13993_v18 }
 0x7bc   : > { %v9301_v50 = vadd.f32 %v6898_v24, %v13984_v44  ;;  %v9341_v4 = vadd.f32 %v7164_v38, %v13987_v63  ;;  %v6900_v35 = vpop.f32.mrb[127].mxu0  ;;  %v7166_v30 = vpop.f32.mrb[207].mxu1  ;;  %10961 = vpow.bf16 %v7370_v48 }
 0x7bd   : > { %v9302_v57 = vadd.f32 %v6900_v35, %v13990_v62  ;;  %v9342_v58 = vadd.f32 %v7166_v30, %v13993_v18  ;;  %10963 = vpow.bf16 %v7373_v33 }
 0x7be   : > { %v14023_v37 = vpack.c.bf16 %v9301_v50, %v9299_v40  ;;  %v14025_v43 = vpack.c.bf16 %v9341_v4, %v9339_v23 }
 0x7bf   : > { %v14027_v56 = vpack.c.bf16 %v9302_v57, %v9300_v16  ;;  %v14029_v41 = vpack.c.bf16 %v9342_v58, %v9340_v10 }
 0x7c0   : > { %14583 = vst [vmem:[#allocation22_spill] sm:$0xff] %v14025_v43  ;;  %v7333_v7 = vmin.bf16 %v14552_v6, %v14023_v37  ;;  %vm7293_vm9 = vcmp.gt.bf16.partialorder %v14023_v37, 0 }
 0x7c1   : > { %14584 = vst [vmem:[#allocation23_spill] sm:$0xff] %v14029_v41  ;;  %v7334_v48 = vmin.bf16 %v14552_v6, %v14027_v56  ;;  %v6904_v12 = vpop.f32.mrb[128].mxu0  ;;  %v7170_v3 = vpop.f32.mrb[208].mxu1  ;;  %vm7294_vm8 = vcmp.gt.bf16.partialorder %v14027_v56, 0 }
 0x7c2   : > { %v7382_v24 = vmul.bf16 1069105081, %v7333_v7  ;;  %v6906_v38 = vpop.f32.mrb[129].mxu0  ;;  %v7172_v35 = vpop.f32.mrb[209].mxu1  ;;  %v9303_v40 = vadd.f32 %v6904_v12, %v13984_v44  ;;  %v9343_v16 = vadd.f32 %v7170_v3, %v13987_v63 }
 0x7c3   : > { %v7385_v33 = vmul.bf16 1069105081, %v7334_v48  ;;  %v6908_v23 = vpop.f32.mrb[130].mxu0  ;;  %v7174_v50 = vpop.f32.mrb[210].mxu1  ;;  %v9304_v58 = vadd.f32 %v6906_v38, %v13990_v62  ;;  %v9344_v7 = vadd.f32 %v7172_v35, %v13993_v18 }
 0x7c4   : > { %10965 = vpow.bf16 %v7382_v24  ;;  %v9305_v4 = vadd.f32 %v6908_v23, %v13984_v44  ;;  %v9345_v30 = vadd.f32 %v7174_v50, %v13987_v63  ;;  %v6910_v10 = vpop.f32.mrb[131].mxu0  ;;  %v7176_v57 = vpop.f32.mrb[211].mxu1 }
 0x7c5   : > { %v9306_v17 = vadd.f32 %v6910_v10, %v13990_v62  ;;  %v9346_v48 = vadd.f32 %v7176_v57, %v13993_v18  ;;  %10967 = vpow.bf16 %v7385_v33 }
 0x7c6   : > { %v14043_v12 = vpack.c.bf16 %v9305_v4, %v9303_v40  ;;  %v14045_v24 = vpack.c.bf16 %v9345_v30, %v9343_v16 }
 0x7c7   : > { %v14047_v3 = vpack.c.bf16 %v9306_v17, %v9304_v58  ;;  %v14049_v23 = vpack.c.bf16 %v9346_v48, %v9344_v7  ;;  %v10962_v50 = vpop.eup %10961  ;;  %v14587_v7 = vmov 1065369472  }
 0x7c8   : > { %14585 = vst [vmem:[#allocation24_spill] sm:$0xff] %v14045_v24  ;;  %v7337_v36 = vmin.bf16 %v14552_v6, %v14043_v12  ;;  %v10964_v38 = vpop.eup %10963  ;;  %v7489_v48 = vsub.bf16 %v10962_v50, %v14587_v7  ;;  %vm7297_vm11 = vcmp.gt.bf16.partialorder %v14043_v12, 0 }
 0x7c9   : > { %14586 = vst [vmem:[#allocation25_spill] sm:$0xff] %v14049_v23  ;;  %v7338_v35 = vmin.bf16 %v14552_v6, %v14047_v3  ;;  %v6914_v10 = vpop.f32.mrb[132].mxu0  ;;  %v7180_v34 = vpop.f32.mrb[212].mxu1  ;;  %v7490_v43 = vsub.bf16 %v10964_v38, %v14587_v7  ;;  %vm7298_vm10 = vcmp.gt.bf16.partialorder %v14047_v3, 0 }
 0x7ca   : > { %v7394_v33 = vmul.bf16 1069105081, %v7337_v36  ;;  %v6916_v40 = vpop.f32.mrb[133].mxu0  ;;  %v7182_v16 = vpop.f32.mrb[213].mxu1  ;;  %v9307_v4 = vadd.f32 %v6914_v10, %v13984_v44  ;;  %v9347_v30 = vadd.f32 %v7180_v34, %v13987_v63 }
 0x7cb   : > { %v7397_v17 = vmul.bf16 1069105081, %v7338_v35  ;;  %v6918_v57 = vpop.f32.mrb[134].mxu0  ;;  %v7184_v58 = vpop.f32.mrb[214].mxu1  ;;  %v9308_v52 = vadd.f32 %v6916_v40, %v13990_v62  ;;  %v9348_v35 = vadd.f32 %v7182_v16, %v13993_v18  ;;  %v14588_v40 = vmov 0  }
 0x7cc   : > { %10969 = vpow.bf16 %v7394_v33  ;;  %v9309_v6 = vadd.f32 %v6918_v57, %v13984_v44  ;;  %v9349_v24 = vadd.f32 %v7184_v58, %v13987_v63  ;;  %v6920_v23 = vpop.f32.mrb[135].mxu0  ;;  %v7186_v36 = vpop.f32.mrb[215].mxu1  ;;  %v7530_v33 = vsel %vm7290_vm7, %v14007_v47, %v7490_v43 }
 0x7cd   : > { %v9310_v10 = vadd.f32 %v6920_v23, %v13990_v62  ;;  %v9350_v34 = vadd.f32 %v7186_v36, %v13993_v18  ;;  %10971 = vpow.bf16 %v7397_v17  ;;  %7997 = vmatprep.mubr.bf16.mxu0 %v7530_v33  ;;  %v7529_v23 = vsel %vm7289_vm6, %v14003_v13, %v7489_v48 }
 0x7ce   : > { %v14067_v49 = vpack.c.bf16 %v9309_v6, %v9307_v4  ;;  %v14069_v50 = vpack.c.bf16 %v9349_v24, %v9347_v30  ;;  %7998 = vmatmul.mubr.bf16.vlgmr.msra.gmra.mrb[160].mxu0 %v7529_v23 }
 0x7cf   : > { %v10966_v57 = vpop.eup %10965  ;;  %v14074_v58 = vpack.c.bf16 %v9310_v10, %v9308_v52  ;;  %v14076_v38 = vpack.c.bf16 %v9350_v34, %v9348_v35  ;;  %8099 = vmatpush1.bf16.msra.mxu0 %v13810_v27 }
 0x7d0   : > { %v7341_v6 = vmin.bf16 %v14588_v40, %v14067_v49  ;;  %v7343_v24 = vmin.bf16 %v14588_v40, %v14069_v50  ;;  %v10968_v16 = vpop.eup %10967  ;;  %8100 = vmatprep.subr.bf16.mxu0 %v13814_v5  ;;  %v7493_v35 = vsub.bf16 %v10966_v57, %v14587_v7  ;;  %vm7303_vm13 = vcmp.gt.bf16.partialorder %v14069_v50, 0 }
 0x7d1   : > { %v7342_v47 = vmin.bf16 %v14588_v40, %v14074_v58  ;;  %v7344_v52 = vmin.bf16 %v14588_v40, %v14076_v38  ;;  %v6924_v43 = vpop.f32.mrb[136].mxu0  ;;  %v7190_v17 = vpop.f32.mrb[216].mxu1  ;;  %v7494_v0 = vsub.bf16 %v10968_v16, %v14587_v7  ;;  %vm7302_vm12 = vcmp.gt.bf16.partialorder %v14074_v58, 0 }
 0x7d2   : > { %v7406_v13 = vmul.bf16 1069105081, %v7341_v6  ;;  %v7412_v4 = vmul.bf16 1069105081, %v7343_v24  ;;  %v9311_v30 = vadd.f32 %v6924_v43, %v13984_v44  ;;  %v6926_v48 = vpop.f32.mrb[137].mxu0  ;;  %v7192_v36 = vpop.f32.mrb[217].mxu1  ;;  %v9351_v27 = vadd.f32 %v7190_v17, %v13987_v63 }
 0x7d3   : > { %v7409_v10 = vmul.bf16 1069105081, %v7342_v47  ;;  %v7415_v34 = vmul.bf16 1069105081, %v7344_v52  ;;  %v9312_v33 = vadd.f32 %v6926_v48, %v13990_v62  ;;  %v6928_v23 = vpop.f32.mrb[138].mxu0  ;;  %v7194_v29 = vpop.f32.mrb[218].mxu1  ;;  %v9352_v5 = vadd.f32 %v7192_v36, %v13993_v18  ;;  %8101 = vmatpush1.bf16.msra.mxu0 %v13818_v20 }
 0x7d4   : > { %10973 = vpow.bf16 %v7406_v13  ;;  %v9313_v6 = vadd.f32 %v6928_v23, %v13984_v44  ;;  %v9353_v24 = vadd.f32 %v7194_v29, %v13987_v63  ;;  %v6930_v43 = vpop.f32.mrb[139].mxu0  ;;  %v7196_v41 = vpop.f32.mrb[219].mxu1  ;;  %v7534_v29 = vsel %vm7294_vm8, %v14027_v56, %v7494_v0  ;;  %8102 = vmatprep.subr.bf16.mxu0 %v13822_v42 }
 0x7d5   : > { %10975 = vpow.bf16 %v7412_v4  ;;  %v9314_v57 = vadd.f32 %v6930_v43, %v13990_v62  ;;  %v9354_v47 = vadd.f32 %v7196_v41, %v13993_v18  ;;  %8007 = vmatprep.mubr.bf16.mxu0 %v7534_v29  ;;  %v7533_v41 = vsel %vm7293_vm9, %v14023_v37, %v7493_v35 }
 0x7d6   : > { %10977 = vpow.bf16 %v7409_v10  ;;  %v14104_v52 = vpack.c.bf16 %v9313_v6, %v9311_v30  ;;  %v14106_v17 = vpack.c.bf16 %v9353_v24, %v9351_v27  ;;  %8008 = vmatmul.mubr.bf16.gmra.mrb[164].mxu0 %v7533_v41  ;;  %vm7304_vm14 = vcmp.gt.bf16.partialorder %v14076_v38, 0 }
 0x7d7   : > { %v10970_v16 = vpop.eup %10969  ;;  %10979 = vpow.bf16 %v7415_v34  ;;  %v14112_v13 = vpack.c.bf16 %v9314_v57, %v9312_v33  ;;  %v14114_v20 = vpack.c.bf16 %v9354_v47, %v9352_v5  ;;  %8103 = vmatpush1.bf16.msra.mxu0 %v13831_v15  ;;  %vm7301_vm15 = vcmp.gt.bf16.partialorder %v14067_v49, 0 }
 0x7d8   : > { %v7345_v4 = vmin.bf16 %v14588_v40, %v14104_v52  ;;  %v7347_v30 = vmin.bf16 %v14588_v40, %v14106_v17  ;;  %v10972_v0 = vpop.eup %10971  ;;  %8104 = vmatprep.subr.bf16.mxu0 %v13903_v46  ;;  %v7497_v27 = vsub.bf16 %v10970_v16, %v14587_v7  ;;  %vm7305_vm2 = vcmp.gt.bf16.partialorder %v14104_v52, 0 }
 0x7d9   : > { %v7346_v42 = vmin.bf16 %v14588_v40, %v14112_v13  ;;  %v7348_v56 = vmin.bf16 %v14588_v40, %v14114_v20  ;;  %v6934_v48 = vpop.f32.mrb[140].mxu0  ;;  %v7200_v36 = vpop.f32.mrb[220].mxu1  ;;  %v7498_v41 = vsub.bf16 %v10972_v0, %v14587_v7  ;;  %vm7306_vm0 = vcmp.gt.bf16.partialorder %v14112_v13, 0 }
 0x7da   : > { %v7418_v37 = vmul.bf16 1069105081, %v7345_v4  ;;  %v7424_v35 = vmul.bf16 1069105081, %v7347_v30  ;;  %v6936_v10 = vpop.f32.mrb[141].mxu0  ;;  %v7202_v34 = vpop.f32.mrb[221].mxu1  ;;  %v9315_v6 = vadd.f32 %v6934_v48, %v13984_v44  ;;  %v9355_v15 = vadd.f32 %v7200_v36, %v13987_v63 }
 0x7db   : > { %v7421_v33 = vmul.bf16 1069105081, %v7346_v42  ;;  %v7427_v23 = vmul.bf16 1069105081, %v7348_v56  ;;  %v6938_v24 = vpop.f32.mrb[142].mxu0  ;;  %v7204_v43 = vpop.f32.mrb[222].mxu1  ;;  %v9316_v46 = vadd.f32 %v6936_v10, %v13990_v62  ;;  %v9356_v16 = vadd.f32 %v7202_v34, %v13993_v18  ;;  %8105 = vmatpush1.bf16.msra.mxu0 %v13901_v32 }
 0x7dc   : > { %10981 = vpow.bf16 %v7418_v37  ;;  %v9317_v5 = vadd.f32 %v6938_v24, %v13984_v44  ;;  %v9357_v57 = vadd.f32 %v7204_v43, %v13987_v63  ;;  %v6940_v47 = vpop.f32.mrb[143].mxu0  ;;  %v7206_v29 = vpop.f32.mrb[223].mxu1  ;;  %v7538_v0 = vsel %vm7298_vm10, %v14047_v3, %v7498_v41  ;;  %8106 = vmatprep.subr.bf16.mxu0 %v13909_v53 }
 0x7dd   : > { %v9318_v4 = vadd.f32 %v6940_v47, %v13990_v62  ;;  %v9358_v30 = vadd.f32 %v7206_v29, %v13993_v18  ;;  %10983 = vpow.bf16 %v7421_v33  ;;  %8017 = vmatprep.mubr.bf16.mxu0 %v7538_v0  ;;  %v7537_v37 = vsel %vm7297_vm11, %v14043_v12, %v7497_v27 }
 0x7de   : > { %v14143_v42 = vpack.c.bf16 %v9317_v5, %v9315_v6  ;;  %v14145_v56 = vpack.c.bf16 %v9357_v57, %v9355_v15  ;;  %10985 = vpow.bf16 %v7427_v23  ;;  %8018 = vmatmul.mubr.bf16.gmra.mrb[168].mxu0 %v7537_v37  ;;  %vm7308_vm1 = vcmp.gt.bf16.partialorder %v14114_v20, 0 }
 0x7df   : > { %v10974_v48 = vpop.eup %10973  ;;  %v14152_v36 = vpack.c.bf16 %v9318_v4, %v9316_v46  ;;  %v14154_v32 = vpack.c.bf16 %v9358_v30, %v9356_v16  ;;  %10987 = vpow.bf16 %v7424_v35  ;;  %8107 = vmatpush1.bf16.msra.mxu0 %v13907_v28  ;;  %vm7307_vm3 = vcmp.gt.bf16.partialorder %v14106_v17, 0 }
 0x7e0   : > { %v10976_v10 = vpop.eup %10975  ;;  %v7349_v34 = vmin.bf16 %v14588_v40, %v14143_v42  ;;  %v14163_v53 = vmin.bf16 %v14588_v40, %v14145_v56  ;;  %v7501_v6 = vsub.bf16 %v10974_v48, %v14587_v7  ;;  %8108 = vmatprep.subr.bf16.mxu0 %v13911_v51  ;;  %vm7309_vm6 = vcmp.gt.bf16.partialorder %v14143_v42, 0 }
 0x7e1   : > { %v10978_v3 = vpop.eup %10977  ;;  %v7350_v33 = vmin.bf16 %v14588_v40, %v14152_v36  ;;  %v7352_v12 = vmin.bf16 %v14588_v40, %v14154_v32  ;;  %v6944_v27 = vpop.f32.mrb[144].mxu0  ;;  %v7503_v47 = vsub.bf16 %v10976_v10, %v14587_v7  ;;  %vm7310_vm4 = vcmp.gt.bf16.partialorder %v14152_v36, 0 }
 0x7e2   : > { %v7210_v23 = vpop.f32.mrb[224].mxu1  ;;  %v10980_v15 = vpop.eup %10979  ;;  %v7430_v24 = vmul.bf16 1069105081, %v7349_v34  ;;  %v7436_v43 = vmul.bf16 1069105081, %v14163_v53  ;;  %v9319_v5 = vadd.f32 %v6944_v27, %v13984_v44  ;;  %v7502_v34 = vsub.bf16 %v10978_v3, %v14587_v7 }
 0x7e3   : > { %v6946_v57 = vpop.f32.mrb[145].mxu0  ;;  %v7212_v35 = vpop.f32.mrb[225].mxu1  ;;  %v7433_v29 = vmul.bf16 1069105081, %v7350_v33  ;;  %v7439_v41 = vmul.bf16 1069105081, %v7352_v12  ;;  %v9359_v46 = vadd.f32 %v7210_v23, %v13987_v63  ;;  %v7504_v33 = vsub.bf16 %v10980_v15, %v14587_v7  ;;  %8109 = vmatpush1.bf16.msra.mxu0 %v13915_v22 }
 0x7e4   : > { %v9320_v28 = vadd.f32 %v6946_v57, %v13990_v62  ;;  %v6948_v16 = vpop.f32.mrb[146].mxu0  ;;  %v7214_v4 = vpop.f32.mrb[226].mxu1  ;;  %10989 = vpow.bf16 %v7430_v24  ;;  %v9360_v10 = vadd.f32 %v7212_v35, %v13993_v18  ;;  %v7542_v23 = vsel %vm7302_vm12, %v14074_v58, %v7502_v34  ;;  %8110 = vmatprep.subr.bf16.mxu0 %v13921_v39 }
 0x7e5   : > { %v9321_v30 = vadd.f32 %v6948_v16, %v13984_v44  ;;  %v9361_v0 = vadd.f32 %v7214_v4, %v13987_v63  ;;  %v6950_v48 = vpop.f32.mrb[147].mxu0  ;;  %v7216_v37 = vpop.f32.mrb[227].mxu1  ;;  %10991 = vpow.bf16 %v7433_v29  ;;  %8027 = vmatprep.mubr.bf16.mxu0 %v7542_v23  ;;  %v7544_v22 = vsel %vm7304_vm14, %v14076_v38, %v7504_v33 }
 0x7e6   : > { %v9322_v51 = vadd.f32 %v6950_v48, %v13990_v62  ;;  %v9362_v53 = vadd.f32 %v7216_v37, %v13993_v18  ;;  %10993 = vpow.bf16 %v7439_v41  ;;  %8160 = vmatprep.mubr.bf16.mxu1 %v7544_v22  ;;  %v7541_v39 = vsel %vm7301_vm15, %v14067_v49, %v7501_v6 }
 0x7e7   : > { %v14187_v12 = vpack.c.bf16 %v9321_v30, %v9319_v5  ;;  %v14189_v27 = vpack.c.bf16 %v9361_v0, %v9359_v46  ;;  %v10982_v3 = vpop.eup %10981  ;;  %v7543_v58 = vsel %vm7303_vm13, %v14069_v50, %v7503_v47  ;;  %8028 = vmatmul.mubr.bf16.gmra.mrb[172].mxu0 %v7541_v39  ;;  %10995 = vpow.bf16 %v7436_v43 }
 0x7e8   : > { %v14195_v24 = vpack.c.bf16 %v9322_v51, %v9320_v28  ;;  %v14197_v57 = vpack.c.bf16 %v9362_v53, %v9360_v10  ;;  %v10984_v35 = vpop.eup %10983  ;;  %8161 = vmatmul.mubr.bf16.vlgmr.msra.gmra.mrb[240].mxu1 %v7543_v58  ;;  %8111 = vmatpush1.bf16.msra.mxu0 %v13919_v55  ;;  %v7505_v28 = vsub.bf16 %v10982_v3, %v14587_v7  ;;  %vm7312_vm5 = vcmp.gt.bf16.partialorder %v14154_v32, 0 }
 0x7e9   : > { %v7353_v15 = vmin.bf16 %v14588_v40, %v14187_v12  ;;  %v7355_v5 = vmin.bf16 %v14588_v40, %v14189_v27  ;;  %v6954_v38 = vpop.f32.mrb[148].mxu0  ;;  %v7220_v41 = vpop.f32.mrb[228].mxu1  ;;  %8112 = vmatprep.subr.bf16.mxu0 %v13923_v21  ;;  %v7506_v33 = vsub.bf16 %v10984_v35, %v14587_v7  ;;  %vm7311_vm7 = vcmp.gt.bf16.partialorder %v14145_v56, 0 }
 0x7ea   : > { %v7354_v29 = vmin.bf16 %v14588_v40, %v14195_v24  ;;  %v10986_v46 = vpop.eup %10985  ;;  %v7356_v50 = vmin.bf16 %v14588_v40, %v14197_v57  ;;  %v6956_v6 = vpop.f32.mrb[149].mxu0  ;;  %v9323_v30 = vadd.f32 %v6954_v38, %v13984_v44  ;;  %v9363_v0 = vadd.f32 %v7220_v41, %v13987_v63 }
 0x7eb   : > { %v7442_v49 = vmul.bf16 1069105081, %v7353_v15  ;;  %v7222_v47 = vpop.f32.mrb[229].mxu1  ;;  %v7448_v16 = vmul.bf16 1069105081, %v7355_v5  ;;  %v6958_v48 = vpop.f32.mrb[150].mxu0  ;;  %v9324_v34 = vadd.f32 %v6956_v6, %v13990_v62  ;;  %v7508_v15 = vsub.bf16 %v10986_v46, %v14587_v7 }
 0x7ec   : > { %v7445_v4 = vmul.bf16 1069105081, %v7354_v29  ;;  %v7224_v43 = vpop.f32.mrb[230].mxu1  ;;  %v10988_v37 = vpop.eup %10987  ;;  %v9325_v10 = vadd.f32 %v6958_v48, %v13984_v44  ;;  %v9364_v23 = vadd.f32 %v7222_v47, %v13993_v18  ;;  %v7451_v21 = vmul.bf16 1069105081, %v7356_v50  ;;  %8113 = vmatpush1.bf16.msra.mxu0 %v13927_v26 }
 0x7ed   : > { %v9365_v55 = vadd.f32 %v7224_v43, %v13987_v63  ;;  %v6960_v51 = vpop.f32.mrb[151].mxu0  ;;  %v7226_v53 = vpop.f32.mrb[231].mxu1  ;;  %v7546_v58 = vsel %vm7306_vm0, %v14112_v13, %v7506_v33  ;;  %10997 = vpow.bf16 %v7442_v49  ;;  %v7548_v41 = vsel %vm7308_vm1, %v14114_v20, %v7508_v15  ;;  %8114 = vmatprep.subr.bf16.mxu0 %v13933_v19 }
 0x7ee   : > { %v9326_v3 = vadd.f32 %v6960_v51, %v13990_v62  ;;  %v9366_v22 = vadd.f32 %v7226_v53, %v13993_v18  ;;  %v14233_v5 = vpack.c.bf16 %v9325_v10, %v9323_v30  ;;  %8037 = vmatprep.mubr.bf16.mxu0 %v7546_v58  ;;  %10999 = vpow.bf16 %v7445_v4  ;;  %8170 = vmatprep.mubr.bf16.mxu1 %v7548_v41 }
 0x7ef   : > { %v14235_v39 = vpack.c.bf16 %v9365_v55, %v9363_v0  ;;  %v10990_v35 = vpop.eup %10989  ;;  %v7545_v26 = vsel %vm7305_vm2, %v14104_v52, %v7505_v28  ;;  %11001 = vpow.bf16 %v7448_v16  ;;  %v7507_v49 = vsub.bf16 %v10988_v37, %v14587_v7 }
 0x7f0   : > { %v14242_v29 = vpack.c.bf16 %v9326_v3, %v9324_v34  ;;  %v14244_v38 = vpack.c.bf16 %v9366_v22, %v9364_v23  ;;  %v14252_v13 = vmin.bf16 %v14588_v40, %v14233_v5  ;;  %v10992_v46 = vpop.eup %10991  ;;  %8038 = vmatmul.mubr.bf16.gmra.mrb[176].mxu0 %v7545_v26  ;;  %11003 = vpow.bf16 %v7451_v21 }
 0x7f1   : > { %v6964_v50 = vpop.f32.mrb[152].mxu0  ;;  %v7230_v6 = vpop.f32.mrb[232].mxu1  ;;  %v7359_v28 = vmin.bf16 %v14588_v40, %v14235_v39  ;;  %v7509_v30 = vsub.bf16 %v10990_v35, %v14587_v7  ;;  %8115 = vmatpush1.bf16.msra.mxu0 %v13931_v61  ;;  %v7547_v48 = vsel %vm7307_vm3, %v14106_v17, %v7507_v49  ;;  %v7510_v21 = vsub.bf16 %v10992_v46, %v14587_v7 }
 0x7f2   : > { %v7358_v20 = vmin.bf16 %v14588_v40, %v14242_v29  ;;  %v7360_v19 = vmin.bf16 %v14588_v40, %v14244_v38  ;;  %v10994_v47 = vpop.eup %10993  ;;  %v7454_v52 = vmul.bf16 1069105081, %v14252_v13  ;;  %v6966_v4 = vpop.f32.mrb[153].mxu0  ;;  %v9327_v43 = vadd.f32 %v6964_v50, %v13984_v44  ;;  %8116 = vmatprep.subr.bf16.mxu0 %v13935_v8  ;;  %8171 = vmatmul.mubr.bf16.gmra.mrb[244].mxu1 %v7547_v48 }
 0x7f3   : > { %v7232_v16 = vpop.f32.mrb[233].mxu1  ;;  %v9367_v37 = vadd.f32 %v7230_v6, %v13987_v63  ;;  %v6968_v34 = vpop.f32.mrb[154].mxu0  ;;  %v9328_v51 = vadd.f32 %v6966_v4, %v13990_v62  ;;  %v7460_v8 = vmul.bf16 1069105081, %v7359_v28  ;;  %v7512_v41 = vsub.bf16 %v10994_v47, %v14587_v7 }
 0x7f4   : > { %v7457_v0 = vmul.bf16 1069105081, %v7358_v20  ;;  %v7234_v10 = vpop.f32.mrb[234].mxu1  ;;  %v7463_v55 = vmul.bf16 1069105081, %v7360_v19  ;;  %v9329_v53 = vadd.f32 %v6968_v34, %v13984_v44  ;;  %v6970_v33 = vpop.f32.mrb[155].mxu0  ;;  %v9368_v17 = vadd.f32 %v7232_v16, %v13993_v18 }
 0x7f5   : > { %v9369_v61 = vadd.f32 %v7234_v10, %v13987_v63  ;;  %v7236_v23 = vpop.f32.mrb[235].mxu1  ;;  %v10996_v3 = vpop.eup %10995  ;;  %v9330_v22 = vadd.f32 %v6970_v33, %v13990_v62  ;;  %8117 = vmatpush1.bf16.msra.mxu0 %v13939_v1  ;;  %v7550_v20 = vsel %vm7310_vm4, %v14152_v36, %v7510_v21  ;;  %v7552_v1 = vsel %vm7312_vm5, %v14154_v32, %v7512_v41 }
 0x7f6   : > { %v9370_v15 = vadd.f32 %v7236_v23, %v13993_v18  ;;  %v14282_v58 = vpack.c.bf16 %v9329_v53, %v9327_v43  ;;  %11005 = vpow.bf16 %v7457_v0  ;;  %8118 = vmatprep.subr.bf16.mxu0 %v13946_v11  ;;  %8047 = vmatprep.mubr.bf16.mxu0 %v7550_v20  ;;  %v7549_v11 = vsel %vm7309_vm6, %v14143_v42, %v7509_v30 }
 0x7f7   : > { %v14284_v35 = vpack.c.bf16 %v9369_v61, %v9367_v37  ;;  %v14288_v13 = vpack.c.bf16 %v9330_v22, %v9328_v51  ;;  %11007 = vpow.bf16 %v7463_v55  ;;  %8180 = vmatprep.mubr.bf16.mxu1 %v7552_v1  ;;  %v7511_v32 = vsub.bf16 %v10996_v3, %v14587_v7 }
 0x7f8   : > { %v14290_v26 = vpack.c.bf16 %v9370_v15, %v9368_v17  ;;  %v7361_v46 = vmin.bf16 %v14588_v40, %v14282_v58  ;;  %v10998_v47 = vpop.eup %10997  ;;  %11009 = vpow.bf16 %v7454_v52  ;;  %8048 = vmatmul.mubr.bf16.gmra.mrb[180].mxu0 %v7549_v11  ;;  %vm7314_vm8 = vcmp.gt.bf16.partialorder %v14195_v24, 0 }
 0x7f9   : > { %v7363_v19 = vmin.bf16 %v14588_v40, %v14284_v35  ;;  %v7362_v49 = vmin.bf16 %v14588_v40, %v14288_v13  ;;  %v6974_v50 = vpop.f32.mrb[156].mxu0  ;;  %v7240_v6 = vpop.f32.mrb[236].mxu1  ;;  %11011 = vpow.bf16 %v7460_v8  ;;  %8119 = vmatpush1.bf16.msra.mxu0 %v13944_v31  ;;  %v7551_v52 = vsel %vm7311_vm7, %v14145_v56, %v7511_v32 }
 0x7fa   : > { %v7364_v36 = vmin.bf16 %v14588_v40, %v14290_v26  ;;  %v7466_v28 = vmul.bf16 1069105081, %v7361_v46  ;;  %v6976_v16 = vpop.f32.mrb[157].mxu0  ;;  %v7242_v0 = vpop.f32.mrb[237].mxu1  ;;  %v9331_v34 = vadd.f32 %v6974_v50, %v13984_v44  ;;  %v9371_v55 = vadd.f32 %v7240_v6, %v13987_v63  ;;  %8120 = vmatprep.subr.bf16.mxu0 %v13948_v59  ;;  %8181 = vmatmul.mubr.bf16.gmra.mrb[248].mxu1 %v7551_v52 }
 0x7fb   : > { %v7472_v4 = vmul.bf16 1069105081, %v7363_v19  ;;  %v11000_v48 = vpop.eup %10999  ;;  %v7469_v43 = vmul.bf16 1069105081, %v7362_v49  ;;  %v6978_v42 = vpop.f32.mrb[158].mxu0  ;;  %v9332_v51 = vadd.f32 %v6976_v16, %v13990_v62  ;;  %v9372_v3 = vadd.f32 %v7242_v0, %v13993_v18 }
 0x7fc   : > { %v7475_v37 = vmul.bf16 1069105081, %v7364_v36  ;;  %v7244_v30 = vpop.f32.mrb[238].mxu1  ;;  %v11002_v10 = vpop.eup %11001  ;;  %v9333_v53 = vadd.f32 %v6978_v42, %v13984_v44  ;;  %v7514_v44 = vsub.bf16 %v11000_v48, %v14587_v7  ;;  %vm7316_vm9 = vcmp.gt.bf16.partialorder %v14197_v57, 0  ;;  %v14589_v48 = vld [vmem:[#allocation21_spill] sm:$0xff] }
 0x7fd   : > { %v6980_v61 = vpop.f32.mrb[159].mxu0  ;;  %v7246_v33 = vpop.f32.mrb[239].mxu1  ;;  %v9373_v31 = vadd.f32 %v7244_v30, %v13987_v63  ;;  %11013 = vpow.bf16 %v7469_v43  ;;  %8121 = vmatpush1.bf16.msra.mxu0 %v13952_v45  ;;  %v7513_v19 = vsub.bf16 %v10998_v47, %v14587_v7  ;;  %vm7313_vm10 = vcmp.gt.bf16.partialorder %v14187_v12, 0  ;;  %v14592_v30 = vld [vmem:[#allocation19_spill] sm:$0xff] }
 0x7fe   : > { %v11004_v23 = vpop.eup %11003  ;;  %v9334_v17 = vadd.f32 %v6980_v61, %v13990_v62  ;;  %v9374_v56 = vadd.f32 %v7246_v33, %v13993_v18  ;;  %v14325_v22 = vpack.c.bf16 %v9333_v53, %v9331_v34  ;;  %11015 = vpow.bf16 %v7475_v37  ;;  %8122 = vmatprep.subr.bf16.mxu0 %v13958_v60 }
 0x7ff   : > { %v14329_v15 = vpack.c.bf16 %v9373_v31, %v9371_v55  ;;  %v7554_v63 = vsel %vm7314_vm8, %v14195_v24, %v7514_v44  ;;  %v7516_v62 = vsub.bf16 %v11004_v23, %v14587_v7  ;;  %v7332_v18 = vmin.bf16 %v14588_v40, %v14009_v9  ;;  %v14595_v44 = vld [vmem:[#allocation25_spill] sm:$0xff] }
 0x800   : > { %v14331_v59 = vpack.c.bf16 %v9334_v17, %v9332_v51  ;;  %v14333_v21 = vpack.c.bf16 %v9374_v56, %v9372_v3  ;;  %8057 = vmatprep.mubr.bf16.mxu0 %v7554_v63  ;;  %11017 = vpow.bf16 %v7466_v28  ;;  %v7365_v60 = vmin.bf16 %v14588_v40, %v14325_v22  ;;  %v14594_v17 = vld [vmem:[#allocation22_spill] sm:$0xff] }
 0x801   : > { %v11006_v41 = vpop.eup %11005  ;;  %v7556_v24 = vsel %vm7316_vm9, %v14197_v57, %v7516_v62  ;;  %11019 = vpow.bf16 %v7472_v4  ;;  %8123 = vmatpush1.bf16.msra.mxu0 %v13956_v25  ;;  %v7367_v1 = vmin.bf16 %v14588_v40, %v14329_v15  ;;  %v7515_v36 = vsub.bf16 %v11002_v10, %v14587_v7 }
 0x802   : > { %v7366_v8 = vmin.bf16 %v14588_v40, %v14331_v59  ;;  %v7368_v45 = vmin.bf16 %v14588_v40, %v14333_v21  ;;  %v11008_v20 = vpop.eup %11007  ;;  %8190 = vmatprep.mubr.bf16.mxu1 %v7556_v24  ;;  %8124 = vmatprep.subr.bf16.mxu0 %v13960_v14  ;;  %v7379_v11 = vmul.bf16 1069105081, %v7332_v18  ;;  %v7553_v50 = vsel %vm7313_vm10, %v14187_v12, %v7513_v19 }
 0x803   : > { %v11010_v57 = vpop.eup %11009  ;;  %vm7315_vm11 = vcmp.gt.bf16.partialorder %v14189_v27, 0  ;;  %v7518_v6 = vsub.bf16 %v11006_v41, %v14587_v7  ;;  %8058 = vmatmul.mubr.bf16.gmra.mrb[184].mxu0 %v7553_v50  ;;  %vm7318_vm12 = vcmp.gt.bf16.partialorder %v14242_v29, 0  ;;  %v7520_v28 = vsub.bf16 %v11008_v20, %v14587_v7 }
 0x804   : > { %v7481_v46 = vmul.bf16 1069105081, %v7366_v8  ;;  %v7487_v49 = vmul.bf16 1069105081, %v7368_v45  ;;  %v11012_v47 = vpop.eup %11011  ;;  %v7555_v25 = vsel %vm7315_vm11, %v14189_v27, %v7515_v36  ;;  %v7478_v4 = vmul.bf16 1069105081, %v7365_v60 }
 0x805   : > { %8191 = vmatmul.mubr.bf16.gmra.mrb[252].mxu1 %v7555_v25  ;;  %v7558_v14 = vsel %vm7318_vm12, %v14242_v29, %v7518_v6  ;;  %vm7320_vm13 = vcmp.gt.bf16.partialorder %v14244_v38, 0  ;;  %8125 = vmatpush1.bf16.msra.mxu0 %v13964_v54  ;;  %v7484_v12 = vmul.bf16 1069105081, %v7367_v1  ;;  %v7517_v16 = vsub.bf16 %v11010_v57, %v14587_v7  ;;  %v14590_v54 = vld [vmem:[#allocation23_spill] sm:$0xff] }
 0x806   : > { %11021 = vpow.bf16 %v7481_v46  ;;  %8067 = vmatprep.mubr.bf16.mxu0 %v7558_v14  ;;  %v7560_v32 = vsel %vm7320_vm13, %v14244_v38, %v7520_v28  ;;  %8126 = vmatprep.subr.bf16.mxu0 %v13970_v2  ;;  %v7331_v43 = vmin.bf16 %v14588_v40, %v14589_v48  ;;  %v7519_v29 = vsub.bf16 %v11012_v47, %v14587_v7  ;;  %v14591_v38 = vld [vmem:[#allocation18_spill] sm:$0xff] }
 0x807   : > { %11023 = vpow.bf16 %v7487_v49  ;;  %8200 = vmatprep.mubr.bf16.mxu1 %v7560_v32  ;;  %v7336_v34 = vmin.bf16 %v14588_v40, %v14590_v54  ;;  %vm7322_vm14 = vcmp.gt.bf16.partialorder %v14288_v13, 0  ;;  %vm7317_vm15 = vcmp.gt.bf16.partialorder %v14233_v5, 0 }
 0x808   : > { %v11014_v27 = vpop.eup %11013  ;;  %11025 = vpow.bf16 %v7379_v11  ;;  %vm7324_vm0 = vcmp.gt.bf16.partialorder %v14290_v26, 0  ;;  %vm7319_vm1 = vcmp.gt.bf16.partialorder %v14235_v39, 0  ;;  %v7557_v52 = vsel %vm7317_vm15, %v14233_v5, %v7517_v16  ;;  %v7633_v16 = vld [vmem:[%s14597_s27] sm:$0x3] }
 0x809   : > { %v11016_v0 = vpop.eup %11015  ;;  %v7522_v37 = vsub.bf16 %v11014_v27, %v14587_v7  ;;  %11027 = vpow.bf16 %v7478_v4  ;;  %8127 = vmatpush1.bf16.msra.mxu0 %v14591_v38  ;;  %v7376_v53 = vmul.bf16 1069105081, %v7331_v43  ;;  %v7559_v61 = vsel %vm7319_vm1, %v14235_v39, %v7519_v29  ;;  %v14599_v43 = vld [vmem:[#allocation17_spill] sm:$0xff] }
 0x80a   : > { %v7524_v2 = vsub.bf16 %v11016_v0, %v14587_v7  ;;  %11029 = vpow.bf16 %v7484_v12  ;;  %8128 = vmatprep.subr.bf16.mxu0 %v14592_v30  ;;  %v7391_v33 = vmul.bf16 1069105081, %v7336_v34  ;;  %v7335_v56 = vmin.bf16 %v14588_v40, %v14594_v17  ;;  %v14598_v0 = vld [vmem:[#allocation16_spill] sm:$0xff] }
 0x80b   : > { %v7562_v42 = vsel %vm7322_vm14, %v14288_v13, %v7522_v37  ;;  %v11018_v10 = vpop.eup %11017  ;;  %8068 = vmatmul.mubr.bf16.gmra.mrb[188].mxu0 %v7557_v52  ;;  %v14593_v13 = vld [vmem:[#allocation20_spill] sm:$0xff]  ;;  %11031 = vpow.bf16 %v7376_v53  ;;  %vm7326_vm2 = vcmp.gt.bf16.partialorder %v14331_v59, 0  ;;  %v7340_v63 = vmin.bf16 %v14588_v40, %v14595_v44 }
 0x80c   : > { %v7564_v55 = vsel %vm7324_vm0, %v14290_v26, %v7524_v2  ;;  %v11020_v51 = vpop.eup %11019  ;;  %8077 = vmatprep.mubr.bf16.mxu0 %v7562_v42  ;;  %v7521_v3 = vsub.bf16 %v11018_v10, %v14587_v7  ;;  %11033 = vpow.bf16 %v7391_v33  ;;  %vm7321_vm3 = vcmp.gt.bf16.partialorder %v14282_v58, 0 }
 0x80d   : > { %8201 = vmatmul.mubr.bf16.gmra.mrb[0].mxu1 %v7559_v61  ;;  %8129 = vmatpush1.bf16.msra.mxu0 %v14593_v13  ;;  %v7523_v5 = vsub.bf16 %v11020_v51, %v14587_v7  ;;  %vm7328_vm4 = vcmp.gt.bf16.partialorder %v14333_v21, 0  ;;  %vm7323_vm5 = vcmp.gt.bf16.partialorder %v14284_v35, 0  ;;  %v7388_v60 = vmul.bf16 1069105081, %v7335_v56 }
 0x80e   : > { %8210 = vmatprep.mubr.bf16.mxu1 %v7564_v55  ;;  %v7561_v8 = vsel %vm7321_vm3, %v14282_v58, %v7521_v3  ;;  %v7403_v46 = vmul.bf16 1069105081, %v7340_v63  ;;  %v14596_v58 = vld [vmem:[#allocation24_spill] sm:$0xff]  ;;  %vm7325_vm6 = vcmp.gt.bf16.partialorder %v14325_v22, 0  ;;  %vm7327_vm7 = vcmp.gt.bf16.partialorder %v14329_v15, 0 }
 0x80f   : > { %v7563_v24 = vsel %vm7323_vm5, %v14284_v35, %v7523_v5  ;;  %11035 = vpow.bf16 %v7388_v60  ;;  %vm7292_vm8 = vcmp.gt.bf16.partialorder %v14009_v9, 0  ;;  %vm7291_vm9 = vcmp.gt.bf16.partialorder %v14589_v48, 0 }
 0x810   : > { %11037 = vpow.bf16 %v7403_v46  ;;  %vm7296_vm10 = vcmp.gt.bf16.partialorder %v14590_v54, 0  ;;  %vm7295_vm11 = vcmp.gt.bf16.partialorder %v14594_v17, 0  ;;  %vm7300_vm12 = vcmp.gt.bf16.partialorder %v14595_v44, 0 }
 0x811   : > { %v11022_v23 = vpop.eup %11021  ;;  %vm7299_vm13 = vcmp.gt.bf16.partialorder %v14596_v58, 0  ;;  %v14435_v29 = vrot.slane %v7633_v16, %v14599_v43 }
 0x812   : > { %v11024_v31 = vpop.eup %11023  ;;  %v7526_v26 = vsub.bf16 %v11022_v23, %v14587_v7 }
 0x813   : > { %v7528_v39 = vsub.bf16 %v11024_v31, %v14587_v7  ;;  %v11026_v18 = vpop.eup %11025  ;;  %8078 = vmatmul.mubr.bf16.gmra.mrb[192].mxu0 %v7561_v8 }
 0x814   : > { %v7566_v62 = vsel %vm7326_vm2, %v14331_v59, %v7526_v26  ;;  %v11028_v45 = vpop.eup %11027  ;;  %v7492_v1 = vsub.bf16 %v11026_v18, %v14587_v7 }
 0x815   : > { %v7568_v41 = vsel %vm7328_vm4, %v14333_v21, %v7528_v39  ;;  %v11030_v20 = vpop.eup %11029  ;;  %8211 = vmatmul.mubr.bf16.gmra.mrb[4].mxu1 %v7563_v24  ;;  %8087 = vmatprep.mubr.bf16.mxu0 %v7566_v62  ;;  %v7525_v59 = vsub.bf16 %v11028_v45, %v14587_v7  ;;  %v7339_v21 = vmin.bf16 %v14588_v40, %v14596_v58 }
 0x816   : > { %8220 = vmatprep.mubr.bf16.mxu1 %v7568_v41  ;;  %v7527_v19 = vsub.bf16 %v11030_v20, %v14587_v7  ;;  %v11032_v35 = vpop.eup %11031  ;;  %v7532_v11 = vsel %vm7292_vm8, %v14009_v9, %v7492_v1 }
 0x817   : > { %v7565_v49 = vsel %vm7325_vm6, %v14325_v22, %v7525_v59  ;;  %v11034_v36 = vpop.eup %11033  ;;  %v7400_v50 = vmul.bf16 1069105081, %v7339_v21  ;;  %v7491_v40 = vsub.bf16 %v11032_v35, %v14587_v7 }
 0x818   : > { %v7567_v57 = vsel %vm7327_vm7, %v14329_v15, %v7527_v19  ;;  %v7496_v6 = vsub.bf16 %v11034_v36, %v14587_v7 }
 0x819   : > { %11039 = vpow.bf16 %v7400_v50  ;;  %v7531_v22 = vsel %vm7291_vm9, %v14589_v48, %v7491_v40  ;;  %v14432_v48 = vrot.slane %v7633_v16, %v14598_v0 }
 0x81a   : > { %v11036_v47 = vpop.eup %11035  ;;  %v7536_v15 = vsel %vm7296_vm10, %v14590_v54, %v7496_v6 }
 0x81b   : > { %8088 = vmatmul.mubr.bf16.gmra.mrb[196].mxu0 %v7565_v49  ;;  %v11038_v25 = vpop.eup %11037  ;;  %v7495_v9 = vsub.bf16 %v11036_v47, %v14587_v7 }
 0x81c   : > { %8130 = vmatprep.mubr.bf16.mxu0 %v7532_v11  ;;  %v7500_v28 = vsub.bf16 %v11038_v25, %v14587_v7 }
 0x81d   : > { %8221 = vmatmul.mubr.bf16.gmra.mrb[8].mxu1 %v7567_v57  ;;  %v7535_v4 = vsel %vm7295_vm11, %v14594_v17, %v7495_v9 }
 0x81e   : > { %v7540_v12 = vsel %vm7300_vm12, %v14595_v44, %v7500_v28 }
 0x823   : > { %8131 = vmatmul.mubr.bf16.vlgmr.msra.gmra.mrb[160].mxu0 %v7531_v22 }
 0x824   : > { %8140 = vmatprep.mubr.bf16.mxu0 %v7536_v15  ;;  %v11040_v14 = vpop.eup %11039 }
 0x825   : > { %v7499_v32 = vsub.bf16 %v11040_v14, %v14587_v7 }
 0x827   : > { %v7539_v27 = vsel %vm7299_vm13, %v14596_v58, %v7499_v32 }
 0x82b   : > { %8141 = vmatmul.mubr.bf16.gmra.mrb[164].mxu0 %v7535_v4 }
 0x82c   : > { %8150 = vmatprep.mubr.bf16.mxu0 %v7540_v12 }
 0x833   : > { %8151 = vmatmul.mubr.bf16.gmra.mrb[168].mxu0 %v7539_v27 }
 0x8ba   : > { %v8029_v37 = vpop.f32.mrb[172].mxu0 }
 0x8bb   : > { %v8162_v54 = vpop.f32.mrb[240].mxu1  ;;  %v8030_v7 = vadd.f32 %v8029_v37, %v14432_v48  ;;  %v8031_v34 = vpop.f32.mrb[173].mxu0 }
 0x8bc   : > { %v8164_v2 = vpop.f32.mrb[241].mxu1  ;;  %v8032_v38 = vadd.f32 %v8031_v34, %v14435_v29  ;;  %v8033_v42 = vpop.f32.mrb[174].mxu0 }
 0x8bd   : > { %v8166_v30 = vpop.f32.mrb[242].mxu1  ;;  %v8163_v10 = vadd.f32 %v8162_v54, %v8030_v7  ;;  %v8034_v52 = vadd.f32 %v8033_v42, %v14432_v48  ;;  %v8035_v55 = vpop.f32.mrb[175].mxu0 }
 0x8be   : > { %v8168_v51 = vpop.f32.mrb[243].mxu1  ;;  %v8165_v53 = vadd.f32 %v8164_v2, %v8032_v38  ;;  %v8036_v61 = vadd.f32 %v8035_v55, %v14435_v29 }
 0x8bf   : > { %8243 = vst [vmem:[%s14442_s26 + $0x60] sm:$0xff] %v8163_v10  ;;  %v8167_v33 = vadd.f32 %v8166_v30, %v8034_v52 }
 0x8c0   : > { %8244 = vst [vmem:[%s14442_s26 + $0x68] sm:$0xff] %v8165_v53  ;;  %v8169_v13 = vadd.f32 %v8168_v51, %v8036_v61 }
 0x8c1   : > { %8245 = vst [vmem:[%s14442_s26 + $0x70] sm:$0xff] %v8167_v33 }
 0x8c2   : > { %8246 = vst [vmem:[%s14442_s26 + $0x78] sm:$0xff] %v8169_v13 }
 0x8c3   : > { %v8039_v23 = vpop.f32.mrb[176].mxu0 }
 0x8c4   : > { %v8040_v3 = vadd.f32 %v8039_v23, %v14432_v48  ;;  %v8041_v31 = vpop.f32.mrb[177].mxu0 }
 0x8c5   : > { %v8042_v5 = vadd.f32 %v8041_v31, %v14435_v29  ;;  %v8043_v26 = vpop.f32.mrb[178].mxu0  ;;  %v8172_v17 = vpop.f32.mrb[244].mxu1 }
 0x8c6   : > { %v8044_v56 = vadd.f32 %v8043_v26, %v14432_v48  ;;  %v8045_v39 = vpop.f32.mrb[179].mxu0  ;;  %v8173_v44 = vadd.f32 %v8172_v17, %v8040_v3  ;;  %v8174_v63 = vpop.f32.mrb[245].mxu1 }
 0x8c7   : > { %v8046_v62 = vadd.f32 %v8045_v39, %v14435_v29  ;;  %v8175_v18 = vadd.f32 %v8174_v63, %v8042_v5  ;;  %v8176_v8 = vpop.f32.mrb[246].mxu1 }
 0x8c8   : > { %8247 = vst [vmem:[%s14442_s26 + $0x80] sm:$0xff] %v8173_v44  ;;  %v8177_v41 = vadd.f32 %v8176_v8, %v8044_v56  ;;  %v8178_v45 = vpop.f32.mrb[247].mxu1 }
 0x8c9   : > { %8248 = vst [vmem:[%s14442_s26 + $0x88] sm:$0xff] %v8175_v18  ;;  %v8179_v24 = vadd.f32 %v8178_v45, %v8046_v62 }
 0x8ca   : > { %8249 = vst [vmem:[%s14442_s26 + $0x90] sm:$0xff] %v8177_v41 }
 0x8cb   : > { %8250 = vst [vmem:[%s14442_s26 + $0x98] sm:$0xff] %v8179_v24  ;;  %v8049_v20 = vpop.f32.mrb[180].mxu0 }
 0x8cc   : > { %v8050_v60 = vadd.f32 %v8049_v20, %v14432_v48  ;;  %v8051_v46 = vpop.f32.mrb[181].mxu0 }
 0x8cd   : > { %v8052_v59 = vadd.f32 %v8051_v46, %v14435_v29  ;;  %v8053_v19 = vpop.f32.mrb[182].mxu0  ;;  %v8182_v1 = vpop.f32.mrb[248].mxu1 }
 0x8ce   : > { %v8054_v58 = vadd.f32 %v8053_v19, %v14432_v48  ;;  %v8055_v21 = vpop.f32.mrb[183].mxu0  ;;  %v8183_v35 = vadd.f32 %v8182_v1, %v8050_v60  ;;  %v8184_v49 = vpop.f32.mrb[249].mxu1 }
 0x8cf   : > { %v8056_v36 = vadd.f32 %v8055_v21, %v14435_v29  ;;  %v8185_v57 = vadd.f32 %v8184_v49, %v8052_v59  ;;  %v8186_v11 = vpop.f32.mrb[250].mxu1 }
 0x8d0   : > { %8251 = vst [vmem:[%s14442_s26 + $0xa0] sm:$0xff] %v8183_v35  ;;  %v8187_v50 = vadd.f32 %v8186_v11, %v8054_v58  ;;  %v8188_v40 = vpop.f32.mrb[251].mxu1 }
 0x8d1   : > { %8252 = vst [vmem:[%s14442_s26 + $0xa8] sm:$0xff] %v8185_v57  ;;  %v8189_v6 = vadd.f32 %v8188_v40, %v8056_v36 }
 0x8d2   : > { %8253 = vst [vmem:[%s14442_s26 + $0xb0] sm:$0xff] %v8187_v50 }
 0x8d3   : > { %8254 = vst [vmem:[%s14442_s26 + $0xb8] sm:$0xff] %v8189_v6 }
 0x8d6   : > { %v8059_v22 = vpop.f32.mrb[184].mxu0 }
 0x8d7   : > { %v8060_v47 = vadd.f32 %v8059_v22, %v14432_v48  ;;  %v8061_v25 = vpop.f32.mrb[185].mxu0 }
 0x8d8   : > { %v8192_v15 = vpop.f32.mrb[252].mxu1  ;;  %v8062_v9 = vadd.f32 %v8061_v25, %v14435_v29  ;;  %v8063_v4 = vpop.f32.mrb[186].mxu0 }
 0x8d9   : > { %v8194_v28 = vpop.f32.mrb[253].mxu1  ;;  %v8193_v14 = vadd.f32 %v8192_v15, %v8060_v47  ;;  %v8064_v12 = vadd.f32 %v8063_v4, %v14432_v48  ;;  %v8065_v27 = vpop.f32.mrb[187].mxu0 }
 0x8da   : > { %v8196_v32 = vpop.f32.mrb[254].mxu1  ;;  %v8195_v16 = vadd.f32 %v8194_v28, %v8062_v9  ;;  %v8066_v0 = vadd.f32 %v8065_v27, %v14435_v29 }
 0x8db   : > { %v8198_v43 = vpop.f32.mrb[255].mxu1  ;;  %8255 = vst [vmem:[%s14442_s26 + $0xc0] sm:$0xff] %v8193_v14  ;;  %v8197_v37 = vadd.f32 %v8196_v32, %v8064_v12 }
 0x8dc   : > { %8256 = vst [vmem:[%s14442_s26 + $0xc8] sm:$0xff] %v8195_v16  ;;  %v8199_v54 = vadd.f32 %v8198_v43, %v8066_v0 }
 0x8dd   : > { %8257 = vst [vmem:[%s14442_s26 + $0xd0] sm:$0xff] %v8197_v37 }
 0x8de   : > { %8258 = vst [vmem:[%s14442_s26 + $0xd8] sm:$0xff] %v8199_v54  ;;  %v8069_v7 = vpop.f32.mrb[188].mxu0 }
 0x8df   : > { %v8070_v34 = vadd.f32 %v8069_v7, %v14432_v48  ;;  %v8071_v38 = vpop.f32.mrb[189].mxu0 }
 0x8e0   : > { %v8202_v2 = vpop.f32.mrb[0].mxu1  ;;  %v8072_v42 = vadd.f32 %v8071_v38, %v14435_v29  ;;  %v8073_v10 = vpop.f32.mrb[190].mxu0 }
 0x8e1   : > { %v8204_v30 = vpop.f32.mrb[1].mxu1  ;;  %v8203_v52 = vadd.f32 %v8202_v2, %v8070_v34  ;;  %v8074_v55 = vadd.f32 %v8073_v10, %v14432_v48  ;;  %v8075_v53 = vpop.f32.mrb[191].mxu0 }
 0x8e2   : > { %v8206_v51 = vpop.f32.mrb[2].mxu1  ;;  %v8205_v61 = vadd.f32 %v8204_v30, %v8072_v42  ;;  %v8076_v33 = vadd.f32 %v8075_v53, %v14435_v29 }
 0x8e3   : > { %v8208_v13 = vpop.f32.mrb[3].mxu1  ;;  %8259 = vst [vmem:[%s14442_s26 + $0xe0] sm:$0xff] %v8203_v52  ;;  %v8207_v23 = vadd.f32 %v8206_v51, %v8074_v55 }
 0x8e4   : > { %8260 = vst [vmem:[%s14442_s26 + $0xe8] sm:$0xff] %v8205_v61  ;;  %v8209_v3 = vadd.f32 %v8208_v13, %v8076_v33 }
 0x8e5   : > { %8261 = vst [vmem:[%s14442_s26 + $0xf0] sm:$0xff] %v8207_v23 }
 0x8e6   : > { %8262 = vst [vmem:[%s14442_s26 + $0xf8] sm:$0xff] %v8209_v3  ;;  %v8079_v31 = vpop.f32.mrb[192].mxu0 }
 0x8e7   : > { %v8080_v5 = vadd.f32 %v8079_v31, %v14432_v48  ;;  %v8081_v17 = vpop.f32.mrb[193].mxu0 }
 0x8e8   : > { %v8212_v26 = vpop.f32.mrb[4].mxu1  ;;  %v8082_v56 = vadd.f32 %v8081_v17, %v14435_v29  ;;  %v8083_v44 = vpop.f32.mrb[194].mxu0 }
 0x8e9   : > { %v8214_v39 = vpop.f32.mrb[5].mxu1  ;;  %v8213_v63 = vadd.f32 %v8212_v26, %v8080_v5  ;;  %v8084_v62 = vadd.f32 %v8083_v44, %v14432_v48  ;;  %v8085_v8 = vpop.f32.mrb[195].mxu0 }
 0x8ea   : > { %v8216_v18 = vpop.f32.mrb[6].mxu1  ;;  %v8215_v41 = vadd.f32 %v8214_v39, %v8082_v56  ;;  %v8086_v45 = vadd.f32 %v8085_v8, %v14435_v29 }
 0x8eb   : > { %v8218_v24 = vpop.f32.mrb[7].mxu1  ;;  %8263 = vst [vmem:[%s14442_s26 + $0x100] sm:$0xff] %v8213_v63  ;;  %v8217_v20 = vadd.f32 %v8216_v18, %v8084_v62 }
 0x8ec   : > { %8264 = vst [vmem:[%s14442_s26 + $0x108] sm:$0xff] %v8215_v41  ;;  %v8219_v60 = vadd.f32 %v8218_v24, %v8086_v45 }
 0x8ed   : > { %8265 = vst [vmem:[%s14442_s26 + $0x110] sm:$0xff] %v8217_v20 }
 0x8ee   : > { %8266 = vst [vmem:[%s14442_s26 + $0x118] sm:$0xff] %v8219_v60  ;;  %v8089_v46 = vpop.f32.mrb[196].mxu0 }
 0x8ef   : > { %v8090_v59 = vadd.f32 %v8089_v46, %v14432_v48  ;;  %v8091_v1 = vpop.f32.mrb[197].mxu0 }
 0x8f0   : > { %v8222_v19 = vpop.f32.mrb[8].mxu1  ;;  %v8092_v58 = vadd.f32 %v8091_v1, %v14435_v29  ;;  %v8093_v35 = vpop.f32.mrb[198].mxu0 }
 0x8f1   : > { %v8224_v21 = vpop.f32.mrb[9].mxu1  ;;  %v8223_v49 = vadd.f32 %v8222_v19, %v8090_v59  ;;  %v8094_v36 = vadd.f32 %v8093_v35, %v14432_v48  ;;  %v8095_v11 = vpop.f32.mrb[199].mxu0 }
 0x8f2   : > { %v8226_v57 = vpop.f32.mrb[10].mxu1  ;;  %v8225_v50 = vadd.f32 %v8224_v21, %v8092_v58  ;;  %v8096_v40 = vadd.f32 %v8095_v11, %v14435_v29 }
 0x8f3   : > { %v8228_v6 = vpop.f32.mrb[11].mxu1  ;;  %8267 = vst [vmem:[%s14442_s26 + $0x120] sm:$0xff] %v8223_v49  ;;  %v8227_v22 = vadd.f32 %v8226_v57, %v8094_v36 }
 0x8f4   : > { %8268 = vst [vmem:[%s14442_s26 + $0x128] sm:$0xff] %v8225_v50  ;;  %v8229_v47 = vadd.f32 %v8228_v6, %v8096_v40 }
 0x8f5   : > { %8269 = vst [vmem:[%s14442_s26 + $0x130] sm:$0xff] %v8227_v22 }
 0x8f6   : > { %8270 = vst [vmem:[%s14442_s26 + $0x138] sm:$0xff] %v8229_v47  ;;  %v8132_v15 = vpop.f32.mrb[160].mxu0 }
 0x8f7   : > { %v9375_v25 = vadd.f32 %v8132_v15, %v14432_v48  ;;  %v8134_v9 = vpop.f32.mrb[161].mxu0 }
 0x8f8   : > { %v9376_v28 = vadd.f32 %v8134_v9, %v14435_v29  ;;  %v8136_v4 = vpop.f32.mrb[162].mxu0 }
 0x8f9   : > { %8231 = vst [vmem:[%s14442_s26] sm:$0xff] %v9375_v25  ;;  %v9377_v14 = vadd.f32 %v8136_v4, %v14432_v48  ;;  %v8138_v12 = vpop.f32.mrb[163].mxu0 }
 0x8fa   : > { %8232 = vst [vmem:[%s14442_s26 + $0x8] sm:$0xff] %v9376_v28  ;;  %v9378_v32 = vadd.f32 %v8138_v12, %v14435_v29 }
 0x8fb   : > { %8233 = vst [vmem:[%s14442_s26 + $0x10] sm:$0xff] %v9377_v14 }
 0x8fc   : > { %8234 = vst [vmem:[%s14442_s26 + $0x18] sm:$0xff] %v9378_v32 }
 0x8fe   : > { %v8142_v27 = vpop.f32.mrb[164].mxu0 }
 0x8ff   : > { %v9379_v16 = vadd.f32 %v8142_v27, %v14432_v48  ;;  %v8144_v0 = vpop.f32.mrb[165].mxu0 }
 0x900   : > { %v9380_v43 = vadd.f32 %v8144_v0, %v14435_v29  ;;  %v8146_v37 = vpop.f32.mrb[166].mxu0 }
 0x901   : > { %8235 = vst [vmem:[%s14442_s26 + $0x20] sm:$0xff] %v9379_v16  ;;  %v9381_v54 = vadd.f32 %v8146_v37, %v14432_v48  ;;  %v8148_v7 = vpop.f32.mrb[167].mxu0 }
 0x902   : > { %8236 = vst [vmem:[%s14442_s26 + $0x28] sm:$0xff] %v9380_v43  ;;  %v9382_v34 = vadd.f32 %v8148_v7, %v14435_v29 }
 0x903   : > { %8237 = vst [vmem:[%s14442_s26 + $0x30] sm:$0xff] %v9381_v54 }
 0x904   : > { %8238 = vst [vmem:[%s14442_s26 + $0x38] sm:$0xff] %v9382_v34 }
 0x906   : > { %v8152_v2 = vpop.f32.mrb[168].mxu0 }
 0x907   : > { %v9383_v38 = vadd.f32 %v8152_v2, %v14432_v48  ;;  %v8154_v42 = vpop.f32.mrb[169].mxu0 }
 0x908   : > { %v9384_v30 = vadd.f32 %v8154_v42, %v14435_v29  ;;  %v8156_v10 = vpop.f32.mrb[170].mxu0 }
 0x909   : > { %8239 = vst [vmem:[%s14442_s26 + $0x40] sm:$0xff] %v9383_v38  ;;  %v9385_v52 = vadd.f32 %v8156_v10, %v14432_v48  ;;  %v8158_v55 = vpop.f32.mrb[171].mxu0 }
 0x90a   : > { %8240 = vst [vmem:[%s14442_s26 + $0x48] sm:$0xff] %v9384_v30  ;;  %v9386_v51 = vadd.f32 %v8158_v55, %v14435_v29 }
 0x90b   : > { %8241 = vst [vmem:[%s14442_s26 + $0x50] sm:$0xff] %v9385_v52 }
 0x90c   : > { %8242 = vst [vmem:[%s14442_s26 + $0x58] sm:$0xff] %v9386_v51 }
 0x90d PF: > { %s29_s18 = sadd.s32 1, %s11231_s18  }
 0x90e   : > { %p26_p3 = scmp.ge.s32.totalorder %s29_s18, 4  }
 0x910   :  { %28 = sbr.rel (!%p26_p3) target bundleno = 9 (0x9), region = 135 }
 0x917   :  { %8295 = vsyncpa [#allocation3], 1 }
 0x918   :  { %8297 = vsyncpa [#allocation3 + $0x1], 1 }
 0x919   :  { %8298 = vsyncpa [#allocation5], 1 }
 0x91a   :  { %8299 = vsyncpa [#allocation8], 1 }
 0x91b   :  { %8300 = vsyncpa [#allocation11], 1 }

</bundles_post_ra>
